<compile_context>
chip_gen: v5e
topology: v5e:2x2
jax: 0.10.0
libtpu: 0.0.40
codegen_flags: <defaults>
</compile_context>

<pallas_src>
import math
import functools
import numpy as np
import jax
import jax.numpy as jnp
from jax.experimental import pallas as pl
from jax.experimental.pallas import tpu as pltpu


# ----------------------- Clenshaw-Curtis quadrature (host-side constants) --------------
def compute_cc_weights(nb_steps):
    lam = np.arange(0, nb_steps + 1, 1).reshape(-1, 1).astype(np.float64)
    lam = np.cos((lam @ lam.T) * math.pi / nb_steps)
    lam[:, 0] = 0.5
    lam[:, -1] = 0.5 * lam[:, -1]
    lam = lam * 2.0 / nb_steps
    W = np.arange(0, nb_steps + 1, 1).reshape(-1, 1).astype(np.float64)
    W[np.arange(1, nb_steps + 1, 2)] = 0
    W = 2.0 / (1.0 - W ** 2)
    W[0] = 1
    W[np.arange(1, nb_steps + 1, 2)] = 0
    cc_weights = (lam.T @ W).flatten()
    steps = np.cos(np.arange(0, nb_steps + 1, 1) * math.pi / nb_steps)
    return cc_weights, steps


def _relu(v):
    return jnp.maximum(v, 0.0)


def _dot(a, b):
    return jnp.dot(a, b, preferred_element_type=jnp.float32)


def _round_up(n, m):
    return ((n + m - 1) // m) * m


# ----------------------- fused kernel: embedding MLP + UMNN + sigmoid ------------------
def fused_kernel(x_ref,
                 ew0_ref, ewh_ref, ebh_ref, ew4_ref, eb4_ref,
                 sc0x_ref, sc0h_ref, b0_ref,
                 wh_ref, bh_ref, whd_ref, bhd_ref,
                 ts_ref, cw_ref,
                 out_ref, *, n_dims, hp):
    x = x_ref[...]                                   # (B, D)
    B = x.shape[0]
    T1 = ts_ref.shape[0]                             # nb_steps + 1 quadrature points

    # ---- embedding MLP (hidden padded to 256, zero pad is exact) ----
    ebh = ebh_ref[...]                               # (4, EHP)
    h = _relu(_dot(x, ew0_ref[...]) + ebh[0:1])
    h = _relu(_dot(h, ewh_ref[0]) + ebh[1:2])
    h = _relu(_dot(h, ewh_ref[1]) + ebh[2:3])
    h = _relu(_dot(h, ewh_ref[2]) + ebh[3:4])
    h = _relu(_dot(h, ew4_ref[...]) + eb4_ref[...])  # (B, E)

    # ---- fused layer-0 of scale-net + integrand, all D dims in one matmul ----
    # Per-dim removal of x_i is baked into zeroed weight rows (prepare_params), so no
    # per-dim concatenation and no concat([x, h]) is needed here.
    z0_all = (_dot(x, sc0x_ref[...]) + _dot(h, sc0h_ref[...])
              + b0_ref[...])                         # (B, D*2*HP)

    ts = ts_ref[...].reshape(T1, 1, 1)               # (steps + 1) / 2
    cw = cw_ref[...].reshape(T1, 1, 1)               # CC weights

    two_hp = 2 * hp
    out = jnp.zeros((B, 1), jnp.float32)
    for i in range(n_dims):                          # static unroll over input dims
        xi = x[:, i:i + 1]                           # (B, 1)
        col = z0_all[:, i * two_hp:(i + 1) * two_hp]  # 256-lane aligned static slice
        zs = _relu(col[:, :hp])                      # scale-net layer-0 activation
        base = col[:, hp:]                           # integrand conditioning (pre-act)

        bh = bh_ref[i]                               # (4, HP)  biases: s1,s2,i1,i2
        whd = whd_ref[i]                             # (4, HP)  [i0x | off | scale | i3]
        bhd = bhd_ref[i]                             # (1, 4)   [off_b, scale_b, i3_b, 0]

        # scaling / offset net
        zs = _relu(_dot(zs, wh_ref[i, 0]) + bh[0:1])
        zs = _relu(_dot(zs, wh_ref[i, 1]) + bh[1:2])
        offs = jnp.sum(zs * whd[1:2], axis=-1, keepdims=True) + bhd[:, 0:1]
        scal = jnp.exp(jnp.sum(zs * whd[2:3], axis=-1, keepdims=True) + bhd[:, 1:2])

        # integrand: all quadrature points batched into the matmul M dimension
        xt = ts * xi[None]                                    # (T1, B, 1)
        z1 = _relu(base[None] + xt * whd[0:1][None])          # (T1, B, HP)
        z1 = z1.reshape(T1 * B, hp)                           # (T1*B, HP)
        z2 = _relu(_dot(z1, wh_ref[i, 2]) + bh[2:3])
        z3 = _relu(_dot(z2, wh_ref[i, 3]) + bh[3:4])
        gp = jnp.sum(z3 * whd[3:4], axis=-1, keepdims=True) + bhd[:, 2:3]
        g = jnp.where(gp > 0, gp, jnp.exp(jnp.minimum(gp, 0.0)) - 1.0) + 1.0  # ELU + 1
        integral = jnp.sum(g.reshape(T1, B, 1) * cw, axis=0) * (xi * 0.5)     # (B, 1)

        out = out + scal * integral + offs

    # torch.sigmoid, divide via the EUP approx-reciprocal path
    out_ref[...] = pl.reciprocal(1.0 + jnp.exp(-out), approx=True)


# ----------------------- parameters ----------------------------------------------------
def init_params(key, in_dim, out_embedding, emb_hidden=200, main_hidden=100,
                num_embedding_layers=3, num_main_hidden_layers=3):
    keys = iter(jax.random.split(key, 32))

    def linear(k, fan_in, fan_out, n=None):
        k1, k2 = jax.random.split(k)
        bound = 1.0 / math.sqrt(fan_in)
        shp_w = (fan_in, fan_out) if n is None else (n, fan_in, fan_out)
        shp_b = (1, fan_out) if n is None else (n, 1, fan_out)
        W = jax.random.uniform(k1, shp_w, jnp.float32, -bound, bound)
        b = jax.random.uniform(k2, shp_b, jnp.float32, -bound, bound)
        return W, b

    emb_sizes = [in_dim] + [emb_hidden] * (num_embedding_layers + 1) + [out_embedding]
    emb = [linear(next(keys), a, b) for a, b in zip(emb_sizes[:-1], emb_sizes[1:])]

    dc = in_dim - 1 + out_embedding
    scale_sizes = [dc] + [main_hidden] * num_main_hidden_layers + [2]
    integ_sizes = [1 + dc] + [main_hidden] * num_main_hidden_layers + [1]
    scale = [linear(next(keys), a, b, n=in_dim)
             for a, b in zip(scale_sizes[:-1], scale_sizes[1:])]
    integ = [linear(next(keys), a, b, n=in_dim)
             for a, b in zip(integ_sizes[:-1], integ_sizes[1:])]
    return {"emb": emb, "scale": scale, "integrand": integ}


# ----------------------- one-time weight packing (load time, numpy) --------------------
def prepare_params(params, nb_steps=10):
    """Pack EmbeddingNet weights for the fused Pallas kernel.  Call ONCE at load time."""
    emb = [(np.asarray(W, np.float32), np.asarray(b, np.float32)) for W, b in params["emb"]]
    sc = [(np.asarray(W, np.float32), np.asarray(b, np.float32)) for W, b in params["scale"]]
    it = [(np.asarray(W, np.float32), np.asarray(b, np.float32)) for W, b in params["integrand"]]

    D = emb[0][0].shape[0]
    E = emb[-1][0].shape[1]
    EH = emb[1][0].shape[0]                  # embedding hidden width (200)
    EHP = _round_up(EH, 128)                 # 256: lane-dense embedding tiles
    H = sc[1][0].shape[-1]                   # main hidden width (100)
    HP = _round_up(H, 128)                   # 128

    # ---- embedding MLP, hidden padded EH -> EHP ----
    ew0 = np.zeros((D, EHP), np.float32); ew0[:, :EH] = emb[0][0]
    ew_hid = np.zeros((3, EHP, EHP), np.float32)
    eb_hid = np.zeros((4, EHP), np.float32)
    eb_hid[0, :EH] = emb[0][1][0]
    for l in range(3):
        ew_hid[l, :EH, :EH] = emb[1 + l][0]
        eb_hid[1 + l, :EH] = emb[1 + l][1][0]
    ew4 = np.zeros((EHP, E), np.float32); ew4[:EH, :] = emb[4][0]
    eb4 = emb[4][1]                                           # (1, E)

    # ---- per-dim UMNN sub-nets ----
    s0, sb0 = sc[0]; s1, sb1 = sc[1]; s2, sb2 = sc[2]; s3, sb3 = sc[3]
    i0, ib0 = it[0]; i1, ib1 = it[1]; i2, ib2 = it[2]; i3, ib3 = it[3]
    i0x = i0[:, 0, :]            # (D, H) weight on the integrated variable
    i0c = i0[:, 1:, :]           # (D, dc, H) weights on the conditioner c_i

    # Fused layer-0: per dim concat [scale-l0 | integrand-l0] over c_i, expand to the
    # full [x ; h] row basis with a zero row at position i, split x-rows / h-rows, and
    # stack all dims along the lane axis -> one (K, D*2*HP) matmul in the kernel.
    two_hp = 2 * HP
    sc0x = np.zeros((D, D * two_hp), np.float32)
    sc0h = np.zeros((E, D * two_hp), np.float32)
    b0 = np.zeros((1, D * two_hp), np.float32)
    for i in range(D):
        rows = list(range(0, i)) + list(range(i + 1, D)) + list(range(D, D + E))
        blk = np.zeros((D + E, two_hp), np.float32)
        blk[rows, 0:H] = s0[i]
        blk[rows, HP:HP + H] = i0c[i]
        sc0x[:, i * two_hp:(i + 1) * two_hp] = blk[:D]
        sc0h[:, i * two_hp:(i + 1) * two_hp] = blk[D:]
        b0[0, i * two_hp:i * two_hp + H] = sb0[i, 0]
        b0[0, i * two_hp + HP:i * two_hp + HP + H] = ib0[i, 0]

    # Hidden layers of both nets, padded to HP and stacked (fewer DMA descriptors).
    w_hid = np.zeros((D, 4, HP, HP), np.float32)
    w_hid[:, 0, :H, :H] = s1; w_hid[:, 1, :H, :H] = s2
    w_hid[:, 2, :H, :H] = i1; w_hid[:, 3, :H, :H] = i2
    b_hid = np.zeros((D, 4, HP), np.float32)
    b_hid[:, 0, :H] = sb1[:, 0]; b_hid[:, 1, :H] = sb2[:, 0]
    b_hid[:, 2, :H] = ib1[:, 0]; b_hid[:, 3, :H] = ib2[:, 0]

    # Head vectors: [i0x row | offset head | scale head | integrand head].
    w_head = np.zeros((D, 4, HP), np.float32)
    w_head[:, 0, :H] = i0x
    w_head[:, 1, :H] = s3[:, :, 0]
    w_head[:, 2, :H] = s3[:, :, 1]
    w_head[:, 3, :H] = i3[:, :, 0]
    b_head = np.zeros((D, 1, 4), np.float32)
    b_head[:, 0, 0] = sb3[:, 0, 0]
    b_head[:, 0, 1] = sb3[:, 0, 1]
    b_head[:, 0, 2] = ib3[:, 0, 0]

    ccw, steps = compute_cc_weights(nb_steps)
    ts = ((steps + 1.0) * 0.5).astype(np.float32).reshape(-1, 1)   # (T1, 1)
    cw = ccw.astype(np.float32).reshape(-1, 1)                     # (T1, 1)

    packed = dict(ew0=ew0, ew_hid=ew_hid, eb_hid=eb_hid, ew4=ew4, eb4=eb4,
                  sc0x=sc0x, sc0h=sc0h, b0=b0,
                  w_hid=w_hid, b_hid=b_hid, w_head=w_head, b_head=b_head,
                  ts=ts, cw=cw)
    return {k: jnp.asarray(v) for k, v in packed.items()}


# ----------------------- forward --------------------------------------------------------
@jax.jit
def embedding_net_forward(x, packed):
    B, D = x.shape
    HP = packed["b_hid"].shape[-1]
    kernel = functools.partial(fused_kernel, n_dims=D, hp=HP)
    args = (x,
            packed["ew0"], packed["ew_hid"], packed["eb_hid"], packed["ew4"], packed["eb4"],
            packed["sc0x"], packed["sc0h"], packed["b0"],
            packed["w_hid"], packed["b_hid"], packed["w_head"], packed["b_head"],
            packed["ts"], packed["cw"])
    vmem = pl.BlockSpec(memory_space=pltpu.MemorySpace.VMEM)
    return pl.pallas_call(
        kernel,
        out_shape=jax.ShapeDtypeStruct((B, 1), jnp.float32),
        in_specs=[vmem] * len(args),
        out_specs=vmem,
    )(*args)


# ----------------------- pure-JAX reference (for correctness check) --------------------
def reference_forward(x, params, nb_steps=10):
    hp = lambda a, b: jnp.dot(a, b, precision=jax.lax.Precision.HIGHEST)
    relu = lambda v: jnp.maximum(v, 0.0)

    h = x
    for W, b in params["emb"]:
        h = relu(hp(h, W) + b)

    ccw, steps = compute_cc_weights(nb_steps)
    B, D = x.shape
    out = jnp.zeros((B, 1), jnp.float32)
    S, I = params["scale"], params["integrand"]
    for i in range(D):
        c = jnp.concatenate([x[:, :i], x[:, i + 1:], h], axis=1)
        z = c
        for W, b in S[:-1]:
            z = relu(hp(z, W[i]) + b[i])
        W, b = S[-1]
        z = hp(z, W[i]) + b[i]
        offset, scaling = z[:, 0:1], jnp.exp(z[:, 1:2])
        xi = x[:, i:i + 1]
        acc = jnp.zeros((B, 1), jnp.float32)
        for t in range(nb_steps + 1):
            u = jnp.concatenate([xi * float((steps[t] + 1.0) * 0.5), c], axis=1)
            for W, b in I[:-1]:
                u = relu(hp(u, W[i]) + b[i])
            W, b = I[-1]
            u = hp(u, W[i]) + b[i]
            g = jnp.where(u > 0, u, jnp.exp(u) - 1.0) + 1.0
            acc = acc + float(ccw[t]) * g
        out = out + scaling * (acc * xi * 0.5) + offset
    return 1.0 / (1.0 + jnp.exp(-out))


if __name__ == "__main__":
    B, D, E = 8, 8, 16                   # batch, in_embedding == in_main, out_embedding
    NB_STEPS = 10
    key = jax.random.PRNGKey(0)
    kx, kp = jax.random.split(key)
    x = jax.random.normal(kx, (B, D), jnp.float32)
    params = init_params(kp, D, E)

    packed = prepare_params(params, nb_steps=NB_STEPS)   # one-time, load-time packing
    y = embedding_net_forward(x, packed)
    y = jax.block_until_ready(y)
    assert y.shape == (B, 1)

    y_ref = reference_forward(x, params, nb_steps=NB_STEPS)
    np.testing.assert_allclose(np.asarray(y), np.asarray(y_ref), atol=2e-3, rtol=2e-3)
    print("KERNEL_OK")
</pallas_src>

<mosaic_0001>
module attributes {stable_mosaic.version = 11 : i64} {
  func.func @fused_kernel(%arg0: memref<8x8xf32, #tpu.memory_space<vmem>>, %arg1: memref<8x256xf32, #tpu.memory_space<vmem>>, %arg2: memref<3x256x256xf32, #tpu.memory_space<vmem>>, %arg3: memref<4x256xf32, #tpu.memory_space<vmem>>, %arg4: memref<256x16xf32, #tpu.memory_space<vmem>>, %arg5: memref<1x16xf32, #tpu.memory_space<vmem>>, %arg6: memref<8x2048xf32, #tpu.memory_space<vmem>>, %arg7: memref<16x2048xf32, #tpu.memory_space<vmem>>, %arg8: memref<1x2048xf32, #tpu.memory_space<vmem>>, %arg9: memref<8x4x128x128xf32, #tpu.memory_space<vmem>>, %arg10: memref<8x4x128xf32, #tpu.memory_space<vmem>>, %arg11: memref<8x4x128xf32, #tpu.memory_space<vmem>>, %arg12: memref<8x1x4xf32, #tpu.memory_space<vmem>>, %arg13: memref<11x1xf32, #tpu.memory_space<vmem>>, %arg14: memref<11x1xf32, #tpu.memory_space<vmem>>, %arg15: memref<8x1xf32, #tpu.memory_space<vmem>>) attributes {dimension_semantics = [], scalar_prefetch = 0 : i64, scratch_operands = 0 : i64, tpu.core_type = #tpu.core_type<tc>} {
    %c0 = arith.constant 0 : index
    %c0_0 = arith.constant 0 : index
    %0 = vector.load %arg0[%c0, %c0_0] : memref<8x8xf32, #tpu.memory_space<vmem>>, vector<8x8xf32>
    %c0_1 = arith.constant 0 : index
    %c0_2 = arith.constant 0 : index
    %1 = vector.load %arg3[%c0_1, %c0_2] : memref<4x256xf32, #tpu.memory_space<vmem>>, vector<4x256xf32>
    %c0_3 = arith.constant 0 : index
    %c0_4 = arith.constant 0 : index
    %2 = vector.load %arg1[%c0_3, %c0_4] : memref<8x256xf32, #tpu.memory_space<vmem>>, vector<8x256xf32>
    %cst = arith.constant dense<0.000000e+00> : vector<8x256xf32>
    %3 = tpu.matmul %0, %2, %cst {dimension_numbers = #tpu.dot_dimension_numbers<[1], [0], [0], [1], [0, 0, 1, 1], [], []>} : vector<8x8xf32>, vector<8x256xf32>, vector<8x256xf32> -> vector<8x256xf32>
    %4 = vector.extract_strided_slice %1 {offsets = [0, 0], sizes = [1, 256], strides = [1, 1]} : vector<4x256xf32> to vector<1x256xf32>
    %5 = vector.broadcast %4 : vector<1x256xf32> to vector<8x256xf32>
    %6 = arith.addf %3, %5 : vector<8x256xf32>
    %cst_5 = arith.constant 0.000000e+00 : f32
    %7 = vector.broadcast %cst_5 : f32 to vector<8x256xf32>
    %8 = arith.maximumf %6, %7 : vector<8x256xf32>
    %c0_6 = arith.constant 0 : index
    %c0_7 = arith.constant 0 : index
    %c0_8 = arith.constant 0 : index
    %9 = vector.load %arg2[%c0_6, %c0_7, %c0_8] : memref<3x256x256xf32, #tpu.memory_space<vmem>>, vector<1x256x256xf32>
    %10 = vector.shape_cast %9 : vector<1x256x256xf32> to vector<256x256xf32>
    %cst_9 = arith.constant dense<0.000000e+00> : vector<8x256xf32>
    %11 = tpu.matmul %8, %10, %cst_9 {dimension_numbers = #tpu.dot_dimension_numbers<[1], [0], [0], [1], [0, 0, 1, 1], [], []>} : vector<8x256xf32>, vector<256x256xf32>, vector<8x256xf32> -> vector<8x256xf32>
    %12 = vector.extract_strided_slice %1 {offsets = [1, 0], sizes = [1, 256], strides = [1, 1]} : vector<4x256xf32> to vector<1x256xf32>
    %13 = vector.broadcast %12 : vector<1x256xf32> to vector<8x256xf32>
    %14 = arith.addf %11, %13 : vector<8x256xf32>
    %cst_10 = arith.constant 0.000000e+00 : f32
    %15 = vector.broadcast %cst_10 : f32 to vector<8x256xf32>
    %16 = arith.maximumf %14, %15 : vector<8x256xf32>
    %c1 = arith.constant 1 : index
    %c0_11 = arith.constant 0 : index
    %c0_12 = arith.constant 0 : index
    %17 = vector.load %arg2[%c1, %c0_11, %c0_12] : memref<3x256x256xf32, #tpu.memory_space<vmem>>, vector<1x256x256xf32>
    %18 = vector.shape_cast %17 : vector<1x256x256xf32> to vector<256x256xf32>
    %cst_13 = arith.constant dense<0.000000e+00> : vector<8x256xf32>
    %19 = tpu.matmul %16, %18, %cst_13 {dimension_numbers = #tpu.dot_dimension_numbers<[1], [0], [0], [1], [0, 0, 1, 1], [], []>} : vector<8x256xf32>, vector<256x256xf32>, vector<8x256xf32> -> vector<8x256xf32>
    %20 = vector.extract_strided_slice %1 {offsets = [2, 0], sizes = [1, 256], strides = [1, 1]} : vector<4x256xf32> to vector<1x256xf32>
    %21 = vector.broadcast %20 : vector<1x256xf32> to vector<8x256xf32>
    %22 = arith.addf %19, %21 : vector<8x256xf32>
    %cst_14 = arith.constant 0.000000e+00 : f32
    %23 = vector.broadcast %cst_14 : f32 to vector<8x256xf32>
    %24 = arith.maximumf %22, %23 : vector<8x256xf32>
    %c2 = arith.constant 2 : index
    %c0_15 = arith.constant 0 : index
    %c0_16 = arith.constant 0 : index
    %25 = vector.load %arg2[%c2, %c0_15, %c0_16] : memref<3x256x256xf32, #tpu.memory_space<vmem>>, vector<1x256x256xf32>
    %26 = vector.shape_cast %25 : vector<1x256x256xf32> to vector<256x256xf32>
    %cst_17 = arith.constant dense<0.000000e+00> : vector<8x256xf32>
    %27 = tpu.matmul %24, %26, %cst_17 {dimension_numbers = #tpu.dot_dimension_numbers<[1], [0], [0], [1], [0, 0, 1, 1], [], []>} : vector<8x256xf32>, vector<256x256xf32>, vector<8x256xf32> -> vector<8x256xf32>
    %28 = vector.extract_strided_slice %1 {offsets = [3, 0], sizes = [1, 256], strides = [1, 1]} : vector<4x256xf32> to vector<1x256xf32>
    %29 = vector.broadcast %28 : vector<1x256xf32> to vector<8x256xf32>
    %30 = arith.addf %27, %29 : vector<8x256xf32>
    %cst_18 = arith.constant 0.000000e+00 : f32
    %31 = vector.broadcast %cst_18 : f32 to vector<8x256xf32>
    %32 = arith.maximumf %30, %31 : vector<8x256xf32>
    %c0_19 = arith.constant 0 : index
    %c0_20 = arith.constant 0 : index
    %33 = vector.load %arg4[%c0_19, %c0_20] : memref<256x16xf32, #tpu.memory_space<vmem>>, vector<256x16xf32>
    %cst_21 = arith.constant dense<0.000000e+00> : vector<8x16xf32>
    %34 = tpu.matmul %32, %33, %cst_21 {dimension_numbers = #tpu.dot_dimension_numbers<[1], [0], [0], [1], [0, 0, 1, 1], [], []>} : vector<8x256xf32>, vector<256x16xf32>, vector<8x16xf32> -> vector<8x16xf32>
    %c0_22 = arith.constant 0 : index
    %c0_23 = arith.constant 0 : index
    %35 = vector.load %arg5[%c0_22, %c0_23] : memref<1x16xf32, #tpu.memory_space<vmem>>, vector<1x16xf32>
    %36 = vector.broadcast %35 : vector<1x16xf32> to vector<8x16xf32>
    %37 = arith.addf %34, %36 : vector<8x16xf32>
    %cst_24 = arith.constant 0.000000e+00 : f32
    %38 = vector.broadcast %cst_24 : f32 to vector<8x16xf32>
    %39 = arith.maximumf %37, %38 : vector<8x16xf32>
    %c0_25 = arith.constant 0 : index
    %c0_26 = arith.constant 0 : index
    %40 = vector.load %arg6[%c0_25, %c0_26] : memref<8x2048xf32, #tpu.memory_space<vmem>>, vector<8x2048xf32>
    %cst_27 = arith.constant dense<0.000000e+00> : vector<8x2048xf32>
    %41 = tpu.matmul %0, %40, %cst_27 {dimension_numbers = #tpu.dot_dimension_numbers<[1], [0], [0], [1], [0, 0, 1, 1], [], []>} : vector<8x8xf32>, vector<8x2048xf32>, vector<8x2048xf32> -> vector<8x2048xf32>
    %c0_28 = arith.constant 0 : index
    %c0_29 = arith.constant 0 : index
    %42 = vector.load %arg7[%c0_28, %c0_29] : memref<16x2048xf32, #tpu.memory_space<vmem>>, vector<16x2048xf32>
    %cst_30 = arith.constant dense<0.000000e+00> : vector<8x2048xf32>
    %43 = tpu.matmul %39, %42, %cst_30 {dimension_numbers = #tpu.dot_dimension_numbers<[1], [0], [0], [1], [0, 0, 1, 1], [], []>} : vector<8x16xf32>, vector<16x2048xf32>, vector<8x2048xf32> -> vector<8x2048xf32>
    %44 = arith.addf %41, %43 : vector<8x2048xf32>
    %c0_31 = arith.constant 0 : index
    %c0_32 = arith.constant 0 : index
    %45 = vector.load %arg8[%c0_31, %c0_32] : memref<1x2048xf32, #tpu.memory_space<vmem>>, vector<1x2048xf32>
    %46 = vector.broadcast %45 : vector<1x2048xf32> to vector<8x2048xf32>
    %47 = arith.addf %44, %46 : vector<8x2048xf32>
    %c0_33 = arith.constant 0 : index
    %c0_34 = arith.constant 0 : index
    %48 = vector.load %arg13[%c0_33, %c0_34] : memref<11x1xf32, #tpu.memory_space<vmem>>, vector<11x1xf32>
    %49 = vector.shape_cast %48 : vector<11x1xf32> to vector<11x1x1xf32>
    %c0_35 = arith.constant 0 : index
    %c0_36 = arith.constant 0 : index
    %50 = vector.load %arg14[%c0_35, %c0_36] : memref<11x1xf32, #tpu.memory_space<vmem>>, vector<11x1xf32>
    %51 = vector.shape_cast %50 : vector<11x1xf32> to vector<11x1x1xf32>
    %cst_37 = arith.constant 0.000000e+00 : f32
    %52 = vector.broadcast %cst_37 : f32 to vector<8x1xf32>
    %53 = vector.extract_strided_slice %0 {offsets = [0, 0], sizes = [8, 1], strides = [1, 1]} : vector<8x8xf32> to vector<8x1xf32>
    %54 = vector.extract_strided_slice %47 {offsets = [0, 0], sizes = [8, 256], strides = [1, 1]} : vector<8x2048xf32> to vector<8x256xf32>
    %55 = vector.extract_strided_slice %54 {offsets = [0, 0], sizes = [8, 128], strides = [1, 1]} : vector<8x256xf32> to vector<8x128xf32>
    %cst_38 = arith.constant 0.000000e+00 : f32
    %56 = vector.broadcast %cst_38 : f32 to vector<8x128xf32>
    %57 = arith.maximumf %55, %56 : vector<8x128xf32>
    %58 = vector.extract_strided_slice %54 {offsets = [0, 128], sizes = [8, 128], strides = [1, 1]} : vector<8x256xf32> to vector<8x128xf32>
    %c0_39 = arith.constant 0 : index
    %c0_40 = arith.constant 0 : index
    %c0_41 = arith.constant 0 : index
    %59 = vector.load %arg10[%c0_39, %c0_40, %c0_41] : memref<8x4x128xf32, #tpu.memory_space<vmem>>, vector<1x4x128xf32>
    %60 = vector.shape_cast %59 : vector<1x4x128xf32> to vector<4x128xf32>
    %c0_42 = arith.constant 0 : index
    %c0_43 = arith.constant 0 : index
    %c0_44 = arith.constant 0 : index
    %61 = vector.load %arg11[%c0_42, %c0_43, %c0_44] : memref<8x4x128xf32, #tpu.memory_space<vmem>>, vector<1x4x128xf32>
    %62 = vector.shape_cast %61 : vector<1x4x128xf32> to vector<4x128xf32>
    %c0_45 = arith.constant 0 : index
    %c0_46 = arith.constant 0 : index
    %c0_47 = arith.constant 0 : index
    %63 = vector.load %arg12[%c0_45, %c0_46, %c0_47] : memref<8x1x4xf32, #tpu.memory_space<vmem>>, vector<1x1x4xf32>
    %64 = vector.shape_cast %63 : vector<1x1x4xf32> to vector<1x4xf32>
    %c0_48 = arith.constant 0 : index
    %c0_49 = arith.constant 0 : index
    %c0_50 = arith.constant 0 : index
    %c0_51 = arith.constant 0 : index
    %65 = vector.load %arg9[%c0_48, %c0_49, %c0_50, %c0_51] : memref<8x4x128x128xf32, #tpu.memory_space<vmem>>, vector<1x1x128x128xf32>
    %66 = vector.shape_cast %65 : vector<1x1x128x128xf32> to vector<128x128xf32>
    %cst_52 = arith.constant dense<0.000000e+00> : vector<8x128xf32>
    %67 = tpu.matmul %57, %66, %cst_52 {dimension_numbers = #tpu.dot_dimension_numbers<[1], [0], [0], [1], [0, 0, 1, 1], [], []>} : vector<8x128xf32>, vector<128x128xf32>, vector<8x128xf32> -> vector<8x128xf32>
    %68 = vector.extract_strided_slice %60 {offsets = [0, 0], sizes = [1, 128], strides = [1, 1]} : vector<4x128xf32> to vector<1x128xf32>
    %69 = vector.broadcast %68 : vector<1x128xf32> to vector<8x128xf32>
    %70 = arith.addf %67, %69 : vector<8x128xf32>
    %cst_53 = arith.constant 0.000000e+00 : f32
    %71 = vector.broadcast %cst_53 : f32 to vector<8x128xf32>
    %72 = arith.maximumf %70, %71 : vector<8x128xf32>
    %c0_54 = arith.constant 0 : index
    %c1_55 = arith.constant 1 : index
    %c0_56 = arith.constant 0 : index
    %c0_57 = arith.constant 0 : index
    %73 = vector.load %arg9[%c0_54, %c1_55, %c0_56, %c0_57] : memref<8x4x128x128xf32, #tpu.memory_space<vmem>>, vector<1x1x128x128xf32>
    %74 = vector.shape_cast %73 : vector<1x1x128x128xf32> to vector<128x128xf32>
    %cst_58 = arith.constant dense<0.000000e+00> : vector<8x128xf32>
    %75 = tpu.matmul %72, %74, %cst_58 {dimension_numbers = #tpu.dot_dimension_numbers<[1], [0], [0], [1], [0, 0, 1, 1], [], []>} : vector<8x128xf32>, vector<128x128xf32>, vector<8x128xf32> -> vector<8x128xf32>
    %76 = vector.extract_strided_slice %60 {offsets = [1, 0], sizes = [1, 128], strides = [1, 1]} : vector<4x128xf32> to vector<1x128xf32>
    %77 = vector.broadcast %76 : vector<1x128xf32> to vector<8x128xf32>
    %78 = arith.addf %75, %77 : vector<8x128xf32>
    %cst_59 = arith.constant 0.000000e+00 : f32
    %79 = vector.broadcast %cst_59 : f32 to vector<8x128xf32>
    %80 = arith.maximumf %78, %79 : vector<8x128xf32>
    %81 = vector.extract_strided_slice %62 {offsets = [1, 0], sizes = [1, 128], strides = [1, 1]} : vector<4x128xf32> to vector<1x128xf32>
    %82 = vector.broadcast %81 : vector<1x128xf32> to vector<8x128xf32>
    %83 = arith.mulf %80, %82 : vector<8x128xf32>
    %cst_60 = arith.constant dense<0.000000e+00> : vector<8xf32>
    %84 = vector.multi_reduction <add>, %83, %cst_60 [1] : vector<8x128xf32> to vector<8xf32>
    %85 = vector.shape_cast %84 : vector<8xf32> to vector<8x1xf32>
    %86 = vector.extract_strided_slice %64 {offsets = [0, 0], sizes = [1, 1], strides = [1, 1]} : vector<1x4xf32> to vector<1x1xf32>
    %87 = vector.broadcast %86 : vector<1x1xf32> to vector<8x1xf32>
    %88 = arith.addf %85, %87 : vector<8x1xf32>
    %89 = vector.extract_strided_slice %62 {offsets = [2, 0], sizes = [1, 128], strides = [1, 1]} : vector<4x128xf32> to vector<1x128xf32>
    %90 = vector.broadcast %89 : vector<1x128xf32> to vector<8x128xf32>
    %91 = arith.mulf %80, %90 : vector<8x128xf32>
    %cst_61 = arith.constant dense<0.000000e+00> : vector<8xf32>
    %92 = vector.multi_reduction <add>, %91, %cst_61 [1] : vector<8x128xf32> to vector<8xf32>
    %93 = vector.shape_cast %92 : vector<8xf32> to vector<8x1xf32>
    %94 = vector.extract_strided_slice %64 {offsets = [0, 1], sizes = [1, 1], strides = [1, 1]} : vector<1x4xf32> to vector<1x1xf32>
    %95 = vector.broadcast %94 : vector<1x1xf32> to vector<8x1xf32>
    %96 = arith.addf %93, %95 : vector<8x1xf32>
    %97 = math.exp %96 : vector<8x1xf32>
    %98 = vector.shape_cast %53 : vector<8x1xf32> to vector<1x8x1xf32>
    %99 = vector.broadcast %49 : vector<11x1x1xf32> to vector<11x8x1xf32>
    %100 = vector.broadcast %98 : vector<1x8x1xf32> to vector<11x8x1xf32>
    %101 = arith.mulf %99, %100 : vector<11x8x1xf32>
    %102 = vector.shape_cast %58 : vector<8x128xf32> to vector<1x8x128xf32>
    %103 = vector.extract_strided_slice %62 {offsets = [0, 0], sizes = [1, 128], strides = [1, 1]} : vector<4x128xf32> to vector<1x128xf32>
    %104 = vector.shape_cast %103 : vector<1x128xf32> to vector<1x1x128xf32>
    %105 = vector.broadcast %101 : vector<11x8x1xf32> to vector<11x8x128xf32>
    %106 = vector.broadcast %104 : vector<1x1x128xf32> to vector<11x8x128xf32>
    %107 = arith.mulf %105, %106 : vector<11x8x128xf32>
    %108 = vector.broadcast %102 : vector<1x8x128xf32> to vector<11x8x128xf32>
    %109 = arith.addf %108, %107 : vector<11x8x128xf32>
    %cst_62 = arith.constant 0.000000e+00 : f32
    %110 = vector.broadcast %cst_62 : f32 to vector<11x8x128xf32>
    %111 = arith.maximumf %109, %110 : vector<11x8x128xf32>
    %112 = vector.shape_cast %111 : vector<11x8x128xf32> to vector<88x128xf32>
    %c0_63 = arith.constant 0 : index
    %c2_64 = arith.constant 2 : index
    %c0_65 = arith.constant 0 : index
    %c0_66 = arith.constant 0 : index
    %113 = vector.load %arg9[%c0_63, %c2_64, %c0_65, %c0_66] : memref<8x4x128x128xf32, #tpu.memory_space<vmem>>, vector<1x1x128x128xf32>
    %114 = vector.shape_cast %113 : vector<1x1x128x128xf32> to vector<128x128xf32>
    %cst_67 = arith.constant dense<0.000000e+00> : vector<88x128xf32>
    %115 = tpu.matmul %112, %114, %cst_67 {dimension_numbers = #tpu.dot_dimension_numbers<[1], [0], [0], [1], [0, 0, 1, 1], [], []>} : vector<88x128xf32>, vector<128x128xf32>, vector<88x128xf32> -> vector<88x128xf32>
    %116 = vector.extract_strided_slice %60 {offsets = [2, 0], sizes = [1, 128], strides = [1, 1]} : vector<4x128xf32> to vector<1x128xf32>
    %117 = vector.broadcast %116 : vector<1x128xf32> to vector<88x128xf32>
    %118 = arith.addf %115, %117 : vector<88x128xf32>
    %cst_68 = arith.constant 0.000000e+00 : f32
    %119 = vector.broadcast %cst_68 : f32 to vector<88x128xf32>
    %120 = arith.maximumf %118, %119 : vector<88x128xf32>
    %c0_69 = arith.constant 0 : index
    %c3 = arith.constant 3 : index
    %c0_70 = arith.constant 0 : index
    %c0_71 = arith.constant 0 : index
    %121 = vector.load %arg9[%c0_69, %c3, %c0_70, %c0_71] : memref<8x4x128x128xf32, #tpu.memory_space<vmem>>, vector<1x1x128x128xf32>
    %122 = vector.shape_cast %121 : vector<1x1x128x128xf32> to vector<128x128xf32>
    %cst_72 = arith.constant dense<0.000000e+00> : vector<88x128xf32>
    %123 = tpu.matmul %120, %122, %cst_72 {dimension_numbers = #tpu.dot_dimension_numbers<[1], [0], [0], [1], [0, 0, 1, 1], [], []>} : vector<88x128xf32>, vector<128x128xf32>, vector<88x128xf32> -> vector<88x128xf32>
    %124 = vector.extract_strided_slice %60 {offsets = [3, 0], sizes = [1, 128], strides = [1, 1]} : vector<4x128xf32> to vector<1x128xf32>
    %125 = vector.broadcast %124 : vector<1x128xf32> to vector<88x128xf32>
    %126 = arith.addf %123, %125 : vector<88x128xf32>
    %cst_73 = arith.constant 0.000000e+00 : f32
    %127 = vector.broadcast %cst_73 : f32 to vector<88x128xf32>
    %128 = arith.maximumf %126, %127 : vector<88x128xf32>
    %129 = vector.extract_strided_slice %62 {offsets = [3, 0], sizes = [1, 128], strides = [1, 1]} : vector<4x128xf32> to vector<1x128xf32>
    %130 = vector.broadcast %129 : vector<1x128xf32> to vector<88x128xf32>
    %131 = arith.mulf %128, %130 : vector<88x128xf32>
    %cst_74 = arith.constant dense<0.000000e+00> : vector<88xf32>
    %132 = vector.multi_reduction <add>, %131, %cst_74 [1] : vector<88x128xf32> to vector<88xf32>
    %133 = vector.shape_cast %132 : vector<88xf32> to vector<88x1xf32>
    %134 = vector.extract_strided_slice %64 {offsets = [0, 2], sizes = [1, 1], strides = [1, 1]} : vector<1x4xf32> to vector<1x1xf32>
    %135 = vector.broadcast %134 : vector<1x1xf32> to vector<88x1xf32>
    %136 = arith.addf %133, %135 : vector<88x1xf32>
    %cst_75 = arith.constant 0.000000e+00 : f32
    %137 = vector.broadcast %cst_75 : f32 to vector<88x1xf32>
    %138 = arith.cmpf ogt, %136, %137 : vector<88x1xf32>
    %cst_76 = arith.constant 0.000000e+00 : f32
    %139 = vector.broadcast %cst_76 : f32 to vector<88x1xf32>
    %140 = arith.minimumf %136, %139 : vector<88x1xf32>
    %141 = math.exp %140 : vector<88x1xf32>
    %cst_77 = arith.constant 1.000000e+00 : f32
    %142 = vector.broadcast %cst_77 : f32 to vector<88x1xf32>
    %143 = arith.subf %141, %142 : vector<88x1xf32>
    %144 = arith.select %138, %136, %143 : vector<88x1xi1>, vector<88x1xf32>
    %cst_78 = arith.constant 1.000000e+00 : f32
    %145 = vector.broadcast %cst_78 : f32 to vector<88x1xf32>
    %146 = arith.addf %144, %145 : vector<88x1xf32>
    %147 = vector.shape_cast %146 : vector<88x1xf32> to vector<11x8x1xf32>
    %148 = vector.broadcast %51 : vector<11x1x1xf32> to vector<11x8x1xf32>
    %149 = arith.mulf %147, %148 : vector<11x8x1xf32>
    %cst_79 = arith.constant dense<0.000000e+00> : vector<8x1xf32>
    %150 = vector.multi_reduction <add>, %149, %cst_79 [0] : vector<11x8x1xf32> to vector<8x1xf32>
    %cst_80 = arith.constant 5.000000e-01 : f32
    %151 = vector.broadcast %cst_80 : f32 to vector<8x1xf32>
    %152 = arith.mulf %53, %151 : vector<8x1xf32>
    %153 = arith.mulf %150, %152 : vector<8x1xf32>
    %154 = arith.mulf %97, %153 : vector<8x1xf32>
    %155 = arith.addf %52, %154 : vector<8x1xf32>
    %156 = arith.addf %155, %88 : vector<8x1xf32>
    %157 = vector.extract_strided_slice %0 {offsets = [0, 1], sizes = [8, 1], strides = [1, 1]} : vector<8x8xf32> to vector<8x1xf32>
    %158 = vector.extract_strided_slice %47 {offsets = [0, 256], sizes = [8, 256], strides = [1, 1]} : vector<8x2048xf32> to vector<8x256xf32>
    %159 = vector.extract_strided_slice %158 {offsets = [0, 0], sizes = [8, 128], strides = [1, 1]} : vector<8x256xf32> to vector<8x128xf32>
    %cst_81 = arith.constant 0.000000e+00 : f32
    %160 = vector.broadcast %cst_81 : f32 to vector<8x128xf32>
    %161 = arith.maximumf %159, %160 : vector<8x128xf32>
    %162 = vector.extract_strided_slice %158 {offsets = [0, 128], sizes = [8, 128], strides = [1, 1]} : vector<8x256xf32> to vector<8x128xf32>
    %c1_82 = arith.constant 1 : index
    %c0_83 = arith.constant 0 : index
    %c0_84 = arith.constant 0 : index
    %163 = vector.load %arg10[%c1_82, %c0_83, %c0_84] : memref<8x4x128xf32, #tpu.memory_space<vmem>>, vector<1x4x128xf32>
    %164 = vector.shape_cast %163 : vector<1x4x128xf32> to vector<4x128xf32>
    %c1_85 = arith.constant 1 : index
    %c0_86 = arith.constant 0 : index
    %c0_87 = arith.constant 0 : index
    %165 = vector.load %arg11[%c1_85, %c0_86, %c0_87] : memref<8x4x128xf32, #tpu.memory_space<vmem>>, vector<1x4x128xf32>
    %166 = vector.shape_cast %165 : vector<1x4x128xf32> to vector<4x128xf32>
    %c1_88 = arith.constant 1 : index
    %c0_89 = arith.constant 0 : index
    %c0_90 = arith.constant 0 : index
    %167 = vector.load %arg12[%c1_88, %c0_89, %c0_90] : memref<8x1x4xf32, #tpu.memory_space<vmem>>, vector<1x1x4xf32>
    %168 = vector.shape_cast %167 : vector<1x1x4xf32> to vector<1x4xf32>
    %c1_91 = arith.constant 1 : index
    %c0_92 = arith.constant 0 : index
    %c0_93 = arith.constant 0 : index
    %c0_94 = arith.constant 0 : index
    %169 = vector.load %arg9[%c1_91, %c0_92, %c0_93, %c0_94] : memref<8x4x128x128xf32, #tpu.memory_space<vmem>>, vector<1x1x128x128xf32>
    %170 = vector.shape_cast %169 : vector<1x1x128x128xf32> to vector<128x128xf32>
    %cst_95 = arith.constant dense<0.000000e+00> : vector<8x128xf32>
    %171 = tpu.matmul %161, %170, %cst_95 {dimension_numbers = #tpu.dot_dimension_numbers<[1], [0], [0], [1], [0, 0, 1, 1], [], []>} : vector<8x128xf32>, vector<128x128xf32>, vector<8x128xf32> -> vector<8x128xf32>
    %172 = vector.extract_strided_slice %164 {offsets = [0, 0], sizes = [1, 128], strides = [1, 1]} : vector<4x128xf32> to vector<1x128xf32>
    %173 = vector.broadcast %172 : vector<1x128xf32> to vector<8x128xf32>
    %174 = arith.addf %171, %173 : vector<8x128xf32>
    %cst_96 = arith.constant 0.000000e+00 : f32
    %175 = vector.broadcast %cst_96 : f32 to vector<8x128xf32>
    %176 = arith.maximumf %174, %175 : vector<8x128xf32>
    %c1_97 = arith.constant 1 : index
    %c1_98 = arith.constant 1 : index
    %c0_99 = arith.constant 0 : index
    %c0_100 = arith.constant 0 : index
    %177 = vector.load %arg9[%c1_97, %c1_98, %c0_99, %c0_100] : memref<8x4x128x128xf32, #tpu.memory_space<vmem>>, vector<1x1x128x128xf32>
    %178 = vector.shape_cast %177 : vector<1x1x128x128xf32> to vector<128x128xf32>
    %cst_101 = arith.constant dense<0.000000e+00> : vector<8x128xf32>
    %179 = tpu.matmul %176, %178, %cst_101 {dimension_numbers = #tpu.dot_dimension_numbers<[1], [0], [0], [1], [0, 0, 1, 1], [], []>} : vector<8x128xf32>, vector<128x128xf32>, vector<8x128xf32> -> vector<8x128xf32>
    %180 = vector.extract_strided_slice %164 {offsets = [1, 0], sizes = [1, 128], strides = [1, 1]} : vector<4x128xf32> to vector<1x128xf32>
    %181 = vector.broadcast %180 : vector<1x128xf32> to vector<8x128xf32>
    %182 = arith.addf %179, %181 : vector<8x128xf32>
    %cst_102 = arith.constant 0.000000e+00 : f32
    %183 = vector.broadcast %cst_102 : f32 to vector<8x128xf32>
    %184 = arith.maximumf %182, %183 : vector<8x128xf32>
    %185 = vector.extract_strided_slice %166 {offsets = [1, 0], sizes = [1, 128], strides = [1, 1]} : vector<4x128xf32> to vector<1x128xf32>
    %186 = vector.broadcast %185 : vector<1x128xf32> to vector<8x128xf32>
    %187 = arith.mulf %184, %186 : vector<8x128xf32>
    %cst_103 = arith.constant dense<0.000000e+00> : vector<8xf32>
    %188 = vector.multi_reduction <add>, %187, %cst_103 [1] : vector<8x128xf32> to vector<8xf32>
    %189 = vector.shape_cast %188 : vector<8xf32> to vector<8x1xf32>
    %190 = vector.extract_strided_slice %168 {offsets = [0, 0], sizes = [1, 1], strides = [1, 1]} : vector<1x4xf32> to vector<1x1xf32>
    %191 = vector.broadcast %190 : vector<1x1xf32> to vector<8x1xf32>
    %192 = arith.addf %189, %191 : vector<8x1xf32>
    %193 = vector.extract_strided_slice %166 {offsets = [2, 0], sizes = [1, 128], strides = [1, 1]} : vector<4x128xf32> to vector<1x128xf32>
    %194 = vector.broadcast %193 : vector<1x128xf32> to vector<8x128xf32>
    %195 = arith.mulf %184, %194 : vector<8x128xf32>
    %cst_104 = arith.constant dense<0.000000e+00> : vector<8xf32>
    %196 = vector.multi_reduction <add>, %195, %cst_104 [1] : vector<8x128xf32> to vector<8xf32>
    %197 = vector.shape_cast %196 : vector<8xf32> to vector<8x1xf32>
    %198 = vector.extract_strided_slice %168 {offsets = [0, 1], sizes = [1, 1], strides = [1, 1]} : vector<1x4xf32> to vector<1x1xf32>
    %199 = vector.broadcast %198 : vector<1x1xf32> to vector<8x1xf32>
    %200 = arith.addf %197, %199 : vector<8x1xf32>
    %201 = math.exp %200 : vector<8x1xf32>
    %202 = vector.shape_cast %157 : vector<8x1xf32> to vector<1x8x1xf32>
    %203 = vector.broadcast %49 : vector<11x1x1xf32> to vector<11x8x1xf32>
    %204 = vector.broadcast %202 : vector<1x8x1xf32> to vector<11x8x1xf32>
    %205 = arith.mulf %203, %204 : vector<11x8x1xf32>
    %206 = vector.shape_cast %162 : vector<8x128xf32> to vector<1x8x128xf32>
    %207 = vector.extract_strided_slice %166 {offsets = [0, 0], sizes = [1, 128], strides = [1, 1]} : vector<4x128xf32> to vector<1x128xf32>
    %208 = vector.shape_cast %207 : vector<1x128xf32> to vector<1x1x128xf32>
    %209 = vector.broadcast %205 : vector<11x8x1xf32> to vector<11x8x128xf32>
    %210 = vector.broadcast %208 : vector<1x1x128xf32> to vector<11x8x128xf32>
    %211 = arith.mulf %209, %210 : vector<11x8x128xf32>
    %212 = vector.broadcast %206 : vector<1x8x128xf32> to vector<11x8x128xf32>
    %213 = arith.addf %212, %211 : vector<11x8x128xf32>
    %cst_105 = arith.constant 0.000000e+00 : f32
    %214 = vector.broadcast %cst_105 : f32 to vector<11x8x128xf32>
    %215 = arith.maximumf %213, %214 : vector<11x8x128xf32>
    %216 = vector.shape_cast %215 : vector<11x8x128xf32> to vector<88x128xf32>
    %c1_106 = arith.constant 1 : index
    %c2_107 = arith.constant 2 : index
    %c0_108 = arith.constant 0 : index
    %c0_109 = arith.constant 0 : index
    %217 = vector.load %arg9[%c1_106, %c2_107, %c0_108, %c0_109] : memref<8x4x128x128xf32, #tpu.memory_space<vmem>>, vector<1x1x128x128xf32>
    %218 = vector.shape_cast %217 : vector<1x1x128x128xf32> to vector<128x128xf32>
    %cst_110 = arith.constant dense<0.000000e+00> : vector<88x128xf32>
    %219 = tpu.matmul %216, %218, %cst_110 {dimension_numbers = #tpu.dot_dimension_numbers<[1], [0], [0], [1], [0, 0, 1, 1], [], []>} : vector<88x128xf32>, vector<128x128xf32>, vector<88x128xf32> -> vector<88x128xf32>
    %220 = vector.extract_strided_slice %164 {offsets = [2, 0], sizes = [1, 128], strides = [1, 1]} : vector<4x128xf32> to vector<1x128xf32>
    %221 = vector.broadcast %220 : vector<1x128xf32> to vector<88x128xf32>
    %222 = arith.addf %219, %221 : vector<88x128xf32>
    %cst_111 = arith.constant 0.000000e+00 : f32
    %223 = vector.broadcast %cst_111 : f32 to vector<88x128xf32>
    %224 = arith.maximumf %222, %223 : vector<88x128xf32>
    %c1_112 = arith.constant 1 : index
    %c3_113 = arith.constant 3 : index
    %c0_114 = arith.constant 0 : index
    %c0_115 = arith.constant 0 : index
    %225 = vector.load %arg9[%c1_112, %c3_113, %c0_114, %c0_115] : memref<8x4x128x128xf32, #tpu.memory_space<vmem>>, vector<1x1x128x128xf32>
    %226 = vector.shape_cast %225 : vector<1x1x128x128xf32> to vector<128x128xf32>
    %cst_116 = arith.constant dense<0.000000e+00> : vector<88x128xf32>
    %227 = tpu.matmul %224, %226, %cst_116 {dimension_numbers = #tpu.dot_dimension_numbers<[1], [0], [0], [1], [0, 0, 1, 1], [], []>} : vector<88x128xf32>, vector<128x128xf32>, vector<88x128xf32> -> vector<88x128xf32>
    %228 = vector.extract_strided_slice %164 {offsets = [3, 0], sizes = [1, 128], strides = [1, 1]} : vector<4x128xf32> to vector<1x128xf32>
    %229 = vector.broadcast %228 : vector<1x128xf32> to vector<88x128xf32>
    %230 = arith.addf %227, %229 : vector<88x128xf32>
    %cst_117 = arith.constant 0.000000e+00 : f32
    %231 = vector.broadcast %cst_117 : f32 to vector<88x128xf32>
    %232 = arith.maximumf %230, %231 : vector<88x128xf32>
    %233 = vector.extract_strided_slice %166 {offsets = [3, 0], sizes = [1, 128], strides = [1, 1]} : vector<4x128xf32> to vector<1x128xf32>
    %234 = vector.broadcast %233 : vector<1x128xf32> to vector<88x128xf32>
    %235 = arith.mulf %232, %234 : vector<88x128xf32>
    %cst_118 = arith.constant dense<0.000000e+00> : vector<88xf32>
    %236 = vector.multi_reduction <add>, %235, %cst_118 [1] : vector<88x128xf32> to vector<88xf32>
    %237 = vector.shape_cast %236 : vector<88xf32> to vector<88x1xf32>
    %238 = vector.extract_strided_slice %168 {offsets = [0, 2], sizes = [1, 1], strides = [1, 1]} : vector<1x4xf32> to vector<1x1xf32>
    %239 = vector.broadcast %238 : vector<1x1xf32> to vector<88x1xf32>
    %240 = arith.addf %237, %239 : vector<88x1xf32>
    %cst_119 = arith.constant 0.000000e+00 : f32
    %241 = vector.broadcast %cst_119 : f32 to vector<88x1xf32>
    %242 = arith.cmpf ogt, %240, %241 : vector<88x1xf32>
    %cst_120 = arith.constant 0.000000e+00 : f32
    %243 = vector.broadcast %cst_120 : f32 to vector<88x1xf32>
    %244 = arith.minimumf %240, %243 : vector<88x1xf32>
    %245 = math.exp %244 : vector<88x1xf32>
    %cst_121 = arith.constant 1.000000e+00 : f32
    %246 = vector.broadcast %cst_121 : f32 to vector<88x1xf32>
    %247 = arith.subf %245, %246 : vector<88x1xf32>
    %248 = arith.select %242, %240, %247 : vector<88x1xi1>, vector<88x1xf32>
    %cst_122 = arith.constant 1.000000e+00 : f32
    %249 = vector.broadcast %cst_122 : f32 to vector<88x1xf32>
    %250 = arith.addf %248, %249 : vector<88x1xf32>
    %251 = vector.shape_cast %250 : vector<88x1xf32> to vector<11x8x1xf32>
    %252 = vector.broadcast %51 : vector<11x1x1xf32> to vector<11x8x1xf32>
    %253 = arith.mulf %251, %252 : vector<11x8x1xf32>
    %cst_123 = arith.constant dense<0.000000e+00> : vector<8x1xf32>
    %254 = vector.multi_reduction <add>, %253, %cst_123 [0] : vector<11x8x1xf32> to vector<8x1xf32>
    %cst_124 = arith.constant 5.000000e-01 : f32
    %255 = vector.broadcast %cst_124 : f32 to vector<8x1xf32>
    %256 = arith.mulf %157, %255 : vector<8x1xf32>
    %257 = arith.mulf %254, %256 : vector<8x1xf32>
    %258 = arith.mulf %201, %257 : vector<8x1xf32>
    %259 = arith.addf %156, %258 : vector<8x1xf32>
    %260 = arith.addf %259, %192 : vector<8x1xf32>
    %261 = vector.extract_strided_slice %0 {offsets = [0, 2], sizes = [8, 1], strides = [1, 1]} : vector<8x8xf32> to vector<8x1xf32>
    %262 = vector.extract_strided_slice %47 {offsets = [0, 512], sizes = [8, 256], strides = [1, 1]} : vector<8x2048xf32> to vector<8x256xf32>
    %263 = vector.extract_strided_slice %262 {offsets = [0, 0], sizes = [8, 128], strides = [1, 1]} : vector<8x256xf32> to vector<8x128xf32>
    %cst_125 = arith.constant 0.000000e+00 : f32
    %264 = vector.broadcast %cst_125 : f32 to vector<8x128xf32>
    %265 = arith.maximumf %263, %264 : vector<8x128xf32>
    %266 = vector.extract_strided_slice %262 {offsets = [0, 128], sizes = [8, 128], strides = [1, 1]} : vector<8x256xf32> to vector<8x128xf32>
    %c2_126 = arith.constant 2 : index
    %c0_127 = arith.constant 0 : index
    %c0_128 = arith.constant 0 : index
    %267 = vector.load %arg10[%c2_126, %c0_127, %c0_128] : memref<8x4x128xf32, #tpu.memory_space<vmem>>, vector<1x4x128xf32>
    %268 = vector.shape_cast %267 : vector<1x4x128xf32> to vector<4x128xf32>
    %c2_129 = arith.constant 2 : index
    %c0_130 = arith.constant 0 : index
    %c0_131 = arith.constant 0 : index
    %269 = vector.load %arg11[%c2_129, %c0_130, %c0_131] : memref<8x4x128xf32, #tpu.memory_space<vmem>>, vector<1x4x128xf32>
    %270 = vector.shape_cast %269 : vector<1x4x128xf32> to vector<4x128xf32>
    %c2_132 = arith.constant 2 : index
    %c0_133 = arith.constant 0 : index
    %c0_134 = arith.constant 0 : index
    %271 = vector.load %arg12[%c2_132, %c0_133, %c0_134] : memref<8x1x4xf32, #tpu.memory_space<vmem>>, vector<1x1x4xf32>
    %272 = vector.shape_cast %271 : vector<1x1x4xf32> to vector<1x4xf32>
    %c2_135 = arith.constant 2 : index
    %c0_136 = arith.constant 0 : index
    %c0_137 = arith.constant 0 : index
    %c0_138 = arith.constant 0 : index
    %273 = vector.load %arg9[%c2_135, %c0_136, %c0_137, %c0_138] : memref<8x4x128x128xf32, #tpu.memory_space<vmem>>, vector<1x1x128x128xf32>
    %274 = vector.shape_cast %273 : vector<1x1x128x128xf32> to vector<128x128xf32>
    %cst_139 = arith.constant dense<0.000000e+00> : vector<8x128xf32>
    %275 = tpu.matmul %265, %274, %cst_139 {dimension_numbers = #tpu.dot_dimension_numbers<[1], [0], [0], [1], [0, 0, 1, 1], [], []>} : vector<8x128xf32>, vector<128x128xf32>, vector<8x128xf32> -> vector<8x128xf32>
    %276 = vector.extract_strided_slice %268 {offsets = [0, 0], sizes = [1, 128], strides = [1, 1]} : vector<4x128xf32> to vector<1x128xf32>
    %277 = vector.broadcast %276 : vector<1x128xf32> to vector<8x128xf32>
    %278 = arith.addf %275, %277 : vector<8x128xf32>
    %cst_140 = arith.constant 0.000000e+00 : f32
    %279 = vector.broadcast %cst_140 : f32 to vector<8x128xf32>
    %280 = arith.maximumf %278, %279 : vector<8x128xf32>
    %c2_141 = arith.constant 2 : index
    %c1_142 = arith.constant 1 : index
    %c0_143 = arith.constant 0 : index
    %c0_144 = arith.constant 0 : index
    %281 = vector.load %arg9[%c2_141, %c1_142, %c0_143, %c0_144] : memref<8x4x128x128xf32, #tpu.memory_space<vmem>>, vector<1x1x128x128xf32>
    %282 = vector.shape_cast %281 : vector<1x1x128x128xf32> to vector<128x128xf32>
    %cst_145 = arith.constant dense<0.000000e+00> : vector<8x128xf32>
    %283 = tpu.matmul %280, %282, %cst_145 {dimension_numbers = #tpu.dot_dimension_numbers<[1], [0], [0], [1], [0, 0, 1, 1], [], []>} : vector<8x128xf32>, vector<128x128xf32>, vector<8x128xf32> -> vector<8x128xf32>
    %284 = vector.extract_strided_slice %268 {offsets = [1, 0], sizes = [1, 128], strides = [1, 1]} : vector<4x128xf32> to vector<1x128xf32>
    %285 = vector.broadcast %284 : vector<1x128xf32> to vector<8x128xf32>
    %286 = arith.addf %283, %285 : vector<8x128xf32>
    %cst_146 = arith.constant 0.000000e+00 : f32
    %287 = vector.broadcast %cst_146 : f32 to vector<8x128xf32>
    %288 = arith.maximumf %286, %287 : vector<8x128xf32>
    %289 = vector.extract_strided_slice %270 {offsets = [1, 0], sizes = [1, 128], strides = [1, 1]} : vector<4x128xf32> to vector<1x128xf32>
    %290 = vector.broadcast %289 : vector<1x128xf32> to vector<8x128xf32>
    %291 = arith.mulf %288, %290 : vector<8x128xf32>
    %cst_147 = arith.constant dense<0.000000e+00> : vector<8xf32>
    %292 = vector.multi_reduction <add>, %291, %cst_147 [1] : vector<8x128xf32> to vector<8xf32>
    %293 = vector.shape_cast %292 : vector<8xf32> to vector<8x1xf32>
    %294 = vector.extract_strided_slice %272 {offsets = [0, 0], sizes = [1, 1], strides = [1, 1]} : vector<1x4xf32> to vector<1x1xf32>
    %295 = vector.broadcast %294 : vector<1x1xf32> to vector<8x1xf32>
    %296 = arith.addf %293, %295 : vector<8x1xf32>
    %297 = vector.extract_strided_slice %270 {offsets = [2, 0], sizes = [1, 128], strides = [1, 1]} : vector<4x128xf32> to vector<1x128xf32>
    %298 = vector.broadcast %297 : vector<1x128xf32> to vector<8x128xf32>
    %299 = arith.mulf %288, %298 : vector<8x128xf32>
    %cst_148 = arith.constant dense<0.000000e+00> : vector<8xf32>
    %300 = vector.multi_reduction <add>, %299, %cst_148 [1] : vector<8x128xf32> to vector<8xf32>
    %301 = vector.shape_cast %300 : vector<8xf32> to vector<8x1xf32>
    %302 = vector.extract_strided_slice %272 {offsets = [0, 1], sizes = [1, 1], strides = [1, 1]} : vector<1x4xf32> to vector<1x1xf32>
    %303 = vector.broadcast %302 : vector<1x1xf32> to vector<8x1xf32>
    %304 = arith.addf %301, %303 : vector<8x1xf32>
    %305 = math.exp %304 : vector<8x1xf32>
    %306 = vector.shape_cast %261 : vector<8x1xf32> to vector<1x8x1xf32>
    %307 = vector.broadcast %49 : vector<11x1x1xf32> to vector<11x8x1xf32>
    %308 = vector.broadcast %306 : vector<1x8x1xf32> to vector<11x8x1xf32>
    %309 = arith.mulf %307, %308 : vector<11x8x1xf32>
    %310 = vector.shape_cast %266 : vector<8x128xf32> to vector<1x8x128xf32>
    %311 = vector.extract_strided_slice %270 {offsets = [0, 0], sizes = [1, 128], strides = [1, 1]} : vector<4x128xf32> to vector<1x128xf32>
    %312 = vector.shape_cast %311 : vector<1x128xf32> to vector<1x1x128xf32>
    %313 = vector.broadcast %309 : vector<11x8x1xf32> to vector<11x8x128xf32>
    %314 = vector.broadcast %312 : vector<1x1x128xf32> to vector<11x8x128xf32>
    %315 = arith.mulf %313, %314 : vector<11x8x128xf32>
    %316 = vector.broadcast %310 : vector<1x8x128xf32> to vector<11x8x128xf32>
    %317 = arith.addf %316, %315 : vector<11x8x128xf32>
    %cst_149 = arith.constant 0.000000e+00 : f32
    %318 = vector.broadcast %cst_149 : f32 to vector<11x8x128xf32>
    %319 = arith.maximumf %317, %318 : vector<11x8x128xf32>
    %320 = vector.shape_cast %319 : vector<11x8x128xf32> to vector<88x128xf32>
    %c2_150 = arith.constant 2 : index
    %c2_151 = arith.constant 2 : index
    %c0_152 = arith.constant 0 : index
    %c0_153 = arith.constant 0 : index
    %321 = vector.load %arg9[%c2_150, %c2_151, %c0_152, %c0_153] : memref<8x4x128x128xf32, #tpu.memory_space<vmem>>, vector<1x1x128x128xf32>
    %322 = vector.shape_cast %321 : vector<1x1x128x128xf32> to vector<128x128xf32>
    %cst_154 = arith.constant dense<0.000000e+00> : vector<88x128xf32>
    %323 = tpu.matmul %320, %322, %cst_154 {dimension_numbers = #tpu.dot_dimension_numbers<[1], [0], [0], [1], [0, 0, 1, 1], [], []>} : vector<88x128xf32>, vector<128x128xf32>, vector<88x128xf32> -> vector<88x128xf32>
    %324 = vector.extract_strided_slice %268 {offsets = [2, 0], sizes = [1, 128], strides = [1, 1]} : vector<4x128xf32> to vector<1x128xf32>
    %325 = vector.broadcast %324 : vector<1x128xf32> to vector<88x128xf32>
    %326 = arith.addf %323, %325 : vector<88x128xf32>
    %cst_155 = arith.constant 0.000000e+00 : f32
    %327 = vector.broadcast %cst_155 : f32 to vector<88x128xf32>
    %328 = arith.maximumf %326, %327 : vector<88x128xf32>
    %c2_156 = arith.constant 2 : index
    %c3_157 = arith.constant 3 : index
    %c0_158 = arith.constant 0 : index
    %c0_159 = arith.constant 0 : index
    %329 = vector.load %arg9[%c2_156, %c3_157, %c0_158, %c0_159] : memref<8x4x128x128xf32, #tpu.memory_space<vmem>>, vector<1x1x128x128xf32>
    %330 = vector.shape_cast %329 : vector<1x1x128x128xf32> to vector<128x128xf32>
    %cst_160 = arith.constant dense<0.000000e+00> : vector<88x128xf32>
    %331 = tpu.matmul %328, %330, %cst_160 {dimension_numbers = #tpu.dot_dimension_numbers<[1], [0], [0], [1], [0, 0, 1, 1], [], []>} : vector<88x128xf32>, vector<128x128xf32>, vector<88x128xf32> -> vector<88x128xf32>
    %332 = vector.extract_strided_slice %268 {offsets = [3, 0], sizes = [1, 128], strides = [1, 1]} : vector<4x128xf32> to vector<1x128xf32>
    %333 = vector.broadcast %332 : vector<1x128xf32> to vector<88x128xf32>
    %334 = arith.addf %331, %333 : vector<88x128xf32>
    %cst_161 = arith.constant 0.000000e+00 : f32
    %335 = vector.broadcast %cst_161 : f32 to vector<88x128xf32>
    %336 = arith.maximumf %334, %335 : vector<88x128xf32>
    %337 = vector.extract_strided_slice %270 {offsets = [3, 0], sizes = [1, 128], strides = [1, 1]} : vector<4x128xf32> to vector<1x128xf32>
    %338 = vector.broadcast %337 : vector<1x128xf32> to vector<88x128xf32>
    %339 = arith.mulf %336, %338 : vector<88x128xf32>
    %cst_162 = arith.constant dense<0.000000e+00> : vector<88xf32>
    %340 = vector.multi_reduction <add>, %339, %cst_162 [1] : vector<88x128xf32> to vector<88xf32>
    %341 = vector.shape_cast %340 : vector<88xf32> to vector<88x1xf32>
    %342 = vector.extract_strided_slice %272 {offsets = [0, 2], sizes = [1, 1], strides = [1, 1]} : vector<1x4xf32> to vector<1x1xf32>
    %343 = vector.broadcast %342 : vector<1x1xf32> to vector<88x1xf32>
    %344 = arith.addf %341, %343 : vector<88x1xf32>
    %cst_163 = arith.constant 0.000000e+00 : f32
    %345 = vector.broadcast %cst_163 : f32 to vector<88x1xf32>
    %346 = arith.cmpf ogt, %344, %345 : vector<88x1xf32>
    %cst_164 = arith.constant 0.000000e+00 : f32
    %347 = vector.broadcast %cst_164 : f32 to vector<88x1xf32>
    %348 = arith.minimumf %344, %347 : vector<88x1xf32>
    %349 = math.exp %348 : vector<88x1xf32>
    %cst_165 = arith.constant 1.000000e+00 : f32
    %350 = vector.broadcast %cst_165 : f32 to vector<88x1xf32>
    %351 = arith.subf %349, %350 : vector<88x1xf32>
    %352 = arith.select %346, %344, %351 : vector<88x1xi1>, vector<88x1xf32>
    %cst_166 = arith.constant 1.000000e+00 : f32
    %353 = vector.broadcast %cst_166 : f32 to vector<88x1xf32>
    %354 = arith.addf %352, %353 : vector<88x1xf32>
    %355 = vector.shape_cast %354 : vector<88x1xf32> to vector<11x8x1xf32>
    %356 = vector.broadcast %51 : vector<11x1x1xf32> to vector<11x8x1xf32>
    %357 = arith.mulf %355, %356 : vector<11x8x1xf32>
    %cst_167 = arith.constant dense<0.000000e+00> : vector<8x1xf32>
    %358 = vector.multi_reduction <add>, %357, %cst_167 [0] : vector<11x8x1xf32> to vector<8x1xf32>
    %cst_168 = arith.constant 5.000000e-01 : f32
    %359 = vector.broadcast %cst_168 : f32 to vector<8x1xf32>
    %360 = arith.mulf %261, %359 : vector<8x1xf32>
    %361 = arith.mulf %358, %360 : vector<8x1xf32>
    %362 = arith.mulf %305, %361 : vector<8x1xf32>
    %363 = arith.addf %260, %362 : vector<8x1xf32>
    %364 = arith.addf %363, %296 : vector<8x1xf32>
    %365 = vector.extract_strided_slice %0 {offsets = [0, 3], sizes = [8, 1], strides = [1, 1]} : vector<8x8xf32> to vector<8x1xf32>
    %366 = vector.extract_strided_slice %47 {offsets = [0, 768], sizes = [8, 256], strides = [1, 1]} : vector<8x2048xf32> to vector<8x256xf32>
    %367 = vector.extract_strided_slice %366 {offsets = [0, 0], sizes = [8, 128], strides = [1, 1]} : vector<8x256xf32> to vector<8x128xf32>
    %cst_169 = arith.constant 0.000000e+00 : f32
    %368 = vector.broadcast %cst_169 : f32 to vector<8x128xf32>
    %369 = arith.maximumf %367, %368 : vector<8x128xf32>
    %370 = vector.extract_strided_slice %366 {offsets = [0, 128], sizes = [8, 128], strides = [1, 1]} : vector<8x256xf32> to vector<8x128xf32>
    %c3_170 = arith.constant 3 : index
    %c0_171 = arith.constant 0 : index
    %c0_172 = arith.constant 0 : index
    %371 = vector.load %arg10[%c3_170, %c0_171, %c0_172] : memref<8x4x128xf32, #tpu.memory_space<vmem>>, vector<1x4x128xf32>
    %372 = vector.shape_cast %371 : vector<1x4x128xf32> to vector<4x128xf32>
    %c3_173 = arith.constant 3 : index
    %c0_174 = arith.constant 0 : index
    %c0_175 = arith.constant 0 : index
    %373 = vector.load %arg11[%c3_173, %c0_174, %c0_175] : memref<8x4x128xf32, #tpu.memory_space<vmem>>, vector<1x4x128xf32>
    %374 = vector.shape_cast %373 : vector<1x4x128xf32> to vector<4x128xf32>
    %c3_176 = arith.constant 3 : index
    %c0_177 = arith.constant 0 : index
    %c0_178 = arith.constant 0 : index
    %375 = vector.load %arg12[%c3_176, %c0_177, %c0_178] : memref<8x1x4xf32, #tpu.memory_space<vmem>>, vector<1x1x4xf32>
    %376 = vector.shape_cast %375 : vector<1x1x4xf32> to vector<1x4xf32>
    %c3_179 = arith.constant 3 : index
    %c0_180 = arith.constant 0 : index
    %c0_181 = arith.constant 0 : index
    %c0_182 = arith.constant 0 : index
    %377 = vector.load %arg9[%c3_179, %c0_180, %c0_181, %c0_182] : memref<8x4x128x128xf32, #tpu.memory_space<vmem>>, vector<1x1x128x128xf32>
    %378 = vector.shape_cast %377 : vector<1x1x128x128xf32> to vector<128x128xf32>
    %cst_183 = arith.constant dense<0.000000e+00> : vector<8x128xf32>
    %379 = tpu.matmul %369, %378, %cst_183 {dimension_numbers = #tpu.dot_dimension_numbers<[1], [0], [0], [1], [0, 0, 1, 1], [], []>} : vector<8x128xf32>, vector<128x128xf32>, vector<8x128xf32> -> vector<8x128xf32>
    %380 = vector.extract_strided_slice %372 {offsets = [0, 0], sizes = [1, 128], strides = [1, 1]} : vector<4x128xf32> to vector<1x128xf32>
    %381 = vector.broadcast %380 : vector<1x128xf32> to vector<8x128xf32>
    %382 = arith.addf %379, %381 : vector<8x128xf32>
    %cst_184 = arith.constant 0.000000e+00 : f32
    %383 = vector.broadcast %cst_184 : f32 to vector<8x128xf32>
    %384 = arith.maximumf %382, %383 : vector<8x128xf32>
    %c3_185 = arith.constant 3 : index
    %c1_186 = arith.constant 1 : index
    %c0_187 = arith.constant 0 : index
    %c0_188 = arith.constant 0 : index
    %385 = vector.load %arg9[%c3_185, %c1_186, %c0_187, %c0_188] : memref<8x4x128x128xf32, #tpu.memory_space<vmem>>, vector<1x1x128x128xf32>
    %386 = vector.shape_cast %385 : vector<1x1x128x128xf32> to vector<128x128xf32>
    %cst_189 = arith.constant dense<0.000000e+00> : vector<8x128xf32>
    %387 = tpu.matmul %384, %386, %cst_189 {dimension_numbers = #tpu.dot_dimension_numbers<[1], [0], [0], [1], [0, 0, 1, 1], [], []>} : vector<8x128xf32>, vector<128x128xf32>, vector<8x128xf32> -> vector<8x128xf32>
    %388 = vector.extract_strided_slice %372 {offsets = [1, 0], sizes = [1, 128], strides = [1, 1]} : vector<4x128xf32> to vector<1x128xf32>
    %389 = vector.broadcast %388 : vector<1x128xf32> to vector<8x128xf32>
    %390 = arith.addf %387, %389 : vector<8x128xf32>
    %cst_190 = arith.constant 0.000000e+00 : f32
    %391 = vector.broadcast %cst_190 : f32 to vector<8x128xf32>
    %392 = arith.maximumf %390, %391 : vector<8x128xf32>
    %393 = vector.extract_strided_slice %374 {offsets = [1, 0], sizes = [1, 128], strides = [1, 1]} : vector<4x128xf32> to vector<1x128xf32>
    %394 = vector.broadcast %393 : vector<1x128xf32> to vector<8x128xf32>
    %395 = arith.mulf %392, %394 : vector<8x128xf32>
    %cst_191 = arith.constant dense<0.000000e+00> : vector<8xf32>
    %396 = vector.multi_reduction <add>, %395, %cst_191 [1] : vector<8x128xf32> to vector<8xf32>
    %397 = vector.shape_cast %396 : vector<8xf32> to vector<8x1xf32>
    %398 = vector.extract_strided_slice %376 {offsets = [0, 0], sizes = [1, 1], strides = [1, 1]} : vector<1x4xf32> to vector<1x1xf32>
    %399 = vector.broadcast %398 : vector<1x1xf32> to vector<8x1xf32>
    %400 = arith.addf %397, %399 : vector<8x1xf32>
    %401 = vector.extract_strided_slice %374 {offsets = [2, 0], sizes = [1, 128], strides = [1, 1]} : vector<4x128xf32> to vector<1x128xf32>
    %402 = vector.broadcast %401 : vector<1x128xf32> to vector<8x128xf32>
    %403 = arith.mulf %392, %402 : vector<8x128xf32>
    %cst_192 = arith.constant dense<0.000000e+00> : vector<8xf32>
    %404 = vector.multi_reduction <add>, %403, %cst_192 [1] : vector<8x128xf32> to vector<8xf32>
    %405 = vector.shape_cast %404 : vector<8xf32> to vector<8x1xf32>
    %406 = vector.extract_strided_slice %376 {offsets = [0, 1], sizes = [1, 1], strides = [1, 1]} : vector<1x4xf32> to vector<1x1xf32>
    %407 = vector.broadcast %406 : vector<1x1xf32> to vector<8x1xf32>
    %408 = arith.addf %405, %407 : vector<8x1xf32>
    %409 = math.exp %408 : vector<8x1xf32>
    %410 = vector.shape_cast %365 : vector<8x1xf32> to vector<1x8x1xf32>
    %411 = vector.broadcast %49 : vector<11x1x1xf32> to vector<11x8x1xf32>
    %412 = vector.broadcast %410 : vector<1x8x1xf32> to vector<11x8x1xf32>
    %413 = arith.mulf %411, %412 : vector<11x8x1xf32>
    %414 = vector.shape_cast %370 : vector<8x128xf32> to vector<1x8x128xf32>
    %415 = vector.extract_strided_slice %374 {offsets = [0, 0], sizes = [1, 128], strides = [1, 1]} : vector<4x128xf32> to vector<1x128xf32>
    %416 = vector.shape_cast %415 : vector<1x128xf32> to vector<1x1x128xf32>
    %417 = vector.broadcast %413 : vector<11x8x1xf32> to vector<11x8x128xf32>
    %418 = vector.broadcast %416 : vector<1x1x128xf32> to vector<11x8x128xf32>
    %419 = arith.mulf %417, %418 : vector<11x8x128xf32>
    %420 = vector.broadcast %414 : vector<1x8x128xf32> to vector<11x8x128xf32>
    %421 = arith.addf %420, %419 : vector<11x8x128xf32>
    %cst_193 = arith.constant 0.000000e+00 : f32
    %422 = vector.broadcast %cst_193 : f32 to vector<11x8x128xf32>
    %423 = arith.maximumf %421, %422 : vector<11x8x128xf32>
    %424 = vector.shape_cast %423 : vector<11x8x128xf32> to vector<88x128xf32>
    %c3_194 = arith.constant 3 : index
    %c2_195 = arith.constant 2 : index
    %c0_196 = arith.constant 0 : index
    %c0_197 = arith.constant 0 : index
    %425 = vector.load %arg9[%c3_194, %c2_195, %c0_196, %c0_197] : memref<8x4x128x128xf32, #tpu.memory_space<vmem>>, vector<1x1x128x128xf32>
    %426 = vector.shape_cast %425 : vector<1x1x128x128xf32> to vector<128x128xf32>
    %cst_198 = arith.constant dense<0.000000e+00> : vector<88x128xf32>
    %427 = tpu.matmul %424, %426, %cst_198 {dimension_numbers = #tpu.dot_dimension_numbers<[1], [0], [0], [1], [0, 0, 1, 1], [], []>} : vector<88x128xf32>, vector<128x128xf32>, vector<88x128xf32> -> vector<88x128xf32>
    %428 = vector.extract_strided_slice %372 {offsets = [2, 0], sizes = [1, 128], strides = [1, 1]} : vector<4x128xf32> to vector<1x128xf32>
    %429 = vector.broadcast %428 : vector<1x128xf32> to vector<88x128xf32>
    %430 = arith.addf %427, %429 : vector<88x128xf32>
    %cst_199 = arith.constant 0.000000e+00 : f32
    %431 = vector.broadcast %cst_199 : f32 to vector<88x128xf32>
    %432 = arith.maximumf %430, %431 : vector<88x128xf32>
    %c3_200 = arith.constant 3 : index
    %c3_201 = arith.constant 3 : index
    %c0_202 = arith.constant 0 : index
    %c0_203 = arith.constant 0 : index
    %433 = vector.load %arg9[%c3_200, %c3_201, %c0_202, %c0_203] : memref<8x4x128x128xf32, #tpu.memory_space<vmem>>, vector<1x1x128x128xf32>
    %434 = vector.shape_cast %433 : vector<1x1x128x128xf32> to vector<128x128xf32>
    %cst_204 = arith.constant dense<0.000000e+00> : vector<88x128xf32>
    %435 = tpu.matmul %432, %434, %cst_204 {dimension_numbers = #tpu.dot_dimension_numbers<[1], [0], [0], [1], [0, 0, 1, 1], [], []>} : vector<88x128xf32>, vector<128x128xf32>, vector<88x128xf32> -> vector<88x128xf32>
    %436 = vector.extract_strided_slice %372 {offsets = [3, 0], sizes = [1, 128], strides = [1, 1]} : vector<4x128xf32> to vector<1x128xf32>
    %437 = vector.broadcast %436 : vector<1x128xf32> to vector<88x128xf32>
    %438 = arith.addf %435, %437 : vector<88x128xf32>
    %cst_205 = arith.constant 0.000000e+00 : f32
    %439 = vector.broadcast %cst_205 : f32 to vector<88x128xf32>
    %440 = arith.maximumf %438, %439 : vector<88x128xf32>
    %441 = vector.extract_strided_slice %374 {offsets = [3, 0], sizes = [1, 128], strides = [1, 1]} : vector<4x128xf32> to vector<1x128xf32>
    %442 = vector.broadcast %441 : vector<1x128xf32> to vector<88x128xf32>
    %443 = arith.mulf %440, %442 : vector<88x128xf32>
    %cst_206 = arith.constant dense<0.000000e+00> : vector<88xf32>
    %444 = vector.multi_reduction <add>, %443, %cst_206 [1] : vector<88x128xf32> to vector<88xf32>
    %445 = vector.shape_cast %444 : vector<88xf32> to vector<88x1xf32>
    %446 = vector.extract_strided_slice %376 {offsets = [0, 2], sizes = [1, 1], strides = [1, 1]} : vector<1x4xf32> to vector<1x1xf32>
    %447 = vector.broadcast %446 : vector<1x1xf32> to vector<88x1xf32>
    %448 = arith.addf %445, %447 : vector<88x1xf32>
    %cst_207 = arith.constant 0.000000e+00 : f32
    %449 = vector.broadcast %cst_207 : f32 to vector<88x1xf32>
    %450 = arith.cmpf ogt, %448, %449 : vector<88x1xf32>
    %cst_208 = arith.constant 0.000000e+00 : f32
    %451 = vector.broadcast %cst_208 : f32 to vector<88x1xf32>
    %452 = arith.minimumf %448, %451 : vector<88x1xf32>
    %453 = math.exp %452 : vector<88x1xf32>
    %cst_209 = arith.constant 1.000000e+00 : f32
    %454 = vector.broadcast %cst_209 : f32 to vector<88x1xf32>
    %455 = arith.subf %453, %454 : vector<88x1xf32>
    %456 = arith.select %450, %448, %455 : vector<88x1xi1>, vector<88x1xf32>
    %cst_210 = arith.constant 1.000000e+00 : f32
    %457 = vector.broadcast %cst_210 : f32 to vector<88x1xf32>
    %458 = arith.addf %456, %457 : vector<88x1xf32>
    %459 = vector.shape_cast %458 : vector<88x1xf32> to vector<11x8x1xf32>
    %460 = vector.broadcast %51 : vector<11x1x1xf32> to vector<11x8x1xf32>
    %461 = arith.mulf %459, %460 : vector<11x8x1xf32>
    %cst_211 = arith.constant dense<0.000000e+00> : vector<8x1xf32>
    %462 = vector.multi_reduction <add>, %461, %cst_211 [0] : vector<11x8x1xf32> to vector<8x1xf32>
    %cst_212 = arith.constant 5.000000e-01 : f32
    %463 = vector.broadcast %cst_212 : f32 to vector<8x1xf32>
    %464 = arith.mulf %365, %463 : vector<8x1xf32>
    %465 = arith.mulf %462, %464 : vector<8x1xf32>
    %466 = arith.mulf %409, %465 : vector<8x1xf32>
    %467 = arith.addf %364, %466 : vector<8x1xf32>
    %468 = arith.addf %467, %400 : vector<8x1xf32>
    %469 = vector.extract_strided_slice %0 {offsets = [0, 4], sizes = [8, 1], strides = [1, 1]} : vector<8x8xf32> to vector<8x1xf32>
    %470 = vector.extract_strided_slice %47 {offsets = [0, 1024], sizes = [8, 256], strides = [1, 1]} : vector<8x2048xf32> to vector<8x256xf32>
    %471 = vector.extract_strided_slice %470 {offsets = [0, 0], sizes = [8, 128], strides = [1, 1]} : vector<8x256xf32> to vector<8x128xf32>
    %cst_213 = arith.constant 0.000000e+00 : f32
    %472 = vector.broadcast %cst_213 : f32 to vector<8x128xf32>
    %473 = arith.maximumf %471, %472 : vector<8x128xf32>
    %474 = vector.extract_strided_slice %470 {offsets = [0, 128], sizes = [8, 128], strides = [1, 1]} : vector<8x256xf32> to vector<8x128xf32>
    %c4 = arith.constant 4 : index
    %c0_214 = arith.constant 0 : index
    %c0_215 = arith.constant 0 : index
    %475 = vector.load %arg10[%c4, %c0_214, %c0_215] : memref<8x4x128xf32, #tpu.memory_space<vmem>>, vector<1x4x128xf32>
    %476 = vector.shape_cast %475 : vector<1x4x128xf32> to vector<4x128xf32>
    %c4_216 = arith.constant 4 : index
    %c0_217 = arith.constant 0 : index
    %c0_218 = arith.constant 0 : index
    %477 = vector.load %arg11[%c4_216, %c0_217, %c0_218] : memref<8x4x128xf32, #tpu.memory_space<vmem>>, vector<1x4x128xf32>
    %478 = vector.shape_cast %477 : vector<1x4x128xf32> to vector<4x128xf32>
    %c4_219 = arith.constant 4 : index
    %c0_220 = arith.constant 0 : index
    %c0_221 = arith.constant 0 : index
    %479 = vector.load %arg12[%c4_219, %c0_220, %c0_221] : memref<8x1x4xf32, #tpu.memory_space<vmem>>, vector<1x1x4xf32>
    %480 = vector.shape_cast %479 : vector<1x1x4xf32> to vector<1x4xf32>
    %c4_222 = arith.constant 4 : index
    %c0_223 = arith.constant 0 : index
    %c0_224 = arith.constant 0 : index
    %c0_225 = arith.constant 0 : index
    %481 = vector.load %arg9[%c4_222, %c0_223, %c0_224, %c0_225] : memref<8x4x128x128xf32, #tpu.memory_space<vmem>>, vector<1x1x128x128xf32>
    %482 = vector.shape_cast %481 : vector<1x1x128x128xf32> to vector<128x128xf32>
    %cst_226 = arith.constant dense<0.000000e+00> : vector<8x128xf32>
    %483 = tpu.matmul %473, %482, %cst_226 {dimension_numbers = #tpu.dot_dimension_numbers<[1], [0], [0], [1], [0, 0, 1, 1], [], []>} : vector<8x128xf32>, vector<128x128xf32>, vector<8x128xf32> -> vector<8x128xf32>
    %484 = vector.extract_strided_slice %476 {offsets = [0, 0], sizes = [1, 128], strides = [1, 1]} : vector<4x128xf32> to vector<1x128xf32>
    %485 = vector.broadcast %484 : vector<1x128xf32> to vector<8x128xf32>
    %486 = arith.addf %483, %485 : vector<8x128xf32>
    %cst_227 = arith.constant 0.000000e+00 : f32
    %487 = vector.broadcast %cst_227 : f32 to vector<8x128xf32>
    %488 = arith.maximumf %486, %487 : vector<8x128xf32>
    %c4_228 = arith.constant 4 : index
    %c1_229 = arith.constant 1 : index
    %c0_230 = arith.constant 0 : index
    %c0_231 = arith.constant 0 : index
    %489 = vector.load %arg9[%c4_228, %c1_229, %c0_230, %c0_231] : memref<8x4x128x128xf32, #tpu.memory_space<vmem>>, vector<1x1x128x128xf32>
    %490 = vector.shape_cast %489 : vector<1x1x128x128xf32> to vector<128x128xf32>
    %cst_232 = arith.constant dense<0.000000e+00> : vector<8x128xf32>
    %491 = tpu.matmul %488, %490, %cst_232 {dimension_numbers = #tpu.dot_dimension_numbers<[1], [0], [0], [1], [0, 0, 1, 1], [], []>} : vector<8x128xf32>, vector<128x128xf32>, vector<8x128xf32> -> vector<8x128xf32>
    %492 = vector.extract_strided_slice %476 {offsets = [1, 0], sizes = [1, 128], strides = [1, 1]} : vector<4x128xf32> to vector<1x128xf32>
    %493 = vector.broadcast %492 : vector<1x128xf32> to vector<8x128xf32>
    %494 = arith.addf %491, %493 : vector<8x128xf32>
    %cst_233 = arith.constant 0.000000e+00 : f32
    %495 = vector.broadcast %cst_233 : f32 to vector<8x128xf32>
    %496 = arith.maximumf %494, %495 : vector<8x128xf32>
    %497 = vector.extract_strided_slice %478 {offsets = [1, 0], sizes = [1, 128], strides = [1, 1]} : vector<4x128xf32> to vector<1x128xf32>
    %498 = vector.broadcast %497 : vector<1x128xf32> to vector<8x128xf32>
    %499 = arith.mulf %496, %498 : vector<8x128xf32>
    %cst_234 = arith.constant dense<0.000000e+00> : vector<8xf32>
    %500 = vector.multi_reduction <add>, %499, %cst_234 [1] : vector<8x128xf32> to vector<8xf32>
    %501 = vector.shape_cast %500 : vector<8xf32> to vector<8x1xf32>
    %502 = vector.extract_strided_slice %480 {offsets = [0, 0], sizes = [1, 1], strides = [1, 1]} : vector<1x4xf32> to vector<1x1xf32>
    %503 = vector.broadcast %502 : vector<1x1xf32> to vector<8x1xf32>
    %504 = arith.addf %501, %503 : vector<8x1xf32>
    %505 = vector.extract_strided_slice %478 {offsets = [2, 0], sizes = [1, 128], strides = [1, 1]} : vector<4x128xf32> to vector<1x128xf32>
    %506 = vector.broadcast %505 : vector<1x128xf32> to vector<8x128xf32>
    %507 = arith.mulf %496, %506 : vector<8x128xf32>
    %cst_235 = arith.constant dense<0.000000e+00> : vector<8xf32>
    %508 = vector.multi_reduction <add>, %507, %cst_235 [1] : vector<8x128xf32> to vector<8xf32>
    %509 = vector.shape_cast %508 : vector<8xf32> to vector<8x1xf32>
    %510 = vector.extract_strided_slice %480 {offsets = [0, 1], sizes = [1, 1], strides = [1, 1]} : vector<1x4xf32> to vector<1x1xf32>
    %511 = vector.broadcast %510 : vector<1x1xf32> to vector<8x1xf32>
    %512 = arith.addf %509, %511 : vector<8x1xf32>
    %513 = math.exp %512 : vector<8x1xf32>
    %514 = vector.shape_cast %469 : vector<8x1xf32> to vector<1x8x1xf32>
    %515 = vector.broadcast %49 : vector<11x1x1xf32> to vector<11x8x1xf32>
    %516 = vector.broadcast %514 : vector<1x8x1xf32> to vector<11x8x1xf32>
    %517 = arith.mulf %515, %516 : vector<11x8x1xf32>
    %518 = vector.shape_cast %474 : vector<8x128xf32> to vector<1x8x128xf32>
    %519 = vector.extract_strided_slice %478 {offsets = [0, 0], sizes = [1, 128], strides = [1, 1]} : vector<4x128xf32> to vector<1x128xf32>
    %520 = vector.shape_cast %519 : vector<1x128xf32> to vector<1x1x128xf32>
    %521 = vector.broadcast %517 : vector<11x8x1xf32> to vector<11x8x128xf32>
    %522 = vector.broadcast %520 : vector<1x1x128xf32> to vector<11x8x128xf32>
    %523 = arith.mulf %521, %522 : vector<11x8x128xf32>
    %524 = vector.broadcast %518 : vector<1x8x128xf32> to vector<11x8x128xf32>
    %525 = arith.addf %524, %523 : vector<11x8x128xf32>
    %cst_236 = arith.constant 0.000000e+00 : f32
    %526 = vector.broadcast %cst_236 : f32 to vector<11x8x128xf32>
    %527 = arith.maximumf %525, %526 : vector<11x8x128xf32>
    %528 = vector.shape_cast %527 : vector<11x8x128xf32> to vector<88x128xf32>
    %c4_237 = arith.constant 4 : index
    %c2_238 = arith.constant 2 : index
    %c0_239 = arith.constant 0 : index
    %c0_240 = arith.constant 0 : index
    %529 = vector.load %arg9[%c4_237, %c2_238, %c0_239, %c0_240] : memref<8x4x128x128xf32, #tpu.memory_space<vmem>>, vector<1x1x128x128xf32>
    %530 = vector.shape_cast %529 : vector<1x1x128x128xf32> to vector<128x128xf32>
    %cst_241 = arith.constant dense<0.000000e+00> : vector<88x128xf32>
    %531 = tpu.matmul %528, %530, %cst_241 {dimension_numbers = #tpu.dot_dimension_numbers<[1], [0], [0], [1], [0, 0, 1, 1], [], []>} : vector<88x128xf32>, vector<128x128xf32>, vector<88x128xf32> -> vector<88x128xf32>
    %532 = vector.extract_strided_slice %476 {offsets = [2, 0], sizes = [1, 128], strides = [1, 1]} : vector<4x128xf32> to vector<1x128xf32>
    %533 = vector.broadcast %532 : vector<1x128xf32> to vector<88x128xf32>
    %534 = arith.addf %531, %533 : vector<88x128xf32>
    %cst_242 = arith.constant 0.000000e+00 : f32
    %535 = vector.broadcast %cst_242 : f32 to vector<88x128xf32>
    %536 = arith.maximumf %534, %535 : vector<88x128xf32>
    %c4_243 = arith.constant 4 : index
    %c3_244 = arith.constant 3 : index
    %c0_245 = arith.constant 0 : index
    %c0_246 = arith.constant 0 : index
    %537 = vector.load %arg9[%c4_243, %c3_244, %c0_245, %c0_246] : memref<8x4x128x128xf32, #tpu.memory_space<vmem>>, vector<1x1x128x128xf32>
    %538 = vector.shape_cast %537 : vector<1x1x128x128xf32> to vector<128x128xf32>
    %cst_247 = arith.constant dense<0.000000e+00> : vector<88x128xf32>
    %539 = tpu.matmul %536, %538, %cst_247 {dimension_numbers = #tpu.dot_dimension_numbers<[1], [0], [0], [1], [0, 0, 1, 1], [], []>} : vector<88x128xf32>, vector<128x128xf32>, vector<88x128xf32> -> vector<88x128xf32>
    %540 = vector.extract_strided_slice %476 {offsets = [3, 0], sizes = [1, 128], strides = [1, 1]} : vector<4x128xf32> to vector<1x128xf32>
    %541 = vector.broadcast %540 : vector<1x128xf32> to vector<88x128xf32>
    %542 = arith.addf %539, %541 : vector<88x128xf32>
    %cst_248 = arith.constant 0.000000e+00 : f32
    %543 = vector.broadcast %cst_248 : f32 to vector<88x128xf32>
    %544 = arith.maximumf %542, %543 : vector<88x128xf32>
    %545 = vector.extract_strided_slice %478 {offsets = [3, 0], sizes = [1, 128], strides = [1, 1]} : vector<4x128xf32> to vector<1x128xf32>
    %546 = vector.broadcast %545 : vector<1x128xf32> to vector<88x128xf32>
    %547 = arith.mulf %544, %546 : vector<88x128xf32>
    %cst_249 = arith.constant dense<0.000000e+00> : vector<88xf32>
    %548 = vector.multi_reduction <add>, %547, %cst_249 [1] : vector<88x128xf32> to vector<88xf32>
    %549 = vector.shape_cast %548 : vector<88xf32> to vector<88x1xf32>
    %550 = vector.extract_strided_slice %480 {offsets = [0, 2], sizes = [1, 1], strides = [1, 1]} : vector<1x4xf32> to vector<1x1xf32>
    %551 = vector.broadcast %550 : vector<1x1xf32> to vector<88x1xf32>
    %552 = arith.addf %549, %551 : vector<88x1xf32>
    %cst_250 = arith.constant 0.000000e+00 : f32
    %553 = vector.broadcast %cst_250 : f32 to vector<88x1xf32>
    %554 = arith.cmpf ogt, %552, %553 : vector<88x1xf32>
    %cst_251 = arith.constant 0.000000e+00 : f32
    %555 = vector.broadcast %cst_251 : f32 to vector<88x1xf32>
    %556 = arith.minimumf %552, %555 : vector<88x1xf32>
    %557 = math.exp %556 : vector<88x1xf32>
    %cst_252 = arith.constant 1.000000e+00 : f32
    %558 = vector.broadcast %cst_252 : f32 to vector<88x1xf32>
    %559 = arith.subf %557, %558 : vector<88x1xf32>
    %560 = arith.select %554, %552, %559 : vector<88x1xi1>, vector<88x1xf32>
    %cst_253 = arith.constant 1.000000e+00 : f32
    %561 = vector.broadcast %cst_253 : f32 to vector<88x1xf32>
    %562 = arith.addf %560, %561 : vector<88x1xf32>
    %563 = vector.shape_cast %562 : vector<88x1xf32> to vector<11x8x1xf32>
    %564 = vector.broadcast %51 : vector<11x1x1xf32> to vector<11x8x1xf32>
    %565 = arith.mulf %563, %564 : vector<11x8x1xf32>
    %cst_254 = arith.constant dense<0.000000e+00> : vector<8x1xf32>
    %566 = vector.multi_reduction <add>, %565, %cst_254 [0] : vector<11x8x1xf32> to vector<8x1xf32>
    %cst_255 = arith.constant 5.000000e-01 : f32
    %567 = vector.broadcast %cst_255 : f32 to vector<8x1xf32>
    %568 = arith.mulf %469, %567 : vector<8x1xf32>
    %569 = arith.mulf %566, %568 : vector<8x1xf32>
    %570 = arith.mulf %513, %569 : vector<8x1xf32>
    %571 = arith.addf %468, %570 : vector<8x1xf32>
    %572 = arith.addf %571, %504 : vector<8x1xf32>
    %573 = vector.extract_strided_slice %0 {offsets = [0, 5], sizes = [8, 1], strides = [1, 1]} : vector<8x8xf32> to vector<8x1xf32>
    %574 = vector.extract_strided_slice %47 {offsets = [0, 1280], sizes = [8, 256], strides = [1, 1]} : vector<8x2048xf32> to vector<8x256xf32>
    %575 = vector.extract_strided_slice %574 {offsets = [0, 0], sizes = [8, 128], strides = [1, 1]} : vector<8x256xf32> to vector<8x128xf32>
    %cst_256 = arith.constant 0.000000e+00 : f32
    %576 = vector.broadcast %cst_256 : f32 to vector<8x128xf32>
    %577 = arith.maximumf %575, %576 : vector<8x128xf32>
    %578 = vector.extract_strided_slice %574 {offsets = [0, 128], sizes = [8, 128], strides = [1, 1]} : vector<8x256xf32> to vector<8x128xf32>
    %c5 = arith.constant 5 : index
    %c0_257 = arith.constant 0 : index
    %c0_258 = arith.constant 0 : index
    %579 = vector.load %arg10[%c5, %c0_257, %c0_258] : memref<8x4x128xf32, #tpu.memory_space<vmem>>, vector<1x4x128xf32>
    %580 = vector.shape_cast %579 : vector<1x4x128xf32> to vector<4x128xf32>
    %c5_259 = arith.constant 5 : index
    %c0_260 = arith.constant 0 : index
    %c0_261 = arith.constant 0 : index
    %581 = vector.load %arg11[%c5_259, %c0_260, %c0_261] : memref<8x4x128xf32, #tpu.memory_space<vmem>>, vector<1x4x128xf32>
    %582 = vector.shape_cast %581 : vector<1x4x128xf32> to vector<4x128xf32>
    %c5_262 = arith.constant 5 : index
    %c0_263 = arith.constant 0 : index
    %c0_264 = arith.constant 0 : index
    %583 = vector.load %arg12[%c5_262, %c0_263, %c0_264] : memref<8x1x4xf32, #tpu.memory_space<vmem>>, vector<1x1x4xf32>
    %584 = vector.shape_cast %583 : vector<1x1x4xf32> to vector<1x4xf32>
    %c5_265 = arith.constant 5 : index
    %c0_266 = arith.constant 0 : index
    %c0_267 = arith.constant 0 : index
    %c0_268 = arith.constant 0 : index
    %585 = vector.load %arg9[%c5_265, %c0_266, %c0_267, %c0_268] : memref<8x4x128x128xf32, #tpu.memory_space<vmem>>, vector<1x1x128x128xf32>
    %586 = vector.shape_cast %585 : vector<1x1x128x128xf32> to vector<128x128xf32>
    %cst_269 = arith.constant dense<0.000000e+00> : vector<8x128xf32>
    %587 = tpu.matmul %577, %586, %cst_269 {dimension_numbers = #tpu.dot_dimension_numbers<[1], [0], [0], [1], [0, 0, 1, 1], [], []>} : vector<8x128xf32>, vector<128x128xf32>, vector<8x128xf32> -> vector<8x128xf32>
    %588 = vector.extract_strided_slice %580 {offsets = [0, 0], sizes = [1, 128], strides = [1, 1]} : vector<4x128xf32> to vector<1x128xf32>
    %589 = vector.broadcast %588 : vector<1x128xf32> to vector<8x128xf32>
    %590 = arith.addf %587, %589 : vector<8x128xf32>
    %cst_270 = arith.constant 0.000000e+00 : f32
    %591 = vector.broadcast %cst_270 : f32 to vector<8x128xf32>
    %592 = arith.maximumf %590, %591 : vector<8x128xf32>
    %c5_271 = arith.constant 5 : index
    %c1_272 = arith.constant 1 : index
    %c0_273 = arith.constant 0 : index
    %c0_274 = arith.constant 0 : index
    %593 = vector.load %arg9[%c5_271, %c1_272, %c0_273, %c0_274] : memref<8x4x128x128xf32, #tpu.memory_space<vmem>>, vector<1x1x128x128xf32>
    %594 = vector.shape_cast %593 : vector<1x1x128x128xf32> to vector<128x128xf32>
    %cst_275 = arith.constant dense<0.000000e+00> : vector<8x128xf32>
    %595 = tpu.matmul %592, %594, %cst_275 {dimension_numbers = #tpu.dot_dimension_numbers<[1], [0], [0], [1], [0, 0, 1, 1], [], []>} : vector<8x128xf32>, vector<128x128xf32>, vector<8x128xf32> -> vector<8x128xf32>
    %596 = vector.extract_strided_slice %580 {offsets = [1, 0], sizes = [1, 128], strides = [1, 1]} : vector<4x128xf32> to vector<1x128xf32>
    %597 = vector.broadcast %596 : vector<1x128xf32> to vector<8x128xf32>
    %598 = arith.addf %595, %597 : vector<8x128xf32>
    %cst_276 = arith.constant 0.000000e+00 : f32
    %599 = vector.broadcast %cst_276 : f32 to vector<8x128xf32>
    %600 = arith.maximumf %598, %599 : vector<8x128xf32>
    %601 = vector.extract_strided_slice %582 {offsets = [1, 0], sizes = [1, 128], strides = [1, 1]} : vector<4x128xf32> to vector<1x128xf32>
    %602 = vector.broadcast %601 : vector<1x128xf32> to vector<8x128xf32>
    %603 = arith.mulf %600, %602 : vector<8x128xf32>
    %cst_277 = arith.constant dense<0.000000e+00> : vector<8xf32>
    %604 = vector.multi_reduction <add>, %603, %cst_277 [1] : vector<8x128xf32> to vector<8xf32>
    %605 = vector.shape_cast %604 : vector<8xf32> to vector<8x1xf32>
    %606 = vector.extract_strided_slice %584 {offsets = [0, 0], sizes = [1, 1], strides = [1, 1]} : vector<1x4xf32> to vector<1x1xf32>
    %607 = vector.broadcast %606 : vector<1x1xf32> to vector<8x1xf32>
    %608 = arith.addf %605, %607 : vector<8x1xf32>
    %609 = vector.extract_strided_slice %582 {offsets = [2, 0], sizes = [1, 128], strides = [1, 1]} : vector<4x128xf32> to vector<1x128xf32>
    %610 = vector.broadcast %609 : vector<1x128xf32> to vector<8x128xf32>
    %611 = arith.mulf %600, %610 : vector<8x128xf32>
    %cst_278 = arith.constant dense<0.000000e+00> : vector<8xf32>
    %612 = vector.multi_reduction <add>, %611, %cst_278 [1] : vector<8x128xf32> to vector<8xf32>
    %613 = vector.shape_cast %612 : vector<8xf32> to vector<8x1xf32>
    %614 = vector.extract_strided_slice %584 {offsets = [0, 1], sizes = [1, 1], strides = [1, 1]} : vector<1x4xf32> to vector<1x1xf32>
    %615 = vector.broadcast %614 : vector<1x1xf32> to vector<8x1xf32>
    %616 = arith.addf %613, %615 : vector<8x1xf32>
    %617 = math.exp %616 : vector<8x1xf32>
    %618 = vector.shape_cast %573 : vector<8x1xf32> to vector<1x8x1xf32>
    %619 = vector.broadcast %49 : vector<11x1x1xf32> to vector<11x8x1xf32>
    %620 = vector.broadcast %618 : vector<1x8x1xf32> to vector<11x8x1xf32>
    %621 = arith.mulf %619, %620 : vector<11x8x1xf32>
    %622 = vector.shape_cast %578 : vector<8x128xf32> to vector<1x8x128xf32>
    %623 = vector.extract_strided_slice %582 {offsets = [0, 0], sizes = [1, 128], strides = [1, 1]} : vector<4x128xf32> to vector<1x128xf32>
    %624 = vector.shape_cast %623 : vector<1x128xf32> to vector<1x1x128xf32>
    %625 = vector.broadcast %621 : vector<11x8x1xf32> to vector<11x8x128xf32>
    %626 = vector.broadcast %624 : vector<1x1x128xf32> to vector<11x8x128xf32>
    %627 = arith.mulf %625, %626 : vector<11x8x128xf32>
    %628 = vector.broadcast %622 : vector<1x8x128xf32> to vector<11x8x128xf32>
    %629 = arith.addf %628, %627 : vector<11x8x128xf32>
    %cst_279 = arith.constant 0.000000e+00 : f32
    %630 = vector.broadcast %cst_279 : f32 to vector<11x8x128xf32>
    %631 = arith.maximumf %629, %630 : vector<11x8x128xf32>
    %632 = vector.shape_cast %631 : vector<11x8x128xf32> to vector<88x128xf32>
    %c5_280 = arith.constant 5 : index
    %c2_281 = arith.constant 2 : index
    %c0_282 = arith.constant 0 : index
    %c0_283 = arith.constant 0 : index
    %633 = vector.load %arg9[%c5_280, %c2_281, %c0_282, %c0_283] : memref<8x4x128x128xf32, #tpu.memory_space<vmem>>, vector<1x1x128x128xf32>
    %634 = vector.shape_cast %633 : vector<1x1x128x128xf32> to vector<128x128xf32>
    %cst_284 = arith.constant dense<0.000000e+00> : vector<88x128xf32>
    %635 = tpu.matmul %632, %634, %cst_284 {dimension_numbers = #tpu.dot_dimension_numbers<[1], [0], [0], [1], [0, 0, 1, 1], [], []>} : vector<88x128xf32>, vector<128x128xf32>, vector<88x128xf32> -> vector<88x128xf32>
    %636 = vector.extract_strided_slice %580 {offsets = [2, 0], sizes = [1, 128], strides = [1, 1]} : vector<4x128xf32> to vector<1x128xf32>
    %637 = vector.broadcast %636 : vector<1x128xf32> to vector<88x128xf32>
    %638 = arith.addf %635, %637 : vector<88x128xf32>
    %cst_285 = arith.constant 0.000000e+00 : f32
    %639 = vector.broadcast %cst_285 : f32 to vector<88x128xf32>
    %640 = arith.maximumf %638, %639 : vector<88x128xf32>
    %c5_286 = arith.constant 5 : index
    %c3_287 = arith.constant 3 : index
    %c0_288 = arith.constant 0 : index
    %c0_289 = arith.constant 0 : index
    %641 = vector.load %arg9[%c5_286, %c3_287, %c0_288, %c0_289] : memref<8x4x128x128xf32, #tpu.memory_space<vmem>>, vector<1x1x128x128xf32>
    %642 = vector.shape_cast %641 : vector<1x1x128x128xf32> to vector<128x128xf32>
    %cst_290 = arith.constant dense<0.000000e+00> : vector<88x128xf32>
    %643 = tpu.matmul %640, %642, %cst_290 {dimension_numbers = #tpu.dot_dimension_numbers<[1], [0], [0], [1], [0, 0, 1, 1], [], []>} : vector<88x128xf32>, vector<128x128xf32>, vector<88x128xf32> -> vector<88x128xf32>
    %644 = vector.extract_strided_slice %580 {offsets = [3, 0], sizes = [1, 128], strides = [1, 1]} : vector<4x128xf32> to vector<1x128xf32>
    %645 = vector.broadcast %644 : vector<1x128xf32> to vector<88x128xf32>
    %646 = arith.addf %643, %645 : vector<88x128xf32>
    %cst_291 = arith.constant 0.000000e+00 : f32
    %647 = vector.broadcast %cst_291 : f32 to vector<88x128xf32>
    %648 = arith.maximumf %646, %647 : vector<88x128xf32>
    %649 = vector.extract_strided_slice %582 {offsets = [3, 0], sizes = [1, 128], strides = [1, 1]} : vector<4x128xf32> to vector<1x128xf32>
    %650 = vector.broadcast %649 : vector<1x128xf32> to vector<88x128xf32>
    %651 = arith.mulf %648, %650 : vector<88x128xf32>
    %cst_292 = arith.constant dense<0.000000e+00> : vector<88xf32>
    %652 = vector.multi_reduction <add>, %651, %cst_292 [1] : vector<88x128xf32> to vector<88xf32>
    %653 = vector.shape_cast %652 : vector<88xf32> to vector<88x1xf32>
    %654 = vector.extract_strided_slice %584 {offsets = [0, 2], sizes = [1, 1], strides = [1, 1]} : vector<1x4xf32> to vector<1x1xf32>
    %655 = vector.broadcast %654 : vector<1x1xf32> to vector<88x1xf32>
    %656 = arith.addf %653, %655 : vector<88x1xf32>
    %cst_293 = arith.constant 0.000000e+00 : f32
    %657 = vector.broadcast %cst_293 : f32 to vector<88x1xf32>
    %658 = arith.cmpf ogt, %656, %657 : vector<88x1xf32>
    %cst_294 = arith.constant 0.000000e+00 : f32
    %659 = vector.broadcast %cst_294 : f32 to vector<88x1xf32>
    %660 = arith.minimumf %656, %659 : vector<88x1xf32>
    %661 = math.exp %660 : vector<88x1xf32>
    %cst_295 = arith.constant 1.000000e+00 : f32
    %662 = vector.broadcast %cst_295 : f32 to vector<88x1xf32>
    %663 = arith.subf %661, %662 : vector<88x1xf32>
    %664 = arith.select %658, %656, %663 : vector<88x1xi1>, vector<88x1xf32>
    %cst_296 = arith.constant 1.000000e+00 : f32
    %665 = vector.broadcast %cst_296 : f32 to vector<88x1xf32>
    %666 = arith.addf %664, %665 : vector<88x1xf32>
    %667 = vector.shape_cast %666 : vector<88x1xf32> to vector<11x8x1xf32>
    %668 = vector.broadcast %51 : vector<11x1x1xf32> to vector<11x8x1xf32>
    %669 = arith.mulf %667, %668 : vector<11x8x1xf32>
    %cst_297 = arith.constant dense<0.000000e+00> : vector<8x1xf32>
    %670 = vector.multi_reduction <add>, %669, %cst_297 [0] : vector<11x8x1xf32> to vector<8x1xf32>
    %cst_298 = arith.constant 5.000000e-01 : f32
    %671 = vector.broadcast %cst_298 : f32 to vector<8x1xf32>
    %672 = arith.mulf %573, %671 : vector<8x1xf32>
    %673 = arith.mulf %670, %672 : vector<8x1xf32>
    %674 = arith.mulf %617, %673 : vector<8x1xf32>
    %675 = arith.addf %572, %674 : vector<8x1xf32>
    %676 = arith.addf %675, %608 : vector<8x1xf32>
    %677 = vector.extract_strided_slice %0 {offsets = [0, 6], sizes = [8, 1], strides = [1, 1]} : vector<8x8xf32> to vector<8x1xf32>
    %678 = vector.extract_strided_slice %47 {offsets = [0, 1536], sizes = [8, 256], strides = [1, 1]} : vector<8x2048xf32> to vector<8x256xf32>
    %679 = vector.extract_strided_slice %678 {offsets = [0, 0], sizes = [8, 128], strides = [1, 1]} : vector<8x256xf32> to vector<8x128xf32>
    %cst_299 = arith.constant 0.000000e+00 : f32
    %680 = vector.broadcast %cst_299 : f32 to vector<8x128xf32>
    %681 = arith.maximumf %679, %680 : vector<8x128xf32>
    %682 = vector.extract_strided_slice %678 {offsets = [0, 128], sizes = [8, 128], strides = [1, 1]} : vector<8x256xf32> to vector<8x128xf32>
    %c6 = arith.constant 6 : index
    %c0_300 = arith.constant 0 : index
    %c0_301 = arith.constant 0 : index
    %683 = vector.load %arg10[%c6, %c0_300, %c0_301] : memref<8x4x128xf32, #tpu.memory_space<vmem>>, vector<1x4x128xf32>
    %684 = vector.shape_cast %683 : vector<1x4x128xf32> to vector<4x128xf32>
    %c6_302 = arith.constant 6 : index
    %c0_303 = arith.constant 0 : index
    %c0_304 = arith.constant 0 : index
    %685 = vector.load %arg11[%c6_302, %c0_303, %c0_304] : memref<8x4x128xf32, #tpu.memory_space<vmem>>, vector<1x4x128xf32>
    %686 = vector.shape_cast %685 : vector<1x4x128xf32> to vector<4x128xf32>
    %c6_305 = arith.constant 6 : index
    %c0_306 = arith.constant 0 : index
    %c0_307 = arith.constant 0 : index
    %687 = vector.load %arg12[%c6_305, %c0_306, %c0_307] : memref<8x1x4xf32, #tpu.memory_space<vmem>>, vector<1x1x4xf32>
    %688 = vector.shape_cast %687 : vector<1x1x4xf32> to vector<1x4xf32>
    %c6_308 = arith.constant 6 : index
    %c0_309 = arith.constant 0 : index
    %c0_310 = arith.constant 0 : index
    %c0_311 = arith.constant 0 : index
    %689 = vector.load %arg9[%c6_308, %c0_309, %c0_310, %c0_311] : memref<8x4x128x128xf32, #tpu.memory_space<vmem>>, vector<1x1x128x128xf32>
    %690 = vector.shape_cast %689 : vector<1x1x128x128xf32> to vector<128x128xf32>
    %cst_312 = arith.constant dense<0.000000e+00> : vector<8x128xf32>
    %691 = tpu.matmul %681, %690, %cst_312 {dimension_numbers = #tpu.dot_dimension_numbers<[1], [0], [0], [1], [0, 0, 1, 1], [], []>} : vector<8x128xf32>, vector<128x128xf32>, vector<8x128xf32> -> vector<8x128xf32>
    %692 = vector.extract_strided_slice %684 {offsets = [0, 0], sizes = [1, 128], strides = [1, 1]} : vector<4x128xf32> to vector<1x128xf32>
    %693 = vector.broadcast %692 : vector<1x128xf32> to vector<8x128xf32>
    %694 = arith.addf %691, %693 : vector<8x128xf32>
    %cst_313 = arith.constant 0.000000e+00 : f32
    %695 = vector.broadcast %cst_313 : f32 to vector<8x128xf32>
    %696 = arith.maximumf %694, %695 : vector<8x128xf32>
    %c6_314 = arith.constant 6 : index
    %c1_315 = arith.constant 1 : index
    %c0_316 = arith.constant 0 : index
    %c0_317 = arith.constant 0 : index
    %697 = vector.load %arg9[%c6_314, %c1_315, %c0_316, %c0_317] : memref<8x4x128x128xf32, #tpu.memory_space<vmem>>, vector<1x1x128x128xf32>
    %698 = vector.shape_cast %697 : vector<1x1x128x128xf32> to vector<128x128xf32>
    %cst_318 = arith.constant dense<0.000000e+00> : vector<8x128xf32>
    %699 = tpu.matmul %696, %698, %cst_318 {dimension_numbers = #tpu.dot_dimension_numbers<[1], [0], [0], [1], [0, 0, 1, 1], [], []>} : vector<8x128xf32>, vector<128x128xf32>, vector<8x128xf32> -> vector<8x128xf32>
    %700 = vector.extract_strided_slice %684 {offsets = [1, 0], sizes = [1, 128], strides = [1, 1]} : vector<4x128xf32> to vector<1x128xf32>
    %701 = vector.broadcast %700 : vector<1x128xf32> to vector<8x128xf32>
    %702 = arith.addf %699, %701 : vector<8x128xf32>
    %cst_319 = arith.constant 0.000000e+00 : f32
    %703 = vector.broadcast %cst_319 : f32 to vector<8x128xf32>
    %704 = arith.maximumf %702, %703 : vector<8x128xf32>
    %705 = vector.extract_strided_slice %686 {offsets = [1, 0], sizes = [1, 128], strides = [1, 1]} : vector<4x128xf32> to vector<1x128xf32>
    %706 = vector.broadcast %705 : vector<1x128xf32> to vector<8x128xf32>
    %707 = arith.mulf %704, %706 : vector<8x128xf32>
    %cst_320 = arith.constant dense<0.000000e+00> : vector<8xf32>
    %708 = vector.multi_reduction <add>, %707, %cst_320 [1] : vector<8x128xf32> to vector<8xf32>
    %709 = vector.shape_cast %708 : vector<8xf32> to vector<8x1xf32>
    %710 = vector.extract_strided_slice %688 {offsets = [0, 0], sizes = [1, 1], strides = [1, 1]} : vector<1x4xf32> to vector<1x1xf32>
    %711 = vector.broadcast %710 : vector<1x1xf32> to vector<8x1xf32>
    %712 = arith.addf %709, %711 : vector<8x1xf32>
    %713 = vector.extract_strided_slice %686 {offsets = [2, 0], sizes = [1, 128], strides = [1, 1]} : vector<4x128xf32> to vector<1x128xf32>
    %714 = vector.broadcast %713 : vector<1x128xf32> to vector<8x128xf32>
    %715 = arith.mulf %704, %714 : vector<8x128xf32>
    %cst_321 = arith.constant dense<0.000000e+00> : vector<8xf32>
    %716 = vector.multi_reduction <add>, %715, %cst_321 [1] : vector<8x128xf32> to vector<8xf32>
    %717 = vector.shape_cast %716 : vector<8xf32> to vector<8x1xf32>
    %718 = vector.extract_strided_slice %688 {offsets = [0, 1], sizes = [1, 1], strides = [1, 1]} : vector<1x4xf32> to vector<1x1xf32>
    %719 = vector.broadcast %718 : vector<1x1xf32> to vector<8x1xf32>
    %720 = arith.addf %717, %719 : vector<8x1xf32>
    %721 = math.exp %720 : vector<8x1xf32>
    %722 = vector.shape_cast %677 : vector<8x1xf32> to vector<1x8x1xf32>
    %723 = vector.broadcast %49 : vector<11x1x1xf32> to vector<11x8x1xf32>
    %724 = vector.broadcast %722 : vector<1x8x1xf32> to vector<11x8x1xf32>
    %725 = arith.mulf %723, %724 : vector<11x8x1xf32>
    %726 = vector.shape_cast %682 : vector<8x128xf32> to vector<1x8x128xf32>
    %727 = vector.extract_strided_slice %686 {offsets = [0, 0], sizes = [1, 128], strides = [1, 1]} : vector<4x128xf32> to vector<1x128xf32>
    %728 = vector.shape_cast %727 : vector<1x128xf32> to vector<1x1x128xf32>
    %729 = vector.broadcast %725 : vector<11x8x1xf32> to vector<11x8x128xf32>
    %730 = vector.broadcast %728 : vector<1x1x128xf32> to vector<11x8x128xf32>
    %731 = arith.mulf %729, %730 : vector<11x8x128xf32>
    %732 = vector.broadcast %726 : vector<1x8x128xf32> to vector<11x8x128xf32>
    %733 = arith.addf %732, %731 : vector<11x8x128xf32>
    %cst_322 = arith.constant 0.000000e+00 : f32
    %734 = vector.broadcast %cst_322 : f32 to vector<11x8x128xf32>
    %735 = arith.maximumf %733, %734 : vector<11x8x128xf32>
    %736 = vector.shape_cast %735 : vector<11x8x128xf32> to vector<88x128xf32>
    %c6_323 = arith.constant 6 : index
    %c2_324 = arith.constant 2 : index
    %c0_325 = arith.constant 0 : index
    %c0_326 = arith.constant 0 : index
    %737 = vector.load %arg9[%c6_323, %c2_324, %c0_325, %c0_326] : memref<8x4x128x128xf32, #tpu.memory_space<vmem>>, vector<1x1x128x128xf32>
    %738 = vector.shape_cast %737 : vector<1x1x128x128xf32> to vector<128x128xf32>
    %cst_327 = arith.constant dense<0.000000e+00> : vector<88x128xf32>
    %739 = tpu.matmul %736, %738, %cst_327 {dimension_numbers = #tpu.dot_dimension_numbers<[1], [0], [0], [1], [0, 0, 1, 1], [], []>} : vector<88x128xf32>, vector<128x128xf32>, vector<88x128xf32> -> vector<88x128xf32>
    %740 = vector.extract_strided_slice %684 {offsets = [2, 0], sizes = [1, 128], strides = [1, 1]} : vector<4x128xf32> to vector<1x128xf32>
    %741 = vector.broadcast %740 : vector<1x128xf32> to vector<88x128xf32>
    %742 = arith.addf %739, %741 : vector<88x128xf32>
    %cst_328 = arith.constant 0.000000e+00 : f32
    %743 = vector.broadcast %cst_328 : f32 to vector<88x128xf32>
    %744 = arith.maximumf %742, %743 : vector<88x128xf32>
    %c6_329 = arith.constant 6 : index
    %c3_330 = arith.constant 3 : index
    %c0_331 = arith.constant 0 : index
    %c0_332 = arith.constant 0 : index
    %745 = vector.load %arg9[%c6_329, %c3_330, %c0_331, %c0_332] : memref<8x4x128x128xf32, #tpu.memory_space<vmem>>, vector<1x1x128x128xf32>
    %746 = vector.shape_cast %745 : vector<1x1x128x128xf32> to vector<128x128xf32>
    %cst_333 = arith.constant dense<0.000000e+00> : vector<88x128xf32>
    %747 = tpu.matmul %744, %746, %cst_333 {dimension_numbers = #tpu.dot_dimension_numbers<[1], [0], [0], [1], [0, 0, 1, 1], [], []>} : vector<88x128xf32>, vector<128x128xf32>, vector<88x128xf32> -> vector<88x128xf32>
    %748 = vector.extract_strided_slice %684 {offsets = [3, 0], sizes = [1, 128], strides = [1, 1]} : vector<4x128xf32> to vector<1x128xf32>
    %749 = vector.broadcast %748 : vector<1x128xf32> to vector<88x128xf32>
    %750 = arith.addf %747, %749 : vector<88x128xf32>
    %cst_334 = arith.constant 0.000000e+00 : f32
    %751 = vector.broadcast %cst_334 : f32 to vector<88x128xf32>
    %752 = arith.maximumf %750, %751 : vector<88x128xf32>
    %753 = vector.extract_strided_slice %686 {offsets = [3, 0], sizes = [1, 128], strides = [1, 1]} : vector<4x128xf32> to vector<1x128xf32>
    %754 = vector.broadcast %753 : vector<1x128xf32> to vector<88x128xf32>
    %755 = arith.mulf %752, %754 : vector<88x128xf32>
    %cst_335 = arith.constant dense<0.000000e+00> : vector<88xf32>
    %756 = vector.multi_reduction <add>, %755, %cst_335 [1] : vector<88x128xf32> to vector<88xf32>
    %757 = vector.shape_cast %756 : vector<88xf32> to vector<88x1xf32>
    %758 = vector.extract_strided_slice %688 {offsets = [0, 2], sizes = [1, 1], strides = [1, 1]} : vector<1x4xf32> to vector<1x1xf32>
    %759 = vector.broadcast %758 : vector<1x1xf32> to vector<88x1xf32>
    %760 = arith.addf %757, %759 : vector<88x1xf32>
    %cst_336 = arith.constant 0.000000e+00 : f32
    %761 = vector.broadcast %cst_336 : f32 to vector<88x1xf32>
    %762 = arith.cmpf ogt, %760, %761 : vector<88x1xf32>
    %cst_337 = arith.constant 0.000000e+00 : f32
    %763 = vector.broadcast %cst_337 : f32 to vector<88x1xf32>
    %764 = arith.minimumf %760, %763 : vector<88x1xf32>
    %765 = math.exp %764 : vector<88x1xf32>
    %cst_338 = arith.constant 1.000000e+00 : f32
    %766 = vector.broadcast %cst_338 : f32 to vector<88x1xf32>
    %767 = arith.subf %765, %766 : vector<88x1xf32>
    %768 = arith.select %762, %760, %767 : vector<88x1xi1>, vector<88x1xf32>
    %cst_339 = arith.constant 1.000000e+00 : f32
    %769 = vector.broadcast %cst_339 : f32 to vector<88x1xf32>
    %770 = arith.addf %768, %769 : vector<88x1xf32>
    %771 = vector.shape_cast %770 : vector<88x1xf32> to vector<11x8x1xf32>
    %772 = vector.broadcast %51 : vector<11x1x1xf32> to vector<11x8x1xf32>
    %773 = arith.mulf %771, %772 : vector<11x8x1xf32>
    %cst_340 = arith.constant dense<0.000000e+00> : vector<8x1xf32>
    %774 = vector.multi_reduction <add>, %773, %cst_340 [0] : vector<11x8x1xf32> to vector<8x1xf32>
    %cst_341 = arith.constant 5.000000e-01 : f32
    %775 = vector.broadcast %cst_341 : f32 to vector<8x1xf32>
    %776 = arith.mulf %677, %775 : vector<8x1xf32>
    %777 = arith.mulf %774, %776 : vector<8x1xf32>
    %778 = arith.mulf %721, %777 : vector<8x1xf32>
    %779 = arith.addf %676, %778 : vector<8x1xf32>
    %780 = arith.addf %779, %712 : vector<8x1xf32>
    %781 = vector.extract_strided_slice %0 {offsets = [0, 7], sizes = [8, 1], strides = [1, 1]} : vector<8x8xf32> to vector<8x1xf32>
    %782 = vector.extract_strided_slice %47 {offsets = [0, 1792], sizes = [8, 256], strides = [1, 1]} : vector<8x2048xf32> to vector<8x256xf32>
    %783 = vector.extract_strided_slice %782 {offsets = [0, 0], sizes = [8, 128], strides = [1, 1]} : vector<8x256xf32> to vector<8x128xf32>
    %cst_342 = arith.constant 0.000000e+00 : f32
    %784 = vector.broadcast %cst_342 : f32 to vector<8x128xf32>
    %785 = arith.maximumf %783, %784 : vector<8x128xf32>
    %786 = vector.extract_strided_slice %782 {offsets = [0, 128], sizes = [8, 128], strides = [1, 1]} : vector<8x256xf32> to vector<8x128xf32>
    %c7 = arith.constant 7 : index
    %c0_343 = arith.constant 0 : index
    %c0_344 = arith.constant 0 : index
    %787 = vector.load %arg10[%c7, %c0_343, %c0_344] : memref<8x4x128xf32, #tpu.memory_space<vmem>>, vector<1x4x128xf32>
    %788 = vector.shape_cast %787 : vector<1x4x128xf32> to vector<4x128xf32>
    %c7_345 = arith.constant 7 : index
    %c0_346 = arith.constant 0 : index
    %c0_347 = arith.constant 0 : index
    %789 = vector.load %arg11[%c7_345, %c0_346, %c0_347] : memref<8x4x128xf32, #tpu.memory_space<vmem>>, vector<1x4x128xf32>
    %790 = vector.shape_cast %789 : vector<1x4x128xf32> to vector<4x128xf32>
    %c7_348 = arith.constant 7 : index
    %c0_349 = arith.constant 0 : index
    %c0_350 = arith.constant 0 : index
    %791 = vector.load %arg12[%c7_348, %c0_349, %c0_350] : memref<8x1x4xf32, #tpu.memory_space<vmem>>, vector<1x1x4xf32>
    %792 = vector.shape_cast %791 : vector<1x1x4xf32> to vector<1x4xf32>
    %c7_351 = arith.constant 7 : index
    %c0_352 = arith.constant 0 : index
    %c0_353 = arith.constant 0 : index
    %c0_354 = arith.constant 0 : index
    %793 = vector.load %arg9[%c7_351, %c0_352, %c0_353, %c0_354] : memref<8x4x128x128xf32, #tpu.memory_space<vmem>>, vector<1x1x128x128xf32>
    %794 = vector.shape_cast %793 : vector<1x1x128x128xf32> to vector<128x128xf32>
    %cst_355 = arith.constant dense<0.000000e+00> : vector<8x128xf32>
    %795 = tpu.matmul %785, %794, %cst_355 {dimension_numbers = #tpu.dot_dimension_numbers<[1], [0], [0], [1], [0, 0, 1, 1], [], []>} : vector<8x128xf32>, vector<128x128xf32>, vector<8x128xf32> -> vector<8x128xf32>
    %796 = vector.extract_strided_slice %788 {offsets = [0, 0], sizes = [1, 128], strides = [1, 1]} : vector<4x128xf32> to vector<1x128xf32>
    %797 = vector.broadcast %796 : vector<1x128xf32> to vector<8x128xf32>
    %798 = arith.addf %795, %797 : vector<8x128xf32>
    %cst_356 = arith.constant 0.000000e+00 : f32
    %799 = vector.broadcast %cst_356 : f32 to vector<8x128xf32>
    %800 = arith.maximumf %798, %799 : vector<8x128xf32>
    %c7_357 = arith.constant 7 : index
    %c1_358 = arith.constant 1 : index
    %c0_359 = arith.constant 0 : index
    %c0_360 = arith.constant 0 : index
    %801 = vector.load %arg9[%c7_357, %c1_358, %c0_359, %c0_360] : memref<8x4x128x128xf32, #tpu.memory_space<vmem>>, vector<1x1x128x128xf32>
    %802 = vector.shape_cast %801 : vector<1x1x128x128xf32> to vector<128x128xf32>
    %cst_361 = arith.constant dense<0.000000e+00> : vector<8x128xf32>
    %803 = tpu.matmul %800, %802, %cst_361 {dimension_numbers = #tpu.dot_dimension_numbers<[1], [0], [0], [1], [0, 0, 1, 1], [], []>} : vector<8x128xf32>, vector<128x128xf32>, vector<8x128xf32> -> vector<8x128xf32>
    %804 = vector.extract_strided_slice %788 {offsets = [1, 0], sizes = [1, 128], strides = [1, 1]} : vector<4x128xf32> to vector<1x128xf32>
    %805 = vector.broadcast %804 : vector<1x128xf32> to vector<8x128xf32>
    %806 = arith.addf %803, %805 : vector<8x128xf32>
    %cst_362 = arith.constant 0.000000e+00 : f32
    %807 = vector.broadcast %cst_362 : f32 to vector<8x128xf32>
    %808 = arith.maximumf %806, %807 : vector<8x128xf32>
    %809 = vector.extract_strided_slice %790 {offsets = [1, 0], sizes = [1, 128], strides = [1, 1]} : vector<4x128xf32> to vector<1x128xf32>
    %810 = vector.broadcast %809 : vector<1x128xf32> to vector<8x128xf32>
    %811 = arith.mulf %808, %810 : vector<8x128xf32>
    %cst_363 = arith.constant dense<0.000000e+00> : vector<8xf32>
    %812 = vector.multi_reduction <add>, %811, %cst_363 [1] : vector<8x128xf32> to vector<8xf32>
    %813 = vector.shape_cast %812 : vector<8xf32> to vector<8x1xf32>
    %814 = vector.extract_strided_slice %792 {offsets = [0, 0], sizes = [1, 1], strides = [1, 1]} : vector<1x4xf32> to vector<1x1xf32>
    %815 = vector.broadcast %814 : vector<1x1xf32> to vector<8x1xf32>
    %816 = arith.addf %813, %815 : vector<8x1xf32>
    %817 = vector.extract_strided_slice %790 {offsets = [2, 0], sizes = [1, 128], strides = [1, 1]} : vector<4x128xf32> to vector<1x128xf32>
    %818 = vector.broadcast %817 : vector<1x128xf32> to vector<8x128xf32>
    %819 = arith.mulf %808, %818 : vector<8x128xf32>
    %cst_364 = arith.constant dense<0.000000e+00> : vector<8xf32>
    %820 = vector.multi_reduction <add>, %819, %cst_364 [1] : vector<8x128xf32> to vector<8xf32>
    %821 = vector.shape_cast %820 : vector<8xf32> to vector<8x1xf32>
    %822 = vector.extract_strided_slice %792 {offsets = [0, 1], sizes = [1, 1], strides = [1, 1]} : vector<1x4xf32> to vector<1x1xf32>
    %823 = vector.broadcast %822 : vector<1x1xf32> to vector<8x1xf32>
    %824 = arith.addf %821, %823 : vector<8x1xf32>
    %825 = math.exp %824 : vector<8x1xf32>
    %826 = vector.shape_cast %781 : vector<8x1xf32> to vector<1x8x1xf32>
    %827 = vector.broadcast %49 : vector<11x1x1xf32> to vector<11x8x1xf32>
    %828 = vector.broadcast %826 : vector<1x8x1xf32> to vector<11x8x1xf32>
    %829 = arith.mulf %827, %828 : vector<11x8x1xf32>
    %830 = vector.shape_cast %786 : vector<8x128xf32> to vector<1x8x128xf32>
    %831 = vector.extract_strided_slice %790 {offsets = [0, 0], sizes = [1, 128], strides = [1, 1]} : vector<4x128xf32> to vector<1x128xf32>
    %832 = vector.shape_cast %831 : vector<1x128xf32> to vector<1x1x128xf32>
    %833 = vector.broadcast %829 : vector<11x8x1xf32> to vector<11x8x128xf32>
    %834 = vector.broadcast %832 : vector<1x1x128xf32> to vector<11x8x128xf32>
    %835 = arith.mulf %833, %834 : vector<11x8x128xf32>
    %836 = vector.broadcast %830 : vector<1x8x128xf32> to vector<11x8x128xf32>
    %837 = arith.addf %836, %835 : vector<11x8x128xf32>
    %cst_365 = arith.constant 0.000000e+00 : f32
    %838 = vector.broadcast %cst_365 : f32 to vector<11x8x128xf32>
    %839 = arith.maximumf %837, %838 : vector<11x8x128xf32>
    %840 = vector.shape_cast %839 : vector<11x8x128xf32> to vector<88x128xf32>
    %c7_366 = arith.constant 7 : index
    %c2_367 = arith.constant 2 : index
    %c0_368 = arith.constant 0 : index
    %c0_369 = arith.constant 0 : index
    %841 = vector.load %arg9[%c7_366, %c2_367, %c0_368, %c0_369] : memref<8x4x128x128xf32, #tpu.memory_space<vmem>>, vector<1x1x128x128xf32>
    %842 = vector.shape_cast %841 : vector<1x1x128x128xf32> to vector<128x128xf32>
    %cst_370 = arith.constant dense<0.000000e+00> : vector<88x128xf32>
    %843 = tpu.matmul %840, %842, %cst_370 {dimension_numbers = #tpu.dot_dimension_numbers<[1], [0], [0], [1], [0, 0, 1, 1], [], []>} : vector<88x128xf32>, vector<128x128xf32>, vector<88x128xf32> -> vector<88x128xf32>
    %844 = vector.extract_strided_slice %788 {offsets = [2, 0], sizes = [1, 128], strides = [1, 1]} : vector<4x128xf32> to vector<1x128xf32>
    %845 = vector.broadcast %844 : vector<1x128xf32> to vector<88x128xf32>
    %846 = arith.addf %843, %845 : vector<88x128xf32>
    %cst_371 = arith.constant 0.000000e+00 : f32
    %847 = vector.broadcast %cst_371 : f32 to vector<88x128xf32>
    %848 = arith.maximumf %846, %847 : vector<88x128xf32>
    %c7_372 = arith.constant 7 : index
    %c3_373 = arith.constant 3 : index
    %c0_374 = arith.constant 0 : index
    %c0_375 = arith.constant 0 : index
    %849 = vector.load %arg9[%c7_372, %c3_373, %c0_374, %c0_375] : memref<8x4x128x128xf32, #tpu.memory_space<vmem>>, vector<1x1x128x128xf32>
    %850 = vector.shape_cast %849 : vector<1x1x128x128xf32> to vector<128x128xf32>
    %cst_376 = arith.constant dense<0.000000e+00> : vector<88x128xf32>
    %851 = tpu.matmul %848, %850, %cst_376 {dimension_numbers = #tpu.dot_dimension_numbers<[1], [0], [0], [1], [0, 0, 1, 1], [], []>} : vector<88x128xf32>, vector<128x128xf32>, vector<88x128xf32> -> vector<88x128xf32>
    %852 = vector.extract_strided_slice %788 {offsets = [3, 0], sizes = [1, 128], strides = [1, 1]} : vector<4x128xf32> to vector<1x128xf32>
    %853 = vector.broadcast %852 : vector<1x128xf32> to vector<88x128xf32>
    %854 = arith.addf %851, %853 : vector<88x128xf32>
    %cst_377 = arith.constant 0.000000e+00 : f32
    %855 = vector.broadcast %cst_377 : f32 to vector<88x128xf32>
    %856 = arith.maximumf %854, %855 : vector<88x128xf32>
    %857 = vector.extract_strided_slice %790 {offsets = [3, 0], sizes = [1, 128], strides = [1, 1]} : vector<4x128xf32> to vector<1x128xf32>
    %858 = vector.broadcast %857 : vector<1x128xf32> to vector<88x128xf32>
    %859 = arith.mulf %856, %858 : vector<88x128xf32>
    %cst_378 = arith.constant dense<0.000000e+00> : vector<88xf32>
    %860 = vector.multi_reduction <add>, %859, %cst_378 [1] : vector<88x128xf32> to vector<88xf32>
    %861 = vector.shape_cast %860 : vector<88xf32> to vector<88x1xf32>
    %862 = vector.extract_strided_slice %792 {offsets = [0, 2], sizes = [1, 1], strides = [1, 1]} : vector<1x4xf32> to vector<1x1xf32>
    %863 = vector.broadcast %862 : vector<1x1xf32> to vector<88x1xf32>
    %864 = arith.addf %861, %863 : vector<88x1xf32>
    %cst_379 = arith.constant 0.000000e+00 : f32
    %865 = vector.broadcast %cst_379 : f32 to vector<88x1xf32>
    %866 = arith.cmpf ogt, %864, %865 : vector<88x1xf32>
    %cst_380 = arith.constant 0.000000e+00 : f32
    %867 = vector.broadcast %cst_380 : f32 to vector<88x1xf32>
    %868 = arith.minimumf %864, %867 : vector<88x1xf32>
    %869 = math.exp %868 : vector<88x1xf32>
    %cst_381 = arith.constant 1.000000e+00 : f32
    %870 = vector.broadcast %cst_381 : f32 to vector<88x1xf32>
    %871 = arith.subf %869, %870 : vector<88x1xf32>
    %872 = arith.select %866, %864, %871 : vector<88x1xi1>, vector<88x1xf32>
    %cst_382 = arith.constant 1.000000e+00 : f32
    %873 = vector.broadcast %cst_382 : f32 to vector<88x1xf32>
    %874 = arith.addf %872, %873 : vector<88x1xf32>
    %875 = vector.shape_cast %874 : vector<88x1xf32> to vector<11x8x1xf32>
    %876 = vector.broadcast %51 : vector<11x1x1xf32> to vector<11x8x1xf32>
    %877 = arith.mulf %875, %876 : vector<11x8x1xf32>
    %cst_383 = arith.constant dense<0.000000e+00> : vector<8x1xf32>
    %878 = vector.multi_reduction <add>, %877, %cst_383 [0] : vector<11x8x1xf32> to vector<8x1xf32>
    %cst_384 = arith.constant 5.000000e-01 : f32
    %879 = vector.broadcast %cst_384 : f32 to vector<8x1xf32>
    %880 = arith.mulf %781, %879 : vector<8x1xf32>
    %881 = arith.mulf %878, %880 : vector<8x1xf32>
    %882 = arith.mulf %825, %881 : vector<8x1xf32>
    %883 = arith.addf %780, %882 : vector<8x1xf32>
    %884 = arith.addf %883, %816 : vector<8x1xf32>
    %cst_385 = arith.constant 0.000000e+00 : f32
    %885 = vector.broadcast %cst_385 : f32 to vector<8x1xf32>
    %886 = arith.subf %885, %884 : vector<8x1xf32>
    %887 = math.exp %886 : vector<8x1xf32>
    %cst_386 = arith.constant 1.000000e+00 : f32
    %888 = vector.broadcast %cst_386 : f32 to vector<8x1xf32>
    %889 = arith.addf %888, %887 : vector<8x1xf32>
    %890 = tpu.reciprocal %889 {approx = true} : vector<8x1xf32> -> vector<8x1xf32>
    %c0_387 = arith.constant 0 : index
    %c0_388 = arith.constant 0 : index
    %891 = vector.load %arg15[%c0_387, %c0_388] : memref<8x1xf32, #tpu.memory_space<vmem>>, vector<8x1xf32>
    tpu.vector_store %arg15[%c0_387, %c0_388], %890 {strides = array<i32>} : memref<8x1xf32, #tpu.memory_space<vmem>>, vector<8x1xf32>,
    return
  }
}

</mosaic_0001>

<bundles_post_ra>
// kernel: embedding_net_forward.1
= control target key start
LH: loop header
LB: loop body
LE: loop exit
PB: predicated region body
PF: predicated region fallthrough
CT: control target
= control target key end

     0   :  { %20 = vsyncpa [#allocation3], 0  ;;  %s9261_s0 = inlined_call_operand.hbm [shape: f32[8,8], index: 0, kind: input, shape index: {}]   ;;  %s9262_s1 = inlined_call_operand.hbm [shape: f32[8,256], index: 1, kind: input, shape index: {}]   ;;  %s9263_s2 = inlined_call_operand.hbm [shape: f32[3,256,256], index: 2, kind: input, shape index: {}]   ;;  %s9264_s3 = inlined_call_operand.hbm [shape: f32[4,256], index: 3, kind: input, shape index: {}]   ;;  %s9265_s4 = inlined_call_operand.vmem [shape: f32[256,16], index: 4, kind: input, shape index: {}]   ;;  %s9266_s5 = inlined_call_operand.hbm [shape: f32[1,16], index: 5, kind: input, shape index: {}]   ;;  %s9267_s6 = inlined_call_operand.hbm [shape: f32[8,2048], index: 6, kind: input, shape index: {}]   ;;  %s9268_s7 = inlined_call_operand.hbm [shape: f32[16,2048], index: 7, kind: input, shape index: {}]   ;;  %s9269_s8 = inlined_call_operand.hbm [shape: f32[1,2048], index: 8, kind: input, shape index: {}]   ;;  %s9270_s9 = inlined_call_operand.hbm [shape: f32[8,4,128,128], index: 9, kind: input, shape index: {}]   ;;  %s9271_s10 = inlined_call_operand.hbm [shape: f32[8,4,128], index: 10, kind: input, shape index: {}]   ;;  %s9272_s11 = inlined_call_operand.hbm [shape: f32[8,4,128], index: 11, kind: input, shape index: {}]   ;;  %s9273_s12 = inlined_call_operand.vmem [shape: f32[8,1,4], index: 12, kind: input, shape index: {}]   ;;  %s9274_s13 = inlined_call_operand.vmem [shape: f32[11,1], index: 13, kind: input, shape index: {}]   ;;  %s9275_s14 = inlined_call_operand.vmem [shape: f32[11,1], index: 14, kind: input, shape index: {}]   ;;  %s9276_s15 = inlined_call_operand.vmem [shape: f32[8,1], index: 15, kind: output, shape index: {}]  }
   0x1   :  { %21 = vsyncpa [#allocation5], 0 }
   0x2   :  { %22 = vsyncpa [#allocation8], 0 }
   0x3   :  { %23 = vsyncpa [#allocation11], 0 }
   0x4   :  { %24 = vsyncpa [#allocation14], 0  ;;  %s42_s20 = sshll.u32 %s9262_s1, 4  ;;  %s43_s20 = int_to_ptr.hbm [resolvable:$true] %s42_s20 }
   0x5   :  { %25 = vsyncpa [#allocation17], 0  ;;  %s6556_s21 = smov [#allocation4]   ;;  %s66_s25 = sshll.u32 %s9264_s3, 4  ;;  %s67_s25 = int_to_ptr.hbm [resolvable:$true] %s66_s25 }
   0x6   :  { %s44_s22 = sshll.u32 %s6556_s21, 4  ;;  %s6557_s26 = smov [#allocation7]   ;;  %s45_s22 = int_to_ptr.vmem [resolvable:$true] %s44_s22 }
   0x7   :  { %47 = dma.hbm_to_vmem [thread:$0]  %s43_s20, 256, %s45_s22, [#allocation5]  }
   0x8   :  { %s68_s27 = sshll.u32 %s6557_s26, 4  ;;  %s90_s30 = sshll.u32 %s9267_s6, 4  ;;  %s69_s27 = int_to_ptr.vmem [resolvable:$true] %s68_s27  ;;  %s91_s30 = int_to_ptr.hbm [resolvable:$true] %s90_s30 }
   0x9   :  { %71 = dma.hbm_to_vmem [thread:$0]  %s67_s25, 128, %s69_s27, [#allocation8]  }
   0xa   :  { %s114_s17 = sshll.u32 %s9269_s8, 4  ;;  %s6558_s18 = smov [#allocation10]   ;;  %s115_s17 = int_to_ptr.hbm [resolvable:$true] %s114_s17 }
   0xb   :  { %s92_s19 = sshll.u32 %s6558_s18, 4  ;;  %s6559_s3 = smov [#allocation13]   ;;  %s93_s19 = int_to_ptr.vmem [resolvable:$true] %s92_s19 }
   0xc   :  { %95 = dma.hbm_to_vmem [thread:$0]  %s91_s30, 2048, %s93_s19, [#allocation11]  }
   0xd   :  { %s116_s20 = sshll.u32 %s6559_s3, 4  ;;  %s137_s23 = sshll.u32 %s9271_s10, 4  ;;  %s117_s20 = int_to_ptr.vmem [resolvable:$true] %s116_s20  ;;  %s138_s23 = int_to_ptr.hbm [resolvable:$true] %s137_s23 }
   0xe   :  { %119 = dma.hbm_to_vmem [thread:$0]  %s115_s17, 256, %s117_s20, [#allocation14]  }
   0xf   :  { %s6560_s6 = smov [#allocation16]   ;;  %s31_s8 = sshll.u32 %s9261_s0, 4  ;;  %s32_s8 = int_to_ptr.hbm [resolvable:$true] %s31_s8 }
  0x10   :  { %s139_s24 = sshll.u32 %s6560_s6, 4  ;;  %s6561_s27 = smov 64   ;;  %s140_s24 = int_to_ptr.vmem [resolvable:$true] %s139_s24 }
  0x11   :  { %s6562_s28 = smov 4   ;;  %s6563_s29 = smov [#allocation2]  }
  0x12   :  { %145 = dma.hbm_to_vmem [thread:$0]  %s138_s23, 512, %s140_s24, [#allocation17], %s6561_s27, %s6561_s27, %s6562_s28  }
  0x13   :  { %s33_s30 = sshll.u32 %s6563_s29, 4  ;;  %s52_s16 = sshll.u32 %s9263_s2, 4  ;;  %s34_s30 = int_to_ptr.vmem [resolvable:$true] %s33_s30  ;;  %s53_s16 = int_to_ptr.hbm [resolvable:$true] %s52_s16 }
  0x14   :  { %36 = dma.hbm_to_vmem [thread:$0]  %s32_s8, 128, %s34_s30, [#allocation3]  }
  0x15   :  { %s6564_s17 = smov [#allocation6]   ;;  %s79_s3 = sshll.u32 %s9266_s5, 4  ;;  %s80_s3 = int_to_ptr.hbm [resolvable:$true] %s79_s3 }
  0x16   :  { %s54_s18 = sshll.u32 %s6564_s17, 4  ;;  %s6565_s20 = smov 256   ;;  %s55_s18 = int_to_ptr.vmem [resolvable:$true] %s54_s18 }
  0x17   :  { %s6566_s21 = smov 16   ;;  %s6567_s22 = smov [#allocation9]  }
  0x18   :  { %60 = dma.hbm_to_vmem [thread:$0]  %s53_s16, 24576, %s55_s18, [#allocation5], %s6565_s20, %s6565_s20, %s6566_s21  }
  0x19   :  { %s81_s23 = sshll.u32 %s6567_s22, 4  ;;  %s100_s2 = sshll.u32 %s9268_s7, 4  ;;  %s82_s23 = int_to_ptr.vmem [resolvable:$true] %s81_s23  ;;  %s101_s2 = int_to_ptr.hbm [resolvable:$true] %s100_s2 }
  0x1a   :  { %84 = dma.hbm_to_vmem [thread:$0]  %s80_s3, 16, %s82_s23, [#allocation8]  }
  0x1b   :  { %s6568_s25 = smov [#allocation12]   ;;  %s124_s5 = sshll.u32 %s9270_s9, 4  ;;  %s125_s5 = int_to_ptr.hbm [resolvable:$true] %s124_s5 }
  0x1c   :  { %s102_s26 = sshll.u32 %s6568_s25, 4  ;;  %s6569_s30 = smov 2048   ;;  %s103_s26 = int_to_ptr.vmem [resolvable:$true] %s102_s26 }
  0x1d   :  { %s6570_s10 = smov 128   ;;  %s6571_s1 = smov [#allocation15]  }
  0x1e   :  { %108 = dma.hbm_to_vmem [thread:$0]  %s101_s2, 4096, %s103_s26, [#allocation11], %s6569_s30, %s6569_s30, %s6570_s10  }
  0x1f   :  { %s126_s16 = sshll.u32 %s6571_s1, 4  ;;  %s150_s7 = sshll.u32 %s9272_s11, 4  ;;  %s127_s16 = int_to_ptr.vmem [resolvable:$true] %s126_s16  ;;  %s151_s7 = int_to_ptr.hbm [resolvable:$true] %s150_s7 }
  0x20   :  { %s6572_s0 = smov 8   ;;  %s6573_s19 = smov [#allocation18]  }
  0x21   :  { %132 = dma.hbm_to_vmem [thread:$0]  %s125_s5, 65536, %s127_s16, [#allocation14], %s6570_s10, %s6570_s10, %s6572_s0  }
  0x22   :  { %s152_s3 = sshll.u32 %s6573_s19, 4  ;;  %s153_s3 = int_to_ptr.vmem [resolvable:$true] %s152_s3 }
  0x23   :  { %158 = dma.hbm_to_vmem [thread:$0]  %s151_s7, 512, %s153_s3, [#allocation17], %s6561_s27, %s6561_s27, %s6562_s28  }
  0x24   :  { %6544 = dma.done.wait [#allocation3], 128  }
  0x25   :  { %6545 = vsyncadd [#allocation3], 4294967168 }
  0x26   :  { %6546 = dma.done.wait [#allocation5], 24832  }
  0x27   :  { %6547 = vsyncadd [#allocation5], 4294942464 }
  0x28   :  { %6548 = dma.done.wait [#allocation8], 144  }
  0x29   :  { %6549 = vsyncadd [#allocation8], 4294967152 }
  0x2a   :  { %6550 = dma.done.wait [#allocation11], 6144  }
  0x2b   :  { %6551 = vsyncadd [#allocation11], 4294961152 }
  0x2c   :  { %6552 = dma.done.wait [#allocation14], 65792  }
  0x2d   :  { %6553 = vsyncadd [#allocation14], 4294901504 }
  0x2e   :  { %6554 = dma.done.wait [#allocation17], 1024  }
  0x2f   :  { %6555 = vsyncadd [#allocation17], 4294966272  ;;  %v6574_v0 = vmov 0   ;;  %vm220_vm0 = vcmask 64512   ;;  %v211_v1 = vld [vmem:[#allocation4] sm:$0xff]  ;;  %v6703_v2 = vld [vmem:[#allocation2] sm:$0xff] }
  0x30   :  { %6048 = vset.pattern.permute.xlu1 %v6574_v0  ;;  %6049 = vset.pattern.permute.xlu2 %v6574_v0  ;;  %v212_v3 = vld [vmem:[#allocation4 + $0x8] sm:$0xff]  ;;  %v6708_v4 = vld [vmem:[%s9274_s13] sm:$0xff]  ;;  %v6735_v15 = vld [vmem:[%s9274_s13 + $0x8] sm:$0x7]  ;;  %s6575_s13 = smov 2   ;;  %s6577_s6 = smov 126  }
  0x31   :  { %6050 = vset.pattern.permute.xlu0 %v6574_v0  ;;  %239 = vmatpush.msra.mxu0 %v211_v1  ;;  %v6715_v5 = vperm.slane %v6708_v4, 0  ;;  %v1549_v6 = vrot.slane %v6708_v4, 1  ;;  %v1553_v10 = vrot.slane %v6708_v4, 5  ;;  %v1555_v13 = vrot.slane %v6708_v4, 7  ;;  %v6747_v20 = vld [vmem:[%s9275_s14] sm:$0xff]  ;;  %v296_v24 = vld [vmem:[#allocation6 + $0xf0] sm:$0xff] }
  0x32   :  { %259 = vmatpush.msra.mxu1 %v212_v3  ;;  %5891 = vmatmul.msk.f32.vlgmr.msra.gmra.mxu0 %vm220_vm0, %v6703_v2  ;;  %v1556_v17 = vrot.slane %v6735_v15, 1  ;;  %v1562_v21 = vrot.slane %v6747_v20, 1  ;;  %v1565_v23 = vrot.slane %v6747_v20, 4  ;;  %v297_v25 = vld [vmem:[#allocation6 + $0xf8] sm:$0xff]  ;;  %v294_v26 = vld [vmem:[#allocation6 + $0xe0] sm:$0xff]  ;;  %v328_v27 = vld [vmem:[#allocation6 + $0x1f0] sm:$0xff] }
  0x33   :  { %5892 = vmatmul.msk.f32.vlgmr.msra.gmra.mxu1 %vm220_vm0, %v6703_v2  ;;  %v1689_v7 = vmul.f32 %v6715_v5, %v6703_v2  ;;  %v6720_v8 = vperm.slane %v1549_v6, 0  ;;  %v6725_v11 = vperm.slane %v1553_v10, 0  ;;  %v6730_v14 = vperm.slane %v1555_v13, 0  ;;  %336 = vmatpush.msra.mxu2 %v296_v24  ;;  %v295_v28 = vld [vmem:[#allocation6 + $0xe8] sm:$0xff]  ;;  %v329_v29 = vld [vmem:[#allocation6 + $0x1f8] sm:$0xff]  ;;  %v292_v30 = vld [vmem:[#allocation6 + $0xd0] sm:$0xff] }
  0x34   :  { %v6740_v18 = vperm.slane %v1556_v17, 0  ;;  %v2070_v22 = vperm.slane %v1562_v21, 0  ;;  %376 = vmatpush.msrb.mxu0 %v297_v25  ;;  %356 = vmatpush.msra.mxu3 %v328_v27  ;;  %v326_v31 = vld [vmem:[#allocation6 + $0x1e0] sm:$0xff]  ;;  %v293_v32 = vld [vmem:[#allocation6 + $0xd8] sm:$0xff]  ;;  %v327_v33 = vld [vmem:[#allocation6 + $0x1e8] sm:$0xff]  ;;  %v2073_v35 = vperm.slane %v1565_v23, 0 }
  0x35   :  { %1702 = vperm.xlu1 %6048, %v1689_v7   ;;  %v1690_v9 = vmul.f32 %v6720_v8, %v6703_v2  ;;  %v1694_v12 = vmul.f32 %v6725_v11, %v6703_v2  ;;  %v1696_v16 = vmul.f32 %v6730_v14, %v6703_v2  ;;  %396 = vmatpush.msrb.mxu1 %v329_v29  ;;  %v324_v34 = vld [vmem:[#allocation6 + $0x1d0] sm:$0xff]  ;;  %v290_v36 = vld [vmem:[#allocation6 + $0xc0] sm:$0xff]  ;;  %v291_v37 = vld [vmem:[#allocation6 + $0xc8] sm:$0xff]  ;;  %v1568_v44 = vrot.slane %v6747_v20, 7  ;;  %s6578_s24 = smov 1   ;;  %s6579_s2 = smov 125  }
  0x36   :  { %v1698_v19 = vmul.f32 %v6740_v18, %v6703_v2  ;;  %337 = vmatpush.msra.mxu2 %v294_v26  ;;  %377 = vmatpush.msrb.mxu0 %v295_v28  ;;  %v325_v38 = vld [vmem:[#allocation6 + $0x1d8] sm:$0xff]  ;;  %v322_v39 = vld [vmem:[#allocation6 + $0x1c0] sm:$0xff]  ;;  %v288_v40 = vld [vmem:[#allocation6 + $0xb0] sm:$0xff]  ;;  %s6581_s11 = smov 123   ;;  %vm849_vm1 = vcmask 130048   ;;  %s6582_s27 = smov 121  }
  0x37   :  { %357 = vmatpush.msra.mxu3 %v326_v31  ;;  %397 = vmatpush.msrb.mxu1 %v327_v33  ;;  %v289_v41 = vld [vmem:[#allocation6 + $0xb8] sm:$0xff]  ;;  %v323_v42 = vld [vmem:[#allocation6 + $0x1c8] sm:$0xff]  ;;  %v320_v43 = vld [vmem:[#allocation6 + $0x1b0] sm:$0xff]  ;;  %v2076_v53 = vperm.slane %v1568_v44, 0  ;;  %s6583_s28 = smov 122   ;;  %vm2124_vm4 = vcmask 23568  }
  0x38   :  { %338 = vmatpush.msra.mxu2 %v292_v30  ;;  %378 = vmatpush.msrb.mxu0 %v293_v32  ;;  %v286_v45 = vld [vmem:[#allocation6 + $0xa0] sm:$0xff]  ;;  %v287_v46 = vld [vmem:[#allocation6 + $0xa8] sm:$0xff]  ;;  %v321_v47 = vld [vmem:[#allocation6 + $0x1b8] sm:$0xff] }
  0x39   :  { %358 = vmatpush.msra.mxu3 %v324_v34  ;;  %398 = vmatpush.msrb.mxu1 %v325_v38  ;;  %v318_v48 = vld [vmem:[#allocation6 + $0x1a0] sm:$0xff]  ;;  %v284_v49 = vld [vmem:[#allocation6 + $0x90] sm:$0xff]  ;;  %v285_v50 = vld [vmem:[#allocation6 + $0x98] sm:$0xff] }
  0x3a   :  { %339 = vmatpush.msra.mxu2 %v290_v36  ;;  %379 = vmatpush.msrb.mxu0 %v291_v37  ;;  %v319_v51 = vld [vmem:[#allocation6 + $0x1a8] sm:$0xff]  ;;  %v316_v52 = vld [vmem:[#allocation6 + $0x190] sm:$0xff]  ;;  %v282_v54 = vld [vmem:[#allocation6 + $0x80] sm:$0xff] }
  0x3b   :  { %359 = vmatpush.msra.mxu3 %v322_v39  ;;  %399 = vmatpush.msrb.mxu1 %v323_v42  ;;  %v283_v55 = vld [vmem:[#allocation6 + $0x88] sm:$0xff]  ;;  %v6757_v56 = vld [vmem:[%s9275_s14 + $0x8] sm:$0x7]  ;;  %v317_v57 = vld [vmem:[#allocation6 + $0x198] sm:$0xff]  ;;  %s6576_s14 = smov 127  }
  0x3c   :  { %340 = vmatpush.msra.mxu2 %v288_v40  ;;  %380 = vmatpush.msrb.mxu0 %v289_v41  ;;  %v280_v58 = vld [vmem:[#allocation6 + $0x70] sm:$0xff]  ;;  %v314_v59 = vld [vmem:[#allocation6 + $0x180] sm:$0xff]  ;;  %v281_v60 = vld [vmem:[#allocation6 + $0x78] sm:$0xff]  ;;  %v1570_v62 = vrot.slane %v6757_v56, 2 }
  0x3d   :  { %1707 = vperm.xlu1 %6048, %v1690_v9   ;;  %360 = vmatpush.msra.mxu3 %v320_v43  ;;  %v315_v61 = vld [vmem:[#allocation6 + $0x188] sm:$0xff]  ;;  %v278_v63 = vld [vmem:[#allocation6 + $0x60] sm:$0xff]  ;;  %v312_v0 = vld [vmem:[#allocation6 + $0x170] sm:$0xff] }
  0x3e   :  { %341 = vmatpush.msra.mxu2 %v286_v45  ;;  %381 = vmatpush.msrb.mxu0 %v287_v46  ;;  %v279_v1 = vld [vmem:[#allocation6 + $0x68] sm:$0xff]  ;;  %v313_v3 = vld [vmem:[#allocation6 + $0x178] sm:$0xff]  ;;  %v2079_v6 = vperm.slane %v1570_v62, 0  ;;  %v276_v7 = vld [vmem:[#allocation6 + $0x50] sm:$0xff] }
  0x3f   :  { %400 = vmatpush.msrb.mxu1 %v321_v47  ;;  %361 = vmatpush.msra.mxu3 %v318_v48  ;;  %v310_v9 = vld [vmem:[#allocation6 + $0x160] sm:$0xff]  ;;  %v277_v10 = vld [vmem:[#allocation6 + $0x58] sm:$0xff]  ;;  %v275_v17 = vld [vmem:[#allocation6 + $0x48] sm:$0xff] }
  0x40   :  { %342 = vmatpush.msra.mxu2 %v284_v49  ;;  %382 = vmatpush.msrb.mxu0 %v285_v50  ;;  %v274_v13 = vld [vmem:[#allocation6 + $0x40] sm:$0xff]  ;;  %v272_v21 = vld [vmem:[#allocation6 + $0x30] sm:$0xff]  ;;  %v273_v23 = vld [vmem:[#allocation6 + $0x38] sm:$0xff] }
  0x41   :  { %401 = vmatpush.msrb.mxu1 %v319_v51  ;;  %362 = vmatpush.msra.mxu3 %v316_v52  ;;  %v307_v24 = vld [vmem:[#allocation6 + $0x148] sm:$0xff]  ;;  %v270_v25 = vld [vmem:[#allocation6 + $0x20] sm:$0xff]  ;;  %v304_v26 = vld [vmem:[#allocation6 + $0x130] sm:$0xff] }
  0x42   :  { %343 = vmatpush.msra.mxu2 %v282_v54  ;;  %383 = vmatpush.msrb.mxu0 %v283_v55  ;;  %v271_v27 = vld [vmem:[#allocation6 + $0x28] sm:$0xff]  ;;  %v305_v28 = vld [vmem:[#allocation6 + $0x138] sm:$0xff]  ;;  %v268_v29 = vld [vmem:[#allocation6 + $0x10] sm:$0xff] }
  0x43   :  { %402 = vmatpush.msrb.mxu1 %v317_v57  ;;  %363 = vmatpush.msra.mxu3 %v314_v59  ;;  %v302_v30 = vld [vmem:[#allocation6 + $0x120] sm:$0xff]  ;;  %v269_v31 = vld [vmem:[#allocation6 + $0x18] sm:$0xff]  ;;  %v303_v32 = vld [vmem:[#allocation6 + $0x128] sm:$0xff] }
  0x44   :  { %344 = vmatpush.msra.mxu2 %v280_v58  ;;  %384 = vmatpush.msrb.mxu0 %v281_v60  ;;  %v266_v33 = vld [vmem:[#allocation6] sm:$0xff]  ;;  %v300_v34 = vld [vmem:[#allocation6 + $0x110] sm:$0xff]  ;;  %v301_v36 = vld [vmem:[#allocation6 + $0x118] sm:$0xff] }
  0x45   :  { %1727 = vperm.xlu1 %6048, %v1694_v12   ;;  %403 = vmatpush.msrb.mxu1 %v315_v61  ;;  %v311_v12 = vld [vmem:[#allocation6 + $0x168] sm:$0xff]  ;;  %v298_v37 = vld [vmem:[#allocation6 + $0x100] sm:$0xff]  ;;  %v481_v62 = vld [vmem:[#allocation6 + $0x3f0] sm:$0xff] }
  0x46   :  { %345 = vmatpush.msra.mxu2 %v278_v63  ;;  %364 = vmatpush.msra.mxu3 %v312_v0  ;;  %v299_v38 = vld [vmem:[#allocation6 + $0x108] sm:$0xff]  ;;  %v6764_v39 = vld [vmem:[#allocation7] sm:$0xff]  ;;  %v482_v63 = vld [vmem:[#allocation6 + $0x3f8] sm:$0xff] }
  0x47   :  { %385 = vmatpush.msrb.mxu0 %v279_v1  ;;  %404 = vmatpush.msrb.mxu1 %v313_v3  ;;  %v214_v41 = vperm.slane %v6764_v39, 0  ;;  %v215_v42 = vperm.slane %v6764_v39, 4  ;;  %v1550_v1 = vrot.slane %v6708_v4, 2 }
  0x48   :  { %346 = vmatpush.msra.mxu2 %v276_v7  ;;  %365 = vmatpush.msra.mxu3 %v310_v9  ;;  %v480_v7 = vld [vmem:[#allocation6 + $0x3e8] sm:$0xff]  ;;  %v477_v9 = vld [vmem:[#allocation6 + $0x3d0] sm:$0xff] }
  0x49   :  { %386 = vmatpush.msrb.mxu0 %v277_v10  ;;  %405 = vmatpush.msrb.mxu1 %v311_v12  ;;  %v218_v43 = vperm.slane %v214_v41, 0  ;;  %v219_v44 = vperm.slane %v215_v42, 0  ;;  %v6793_v3 = vperm.slane %v1550_v1, 0  ;;  %v478_v10 = vld [vmem:[#allocation6 + $0x3d8] sm:$0xff]  ;;  %v449_v12 = vld [vmem:[#allocation6 + $0x2f0] sm:$0xff]  ;;  %v1554_v42 = vrot.slane %v6708_v4, 6 }
  0x4a   :  { %347 = vmatpush.msra.mxu2 %v274_v13  ;;  %v475_v13 = vld [vmem:[#allocation6 + $0x3c0] sm:$0xff]  ;;  %v462_v1 = vld [vmem:[#allocation6 + $0x358] sm:$0xff] }
  0x4b   :  { %387 = vmatpush.msrb.mxu0 %v275_v17  ;;  %v476_v17 = vld [vmem:[#allocation6 + $0x3c8] sm:$0xff] }
  0x4c   :  { %348 = vmatpush.msra.mxu2 %v272_v21  ;;  %v448_v21 = vld [vmem:[#allocation6 + $0x2e8] sm:$0xff] }
  0x4d   :  { %1737 = vperm.xlu1 %6048, %v1696_v16   ;;  %v308_v16 = vld [vmem:[#allocation6 + $0x150] sm:$0xff]  ;;  %388 = vmatpush.msrb.mxu0 %v273_v23  ;;  %v1551_v23 = vrot.slane %v6708_v4, 3 }
  0x4e   :  { %366 = vmatpush.msra.mxu3 %v308_v16  ;;  %349 = vmatpush.msra.mxu2 %v270_v25  ;;  %v450_v16 = vld [vmem:[#allocation6 + $0x2f8] sm:$0xff] }
  0x4f   :  { %389 = vmatpush.msrb.mxu0 %v271_v27  ;;  %v474_v25 = vld [vmem:[#allocation6 + $0x3b8] sm:$0xff]  ;;  %v445_v27 = vld [vmem:[#allocation6 + $0x2d0] sm:$0xff] }
  0x50   :  { %350 = vmatpush.msra.mxu2 %v268_v29  ;;  %v446_v29 = vld [vmem:[#allocation6 + $0x2d8] sm:$0xff] }
  0x51   :  { %390 = vmatpush.msrb.mxu0 %v269_v31  ;;  %v443_v31 = vld [vmem:[#allocation6 + $0x2c0] sm:$0xff] }
  0x52   :  { %351 = vmatpush.msra.mxu2 %v266_v33  ;;  %v444_v33 = vld [vmem:[#allocation6 + $0x2c8] sm:$0xff] }
  0x54   :  { %489 = vmatpush.msrb.mxu2 %v449_v12  ;;  %v460_v12 = vld [vmem:[#allocation6 + $0x348] sm:$0xff] }
  0x55   :  { %1747 = vperm.xlu1 %6048, %v1698_v19   ;;  %v309_v19 = vld [vmem:[#allocation6 + $0x158] sm:$0xff] }
  0x56   :  { %406 = vmatpush.msrb.mxu1 %v309_v19  ;;  %v447_v19 = vld [vmem:[#allocation6 + $0x2e0] sm:$0xff] }
  0x57   :  { %490 = vmatpush.msrb.mxu2 %v447_v19  ;;  %v458_v19 = vld [vmem:[#allocation6 + $0x338] sm:$0xff] }
  0x58   :  { %407 = vmatpush.msrb.mxu1 %v307_v24  ;;  %v473_v24 = vld [vmem:[#allocation6 + $0x3b0] sm:$0xff] }
  0x59   :  { %491 = vmatpush.msrb.mxu2 %v445_v27  ;;  %v453_v27 = vld [vmem:[#allocation6 + $0x310] sm:$0xff] }
  0x5a   :  { %408 = vmatpush.msrb.mxu1 %v305_v28  ;;  %v471_v28 = vld [vmem:[#allocation6 + $0x3a0] sm:$0xff] }
  0x5b   :  { %492 = vmatpush.msrb.mxu2 %v443_v31  ;;  %v425_v31 = vld [vmem:[#allocation6 + $0x230] sm:$0xff] }
  0x5c   :  { %409 = vmatpush.msrb.mxu1 %v303_v32  ;;  %v469_v32 = vld [vmem:[#allocation6 + $0x390] sm:$0xff] }
  0x5d   :  { %2082 = vrot.lane.b32.xlu1 %v2070_v22, %s6575_s13  ;;  %v306_v22 = vld [vmem:[#allocation6 + $0x140] sm:$0xff] }
  0x5e   :  { %367 = vmatpush.msra.mxu3 %v306_v22  ;;  %410 = vmatpush.msrb.mxu1 %v301_v36  ;;  %v467_v36 = vld [vmem:[#allocation6 + $0x380] sm:$0xff] }
  0x60   :  { %368 = vmatpush.msra.mxu3 %v304_v26  ;;  %411 = vmatpush.msrb.mxu1 %v299_v38  ;;  %v6798_v26 = vperm.slane %v1551_v23, 0  ;;  %v468_v38 = vld [vmem:[#allocation6 + $0x388] sm:$0xff]  ;;  %v430_v23 = vld [vmem:[#allocation6 + $0x258] sm:$0xff] }
  0x62   :  { %369 = vmatpush.msra.mxu3 %v302_v30  ;;  %549 = vmatpush.msra.mxu1 %v482_v63  ;;  %v472_v30 = vld [vmem:[#allocation6 + $0x3a8] sm:$0xff]  ;;  %v461_v63 = vld [vmem:[#allocation6 + $0x350] sm:$0xff] }
  0x64   :  { %370 = vmatpush.msra.mxu3 %v300_v34  ;;  %550 = vmatpush.msra.mxu1 %v480_v7  ;;  %v470_v34 = vld [vmem:[#allocation6 + $0x398] sm:$0xff]  ;;  %v459_v7 = vld [vmem:[#allocation6 + $0x340] sm:$0xff] }
  0x65   :  { %2088 = vrot.lane.b32.xlu1 %v2073_v35, %s6575_s13  ;;  %v267_v35 = vld [vmem:[#allocation6 + $0x8] sm:$0xff] }
  0x66   :  { %391 = vmatpush.msrb.mxu0 %v267_v35  ;;  %371 = vmatpush.msra.mxu3 %v298_v37  ;;  %v441_v35 = vld [vmem:[#allocation6 + $0x2b0] sm:$0xff]  ;;  %v442_v37 = vld [vmem:[#allocation6 + $0x2b8] sm:$0xff] }
  0x67   :  { %551 = vmatpush.msra.mxu1 %v478_v10  ;;  %493 = vmatpush.msrb.mxu2 %v441_v35  ;;  %v423_v35 = vld [vmem:[#allocation6 + $0x220] sm:$0xff] }
  0x68   :  { %509 = vmatpush.msrb.mxu3 %v481_v62  ;;  %529 = vmatpush.msra.mxu0 %v450_v16  ;;  %v435_v62 = vld [vmem:[#allocation6 + $0x280] sm:$0xff]  ;;  %v457_v16 = vld [vmem:[#allocation6 + $0x330] sm:$0xff] }
  0x69   :  { %552 = vmatpush.msra.mxu1 %v476_v17  ;;  %v432_v17 = vld [vmem:[#allocation6 + $0x268] sm:$0xff] }
  0x6a   :  { %530 = vmatpush.msra.mxu0 %v448_v21  ;;  %v429_v21 = vld [vmem:[#allocation6 + $0x250] sm:$0xff] }
  0x6b   :  { %553 = vmatpush.msra.mxu1 %v474_v25  ;;  %v427_v25 = vld [vmem:[#allocation6 + $0x240] sm:$0xff] }
  0x6c   :  { %531 = vmatpush.msra.mxu0 %v446_v29  ;;  %v454_v29 = vld [vmem:[#allocation6 + $0x318] sm:$0xff] }
  0x6d   :  { %2094 = vrot.lane.b32.xlu1 %v2076_v53, %s6575_s13  ;;  %554 = vmatpush.msra.mxu1 %v472_v30 }
  0x6e   :  { %532 = vmatpush.msra.mxu0 %v444_v33  ;;  %v426_v33 = vld [vmem:[#allocation6 + $0x238] sm:$0xff] }
  0x6f   :  { %555 = vmatpush.msra.mxu1 %v470_v34  ;;  %v452_v34 = vld [vmem:[#allocation6 + $0x308] sm:$0xff] }
  0x70   :  { %533 = vmatpush.msra.mxu0 %v442_v37  ;;  %v6810_v37 = vperm.slane %v6735_v15, 0 }
  0x71   :  { %556 = vmatpush.msra.mxu1 %v468_v38  ;;  %v421_v38 = vld [vmem:[#allocation6 + $0x210] sm:$0xff] }
  0x75   :  { %2100 = vrot.lane.b32.xlu1 %v2079_v6, %s6575_s13  ;;  %v479_v6 = vld [vmem:[#allocation6 + $0x3e0] sm:$0xff] }
  0x76   :  { %510 = vmatpush.msrb.mxu3 %v479_v6  ;;  %v433_v6 = vld [vmem:[#allocation6 + $0x270] sm:$0xff] }
  0x78   :  { %511 = vmatpush.msrb.mxu3 %v477_v9  ;;  %v434_v9 = vld [vmem:[#allocation6 + $0x278] sm:$0xff] }
  0x7a   :  { %512 = vmatpush.msrb.mxu3 %v475_v13  ;;  %v431_v13 = vld [vmem:[#allocation6 + $0x260] sm:$0xff] }
  0x7c   :  { %513 = vmatpush.msrb.mxu3 %v473_v24  ;;  %v456_v24 = vld [vmem:[#allocation6 + $0x328] sm:$0xff] }
  0x7d   :  { %2263 = vrot.lane.b32.xlu1 %v6703_v2, %s6576_s14 }
  0x7e   :  { %514 = vmatpush.msrb.mxu3 %v471_v28  ;;  %v428_v28 = vld [vmem:[#allocation6 + $0x248] sm:$0xff] }
  0x80   :  { %515 = vmatpush.msrb.mxu3 %v469_v32  ;;  %v451_v32 = vld [vmem:[#allocation6 + $0x300] sm:$0xff] }
  0x82   :  { %516 = vmatpush.msrb.mxu3 %v467_v36  ;;  %v424_v36 = vld [vmem:[#allocation6 + $0x228] sm:$0xff] }
  0xa7   :  { %v6766_v40 = vpop.permute.xlu1 %1702 }
  0xaf   :  { %v241_v45 = vpop.f32.mrf.mxu0  ;;  %v6770_v47 = vpop.permute.xlu1 %1707 }
  0xb0   :  { %v261_v46 = vpop.f32.mrf.mxu1  ;;  %v242_v48 = vadd.f32 %v241_v45, %v218_v43  ;;  %v439_v43 = vld [vmem:[#allocation6 + $0x2a0] sm:$0xff]  ;;  %v440_v45 = vld [vmem:[#allocation6 + $0x2a8] sm:$0xff] }
  0xb1   :  { %v262_v49 = vadd.f32 %v261_v46, %v219_v44  ;;  %v465_v44 = vld [vmem:[#allocation6 + $0x370] sm:$0xff]  ;;  %v466_v46 = vld [vmem:[#allocation6 + $0x378] sm:$0xff]  ;;  %494 = vmatpush.msrb.mxu2 %v439_v43  ;;  %534 = vmatpush.msra.mxu0 %v440_v45  ;;  %v420_v43 = vld [vmem:[#allocation6 + $0x208] sm:$0xff]  ;;  %v331_v45 = vperm.slane %v6764_v39, 5 }
  0xb2   :  { %v264_v50 = vmax.f32 %v242_v48, 0.0  ;;  %517 = vmatpush.msrb.mxu3 %v465_v44  ;;  %v6803_v48 = vperm.slane %v1554_v42, 0  ;;  %557 = vmatpush.msra.mxu1 %v466_v46  ;;  %v419_v42 = vld [vmem:[#allocation6 + $0x200] sm:$0xff] }
  0xb3   :  { %v265_v51 = vmax.f32 %v262_v49, 0.0  ;;  %v437_v49 = vld [vmem:[#allocation6 + $0x290] sm:$0xff]  ;;  %v335_v46 = vperm.slane %v331_v45, 1  ;;  %v627_v45 = vld [vmem:[#allocation6 + $0x5b8] sm:$0xff] }
  0xb4   :  { %352 = vmatmul.f32.vlgmr.msra.gmra.mxu2 %v264_v50  ;;  %392 = vmatmul.f32.vlgmr.msrb.gmra.mxu0 %v264_v50  ;;  %v463_v50 = vld [vmem:[#allocation6 + $0x360] sm:$0xff] }
  0xb5   :  { %372 = vmatmul.f32.vlgmr.msra.gmra.mxu3 %v265_v51  ;;  %412 = vmatmul.f32.vlgmr.msrb.gmra.mxu1 %v265_v51  ;;  %v438_v51 = vld [vmem:[#allocation6 + $0x298] sm:$0xff] }
  0xb6   :  { %495 = vmatpush.msrb.mxu2 %v437_v49  ;;  %518 = vmatpush.msrb.mxu3 %v463_v50  ;;  %v330_v49 = vperm.slane %v6764_v39, 1 }
  0xb7   :  { %v6772_v52 = vpop.permute.xlu1 %1727  ;;  %535 = vmatpush.msra.mxu0 %v438_v51 }
  0xb8   :  { %496 = vmatpush.msrb.mxu2 %v435_v62  ;;  %519 = vmatpush.msrb.mxu3 %v461_v63  ;;  %v334_v63 = vperm.slane %v330_v49, 1  ;;  %v624_v49 = vld [vmem:[#allocation6 + $0x5a0] sm:$0xff] }
  0xba   :  { %497 = vmatpush.msrb.mxu2 %v433_v6  ;;  %520 = vmatpush.msrb.mxu3 %v459_v7 }
  0xbc   :  { %498 = vmatpush.msrb.mxu2 %v431_v13  ;;  %521 = vmatpush.msrb.mxu3 %v457_v16  ;;  %v1691_v16 = vmul.f32 %v6793_v3, %v6703_v2 }
  0xbe   :  { %499 = vmatpush.msrb.mxu2 %v429_v21  ;;  %1712 = vperm.xlu2 %6049, %v1691_v16   ;;  %v620_v16 = vld [vmem:[#allocation6 + $0x580] sm:$0xff] }
  0xbf   :  { %v6774_v53 = vpop.permute.xlu1 %1737 }
  0xc0   :  { %500 = vmatpush.msrb.mxu2 %v427_v25  ;;  %v634_v25 = vld [vmem:[#allocation6 + $0x5f0] sm:$0xff] }
  0xc2   :  { %501 = vmatpush.msrb.mxu2 %v425_v31 }
  0xc4   :  { %502 = vmatpush.msrb.mxu2 %v423_v35  ;;  %v603_v35 = vld [vmem:[#allocation6 + $0x4f8] sm:$0xff] }
  0xc6   :  { %503 = vmatpush.msrb.mxu2 %v421_v38  ;;  %v1697_v38 = vmul.f32 %v6810_v37, %v6703_v2 }
  0xc7   :  { %v6776_v54 = vpop.permute.xlu1 %1747 }
  0xc8   :  { %504 = vmatpush.msrb.mxu2 %v419_v42  ;;  %v600_v42 = vld [vmem:[#allocation6 + $0x4e0] sm:$0xff] }
  0xcf   :  { %v6778_v55 = vpop.permute.xlu1 %2082 }
  0xd0   :  { %9297 = vst [vmem:[#allocation25_spill] sm:$0xff] %v6778_v55  ;;  %v1792_v55 = vld [vmem:[#allocation15 + $0x110] sm:$0xff] }
  0xd7   :  { %v6780_v57 = vpop.permute.xlu1 %2088 }
  0xd8   :  { %9298 = vst [vmem:[#allocation26_spill] sm:$0xff] %v6780_v57  ;;  %v2186_v57 = vld [vmem:[#allocation15 + $0x278] sm:$0xff] }
  0xdf   :  { %v6782_v58 = vpop.permute.xlu1 %2094 }
  0xe0   :  { %9299 = vst [vmem:[#allocation27_spill] sm:$0xff] %v6782_v58 }
  0xe7   :  { %v6784_v59 = vpop.permute.xlu1 %2100 }
  0xe8   :  { %9300 = vst [vmem:[#allocation28_spill] sm:$0xff] %v6784_v59 }
  0xef   :  { %v6786_v60 = vpop.permute.xlu1 %2263 }
  0xf0   :  { %v2266_v61 = vmul.f32 %v6786_v60, %v6715_v5  ;;  %v2267_v0 = vmul.f32 %v6786_v60, %v6720_v8  ;;  %v2268_v22 = vmul.f32 %v6786_v60, %v6793_v3  ;;  %v2269_v41 = vmul.f32 %v6786_v60, %v6798_v26 }
  0xf1   :  { %v2272_v10 = vmul.f32 %v6786_v60, %v6803_v48  ;;  %v2273_v30 = vmul.f32 %v6786_v60, %v6730_v14  ;;  %v2274_v44 = vmul.f32 %v6786_v60, %v6810_v37 }
  0xf2   :  { %2279 = vperm.xlu1 %6048, %v2266_v61   ;;  %v464_v61 = vld [vmem:[#allocation6 + $0x368] sm:$0xff] }
  0xf3   :  { %558 = vmatpush.msra.mxu1 %v464_v61 }
  0xf5   :  { %559 = vmatpush.msra.mxu1 %v462_v1 }
  0xf7   :  { %560 = vmatpush.msra.mxu1 %v460_v12 }
  0xf9   :  { %561 = vmatpush.msra.mxu1 %v458_v19  ;;  %v1692_v19 = vmul.f32 %v6798_v26, %v6703_v2 }
  0xfa   :  { %2284 = vperm.xlu1 %6048, %v2267_v0   ;;  %v436_v0 = vld [vmem:[#allocation6 + $0x288] sm:$0xff] }
  0xfb   :  { %536 = vmatpush.msra.mxu0 %v436_v0  ;;  %562 = vmatpush.msra.mxu1 %v456_v24  ;;  %v1695_v24 = vmul.f32 %v6803_v48, %v6703_v2 }
  0xfc   :  { %1717 = vperm.xlu2 %6049, %v1692_v19   ;;  %v595_v19 = vld [vmem:[#allocation6 + $0x4b8] sm:$0xff] }
  0xfd   :  { %537 = vmatpush.msra.mxu0 %v434_v9  ;;  %563 = vmatpush.msra.mxu1 %v454_v29 }
  0xff   :  { %538 = vmatpush.msra.mxu0 %v432_v17  ;;  %564 = vmatpush.msra.mxu1 %v452_v34  ;;  %v628_v34 = vld [vmem:[#allocation6 + $0x5c0] sm:$0xff] }
 0x101   :  { %539 = vmatpush.msra.mxu0 %v430_v23 }
 0x102   :  { %2289 = vperm.xlu1 %6048, %v2268_v22   ;;  %v455_v22 = vld [vmem:[#allocation6 + $0x320] sm:$0xff] }
 0x103   :  { %522 = vmatpush.msrb.mxu3 %v455_v22  ;;  %540 = vmatpush.msra.mxu0 %v428_v28  ;;  %v1552_v22 = vrot.slane %v6708_v4, 4  ;;  %v632_v28 = vld [vmem:[#allocation6 + $0x5e0] sm:$0xff]  ;;  %v630_v4 = vld [vmem:[#allocation6 + $0x5d0] sm:$0xff] }
 0x104   :  { %1732 = vperm.xlu2 %6049, %v1695_v24  }
 0x105   :  { %523 = vmatpush.msrb.mxu3 %v453_v27  ;;  %541 = vmatpush.msra.mxu0 %v426_v33  ;;  %v6831_v23 = vperm.slane %v1552_v22, 0  ;;  %v635_v27 = vld [vmem:[#allocation6 + $0x5f8] sm:$0xff]  ;;  %v602_v33 = vld [vmem:[#allocation6 + $0x4f0] sm:$0xff] }
 0x106   :  { %702 = vmatpush.msrb.mxu1 %v635_v27  ;;  %642 = vmatpush.msra.mxu2 %v602_v33  ;;  %v618_v27 = vld [vmem:[#allocation6 + $0x570] sm:$0xff]  ;;  %v591_v33 = vld [vmem:[#allocation6 + $0x498] sm:$0xff] }
 0x107   :  { %524 = vmatpush.msrb.mxu3 %v451_v32  ;;  %542 = vmatpush.msra.mxu0 %v424_v36  ;;  %v1693_v29 = vmul.f32 %v6831_v23, %v6703_v2  ;;  %v631_v32 = vld [vmem:[#allocation6 + $0x5d8] sm:$0xff]  ;;  %v2069_v36 = vperm.slane %v6747_v20, 0 }
 0x108   :  { %643 = vmatpush.msra.mxu2 %v600_v42  ;;  %v615_v42 = vld [vmem:[#allocation6 + $0x558] sm:$0xff] }
 0x109   :  { %662 = vmatpush.msra.mxu3 %v634_v25  ;;  %1722 = vperm.xlu0 %6050, %v1693_v29   ;;  %v592_v25 = vld [vmem:[#allocation6 + $0x4a0] sm:$0xff]  ;;  %v619_v29 = vld [vmem:[#allocation6 + $0x578] sm:$0xff] }
 0x10a   :  { %2294 = vperm.xlu1 %6048, %v2269_v41   ;;  %v422_v41 = vld [vmem:[#allocation6 + $0x218] sm:$0xff] }
 0x10b   :  { %543 = vmatpush.msra.mxu0 %v422_v41  ;;  %663 = vmatpush.msra.mxu3 %v632_v28  ;;  %v629_v41 = vld [vmem:[#allocation6 + $0x5c8] sm:$0xff] }
 0x10c   :  { %1742 = vperm.xlu2 %6049, %v1697_v38   ;;  %v593_v28 = vld [vmem:[#allocation6 + $0x4a8] sm:$0xff]  ;;  %v1566_v38 = vrot.slane %v6747_v20, 5 }
 0x10d   :  { %544 = vmatpush.msra.mxu0 %v420_v43  ;;  %664 = vmatpush.msra.mxu3 %v630_v4  ;;  %v626_v43 = vld [vmem:[#allocation6 + $0x5b0] sm:$0xff] }
 0x10e   :  { %v590_v4 = vld [vmem:[#allocation6 + $0x490] sm:$0xff] }
 0x10f   :  { %682 = vmatpush.msrb.mxu0 %v603_v35  ;;  %665 = vmatpush.msra.mxu3 %v628_v34  ;;  %v588_v34 = vld [vmem:[#allocation6 + $0x480] sm:$0xff]  ;;  %v614_v35 = vld [vmem:[#allocation6 + $0x550] sm:$0xff] }
 0x111   :  { %2080 = vrot.lane.b32.xlu0 %v2069_v36, %s6575_s13  ;;  %666 = vmatpush.msra.mxu3 %v626_v43  ;;  %v589_v36 = vld [vmem:[#allocation6 + $0x488] sm:$0xff]  ;;  %v586_v43 = vld [vmem:[#allocation6 + $0x470] sm:$0xff] }
 0x112   :  { %2309 = vperm.xlu1 %6048, %v2272_v10  }
 0x113   :  { %667 = vmatpush.msra.mxu3 %v624_v49  ;;  %v2074_v49 = vperm.slane %v1566_v38, 0  ;;  %v1569_v38 = vrot.slane %v6757_v56, 1 }
 0x11a   :  { %2314 = vperm.xlu1 %6048, %v2273_v30   ;;  %v633_v30 = vld [vmem:[#allocation6 + $0x5e8] sm:$0xff] }
 0x11b   :  { %703 = vmatpush.msrb.mxu1 %v633_v30 }
 0x11d   :  { %704 = vmatpush.msrb.mxu1 %v631_v32  ;;  %v616_v32 = vld [vmem:[#allocation6 + $0x560] sm:$0xff] }
 0x11f   :  { %705 = vmatpush.msrb.mxu1 %v629_v41  ;;  %v1563_v41 = vrot.slane %v6747_v20, 2 }
 0x121   :  { %706 = vmatpush.msrb.mxu1 %v627_v45  ;;  %v587_v45 = vld [vmem:[#allocation6 + $0x478] sm:$0xff] }
 0x122   :  { %2319 = vperm.xlu1 %6048, %v2274_v44   ;;  %v601_v44 = vld [vmem:[#allocation6 + $0x4e8] sm:$0xff] }
 0x123   :  { %683 = vmatpush.msrb.mxu0 %v601_v44  ;;  %v612_v44 = vld [vmem:[#allocation6 + $0x540] sm:$0xff] }
 0x12a   :  { %2793 = vrot.lane.b32.xlu1 %v6703_v2, %s6577_s6 }
 0x131   :  { %v393_v50 = vpop.f32.mrf.mxu0 }
 0x132   :  { %v394_v51 = vadd.f32 %v393_v50, %v335_v46  ;;  %v413_v61 = vpop.f32.mrf.mxu1  ;;  %v598_v46 = vld [vmem:[#allocation6 + $0x4d0] sm:$0xff]  ;;  %v599_v50 = vld [vmem:[#allocation6 + $0x4d8] sm:$0xff] }
 0x133   :  { %644 = vmatpush.msra.mxu2 %v598_v46  ;;  %684 = vmatpush.msrb.mxu0 %v599_v50  ;;  %v613_v46 = vld [vmem:[#allocation6 + $0x548] sm:$0xff]  ;;  %v2071_v50 = vperm.slane %v1563_v41, 0  ;;  %v575_v41 = vld [vmem:[#allocation6 + $0x418] sm:$0xff] }
 0x134   :  { %v414_v62 = vadd.f32 %v413_v61, %v394_v51  ;;  %v625_v51 = vld [vmem:[#allocation6 + $0x5a8] sm:$0xff] }
 0x135   :  { %707 = vmatpush.msrb.mxu1 %v625_v51  ;;  %v584_v51 = vld [vmem:[#allocation6 + $0x460] sm:$0xff] }
 0x136   :  { %v417_v0 = vmax.f32 %v414_v62, 0.0  ;;  %v1557_v62 = vrot.slane %v6735_v15, 2  ;;  %v621_v15 = vld [vmem:[#allocation6 + $0x588] sm:$0xff] }
 0x137   :  { %v353_v1 = vpop.f32.mrf.mxu2 }
 0x138   :  { %v354_v6 = vadd.f32 %v353_v1, %v334_v63  ;;  %525 = vmatmul.f32.vlgmr.msrb.gmra.mxu3 %v417_v0  ;;  %565 = vmatmul.f32.vlgmr.msra.gmra.mxu1 %v417_v0  ;;  %v373_v7 = vpop.f32.mrf.mxu3  ;;  %v596_v63 = vld [vmem:[#allocation6 + $0x4c0] sm:$0xff]  ;;  %v622_v0 = vld [vmem:[#allocation6 + $0x590] sm:$0xff]  ;;  %v597_v1 = vld [vmem:[#allocation6 + $0x4c8] sm:$0xff] }
 0x139   :  { %645 = vmatpush.msra.mxu2 %v596_v63  ;;  %668 = vmatpush.msra.mxu3 %v622_v0  ;;  %v585_v63 = vld [vmem:[#allocation6 + $0x468] sm:$0xff] }
 0x13a   :  { %v374_v9 = vadd.f32 %v373_v7, %v354_v6  ;;  %v1564_v6 = vrot.slane %v6747_v20, 3  ;;  %v6847_v7 = vperm.slane %v1557_v62, 0  ;;  %685 = vmatpush.msrb.mxu0 %v597_v1  ;;  %v610_v62 = vld [vmem:[#allocation6 + $0x530] sm:$0xff]  ;;  %v611_v1 = vld [vmem:[#allocation6 + $0x538] sm:$0xff] }
 0x13b   :  { %669 = vmatpush.msra.mxu3 %v620_v16  ;;  %v583_v16 = vld [vmem:[#allocation6 + $0x458] sm:$0xff] }
 0x13c   :  { %v416_v10 = vmax.f32 %v374_v9, 0.0  ;;  %v623_v9 = vld [vmem:[#allocation6 + $0x598] sm:$0xff]  ;;  %v2072_v22 = vperm.slane %v1564_v6, 0  ;;  %v1699_v24 = vmul.f32 %v6847_v7, %v6703_v2  ;;  %686 = vmatpush.msrb.mxu0 %v595_v19  ;;  %v617_v2 = vld [vmem:[#allocation6 + $0x568] sm:$0xff] }
 0x13d   :  { %708 = vmatpush.msrb.mxu1 %v623_v9  ;;  %670 = vmatpush.msra.mxu3 %v618_v27  ;;  %v582_v9 = vld [vmem:[#allocation6 + $0x450] sm:$0xff]  ;;  %v609_v19 = vld [vmem:[#allocation6 + $0x528] sm:$0xff]  ;;  %v607_v27 = vld [vmem:[#allocation6 + $0x518] sm:$0xff] }
 0x13e   :  { %505 = vmatmul.f32.vlgmr.msrb.gmra.mxu2 %v416_v10  ;;  %545 = vmatmul.f32.vlgmr.msra.gmra.mxu0 %v416_v10  ;;  %v594_v10 = vld [vmem:[#allocation6 + $0x4b0] sm:$0xff] }
 0x13f   :  { %646 = vmatpush.msra.mxu2 %v594_v10  ;;  %709 = vmatpush.msrb.mxu1 %v621_v15  ;;  %v608_v10 = vld [vmem:[#allocation6 + $0x520] sm:$0xff]  ;;  %v1567_v15 = vrot.slane %v6747_v20, 6 }
 0x140   :  { %2086 = vrot.lane.b32.xlu0 %v2072_v22, %s6575_s13  ;;  %1752 = vperm.xlu2 %6049, %v1699_v24   ;;  %v580_v22 = vld [vmem:[#allocation6 + $0x440] sm:$0xff]  ;;  %v606_v24 = vld [vmem:[#allocation6 + $0x510] sm:$0xff] }
 0x141   :  { %647 = vmatpush.msra.mxu2 %v592_v25  ;;  %687 = vmatpush.msrb.mxu0 %v593_v28  ;;  %v581_v25 = vld [vmem:[#allocation6 + $0x448] sm:$0xff]  ;;  %v578_v28 = vld [vmem:[#allocation6 + $0x430] sm:$0xff] }
 0x142   :  { %710 = vmatpush.msrb.mxu1 %v619_v29  ;;  %671 = vmatpush.msra.mxu3 %v616_v32  ;;  %v604_v29 = vld [vmem:[#allocation6 + $0x500] sm:$0xff]  ;;  %v605_v32 = vld [vmem:[#allocation6 + $0x508] sm:$0xff] }
 0x143   :  { %648 = vmatpush.msra.mxu2 %v590_v4  ;;  %688 = vmatpush.msrb.mxu0 %v591_v33  ;;  %v579_v4 = vld [vmem:[#allocation6 + $0x438] sm:$0xff]  ;;  %v2077_v33 = vperm.slane %v6757_v56, 0  ;;  %v2271_v56 = vmul.f32 %v6786_v60, %v6725_v11 }
 0x144   :  { %711 = vmatpush.msrb.mxu1 %v617_v2  ;;  %672 = vmatpush.msra.mxu3 %v614_v35  ;;  %v2075_v2 = vperm.slane %v1567_v15, 0  ;;  %v577_v35 = vld [vmem:[#allocation6 + $0x428] sm:$0xff] }
 0x145   :  { %649 = vmatpush.msra.mxu2 %v588_v34  ;;  %689 = vmatpush.msrb.mxu0 %v589_v36  ;;  %v576_v34 = vld [vmem:[#allocation6 + $0x420] sm:$0xff]  ;;  %v574_v36 = vld [vmem:[#allocation6 + $0x410] sm:$0xff] }
 0x146   :  { %712 = vmatpush.msrb.mxu1 %v615_v42  ;;  %673 = vmatpush.msra.mxu3 %v612_v44  ;;  %v572_v42 = vld [vmem:[#allocation6 + $0x400] sm:$0xff]  ;;  %v6869_v44 = vld [vmem:[#allocation2] sm:$0xff] }
 0x147   :  { %650 = vmatpush.msra.mxu2 %v586_v43  ;;  %690 = vmatpush.msrb.mxu0 %v587_v45  ;;  %v573_v43 = vld [vmem:[#allocation6 + $0x408] sm:$0xff]  ;;  %v6872_v45 = vmul.f32 0.5, %v6869_v44 }
 0x148   :  { %713 = vmatpush.msrb.mxu1 %v613_v46  ;;  %2090 = vrot.lane.b32.xlu0 %v2074_v49, %s6575_s13  ;;  %v2078_v46 = vperm.slane %v1569_v38, 0  ;;  %v752_v38 = vld [vmem:[%s9265_s4 + $0xe0] sm:$0xff] }
 0x149   :  { %2084 = vrot.lane.b32.xlu2 %v2071_v50, %s6575_s13  ;;  %651 = vmatpush.msra.mxu2 %v584_v51  ;;  %9301 = vst [vmem:[#allocation29_spill] sm:$0xff] %v6872_v45  ;;  %v2270_v50 = vmul.f32 %v6786_v60, %v6831_v23 }
 0x14a   :  { %674 = vmatpush.msra.mxu3 %v610_v62  ;;  %691 = vmatpush.msrb.mxu0 %v585_v63  ;;  %v484_v62 = vperm.slane %v6764_v39, 6 }
 0x14b   :  { %714 = vmatpush.msrb.mxu1 %v611_v1  ;;  %652 = vmatpush.msra.mxu2 %v582_v9  ;;  %v483_v1 = vperm.slane %v6764_v39, 2  ;;  %v2276_v9 = vmul.f32 %v6786_v60, %v6847_v7 }
 0x14c   :  { %675 = vmatpush.msra.mxu3 %v608_v10  ;;  %692 = vmatpush.msrb.mxu0 %v583_v16  ;;  %v488_v63 = vperm.slane %v484_v62, 2  ;;  %v2275_v10 = vmul.f32 %v6786_v60, %v6740_v18  ;;  %v748_v62 = vld [vmem:[%s9265_s4 + $0xc0] sm:$0xff] }
 0x14d   :  { %715 = vmatpush.msrb.mxu1 %v609_v19  ;;  %653 = vmatpush.msra.mxu2 %v580_v22 }
 0x14e   :  { %676 = vmatpush.msra.mxu3 %v606_v24  ;;  %693 = vmatpush.msrb.mxu0 %v581_v25  ;;  %v487_v24 = vperm.slane %v483_v1, 2  ;;  %v747_v1 = vld [vmem:[%s9265_s4 + $0xb8] sm:$0xff] }
 0x14f   :  { %716 = vmatpush.msrb.mxu1 %v607_v27  ;;  %654 = vmatpush.msra.mxu2 %v578_v28 }
 0x150   :  { %677 = vmatpush.msra.mxu3 %v604_v29  ;;  %694 = vmatpush.msrb.mxu0 %v579_v4 }
 0x151   :  { %717 = vmatpush.msrb.mxu1 %v605_v32  ;;  %2096 = vrot.lane.b32.xlu0 %v2077_v33, %s6575_s13 }
 0x152   :  { %2092 = vrot.lane.b32.xlu2 %v2075_v2, %s6575_s13  ;;  %655 = vmatpush.msra.mxu2 %v576_v34  ;;  %v755_v2 = vld [vmem:[%s9265_s4 + $0xf8] sm:$0xff]  ;;  %v753_v34 = vld [vmem:[%s9265_s4 + $0xe8] sm:$0xff] }
 0x153   :  { %695 = vmatpush.msrb.mxu0 %v577_v35  ;;  %780 = vmatpush.msrb.mxu3 %v755_v2  ;;  %v727_v2 = vld [vmem:[%s9265_s4 + $0x18] sm:$0xff] }
 0x154   :  { %656 = vmatpush.msra.mxu2 %v574_v36  ;;  %v739_v36 = vld [vmem:[%s9265_s4 + $0x78] sm:$0xff] }
 0x155   :  { %696 = vmatpush.msrb.mxu0 %v575_v41  ;;  %v738_v41 = vld [vmem:[%s9265_s4 + $0x70] sm:$0xff] }
 0x156   :  { %657 = vmatpush.msra.mxu2 %v572_v42  ;;  %v751_v42 = vld [vmem:[%s9265_s4 + $0xd8] sm:$0xff] }
 0x157   :  { %697 = vmatpush.msrb.mxu0 %v573_v43  ;;  %v737_v43 = vld [vmem:[%s9265_s4 + $0x68] sm:$0xff] }
 0x158   :  { %760 = vmatpush.msrb.mxu2 %v739_v36  ;;  %v726_v36 = vld [vmem:[%s9265_s4 + $0x10] sm:$0xff] }
 0x159   :  { %2148 = vrot.lane.b32.xlu0 %v6872_v45, %s6575_s13 }
 0x15a   :  { %2098 = vrot.lane.b32.xlu2 %v2078_v46, %s6575_s13  ;;  %v750_v46 = vld [vmem:[%s9265_s4 + $0xd0] sm:$0xff]  ;;  %761 = vmatpush.msrb.mxu2 %v738_v41  ;;  %v724_v41 = vld [vmem:[%s9265_s4] sm:$0xff] }
 0x15c   :  { %762 = vmatpush.msrb.mxu2 %v737_v43 }
 0x161   :  { %2299 = vperm.xlu0 %6050, %v2270_v50  }
 0x162   :  { %2304 = vperm.xlu2 %6049, %v2271_v56   ;;  %v749_v56 = vld [vmem:[%s9265_s4 + $0xc8] sm:$0xff] }
 0x164   :  { %v6818_v12 = vpop.permute.xlu1 %2279 }
 0x169   :  { %2324 = vperm.xlu0 %6050, %v2275_v10   ;;  %v732_v10 = vld [vmem:[%s9265_s4 + $0x40] sm:$0xff] }
 0x16a   :  { %2329 = vperm.xlu2 %6049, %v2276_v9   ;;  %v746_v9 = vld [vmem:[%s9265_s4 + $0xb0] sm:$0xff] }
 0x16c   :  { %v6820_v13 = vpop.permute.xlu1 %2284 }
 0x172   :  { %2678 = vrot.lane.b32.xlu2 %v6872_v45, %s6578_s24 }
 0x174   :  { %v6824_v17 = vpop.permute.xlu1 %2289 }
 0x17c   :  { %v6828_v21 = vpop.permute.xlu1 %2294 }
 0x184   :  { %v6837_v31 = vpop.permute.xlu1 %2309 }
 0x18c   :  { %v6843_v61 = vpop.permute.xlu1 %2314 }
 0x194   :  { %v6852_v30 = vpop.permute.xlu1 %2319 }
 0x19c   :  { %v6856_v0 = vpop.permute.xlu1 %2793 }
 0x19d   :  { %v2796_v6 = vmul.f32 %v6856_v0, %v6715_v5  ;;  %v2797_v20 = vmul.f32 %v6856_v0, %v6720_v8  ;;  %v2798_v49 = vmul.f32 %v6856_v0, %v6793_v3  ;;  %v2799_v51 = vmul.f32 %v6856_v0, %v6798_v26 }
 0x19e   :  { %v2802_v19 = vmul.f32 %v6856_v0, %v6803_v48  ;;  %v2803_v60 = vmul.f32 %v6856_v0, %v6730_v14  ;;  %v2804_v33 = vmul.f32 %v6856_v0, %v6810_v37 }
 0x19f   :  { %2809 = vperm.xlu1 %6048, %v2796_v6  }
 0x1a7   :  { %2814 = vperm.xlu1 %6048, %v2797_v20   ;;  %v754_v20 = vld [vmem:[%s9265_s4 + $0xf0] sm:$0xff] }
 0x1a8   :  { %781 = vmatpush.msrb.mxu3 %v754_v20  ;;  %v740_v20 = vld [vmem:[%s9265_s4 + $0x80] sm:$0xff] }
 0x1aa   :  { %782 = vmatpush.msrb.mxu3 %v753_v34  ;;  %v2806_v34 = vmul.f32 %v6856_v0, %v6847_v7 }
 0x1ac   :  { %783 = vmatpush.msrb.mxu3 %v752_v38  ;;  %v725_v38 = vld [vmem:[%s9265_s4 + $0x8] sm:$0xff] }
 0x1ae   :  { %784 = vmatpush.msrb.mxu3 %v751_v42 }
 0x1af   :  { %2819 = vperm.xlu1 %6048, %v2798_v49   ;;  %v736_v49 = vld [vmem:[%s9265_s4 + $0x60] sm:$0xff] }
 0x1b0   :  { %785 = vmatpush.msrb.mxu3 %v750_v46  ;;  %763 = vmatpush.msrb.mxu2 %v736_v49 }
 0x1b2   :  { %786 = vmatpush.msrb.mxu3 %v749_v56  ;;  %v637_v56 = vperm.slane %v6764_v39, 7 }
 0x1b4   :  { %787 = vmatpush.msrb.mxu3 %v748_v62  ;;  %v641_v62 = vperm.slane %v637_v56, 3 }
 0x1b5   :  { %v566_v15 = vpop.f32.mrf.mxu1 }
 0x1b6   :  { %788 = vmatpush.msrb.mxu3 %v747_v1 }
 0x1b7   :  { %2824 = vperm.xlu1 %6048, %v2799_v51   ;;  %v735_v51 = vld [vmem:[%s9265_s4 + $0x58] sm:$0xff] }
 0x1b8   :  { %764 = vmatpush.msrb.mxu2 %v735_v51  ;;  %789 = vmatpush.msrb.mxu3 %v746_v9 }
 0x1bb   :  { %v546_v6 = vpop.f32.mrf.mxu0  ;;  %v526_v29 = vpop.f32.mrf.mxu3 }
 0x1bc   :  { %v547_v16 = vadd.f32 %v546_v6, %v488_v63  ;;  %v734_v63 = vld [vmem:[%s9265_s4 + $0x50] sm:$0xff]  ;;  %v733_v6 = vld [vmem:[%s9265_s4 + $0x48] sm:$0xff] }
 0x1bd   :  { %765 = vmatpush.msrb.mxu2 %v734_v63  ;;  %v636_v63 = vperm.slane %v6764_v39, 3  ;;  %v2800_v39 = vmul.f32 %v6856_v0, %v6831_v23 }
 0x1be   :  { %v567_v22 = vadd.f32 %v566_v15, %v547_v16  ;;  %v745_v16 = vld [vmem:[%s9265_s4 + $0xa8] sm:$0xff]  ;;  %v731_v15 = vld [vmem:[%s9265_s4 + $0x38] sm:$0xff] }
 0x1bf   :  { %2839 = vperm.xlu1 %6048, %v2802_v19   ;;  %766 = vmatpush.msrb.mxu2 %v733_v6 }
 0x1c0   :  { %v570_v25 = vmax.f32 %v567_v22, 0.0  ;;  %790 = vmatpush.msrb.mxu3 %v745_v16  ;;  %v744_v22 = vld [vmem:[%s9265_s4 + $0xa0] sm:$0xff]  ;;  %v640_v16 = vperm.slane %v636_v63, 3  ;;  %2829 = vperm.xlu0 %6050, %v2800_v39  }
 0x1c1   :  { %v506_v27 = vpop.f32.mrf.mxu2  ;;  %767 = vmatpush.msrb.mxu2 %v732_v10  ;;  %v833_v39 = vld [vmem:[#allocation12 + $0x80] sm:$0xff] }
 0x1c2   :  { %v507_v28 = vadd.f32 %v506_v27, %v487_v24  ;;  %678 = vmatmul.f32.vlgmr.msra.gmra.mxu3 %v570_v25  ;;  %718 = vmatmul.f32.vlgmr.msrb.gmra.mxu1 %v570_v25  ;;  %v2801_v24 = vmul.f32 %v6856_v0, %v6725_v11  ;;  %v730_v25 = vld [vmem:[%s9265_s4 + $0x30] sm:$0xff]  ;;  %v743_v27 = vld [vmem:[%s9265_s4 + $0x98] sm:$0xff] }
 0x1c3   :  { %768 = vmatpush.msrb.mxu2 %v731_v15  ;;  %791 = vmatpush.msrb.mxu3 %v744_v22 }
 0x1c4   :  { %v527_v4 = vadd.f32 %v526_v29, %v507_v28  ;;  %2834 = vperm.xlu2 %6049, %v2801_v24   ;;  %v729_v28 = vld [vmem:[%s9265_s4 + $0x28] sm:$0xff]  ;;  %v742_v29 = vld [vmem:[%s9265_s4 + $0x90] sm:$0xff]  ;;  %867 = vmatpush.msra.mxu0 %v833_v39 }
 0x1c5   :  { %769 = vmatpush.msrb.mxu2 %v730_v25  ;;  %792 = vmatpush.msrb.mxu3 %v743_v27  ;;  %v819_v39 = vld [vmem:[#allocation12 + $0x10] sm:$0xff] }
 0x1c6   :  { %v569_v32 = vmax.f32 %v527_v4, 0.0  ;;  %v6984_v4 = vpop.permute.xlu2 %1712 }
 0x1c7   :  { %2844 = vperm.xlu1 %6048, %v2803_v60   ;;  %770 = vmatpush.msrb.mxu2 %v729_v28  ;;  %v728_v60 = vld [vmem:[%s9265_s4 + $0x20] sm:$0xff] }
 0x1c8   :  { %658 = vmatmul.f32.vlgmr.msra.gmra.mxu2 %v569_v32  ;;  %698 = vmatmul.f32.vlgmr.msrb.gmra.mxu0 %v569_v32  ;;  %v741_v32 = vld [vmem:[%s9265_s4 + $0x88] sm:$0xff]  ;;  %s6580_s4 = smov 124  }
 0x1c9   :  { %793 = vmatpush.msrb.mxu3 %v742_v29  ;;  %771 = vmatpush.msrb.mxu2 %v728_v60 }
 0x1cb   :  { %794 = vmatpush.msrb.mxu3 %v741_v32  ;;  %772 = vmatpush.msrb.mxu2 %v727_v2 }
 0x1cc   :  { %2859 = vperm.xlu2 %6049, %v2806_v34  }
 0x1cd   :  { %795 = vmatpush.msrb.mxu3 %v740_v20  ;;  %773 = vmatpush.msrb.mxu2 %v726_v36 }
 0x1ce   :  { %v7011_v42 = vpop.permute.xlu2 %1717 }
 0x1cf   :  { %2849 = vperm.xlu1 %6048, %v2804_v33   ;;  %774 = vmatpush.msrb.mxu2 %v725_v38  ;;  %v2805_v38 = vmul.f32 %v6856_v0, %v6740_v18 }
 0x1d1   :  { %775 = vmatpush.msrb.mxu2 %v724_v41  ;;  %2854 = vperm.xlu0 %6050, %v2805_v38   ;;  %v846_v38 = vld [vmem:[#allocation12 + $0xe8] sm:$0xff] }
 0x1d2   :  { %1127 = vmatpush.msra.mxu3 %v846_v38 }
 0x1d6   :  { %v7017_v49 = vpop.permute.xlu2 %1732 }
 0x1d7   :  { %3320 = vrot.lane.b32.xlu1 %v6869_v44, %s6579_s2 }
 0x1de   :  { %v7023_v1 = vpop.permute.xlu2 %1742 }
 0x1e6   :  { %v7029_v2 = vpop.permute.xlu2 %1752 }
 0x1ee   :  { %v7035_v41 = vpop.permute.xlu2 %2084 }
 0x1ef   :  { %9302 = vst [vmem:[#allocation30_spill] sm:$0xff] %v7035_v41 }
 0x1f6   :  { %v7041_v63 = vpop.permute.xlu2 %2092 }
 0x1f7   :  { %9303 = vst [vmem:[#allocation31_spill] sm:$0xff] %v7041_v63  ;;  %v1801_v63 = vld [vmem:[#allocation15 + $0x158] sm:$0xff] }
 0x211   :  { %v6910_v35 = vpop.permute.xlu1 %2809 }
 0x219   :  { %v6936_v50 = vpop.permute.xlu1 %2814 }
 0x221   :  { %v6962_v19 = vpop.permute.xlu1 %2819 }
 0x229   :  { %v6992_v33 = vpop.permute.xlu1 %2824 }
 0x231   :  { %v7013_v43 = vpop.permute.xlu1 %2839 }
 0x239   :  { %v7015_v46 = vpop.permute.xlu1 %2844 }
 0x23f   :  { %v719_v10 = vpop.f32.mrf.mxu1 }
 0x241   :  { %v7020_v51 = vpop.permute.xlu1 %2849 }
 0x245   :  { %v699_v6 = vpop.f32.mrf.mxu0  ;;  %v679_v60 = vpop.f32.mrf.mxu3 }
 0x246   :  { %v700_v9 = vadd.f32 %v699_v6, %v641_v62  ;;  %v7046_v6 = vpop.permute.xlu2 %2098 }
 0x247   :  { %9304 = vst [vmem:[#allocation32_spill] sm:$0xff] %v7046_v6 }
 0x248   :  { %v720_v15 = vadd.f32 %v719_v10, %v700_v9 }
 0x249   :  { %v3321_v22 = vpop.permute.xlu1 %3320 }
 0x24a   :  { %v723_v24 = vmax.f32 %v720_v15, 0.0  ;;  %v3325_v27 = vmul.f32 %v3321_v22, %v6793_v3  ;;  %v3324_v28 = vmul.f32 %v3321_v22, %v6720_v8  ;;  %v3328_v34 = vmul.f32 %v3321_v22, %v6725_v11 }
 0x24b   :  { %v659_v25 = vpop.f32.mrf.mxu2  ;;  %v3327_v36 = vmul.f32 %v3321_v22, %v6831_v23  ;;  %v3329_v56 = vmul.f32 %v3321_v22, %v6803_v48  ;;  %v3330_v62 = vmul.f32 %v3321_v22, %v6730_v14  ;;  %v3332_v0 = vmul.f32 %v3321_v22, %v6740_v18 }
 0x24c   :  { %v660_v29 = vadd.f32 %v659_v25, %v640_v16  ;;  %3346 = vperm.xlu1 %6048, %v3325_v27   ;;  %796 = vmatmul.f32.vlgmr.msrb.gmra.mxu3 %v723_v24  ;;  %v3331_v15 = vmul.f32 %v3321_v22, %v6810_v37  ;;  %v3333_v27 = vmul.f32 %v3321_v22, %v6847_v7 }
 0x24d   :  { %3341 = vperm.xlu2 %6049, %v3324_v28  }
 0x24e   :  { %v680_v32 = vadd.f32 %v679_v60, %v660_v29  ;;  %v7048_v9 = vpop.permute.xlu2 %2304  ;;  %v3323_v60 = vmul.f32 %v3321_v22, %v6715_v5 }
 0x250   :  { %v722_v20 = vmax.f32 %v680_v32, 0.0  ;;  %3336 = vperm.xlu0 %6050, %v3323_v60  }
 0x252   :  { %776 = vmatmul.f32.vlgmr.msrb.gmra.mxu2 %v722_v20  ;;  %v3326_v20 = vmul.f32 %v3321_v22, %v6798_v26 }
 0x254   :  { %3361 = vperm.xlu1 %6048, %v3328_v34   ;;  %v834_v34 = vld [vmem:[#allocation12 + $0x88] sm:$0xff] }
 0x255   :  { %3356 = vperm.xlu2 %6049, %v3327_v36   ;;  %v845_v36 = vld [vmem:[#allocation12 + $0xe0] sm:$0xff]  ;;  %887 = vmatpush.msra.mxu1 %v834_v34  ;;  %v836_v34 = vld [vmem:[#allocation12 + $0x98] sm:$0xff] }
 0x256   :  { %v7050_v10 = vpop.permute.xlu2 %2329  ;;  %1107 = vmatpush.msra.mxu2 %v845_v36  ;;  %v801_v36 = vld [vmem:[#allocation10] sm:$0xff] }
 0x258   :  { %3351 = vperm.xlu0 %6050, %v3326_v20  }
 0x25c   :  { %3850 = vrot.lane.b32.xlu1 %v6869_v44, %s6580_s4 }
 0x25d   :  { %3366 = vperm.xlu2 %6049, %v3329_v56   ;;  %v817_v56 = vld [vmem:[#allocation12] sm:$0xff] }
 0x25e   :  { %v7052_v16 = vpop.permute.xlu2 %2678  ;;  %868 = vmatpush.msra.mxu0 %v817_v56  ;;  %v820_v56 = vld [vmem:[#allocation12 + $0x18] sm:$0xff] }
 0x25f   :  { %9305 = vst [vmem:[#allocation33_spill] sm:$0xff] %v7052_v16  ;;  %v802_v16 = vld [vmem:[#allocation10 + $0x8] sm:$0xff] }
 0x264   :  { %3371 = vperm.xlu1 %6048, %v3330_v62   ;;  %v818_v62 = vld [vmem:[#allocation12 + $0x8] sm:$0xff] }
 0x265   :  { %4380 = vrot.lane.b32.xlu2 %v6869_v44, %s6581_s11  ;;  %888 = vmatpush.msra.mxu1 %v818_v62 }
 0x266   :  { %v7055_v24 = vpop.permute.xlu2 %2834 }
 0x267   :  { %927 = vmatpush.msrb.mxu1 %v836_v34 }
 0x269   :  { %928 = vmatpush.msrb.mxu1 %v820_v56 }
 0x26c   :  { %3381 = vperm.xlu1 %6048, %v3332_v0   ;;  %v829_v0 = vld [vmem:[#allocation12 + $0x60] sm:$0xff] }
 0x26d   :  { %3376 = vperm.xlu2 %6049, %v3331_v15   ;;  %v830_v15 = vld [vmem:[#allocation12 + $0x68] sm:$0xff]  ;;  %1108 = vmatpush.msra.mxu2 %v829_v0 }
 0x26e   :  { %v7057_v25 = vpop.permute.xlu2 %2859  ;;  %1128 = vmatpush.msra.mxu3 %v830_v15 }
 0x26f   :  { %1188 = vmatpush.msrb.mxu2 %v801_v36 }
 0x270   :  { %1208 = vmatpush.msrb.mxu3 %v802_v16 }
 0x275   :  { %3386 = vperm.xlu2 %6049, %v3333_v27   ;;  %v835_v27 = vld [vmem:[#allocation12 + $0x90] sm:$0xff] }
 0x276   :  { %907 = vmatpush.msrb.mxu0 %v835_v27 }
 0x278   :  { %908 = vmatpush.msrb.mxu0 %v819_v39  ;;  %v6051_v39 = vld [vmem:[#allocation9] ss:$0 sm:$0xff] }
 0x2a7   :  { %v7060_v28 = vpop.permute.xlu2 %3341 }
 0x2af   :  { %v7062_v29 = vpop.permute.xlu2 %3356 }
 0x2b7   :  { %v7065_v32 = vpop.permute.xlu2 %3366 }
 0x2be   :  { %v7068_v60 = vpop.permute.xlu1 %3346 }
 0x2bf   :  { %v7070_v22 = vpop.permute.xlu2 %4380 }
 0x2c0   :  { %v4383_v20 = vmul.f32 %v7070_v22, %v6715_v5  ;;  %v4384_v16 = vmul.f32 %v7070_v22, %v6720_v8 }
 0x2c2   :  { %4396 = vperm.xlu2 %6049, %v4383_v20  }
 0x2c6   :  { %v7074_v38 = vpop.permute.xlu1 %3361 }
 0x2ce   :  { %v7076_v62 = vpop.permute.xlu1 %3850 }
 0x2cf   :  { %v3853_v0 = vmul.f32 %v7076_v62, %v6715_v5  ;;  %v3855_v15 = vmul.f32 %v7076_v62, %v6793_v3  ;;  %v3854_v27 = vmul.f32 %v7076_v62, %v6720_v8  ;;  %v3856_v56 = vmul.f32 %v7076_v62, %v6798_v26  ;;  %v797_v36 = vpop.f32.mrf.mxu3 }
 0x2d0   :  { %v3857_v59 = vmul.f32 %v7076_v62, %v6831_v23 }
 0x2d1   :  { %3866 = vperm.xlu1 %6048, %v3853_v0   ;;  %3876 = vperm.xlu2 %6049, %v3855_v15   ;;  %v837_v0 = vld [vmem:[#allocation12 + $0xa0] sm:$0xff]  ;;  %v838_v15 = vld [vmem:[#allocation12 + $0xa8] sm:$0xff] }
 0x2d2   :  { %3871 = vperm.xlu0 %6050, %v3854_v27   ;;  %v805_v27 = vld [vmem:[#allocation10 + $0x20] sm:$0xff] }
 0x2d5   :  { %v777_v20 = vpop.f32.mrf.mxu2 }
 0x2d6   :  { %v778_v34 = vadd.f32 %v6051_v39, %v777_v20  ;;  %v806_v39 = vld [vmem:[#allocation10 + $0x28] sm:$0xff] }
 0x2d7   :  { %v822_v20 = vld [vmem:[#allocation12 + $0x28] sm:$0xff] }
 0x2d8   :  { %v798_v6 = vadd.f32 %v797_v36, %v778_v34  ;;  %v4387_v34 = vmul.f32 %v7070_v22, %v6831_v23  ;;  %v840_v36 = vld [vmem:[#allocation12 + $0xb8] sm:$0xff] }
 0x2d9   :  { %4401 = vperm.xlu1 %6048, %v4384_v16   ;;  %3881 = vperm.xlu2 %6049, %v3856_v56   ;;  %v4388_v16 = vmul.f32 %v7070_v22, %v6725_v11  ;;  %v839_v56 = vld [vmem:[#allocation12 + $0xb0] sm:$0xff] }
 0x2da   :  { %v7090_v58 = vmax.f32 %v798_v6, 0.0  ;;  %3886 = vperm.xlu0 %6050, %v3857_v59   ;;  %v821_v6 = vld [vmem:[#allocation12 + $0x20] sm:$0xff]  ;;  %v4385_v59 = vmul.f32 %v7070_v22, %v6793_v3 }
 0x2dc   :  { %5893 = vmatmul.msk.f32.vlgmr.msra.gmra.mxu0 %vm849_vm1, %v7090_v58  ;;  %5894 = vmatmul.msk.f32.vlgmr.msra.gmra.mxu1 %vm849_vm1, %v7090_v58 }
 0x2dd   :  { %5905 = vmatmul.msk.f32.vlgmr.msra.gmra.mxu2 %vm849_vm1, %v7090_v58  ;;  %5906 = vmatmul.msk.f32.vlgmr.msra.gmra.mxu3 %vm849_vm1, %v7090_v58 }
 0x2de   :  { %947 = vmatpush.msra.mxu0 %v837_v0  ;;  %967 = vmatpush.msra.mxu1 %v838_v15  ;;  %v809_v0 = vld [vmem:[#allocation10 + $0x40] sm:$0xff]  ;;  %v810_v15 = vld [vmem:[#allocation10 + $0x48] sm:$0xff] }
 0x2df   :  { %1268 = vmatpush.msra.mxu2 %v805_v27  ;;  %1288 = vmatpush.msra.mxu3 %v806_v39  ;;  %v823_v27 = vld [vmem:[#allocation12 + $0x30] sm:$0xff]  ;;  %v824_v39 = vld [vmem:[#allocation12 + $0x38] sm:$0xff] }
 0x2e0   :  { %948 = vmatpush.msra.mxu0 %v821_v6  ;;  %968 = vmatpush.msra.mxu1 %v822_v20  ;;  %v4386_v6 = vmul.f32 %v7070_v22, %v6798_v26  ;;  %v4389_v20 = vmul.f32 %v7070_v22, %v6803_v48 }
 0x2e1   :  { %4406 = vperm.xlu1 %6048, %v4385_v59   ;;  %4416 = vperm.xlu2 %6049, %v4387_v34   ;;  %v841_v59 = vld [vmem:[#allocation12 + $0xc0] sm:$0xff]  ;;  %v842_v34 = vld [vmem:[#allocation12 + $0xc8] sm:$0xff] }
 0x2e2   :  { %4421 = vperm.xlu0 %6050, %v4388_v16   ;;  %v813_v16 = vld [vmem:[#allocation10 + $0x60] sm:$0xff] }
 0x2e4   :  { %5895 = vmatmul.msk.f32.vlgmr.msrb.gmra.mxu0 %vm849_vm1, %v7090_v58  ;;  %5896 = vmatmul.msk.f32.vlgmr.msrb.gmra.mxu1 %vm849_vm1, %v7090_v58 }
 0x2e5   :  { %5909 = vmatmul.msk.f32.vlgmr.msrb.gmra.mxu2 %vm220_vm0, %v6869_v44  ;;  %5910 = vmatmul.msk.f32.vlgmr.msrb.gmra.mxu3 %vm220_vm0, %v6869_v44 }
 0x2e6   :  { %987 = vmatpush.msrb.mxu0 %v839_v56  ;;  %1007 = vmatpush.msrb.mxu1 %v840_v36  ;;  %v814_v56 = vld [vmem:[#allocation10 + $0x68] sm:$0xff]  ;;  %v825_v36 = vld [vmem:[#allocation12 + $0x40] sm:$0xff] }
 0x2e7   :  { %1348 = vmatpush.msrb.mxu2 %v809_v0  ;;  %1368 = vmatpush.msrb.mxu3 %v810_v15  ;;  %v826_v0 = vld [vmem:[#allocation12 + $0x48] sm:$0xff]  ;;  %v3858_v15 = vmul.f32 %v7076_v62, %v6725_v11 }
 0x2e8   :  { %988 = vmatpush.msrb.mxu0 %v823_v27  ;;  %1008 = vmatpush.msrb.mxu1 %v824_v39  ;;  %v4390_v27 = vmul.f32 %v7070_v22, %v6730_v14  ;;  %v843_v39 = vld [vmem:[#allocation12 + $0xd0] sm:$0xff] }
 0x2e9   :  { %4411 = vperm.xlu1 %6048, %v4386_v6   ;;  %5440 = vrot.lane.b32.xlu2 %v6869_v44, %s6582_s27  ;;  %v844_v6 = vld [vmem:[#allocation12 + $0xd8] sm:$0xff] }
 0x2ea   :  { %4426 = vperm.xlu0 %6050, %v4389_v20   ;;  %v827_v20 = vld [vmem:[#allocation12 + $0x50] sm:$0xff] }
 0x2ec   :  { %5897 = vmatmul.msk.f32.vlgmr.msra.gmra.mxu0 %vm849_vm1, %v7090_v58  ;;  %5898 = vmatmul.msk.f32.vlgmr.msra.gmra.mxu1 %vm849_vm1, %v7090_v58 }
 0x2ed   :  { %5913 = vmatmul.msk.f32.vlgmr.msra.gmra.mxu2 %vm220_vm0, %v6869_v44  ;;  %5914 = vmatmul.msk.f32.vlgmr.msra.gmra.mxu3 %vm220_vm0, %v6869_v44 }
 0x2ee   :  { %1027 = vmatpush.msra.mxu0 %v841_v59  ;;  %1047 = vmatpush.msra.mxu1 %v842_v34  ;;  %v828_v59 = vld [vmem:[#allocation12 + $0x58] sm:$0xff]  ;;  %v3859_v34 = vmul.f32 %v7076_v62, %v6803_v48 }
 0x2ef   :  { %1428 = vmatpush.msra.mxu2 %v813_v16  ;;  %1448 = vmatpush.msra.mxu3 %v814_v56  ;;  %v3861_v16 = vmul.f32 %v7076_v62, %v6810_v37  ;;  %v3862_v56 = vmul.f32 %v7076_v62, %v6740_v18 }
 0x2f0   :  { %1028 = vmatpush.msra.mxu0 %v825_v36  ;;  %1048 = vmatpush.msra.mxu1 %v826_v0  ;;  %v847_v36 = vld [vmem:[#allocation12 + $0xf0] sm:$0xff]  ;;  %v848_v0 = vld [vmem:[#allocation12 + $0xf8] sm:$0xff] }
 0x2f1   :  { %3891 = vperm.xlu1 %6048, %v3858_v15   ;;  %4910 = vrot.lane.b32.xlu2 %v6869_v44, %s6583_s28  ;;  %v831_v15 = vld [vmem:[#allocation12 + $0x70] sm:$0xff] }
 0x2f2   :  { %4431 = vperm.xlu0 %6050, %v4390_v27   ;;  %v832_v27 = vld [vmem:[#allocation12 + $0x78] sm:$0xff] }
 0x2f4   :  { %5899 = vmatmul.msk.f32.vlgmr.msrb.gmra.mxu0 %vm849_vm1, %v7090_v58  ;;  %5900 = vmatmul.msk.f32.vlgmr.msrb.gmra.mxu1 %vm849_vm1, %v7090_v58 }
 0x2f5   :  { %5917 = vmatmul.msk.f32.vlgmr.msrb.gmra.mxu2 %vm220_vm0, %v6869_v44  ;;  %5918 = vmatmul.msk.f32.vlgmr.msrb.gmra.mxu3 %vm220_vm0, %v6869_v44 }
 0x2f6   :  { %1067 = vmatpush.msrb.mxu0 %v843_v39  ;;  %1087 = vmatpush.msrb.mxu1 %v844_v6  ;;  %v3860_v39 = vmul.f32 %v7076_v62, %v6730_v14  ;;  %v4392_v6 = vmul.f32 %v7070_v22, %v6740_v18 }
 0x2f8   :  { %1068 = vmatpush.msrb.mxu0 %v827_v20  ;;  %1088 = vmatpush.msrb.mxu1 %v828_v59  ;;  %v4393_v20 = vmul.f32 %v7070_v22, %v6847_v7  ;;  %v803_v59 = vld [vmem:[#allocation10 + $0x10] sm:$0xff] }
 0x2f9   :  { %3896 = vperm.xlu1 %6048, %v3859_v34   ;;  %3906 = vperm.xlu2 %6049, %v3861_v16   ;;  %v804_v34 = vld [vmem:[#allocation10 + $0x18] sm:$0xff]  ;;  %v4391_v16 = vmul.f32 %v7070_v22, %v6810_v37 }
 0x2fa   :  { %3911 = vperm.xlu0 %6050, %v3862_v56   ;;  %v807_v56 = vld [vmem:[#allocation10 + $0x30] sm:$0xff] }
 0x2fc   :  { %5901 = vmatmul.msk.f32.vlgmr.msra.gmra.mxu0 %vm849_vm1, %v7090_v58  ;;  %5902 = vmatmul.msk.f32.vlgmr.msra.gmra.mxu1 %vm849_vm1, %v7090_v58 }
 0x2fd   :  { %5921 = vmatmul.msk.f32.vlgmr.msra.gmra.mxu2 %vm220_vm0, %v6869_v44  ;;  %5922 = vmatmul.msk.f32.vlgmr.msra.gmra.mxu3 %vm220_vm0, %v6869_v44 }
 0x2fe   :  { %1147 = vmatpush.msra.mxu0 %v847_v36  ;;  %1167 = vmatpush.msra.mxu1 %v848_v0  ;;  %v808_v36 = vld [vmem:[#allocation10 + $0x38] sm:$0xff]  ;;  %v3863_v0 = vmul.f32 %v7076_v62, %v6847_v7 }
 0x300   :  { %1148 = vmatpush.msra.mxu0 %v831_v15  ;;  %1168 = vmatpush.msra.mxu1 %v832_v27  ;;  %v7172_v15 = vpop.permute.xlu2 %3376  ;;  %v811_v27 = vld [vmem:[#allocation10 + $0x50] sm:$0xff] }
 0x301   :  { %3901 = vperm.xlu1 %6048, %v3860_v39   ;;  %4441 = vperm.xlu2 %6049, %v4392_v6   ;;  %v812_v39 = vld [vmem:[#allocation10 + $0x58] sm:$0xff] }
 0x302   :  { %4446 = vperm.xlu0 %6050, %v4393_v20   ;;  %v816_v6 = vld [vmem:[#allocation10 + $0x78] sm:$0xff]  ;;  %v1590_v20 = vld [vmem:[#allocation15 + $0x78] sm:$0xff] }
 0x303   :  { %1592 = vmatpush.msrb.mxu2 %v1590_v20  ;;  %v1582_v20 = vld [vmem:[#allocation15 + $0x38] sm:$0xff] }
 0x304   :  { %5903 = vmatmul.msk.f32.vlgmr.msrb.gmra.mxu0 %vm849_vm1, %v7090_v58  ;;  %5904 = vmatmul.msk.f32.vlgmr.msrb.gmra.mxu1 %vm849_vm1, %v7090_v58 }
 0x305   :  { %1228 = vmatpush.msrb.mxu0 %v803_v59  ;;  %1248 = vmatpush.msrb.mxu1 %v804_v34  ;;  %v1589_v59 = vld [vmem:[#allocation15 + $0x70] sm:$0xff]  ;;  %v1588_v34 = vld [vmem:[#allocation15 + $0x68] sm:$0xff] }
 0x306   :  { %1593 = vmatpush.msrb.mxu2 %v1589_v59  ;;  %v1804_v59 = vld [vmem:[#allocation15 + $0x170] sm:$0xff] }
 0x308   :  { %v7178_v22 = vpop.permute.xlu2 %3386  ;;  %1594 = vmatpush.msrb.mxu2 %v1588_v34  ;;  %v1581_v34 = vld [vmem:[#allocation15 + $0x30] sm:$0xff] }
 0x309   :  { %4436 = vperm.xlu1 %6048, %v4391_v16   ;;  %9306 = vst [vmem:[#allocation34_spill] sm:$0xff] %v7178_v22  ;;  %v1587_v16 = vld [vmem:[#allocation15 + $0x60] sm:$0xff] }
 0x30a   :  { %1595 = vmatpush.msrb.mxu2 %v1587_v16  ;;  %v1803_v16 = vld [vmem:[#allocation15 + $0x168] sm:$0xff] }
 0x30c   :  { %5907 = vmatmul.msk.f32.vlgmr.msra.gmra.mxu0 %vm849_vm1, %v7090_v58  ;;  %5908 = vmatmul.msk.f32.vlgmr.msra.gmra.mxu1 %vm849_vm1, %v7090_v58  ;;  %v815_v58 = vld [vmem:[#allocation10 + $0x70] sm:$0xff] }
 0x30d   :  { %1308 = vmatpush.msra.mxu0 %v807_v56  ;;  %1328 = vmatpush.msra.mxu1 %v808_v36  ;;  %v1586_v56 = vld [vmem:[#allocation15 + $0x58] sm:$0xff] }
 0x30e   :  { %1596 = vmatpush.msrb.mxu2 %v1586_v56  ;;  %v1802_v56 = vld [vmem:[#allocation15 + $0x160] sm:$0xff] }
 0x311   :  { %3916 = vperm.xlu1 %6048, %v3863_v0   ;;  %v1585_v0 = vld [vmem:[#allocation15 + $0x50] sm:$0xff] }
 0x312   :  { %1597 = vmatpush.msrb.mxu2 %v1585_v0  ;;  %v1579_v0 = vld [vmem:[#allocation15 + $0x20] sm:$0xff] }
 0x314   :  { %5911 = vmatmul.msk.f32.vlgmr.msrb.gmra.mxu0 %vm220_vm0, %v6869_v44  ;;  %5912 = vmatmul.msk.f32.vlgmr.msrb.gmra.mxu1 %vm220_vm0, %v6869_v44 }
 0x315   :  { %1388 = vmatpush.msrb.mxu0 %v811_v27  ;;  %1408 = vmatpush.msrb.mxu1 %v812_v39  ;;  %v1584_v27 = vld [vmem:[#allocation15 + $0x48] sm:$0xff]  ;;  %v1583_v39 = vld [vmem:[#allocation15 + $0x40] sm:$0xff] }
 0x316   :  { %1598 = vmatpush.msrb.mxu2 %v1584_v27 }
 0x318   :  { %1599 = vmatpush.msrb.mxu2 %v1583_v39  ;;  %v1578_v39 = vld [vmem:[#allocation15 + $0x18] sm:$0xff] }
 0x31a   :  { %1600 = vmatpush.msrb.mxu2 %v1582_v20  ;;  %v1577_v20 = vld [vmem:[#allocation15 + $0x10] sm:$0xff] }
 0x31c   :  { %5915 = vmatmul.msk.f32.vlgmr.msra.gmra.mxu0 %vm220_vm0, %v6869_v44  ;;  %5916 = vmatmul.msk.f32.vlgmr.msra.gmra.mxu1 %vm220_vm0, %v6869_v44  ;;  %v7184_v62 = vpop.permute.xlu2 %4396 }
 0x31d   :  { %1468 = vmatpush.msra.mxu0 %v815_v58  ;;  %1488 = vmatpush.msra.mxu1 %v816_v6  ;;  %9307 = vst [vmem:[#allocation35_spill] sm:$0xff] %v7184_v62  ;;  %v1805_v58 = vld [vmem:[#allocation15 + $0x178] sm:$0xff] }
 0x31e   :  { %1601 = vmatpush.msrb.mxu2 %v1581_v34  ;;  %v1576_v34 = vld [vmem:[#allocation15 + $0x8] sm:$0xff] }
 0x324   :  { %5919 = vmatmul.msk.f32.vlgmr.msrb.gmra.mxu0 %vm220_vm0, %v6869_v44  ;;  %5920 = vmatmul.msk.f32.vlgmr.msrb.gmra.mxu1 %vm220_vm0, %v6869_v44 }
 0x325   :  { %1807 = vmatpush.msrb.mxu0 %v1805_v58  ;;  %v1800_v58 = vld [vmem:[#allocation15 + $0x150] sm:$0xff] }
 0x327   :  { %1808 = vmatpush.msrb.mxu0 %v1804_v59  ;;  %v1799_v59 = vld [vmem:[#allocation15 + $0x148] sm:$0xff] }
 0x329   :  { %1809 = vmatpush.msrb.mxu0 %v1803_v16  ;;  %v1798_v16 = vld [vmem:[#allocation15 + $0x140] sm:$0xff] }
 0x32b   :  { %v7190_v36 = vpop.permute.xlu2 %3876  ;;  %1810 = vmatpush.msrb.mxu0 %v1802_v56  ;;  %v1797_v56 = vld [vmem:[#allocation15 + $0x138] sm:$0xff] }
 0x32c   :  { %5923 = vmatmul.msk.f32.vlgmr.msra.gmra.mxu0 %vm220_vm0, %v6869_v44  ;;  %5924 = vmatmul.msk.f32.vlgmr.msra.gmra.mxu1 %vm220_vm0, %v6869_v44  ;;  %v1580_v44 = vld [vmem:[#allocation15 + $0x28] sm:$0xff] }
 0x32d   :  { %1602 = vmatpush.msrb.mxu2 %v1580_v44  ;;  %1811 = vmatpush.msrb.mxu0 %v1801_v63  ;;  %v1575_v44 = vld [vmem:[#allocation15] sm:$0xff] }
 0x32f   :  { %1603 = vmatpush.msrb.mxu2 %v1579_v0  ;;  %1812 = vmatpush.msrb.mxu0 %v1800_v58  ;;  %v1796_v0 = vld [vmem:[#allocation15 + $0x130] sm:$0xff] }
 0x331   :  { %1604 = vmatpush.msrb.mxu2 %v1578_v39  ;;  %1813 = vmatpush.msrb.mxu0 %v1799_v59  ;;  %v1795_v59 = vld [vmem:[#allocation15 + $0x128] sm:$0xff] }
 0x333   :  { %v7196_v6 = vpop.permute.xlu2 %3881  ;;  %1605 = vmatpush.msrb.mxu2 %v1577_v20  ;;  %1814 = vmatpush.msrb.mxu0 %v1798_v16  ;;  %v2185_v20 = vld [vmem:[#allocation15 + $0x270] sm:$0xff]  ;;  %v1794_v16 = vld [vmem:[#allocation15 + $0x120] sm:$0xff] }
 0x334   :  { %9308 = vst [vmem:[#allocation36_spill] sm:$0xff] %v7196_v6  ;;  %v2382_v6 = vld [vmem:[#allocation15 + $0x378] sm:$0xff] }
 0x335   :  { %1606 = vmatpush.msrb.mxu2 %v1576_v34  ;;  %1815 = vmatpush.msrb.mxu0 %v1797_v56  ;;  %v2184_v34 = vld [vmem:[#allocation15 + $0x268] sm:$0xff]  ;;  %v2182_v56 = vld [vmem:[#allocation15 + $0x258] sm:$0xff] }
 0x337   :  { %1607 = vmatpush.msrb.mxu2 %v1575_v44  ;;  %1816 = vmatpush.msrb.mxu0 %v1796_v0  ;;  %v2183_v44 = vld [vmem:[#allocation15 + $0x260] sm:$0xff] }
 0x339   :  { %2188 = vmatpush.msra.mxu2 %v2186_v57  ;;  %1817 = vmatpush.msrb.mxu0 %v1795_v59  ;;  %v1793_v57 = vld [vmem:[#allocation15 + $0x118] sm:$0xff]  ;;  %v1791_v59 = vld [vmem:[#allocation15 + $0x108] sm:$0xff] }
 0x33b   :  { %v7198_v27 = vpop.permute.xlu2 %4416  ;;  %2189 = vmatpush.msra.mxu2 %v2185_v20  ;;  %1818 = vmatpush.msrb.mxu0 %v1794_v16  ;;  %v2181_v20 = vld [vmem:[#allocation15 + $0x250] sm:$0xff]  ;;  %v1790_v16 = vld [vmem:[#allocation15 + $0x100] sm:$0xff] }
 0x33c   :  { %9309 = vst [vmem:[#allocation37_spill] sm:$0xff] %v7198_v27 }
 0x33d   :  { %2190 = vmatpush.msra.mxu2 %v2184_v34  ;;  %1819 = vmatpush.msrb.mxu0 %v1793_v57  ;;  %v2180_v34 = vld [vmem:[#allocation15 + $0x248] sm:$0xff]  ;;  %v2178_v57 = vld [vmem:[#allocation15 + $0x238] sm:$0xff] }
 0x33f   :  { %2191 = vmatpush.msra.mxu2 %v2183_v44  ;;  %1820 = vmatpush.msrb.mxu0 %v1792_v55  ;;  %v2179_v44 = vld [vmem:[#allocation15 + $0x240] sm:$0xff] }
 0x341   :  { %2192 = vmatpush.msra.mxu2 %v2182_v56  ;;  %1821 = vmatpush.msrb.mxu0 %v1791_v59  ;;  %v2177_v56 = vld [vmem:[#allocation15 + $0x230] sm:$0xff]  ;;  %v2175_v59 = vld [vmem:[#allocation15 + $0x220] sm:$0xff] }
 0x343   :  { %v7200_v63 = vpop.permute.xlu2 %5440  ;;  %2193 = vmatpush.msra.mxu2 %v2181_v20  ;;  %1822 = vmatpush.msrb.mxu0 %v1790_v16  ;;  %v2174_v16 = vld [vmem:[#allocation15 + $0x218] sm:$0xff] }
 0x344   :  { %v5443_v39 = vmul.f32 %v7200_v63, %v6715_v5  ;;  %v5444_v58 = vmul.f32 %v7200_v63, %v6720_v8  ;;  %v5447_v55 = vmul.f32 %v7200_v63, %v6831_v23 }
 0x345   :  { %2194 = vmatpush.msra.mxu2 %v2180_v34 }
 0x346   :  { %5456 = vperm.xlu2 %6049, %v5443_v39   ;;  %5461 = vperm.xlu0 %6050, %v5444_v58  }
 0x347   :  { %2195 = vmatpush.msra.mxu2 %v2179_v44 }
 0x349   :  { %2196 = vmatpush.msra.mxu2 %v2178_v57  ;;  %v2172_v57 = vld [vmem:[#allocation15 + $0x208] sm:$0xff] }
 0x34b   :  { %v7206_v41 = vpop.permute.xlu2 %4910  ;;  %2197 = vmatpush.msra.mxu2 %v2177_v56 }
 0x34c   :  { %v4914_v0 = vmul.f32 %v7206_v41, %v6720_v8  ;;  %v4913_v39 = vmul.f32 %v7206_v41, %v6715_v5  ;;  %v4915_v58 = vmul.f32 %v7206_v41, %v6793_v3  ;;  %v5446_v8 = vmul.f32 %v7200_v63, %v6798_v26 }
 0x34d   :  { %v5445_v5 = vmul.f32 %v7200_v63, %v6793_v3  ;;  %v4917_v3 = vmul.f32 %v7206_v41, %v6831_v23  ;;  %v4916_v34 = vmul.f32 %v7206_v41, %v6798_v26  ;;  %v4918_v44 = vmul.f32 %v7206_v41, %v6725_v11 }
 0x34e   :  { %4931 = vperm.xlu2 %6049, %v4914_v0   ;;  %4926 = vperm.xlu1 %6048, %v4913_v39   ;;  %v2176_v0 = vld [vmem:[#allocation15 + $0x228] sm:$0xff]  ;;  %v2716_v39 = vld [vmem:[#allocation15 + $0x478] sm:$0xff] }
 0x34f   :  { %4936 = vperm.xlu0 %6050, %v4915_v58   ;;  %2718 = vmatpush.msra.mxu0 %v2716_v39  ;;  %v1573_v39 = vld [vmem:[#allocation18] sm:$0xf] }
 0x350   :  { %2198 = vmatpush.msra.mxu2 %v2176_v0  ;;  %v2171_v0 = vld [vmem:[#allocation15 + $0x200] sm:$0xff] }
 0x352   :  { %2199 = vmatpush.msra.mxu2 %v2175_v59  ;;  %v5449_v59 = vmul.f32 %v7200_v63, %v6803_v48 }
 0x354   :  { %2200 = vmatpush.msra.mxu2 %v2174_v16  ;;  %v7240_v16 = vld [vmem:[#allocation13] sm:$0xff] }
 0x356   :  { %5471 = vperm.xlu2 %6049, %v5446_v8   ;;  %5466 = vperm.xlu1 %6048, %v5445_v5   ;;  %v2173_v8 = vld [vmem:[#allocation15 + $0x210] sm:$0xff] }
 0x357   :  { %5476 = vperm.xlu0 %6050, %v5447_v55   ;;  %v2715_v5 = vld [vmem:[#allocation15 + $0x470] sm:$0xff]  ;;  %2201 = vmatpush.msra.mxu2 %v2173_v8  ;;  %v7242_v8 = vperm.slane %v1573_v39, 0 }
 0x358   :  { %2719 = vmatpush.msra.mxu0 %v2715_v5  ;;  %v1497_v5 = vperm.slane %v7240_v16, 0 }
 0x359   :  { %v870_v58 = vpop.f32.mrf.mxu0  ;;  %v890_v20 = vpop.f32.mrf.mxu1  ;;  %2202 = vmatpush.msra.mxu2 %v2172_v57  ;;  %v1498_v57 = vperm.slane %v7240_v16, 1  ;;  %v1756_v39 = vmul.f32 %v7242_v8, %v6766_v40 }
 0x35b   :  { %2203 = vmatpush.msra.mxu2 %v2171_v0  ;;  %v2713_v0 = vld [vmem:[#allocation15 + $0x460] sm:$0xff] }
 0x35e   :  { %4946 = vperm.xlu2 %6049, %v4917_v3   ;;  %4941 = vperm.xlu1 %6048, %v4916_v34   ;;  %v5448_v3 = vmul.f32 %v7200_v63, %v6725_v11  ;;  %v5450_v34 = vmul.f32 %v7200_v63, %v6730_v14 }
 0x35f   :  { %4951 = vperm.xlu0 %6050, %v4918_v44   ;;  %v2714_v44 = vld [vmem:[#allocation15 + $0x468] sm:$0xff] }
 0x360   :  { %v7226_v55 = vpop.f32.mrf.mxu2  ;;  %v7228_v56 = vpop.f32.mrf.mxu3  ;;  %2720 = vmatpush.msra.mxu0 %v2714_v44 }
 0x361   :  { %9310 = vst [vmem:[#allocation38_spill] sm:$0xff] %v7226_v55  ;;  %v7230_v23 = vpop.f32.mrf.mxu0  ;;  %v7232_v26 = vpop.f32.mrf.mxu1 }
 0x362   :  { %9311 = vst [vmem:[#allocation39_spill] sm:$0xff] %v7228_v56  ;;  %2721 = vmatpush.msra.mxu0 %v2713_v0  ;;  %v5451_v0 = vmul.f32 %v7200_v63, %v6810_v37 }
 0x366   :  { %5486 = vperm.xlu2 %6049, %v5449_v59   ;;  %5481 = vperm.xlu1 %6048, %v5448_v3   ;;  %v2712_v59 = vld [vmem:[#allocation15 + $0x458] sm:$0xff] }
 0x367   :  { %5491 = vperm.xlu0 %6050, %v5450_v34   ;;  %v4920_v34 = vmul.f32 %v7206_v41, %v6730_v14  ;;  %2722 = vmatpush.msra.mxu0 %v2712_v59  ;;  %v1757_v14 = vmul.f32 %v7242_v8, %v6770_v47  ;;  %v5453_v59 = vmul.f32 %v7200_v63, %v6847_v7  ;;  %v2379_v47 = vld [vmem:[#allocation15 + $0x360] sm:$0xff] }
 0x368   :  { %v1190_v56 = vpop.f32.mrf.mxu2  ;;  %v1210_v55 = vpop.f32.mrf.mxu3 }
 0x369   :  { %v1191_v11 = vadd.f32 %v1190_v56, %v870_v58  ;;  %v1211_v27 = vadd.f32 %v1210_v55, %v890_v20  ;;  %v7246_v62 = vpop.f32.mrf.mxu0  ;;  %v7248_v22 = vpop.f32.mrf.mxu1  ;;  %v4919_v58 = vmul.f32 %v7206_v41, %v6803_v48  ;;  %v4921_v20 = vmul.f32 %v7206_v41, %v6810_v37 }
 0x36b   :  { %v1529_v3 = vadd.f32 %v1497_v5, %v1191_v11  ;;  %v7252_v44 = vadd.f32 %v1498_v57, %v1211_v27  ;;  %v2381_v27 = vld [vmem:[#allocation15 + $0x370] sm:$0xff]  ;;  %v2380_v57 = vld [vmem:[#allocation15 + $0x368] sm:$0xff]  ;;  %v5452_v11 = vmul.f32 %v7200_v63, %v6740_v18  ;;  %v1723_v63 = vpop.permute.xlu0 %1722 }
 0x36d   :  { %v1571_v55 = vmax.f32 %v1529_v3, 0.0  ;;  %v1767_v56 = vadd.f32 %v1756_v39, %v7252_v44  ;;  %v1768_v39 = vadd.f32 %v1757_v14, %v7252_v44 }
 0x36e   :  { %4961 = vperm.xlu2 %6049, %v4920_v34   ;;  %4956 = vperm.xlu1 %6048, %v4919_v58   ;;  %v2378_v34 = vld [vmem:[#allocation15 + $0x358] sm:$0xff]  ;;  %v1758_v58 = vmul.f32 %v7242_v8, %v6984_v4  ;;  %v2375_v4 = vld [vmem:[#allocation15 + $0x340] sm:$0xff] }
 0x36f   :  { %v1778_v40 = vmax.f32 %v1767_v56, 0.0  ;;  %4966 = vperm.xlu0 %6050, %v4921_v20   ;;  %1608 = vmatmul.f32.vlgmr.msrb.gmra.mxu2 %v1571_v55  ;;  %v1779_v3 = vmax.f32 %v1768_v39, 0.0  ;;  %v2377_v55 = vld [vmem:[#allocation15 + $0x350] sm:$0xff]  ;;  %v2710_v56 = vld [vmem:[#allocation15 + $0x448] sm:$0xff]  ;;  %v2374_v39 = vld [vmem:[#allocation15 + $0x338] sm:$0xff] }
 0x370   :  { %2384 = vmatpush.msrb.mxu2 %v2382_v6  ;;  %v2711_v6 = vld [vmem:[#allocation15 + $0x450] sm:$0xff]  ;;  %v1769_v14 = vadd.f32 %v1758_v58, %v7252_v44  ;;  %v2371_v58 = vld [vmem:[#allocation15 + $0x320] sm:$0xff] }
 0x371   :  { %1823 = vmatmul.f32.vlgmr.msrb.gmra.mxu0 %v1778_v40  ;;  %v7263_v5 = vpop.f32.mrf.mxu0  ;;  %v7265_v48 = vpop.f32.mrf.mxu1  ;;  %v4923_v40 = vmul.f32 %v7206_v41, %v6847_v7  ;;  %v1759_v7 = vmul.f32 %v7242_v8, %v7011_v42  ;;  %v2707_v42 = vld [vmem:[#allocation15 + $0x430] sm:$0xff] }
 0x372   :  { %2385 = vmatpush.msrb.mxu2 %v2381_v27  ;;  %2723 = vmatpush.msra.mxu0 %v2711_v6  ;;  %v4922_v27 = vmul.f32 %v7206_v41, %v6740_v18  ;;  %v2373_v41 = vld [vmem:[#allocation15 + $0x330] sm:$0xff] }
 0x373   :  { %v7294_v6 = vpop.permute.xlu0 %2080 }
 0x374   :  { %2386 = vmatpush.msrb.mxu2 %v2380_v57  ;;  %v2376_v57 = vld [vmem:[#allocation15 + $0x348] sm:$0xff]  ;;  %2724 = vmatpush.msra.mxu0 %v2710_v56 }
 0x376   :  { %5501 = vperm.xlu2 %6049, %v5452_v11   ;;  %5496 = vperm.xlu1 %6048, %v5451_v0   ;;  %v2709_v11 = vld [vmem:[#allocation15 + $0x440] sm:$0xff]  ;;  %v1780_v0 = vmax.f32 %v1769_v14, 0.0 }
 0x377   :  { %5506 = vperm.xlu0 %6050, %v5453_v59   ;;  %2387 = vmatpush.msrb.mxu2 %v2379_v47  ;;  %v1770_v47 = vadd.f32 %v1759_v7, %v7252_v44  ;;  %v2704_v7 = vld [vmem:[#allocation15 + $0x418] sm:$0xff] }
 0x378   :  { %2725 = vmatpush.msra.mxu0 %v2709_v11 }
 0x379   :  { %1826 = vmatmul.f32.gmra.mxu0 %v1779_v3  ;;  %v7276_v37 = vpop.f32.mrf.mxu0  ;;  %v7278_v20 = vpop.f32.mrf.mxu1  ;;  %2388 = vmatpush.msrb.mxu2 %v2378_v34  ;;  %v2372_v3 = vld [vmem:[#allocation15 + $0x328] sm:$0xff]  ;;  %v2708_v34 = vld [vmem:[#allocation15 + $0x438] sm:$0xff]  ;;  %v1781_v56 = vmax.f32 %v1770_v47, 0.0 }
 0x37a   :  { %2726 = vmatpush.msra.mxu0 %v2708_v34  ;;  %v2702_v34 = vld [vmem:[#allocation15 + $0x408] sm:$0xff] }
 0x37b   :  { %2389 = vmatpush.msrb.mxu2 %v2377_v55  ;;  %v1760_v55 = vmul.f32 %v7242_v8, %v1723_v63  ;;  %v2705_v63 = vld [vmem:[#allocation15 + $0x420] sm:$0xff]  ;;  %v7304_v47 = vpop.permute.xlu0 %2086 }
 0x37c   :  { %2727 = vmatpush.msra.mxu0 %v2707_v42  ;;  %9312 = vst [vmem:[#allocation40_spill] sm:$0xff] %v7304_v47  ;;  %v1761_v42 = vmul.f32 %v7242_v8, %v6772_v52  ;;  %v3243_v52 = vld [vmem:[#allocation15 + $0x678] sm:$0xff] }
 0x37d   :  { %2390 = vmatpush.msrb.mxu2 %v2376_v57  ;;  %v1771_v11 = vadd.f32 %v1760_v55, %v7252_v44  ;;  %v2167_v55 = vld [vmem:[#allocation18 + $0x4] sm:$0xf] }
 0x37e   :  { %4976 = vperm.xlu2 %6049, %v4923_v40   ;;  %4971 = vperm.xlu1 %6048, %v4922_v27   ;;  %v2370_v40 = vld [vmem:[#allocation15 + $0x318] sm:$0xff]  ;;  %v2706_v27 = vld [vmem:[#allocation15 + $0x428] sm:$0xff] }
 0x37f   :  { %2391 = vmatpush.msrb.mxu2 %v2375_v4  ;;  %3735 = vrot.lane.b32.xlu0 %v6872_v45, %s6576_s14  ;;  %v2369_v4 = vld [vmem:[#allocation15 + $0x310] sm:$0xff] }
 0x380   :  { %2728 = vmatpush.msra.mxu0 %v2706_v27 }
 0x381   :  { %1829 = vmatmul.f32.gmra.mxu0 %v1780_v0  ;;  %v7287_v59 = vpop.f32.mrf.mxu0  ;;  %v7289_v18 = vpop.f32.mrf.mxu1  ;;  %2392 = vmatpush.msrb.mxu2 %v2374_v39  ;;  %v2368_v0 = vld [vmem:[#allocation15 + $0x308] sm:$0xff]  ;;  %v2367_v39 = vld [vmem:[#allocation15 + $0x300] sm:$0xff] }
 0x382   :  { %2729 = vmatpush.msra.mxu0 %v2705_v63  ;;  %v7313_v63 = vperm.slane %v2167_v55, 0 }
 0x383   :  { %2393 = vmatpush.msrb.mxu2 %v2373_v41  ;;  %v2703_v41 = vld [vmem:[#allocation15 + $0x410] sm:$0xff]  ;;  %v7321_v55 = vpop.permute.xlu0 %2090 }
 0x384   :  { %2730 = vmatpush.msra.mxu0 %v2704_v7  ;;  %v2701_v7 = vld [vmem:[#allocation15 + $0x400] sm:$0xff] }
 0x385   :  { %2394 = vmatpush.msrb.mxu2 %v2372_v3  ;;  %v1782_v3 = vmax.f32 %v1771_v11, 0.0  ;;  %v1772_v11 = vadd.f32 %v1761_v42, %v7252_v44  ;;  %v1762_v42 = vmul.f32 %v7242_v8, %v7017_v49  ;;  %v3239_v49 = vld [vmem:[#allocation15 + $0x658] sm:$0xff] }
 0x386   :  { %4265 = vrot.lane.b32.xlu2 %v6872_v45, %s6577_s6  ;;  %2731 = vmatpush.msra.mxu0 %v2703_v41 }
 0x387   :  { %2395 = vmatpush.msrb.mxu2 %v2371_v58  ;;  %v1499_v58 = vperm.slane %v7240_v16, 2  ;;  %v1783_v47 = vmax.f32 %v1772_v11, 0.0 }
 0x388   :  { %2732 = vmatpush.msra.mxu0 %v2702_v34  ;;  %v3242_v34 = vld [vmem:[#allocation15 + $0x670] sm:$0xff] }
 0x389   :  { %1832 = vmatmul.f32.gmra.mxu0 %v1781_v56  ;;  %v7299_v14 = vpop.f32.mrf.mxu0  ;;  %v7301_v57 = vpop.f32.mrf.mxu1  ;;  %2396 = vmatpush.msrb.mxu2 %v2370_v40 }
 0x38a   :  { %2733 = vmatpush.msra.mxu0 %v2701_v7  ;;  %v2907_v7 = vld [vmem:[#allocation15 + $0x550] sm:$0xff] }
 0x38b   :  { %2397 = vmatpush.msrb.mxu2 %v2369_v4 }
 0x38d   :  { %2398 = vmatpush.msrb.mxu2 %v2368_v0  ;;  %v1500_v0 = vperm.slane %v7240_v16, 3 }
 0x38f   :  { %2399 = vmatpush.msrb.mxu2 %v2367_v39 }
 0x391   :  { %1835 = vmatmul.f32.gmra.mxu0 %v1782_v3  ;;  %v1230_v56 = vpop.f32.mrf.mxu0  ;;  %v1250_v40 = vpop.f32.mrf.mxu1  ;;  %v2912_v3 = vld [vmem:[#allocation15 + $0x578] sm:$0xff] }
 0x392   :  { %v1231_v27 = vadd.f32 %v1230_v56, %v7230_v23  ;;  %v1251_v4 = vadd.f32 %v1250_v40, %v7232_v26  ;;  %2914 = vmatpush.msrb.mxu0 %v2912_v3  ;;  %v2911_v23 = vld [vmem:[#allocation15 + $0x570] sm:$0xff]  ;;  %v2333_v26 = vmul.f32 %v7313_v63, %v6818_v12  ;;  %v2910_v56 = vld [vmem:[#allocation15 + $0x568] sm:$0xff]  ;;  %v2909_v12 = vld [vmem:[#allocation15 + $0x560] sm:$0xff]  ;;  %v1763_v3 = vmul.f32 %v7242_v8, %v6774_v53 }
 0x394   :  { %v1531_v39 = vadd.f32 %v1499_v58, %v1231_v27  ;;  %v7315_v45 = vadd.f32 %v1500_v0, %v1251_v4  ;;  %v3241_v27 = vld [vmem:[#allocation15 + $0x668] sm:$0xff]  ;;  %2915 = vmatpush.msrb.mxu0 %v2911_v23  ;;  %v1773_v4 = vadd.f32 %v1762_v42, %v7252_v44  ;;  %v3240_v0 = vld [vmem:[#allocation15 + $0x660] sm:$0xff]  ;;  %v7334_v42 = vpop.permute.xlu0 %2096 }
 0x395   :  { %v2906_v23 = vld [vmem:[#allocation15 + $0x548] sm:$0xff] }
 0x396   :  { %v2163_v41 = vmax.f32 %v1531_v39, 0.0  ;;  %v2344_v40 = vadd.f32 %v2333_v26, %v7315_v45  ;;  %2916 = vmatpush.msrb.mxu0 %v2910_v56  ;;  %v2908_v39 = vld [vmem:[#allocation15 + $0x558] sm:$0xff]  ;;  %v1774_v56 = vadd.f32 %v1763_v3, %v7252_v44 }
 0x398   :  { %2204 = vmatmul.f32.vlgmr.msra.gmra.mxu2 %v2163_v41  ;;  %v2355_v11 = vmax.f32 %v2344_v40, 0.0  ;;  %2917 = vmatpush.msrb.mxu0 %v2909_v12  ;;  %v2334_v41 = vmul.f32 %v7313_v63, %v6820_v13  ;;  %v2905_v13 = vld [vmem:[#allocation15 + $0x540] sm:$0xff]  ;;  %v1785_v53 = vmax.f32 %v1774_v56, 0.0  ;;  %v2903_v12 = vld [vmem:[#allocation15 + $0x530] sm:$0xff] }
 0x399   :  { %1838 = vmatmul.f32.gmra.mxu0 %v1783_v47  ;;  %v7323_v58 = vpop.f32.mrf.mxu1  ;;  %3245 = vmatpush.msra.mxu2 %v3243_v52  ;;  %v1784_v47 = vmax.f32 %v1773_v4, 0.0  ;;  %v3238_v52 = vld [vmem:[#allocation15 + $0x650] sm:$0xff]  ;;  %v3237_v4 = vld [vmem:[#allocation15 + $0x648] sm:$0xff] }
 0x39a   :  { %2918 = vmatpush.msrb.mxu0 %v2908_v39  ;;  %v1764_v39 = vmul.f32 %v7242_v8, %v7023_v1 }
 0x39b   :  { %3246 = vmatpush.msra.mxu2 %v3242_v34  ;;  %v2345_v34 = vadd.f32 %v2334_v41, %v7315_v45 }
 0x39c   :  { %2919 = vmatpush.msrb.mxu0 %v2907_v7  ;;  %v2902_v7 = vld [vmem:[#allocation15 + $0x528] sm:$0xff] }
 0x39d   :  { %3247 = vmatpush.msra.mxu2 %v3241_v27  ;;  %v2356_v40 = vmax.f32 %v2345_v34, 0.0  ;;  %v2904_v27 = vld [vmem:[#allocation15 + $0x538] sm:$0xff]  ;;  %v7347_v34 = vpop.permute.xlu0 %2148 }
 0x39e   :  { %2920 = vmatpush.msrb.mxu0 %v2906_v23  ;;  %v2901_v23 = vld [vmem:[#allocation15 + $0x520] sm:$0xff] }
 0x39f   :  { %3248 = vmatpush.msra.mxu2 %v3240_v0  ;;  %v3236_v0 = vld [vmem:[#allocation15 + $0x640] sm:$0xff] }
 0x3a0   :  { %2400 = vmatmul.f32.vlgmr.msrb.gmra.mxu2 %v2355_v11  ;;  %2921 = vmatpush.msrb.mxu0 %v2905_v13  ;;  %v2335_v11 = vmul.f32 %v7313_v63, %v6824_v17  ;;  %v1775_v17 = vadd.f32 %v1764_v39, %v7252_v44 }
 0x3a1   :  { %1841 = vmatmul.f32.gmra.mxu0 %v1784_v47  ;;  %3249 = vmatpush.msra.mxu2 %v3239_v49  ;;  %v7331_v26 = vpop.f32.mrf.mxu1  ;;  %v7339_v49 = vld [vmem:[#allocation13 + $0x8] sm:$0xff] }
 0x3a2   :  { %2922 = vmatpush.msrb.mxu0 %v2904_v27  ;;  %v1512_v47 = vperm.slane %v7339_v49, 7  ;;  %v1786_v13 = vmax.f32 %v1775_v17, 0.0  ;;  %v1629_v27 = vld [vmem:[#allocation15 + $0xf8] sm:$0xff]  ;;  %v1626_v17 = vld [vmem:[#allocation15 + $0xe0] sm:$0xff] }
 0x3a3   :  { %3250 = vmatpush.msra.mxu2 %v3238_v52  ;;  %v2346_v52 = vadd.f32 %v2335_v11, %v7315_v45  ;;  %1631 = vmatpush.msrb.mxu3 %v1629_v27  ;;  %v2898_v11 = vld [vmem:[#allocation15 + $0x508] sm:$0xff]  ;;  %v1624_v27 = vld [vmem:[#allocation15 + $0xd0] sm:$0xff] }
 0x3a4   :  { %2923 = vmatpush.msrb.mxu0 %v2903_v12  ;;  %v1628_v12 = vld [vmem:[#allocation15 + $0xf0] sm:$0xff] }
 0x3a5   :  { %3251 = vmatpush.msra.mxu2 %v3237_v4  ;;  %v2357_v1 = vmax.f32 %v2346_v52, 0.0  ;;  %v2899_v4 = vld [vmem:[#allocation15 + $0x510] sm:$0xff]  ;;  %1632 = vmatpush.msrb.mxu3 %v1628_v12  ;;  %v2300_v52 = vpop.permute.xlu0 %2299 }
 0x3a6   :  { %2924 = vmatpush.msrb.mxu0 %v2902_v7 }
 0x3a7   :  { %3252 = vmatpush.msra.mxu2 %v3236_v0  ;;  %v1765_v0 = vmul.f32 %v7242_v8, %v6776_v54  ;;  %v3234_v54 = vld [vmem:[#allocation15 + $0x630] sm:$0xff] }
 0x3a8   :  { %2403 = vmatmul.f32.gmra.mxu2 %v2356_v40  ;;  %2925 = vmatpush.msrb.mxu0 %v2901_v23  ;;  %v2900_v40 = vld [vmem:[#allocation15 + $0x518] sm:$0xff] }
 0x3a9   :  { %1844 = vmatmul.f32.gmra.mxu0 %v1785_v53  ;;  %v1490_v41 = vpop.f32.mrf.mxu1  ;;  %v2336_v53 = vmul.f32 %v7313_v63, %v6828_v21  ;;  %v1776_v7 = vadd.f32 %v1765_v0, %v7252_v44  ;;  %v1625_v23 = vld [vmem:[#allocation15 + $0xd8] sm:$0xff]  ;;  %v1623_v0 = vld [vmem:[#allocation15 + $0xc8] sm:$0xff] }
 0x3aa   :  { %v1491_v3 = vadd.f32 %v1490_v41, %v7301_v57  ;;  %2926 = vmatpush.msrb.mxu0 %v2900_v40  ;;  %v3235_v57 = vld [vmem:[#allocation15 + $0x638] sm:$0xff]  ;;  %v2897_v41 = vld [vmem:[#allocation15 + $0x500] sm:$0xff]  ;;  %v1766_v40 = vmul.f32 %v7242_v8, %v7029_v2 }
 0x3ab   :  { %v2347_v39 = vadd.f32 %v2336_v53, %v7315_v45  ;;  %3253 = vmatpush.msra.mxu2 %v3235_v57  ;;  %v3233_v53 = vld [vmem:[#allocation15 + $0x628] sm:$0xff]  ;;  %v3232_v2 = vld [vmem:[#allocation15 + $0x620] sm:$0xff] }
 0x3ac   :  { %v7349_v56 = vadd.f32 %v1512_v47, %v1491_v3  ;;  %2927 = vmatpush.msrb.mxu0 %v2899_v4  ;;  %v1627_v47 = vld [vmem:[#allocation15 + $0xe8] sm:$0xff]  ;;  %v1787_v3 = vmax.f32 %v1776_v7, 0.0  ;;  %v1883_v4 = vld [vmem:[#allocation15 + $0x1f0] sm:$0xff]  ;;  %v1777_v12 = vadd.f32 %v1766_v40, %v7252_v44  ;;  %v1501_v7 = vperm.slane %v7240_v16, 4 }
 0x3ad   :  { %1633 = vmatpush.msrb.mxu3 %v1627_v47  ;;  %v2358_v21 = vmax.f32 %v2347_v39, 0.0  ;;  %3254 = vmatpush.msra.mxu2 %v3234_v54  ;;  %v1270_v39 = vpop.f32.mrf.mxu2  ;;  %v2338_v44 = vmul.f32 %v7313_v63, %v7048_v9  ;;  %v1621_v54 = vld [vmem:[#allocation15 + $0xb8] sm:$0xff]  ;;  %v1502_v9 = vperm.slane %v7240_v16, 5 }
 0x3ae   :  { %2928 = vmatpush.msrb.mxu0 %v2898_v11  ;;  %v1882_v11 = vld [vmem:[#allocation15 + $0x1e8] sm:$0xff]  ;;  %v1271_v8 = vadd.f32 %v1270_v39, %v7246_v62 }
 0x3af   :  { %1634 = vmatpush.msrb.mxu3 %v1626_v17  ;;  %3255 = vmatpush.msra.mxu2 %v3233_v53  ;;  %v1290_v17 = vpop.f32.mrf.mxu3  ;;  %v2697_v62 = vld [vmem:[#allocation18 + $0x8] sm:$0xf]  ;;  %v2349_v40 = vadd.f32 %v2338_v44, %v7315_v45 }
 0x3b0   :  { %2406 = vmatmul.f32.gmra.mxu2 %v2357_v1  ;;  %2929 = vmatpush.msrb.mxu0 %v2897_v41  ;;  %v2337_v1 = vmul.f32 %v7313_v63, %v2300_v52  ;;  %v1788_v41 = vmax.f32 %v1777_v12, 0.0  ;;  %v1881_v52 = vld [vmem:[#allocation15 + $0x1e0] sm:$0xff]  ;;  %v1291_v53 = vadd.f32 %v1290_v17, %v7248_v22  ;;  %v1619_v12 = vld [vmem:[#allocation15 + $0xa8] sm:$0xff]  ;;  %v3772_v17 = vld [vmem:[#allocation15 + $0x870] sm:$0xff] }
 0x3b1   :  { %1847 = vmatmul.f32.gmra.mxu0 %v1786_v13  ;;  %v1884_v13 = vld [vmem:[#allocation15 + $0x1f8] sm:$0xff]  ;;  %1635 = vmatpush.msrb.mxu3 %v1625_v23  ;;  %v2360_v39 = vmax.f32 %v2349_v40, 0.0  ;;  %v1618_v22 = vld [vmem:[#allocation15 + $0xa0] sm:$0xff]  ;;  %v3771_v40 = vld [vmem:[#allocation15 + $0x868] sm:$0xff] }
 0x3b2   :  { %v2348_v57 = vadd.f32 %v2337_v1, %v7315_v45  ;;  %1886 = vmatpush.msrb.mxu1 %v1884_v13  ;;  %3256 = vmatpush.msra.mxu2 %v3232_v2  ;;  %v1880_v23 = vld [vmem:[#allocation15 + $0x1d8] sm:$0xff]  ;;  %v3230_v1 = vld [vmem:[#allocation15 + $0x610] sm:$0xff] }
 0x3b3   :  { %1636 = vmatpush.msrb.mxu3 %v1624_v27  ;;  %v1620_v13 = vld [vmem:[#allocation15 + $0xb0] sm:$0xff] }
 0x3b4   :  { %1887 = vmatpush.msrb.mxu1 %v1883_v4  ;;  %v2359_v47 = vmax.f32 %v2348_v57, 0.0  ;;  %v1879_v27 = vld [vmem:[#allocation15 + $0x1d0] sm:$0xff]  ;;  %v1533_v4 = vadd.f32 %v1501_v7, %v1271_v8  ;;  %v3229_v57 = vld [vmem:[#allocation15 + $0x608] sm:$0xff]  ;;  %v3773_v8 = vld [vmem:[#allocation15 + $0x878] sm:$0xff] }
 0x3b5   :  { %1637 = vmatpush.msrb.mxu3 %v1623_v0  ;;  %v1878_v0 = vld [vmem:[#allocation15 + $0x1c8] sm:$0xff]  ;;  %v1877_v7 = vld [vmem:[#allocation15 + $0x1c0] sm:$0xff] }
 0x3b6   :  { %1888 = vmatpush.msrb.mxu1 %v1882_v11  ;;  %v7369_v11 = vperm.slane %v2697_v62, 0  ;;  %v2693_v2 = vmax.f32 %v1533_v4, 0.0  ;;  %v1874_v4 = vld [vmem:[#allocation15 + $0x1a8] sm:$0xff] }
 0x3b8   :  { %2409 = vmatmul.f32.gmra.mxu2 %v2358_v21  ;;  %v1622_v21 = vld [vmem:[#allocation15 + $0xc0] sm:$0xff]  ;;  %1889 = vmatpush.msrb.mxu1 %v1881_v52  ;;  %v3439_v52 = vld [vmem:[#allocation15 + $0x778] sm:$0xff]  ;;  %v2863_v44 = vmul.f32 %v7369_v11, %v6910_v35  ;;  %v1615_v35 = vld [vmem:[#allocation15 + $0x88] sm:$0xff] }
 0x3b9   :  { %1850 = vmatmul.f32.gmra.mxu0 %v1787_v3  ;;  %v3231_v3 = vld [vmem:[#allocation15 + $0x618] sm:$0xff]  ;;  %1638 = vmatpush.msrb.mxu3 %v1622_v21  ;;  %v2339_v21 = vmul.f32 %v7313_v63, %v6837_v31  ;;  %v1875_v31 = vld [vmem:[#allocation15 + $0x1b0] sm:$0xff] }
 0x3ba   :  { %3257 = vmatpush.msra.mxu2 %v3231_v3  ;;  %1890 = vmatpush.msrb.mxu1 %v1880_v23  ;;  %v1617_v3 = vld [vmem:[#allocation15 + $0x98] sm:$0xff] }
 0x3bb   :  { %1639 = vmatpush.msrb.mxu3 %v1621_v54  ;;  %v1876_v54 = vld [vmem:[#allocation15 + $0x1b8] sm:$0xff]  ;;  %v2350_v23 = vadd.f32 %v2339_v21, %v7315_v45 }
 0x3bc   :  { %3258 = vmatpush.msra.mxu2 %v3230_v1  ;;  %1891 = vmatpush.msrb.mxu1 %v1879_v27  ;;  %v3438_v1 = vld [vmem:[#allocation15 + $0x770] sm:$0xff]  ;;  %v3437_v27 = vld [vmem:[#allocation15 + $0x768] sm:$0xff] }
 0x3bd   :  { %1640 = vmatpush.msrb.mxu3 %v1620_v13  ;;  %v1616_v13 = vld [vmem:[#allocation15 + $0x90] sm:$0xff] }
 0x3be   :  { %3259 = vmatpush.msra.mxu2 %v3229_v57  ;;  %1892 = vmatpush.msrb.mxu1 %v1878_v0  ;;  %v1873_v0 = vld [vmem:[#allocation15 + $0x1a0] sm:$0xff] }
 0x3bf   :  { %1641 = vmatpush.msrb.mxu3 %v1619_v12  ;;  %v1614_v12 = vld [vmem:[#allocation15 + $0x80] sm:$0xff] }
 0x3c0   :  { %2412 = vmatmul.f32.gmra.mxu2 %v2359_v47  ;;  %v3228_v47 = vld [vmem:[#allocation15 + $0x600] sm:$0xff]  ;;  %1893 = vmatpush.msrb.mxu1 %v1877_v7  ;;  %v7383_v7 = vpop.f32.mrf.mxu0 }
 0x3c1   :  { %1853 = vmatmul.f32.gmra.mxu0 %v1788_v41  ;;  %v7371_v41 = vadd.f32 %v1502_v9, %v1291_v53  ;;  %1642 = vmatpush.msrb.mxu3 %v1618_v22  ;;  %v2361_v53 = vmax.f32 %v2350_v23, 0.0  ;;  %v3436_v9 = vld [vmem:[#allocation15 + $0x760] sm:$0xff]  ;;  %v1872_v22 = vld [vmem:[#allocation15 + $0x198] sm:$0xff]  ;;  %v1870_v23 = vld [vmem:[#allocation15 + $0x188] sm:$0xff] }
 0x3c2   :  { %3260 = vmatpush.msra.mxu2 %v3228_v47  ;;  %1894 = vmatpush.msrb.mxu1 %v1876_v54  ;;  %v3435_v47 = vld [vmem:[#allocation15 + $0x758] sm:$0xff]  ;;  %v3433_v54 = vld [vmem:[#allocation15 + $0x748] sm:$0xff] }
 0x3c3   :  { %v2874_v62 = vadd.f32 %v2863_v44, %v7371_v41  ;;  %1643 = vmatpush.msrb.mxu3 %v1617_v3  ;;  %v2224_v3 = vld [vmem:[#allocation15 + $0x2f0] sm:$0xff]  ;;  %v3770_v44 = vld [vmem:[#allocation15 + $0x860] sm:$0xff] }
 0x3c4   :  { %3441 = vmatpush.msrb.mxu2 %v3439_v52  ;;  %1895 = vmatpush.msrb.mxu1 %v1875_v31  ;;  %v3434_v52 = vld [vmem:[#allocation15 + $0x750] sm:$0xff]  ;;  %v2222_v31 = vld [vmem:[#allocation15 + $0x2e0] sm:$0xff] }
 0x3c5   :  { %1644 = vmatpush.msrb.mxu3 %v1616_v13  ;;  %v2885_v57 = vmax.f32 %v2874_v62, 0.0  ;;  %v3432_v13 = vld [vmem:[#allocation15 + $0x740] sm:$0xff] }
 0x3c6   :  { %3442 = vmatpush.msrb.mxu2 %v3438_v1  ;;  %1896 = vmatpush.msrb.mxu1 %v1874_v4  ;;  %v3769_v4 = vld [vmem:[#allocation15 + $0x858] sm:$0xff] }
 0x3c7   :  { %1645 = vmatpush.msrb.mxu3 %v1615_v35  ;;  %v3431_v35 = vld [vmem:[#allocation15 + $0x738] sm:$0xff] }
 0x3c8   :  { %2415 = vmatmul.f32.gmra.mxu2 %v2360_v39  ;;  %v2340_v39 = vmul.f32 %v7313_v63, %v6843_v61  ;;  %1897 = vmatpush.msrb.mxu1 %v1873_v0  ;;  %v3768_v0 = vld [vmem:[#allocation15 + $0x850] sm:$0xff] }
 0x3c9   :  { %2734 = vmatmul.f32.vlgmr.msra.gmra.mxu0 %v2693_v2  ;;  %3443 = vmatpush.msrb.mxu2 %v3437_v27  ;;  %v2225_v2 = vld [vmem:[#allocation15 + $0x2f8] sm:$0xff]  ;;  %v2341_v27 = vmul.f32 %v7313_v63, %v6852_v30  ;;  %v2220_v30 = vld [vmem:[#allocation15 + $0x2d0] sm:$0xff] }
 0x3ca   :  { %3775 = vmatpush.msra.mxu0 %v3773_v8  ;;  %v2864_v8 = vmul.f32 %v7369_v11, %v6936_v50  ;;  %v2351_v21 = vadd.f32 %v2340_v39, %v7315_v45  ;;  %1646 = vmatpush.msrb.mxu3 %v1614_v12  ;;  %v2223_v50 = vld [vmem:[#allocation15 + $0x2e8] sm:$0xff]  ;;  %v3430_v12 = vld [vmem:[#allocation15 + $0x730] sm:$0xff]  ;;  %v2755_v39 = vld [vmem:[#allocation15 + $0x4f8] sm:$0xff] }
 0x3cb   :  { %3444 = vmatpush.msrb.mxu2 %v3436_v9  ;;  %1898 = vmatpush.msrb.mxu1 %v1872_v22  ;;  %v2221_v9 = vld [vmem:[#allocation15 + $0x2d8] sm:$0xff]  ;;  %v2219_v22 = vld [vmem:[#allocation15 + $0x2c8] sm:$0xff] }
 0x3cc   :  { %3776 = vmatpush.msra.mxu0 %v3772_v17  ;;  %v2875_v61 = vadd.f32 %v2864_v8, %v7371_v41  ;;  %2227 = vmatpush.msra.mxu3 %v2225_v2  ;;  %v1871_v17 = vld [vmem:[#allocation15 + $0x190] sm:$0xff]  ;;  %v2362_v1 = vmax.f32 %v2351_v21, 0.0  ;;  %v7393_v2 = vpop.f32.mrf.mxu0  ;;  %v3429_v8 = vld [vmem:[#allocation15 + $0x728] sm:$0xff] }
 0x3cd   :  { %3445 = vmatpush.msrb.mxu2 %v3435_v47  ;;  %1899 = vmatpush.msrb.mxu1 %v1871_v17 }
 0x3ce   :  { %3777 = vmatpush.msra.mxu0 %v3771_v40  ;;  %2228 = vmatpush.msra.mxu3 %v2224_v3  ;;  %v2886_v62 = vmax.f32 %v2875_v61, 0.0  ;;  %v1869_v40 = vld [vmem:[#allocation15 + $0x180] sm:$0xff]  ;;  %v3767_v61 = vld [vmem:[#allocation15 + $0x848] sm:$0xff] }
 0x3cf   :  { %3446 = vmatpush.msrb.mxu2 %v3434_v52  ;;  %1900 = vmatpush.msrb.mxu1 %v1870_v23  ;;  %v3428_v52 = vld [vmem:[#allocation15 + $0x720] sm:$0xff]  ;;  %v2866_v23 = vmul.f32 %v7369_v11, %v6992_v33  ;;  %v2753_v33 = vld [vmem:[#allocation15 + $0x4e8] sm:$0xff] }
 0x3d0   :  { %2418 = vmatmul.f32.gmra.mxu2 %v2361_v53  ;;  %3778 = vmatpush.msra.mxu0 %v3770_v44  ;;  %v2865_v53 = vmul.f32 %v7369_v11, %v6962_v19  ;;  %v2325_v19 = vpop.permute.xlu0 %2324  ;;  %v2218_v44 = vld [vmem:[#allocation15 + $0x2c0] sm:$0xff] }
 0x3d1   :  { %2930 = vmatmul.f32.vlgmr.msrb.gmra.mxu0 %v2885_v57  ;;  %3447 = vmatpush.msrb.mxu2 %v3433_v54  ;;  %v2352_v57 = vadd.f32 %v2341_v27, %v7315_v45  ;;  %v2342_v17 = vmul.f32 %v7313_v63, %v2325_v19  ;;  %v3427_v54 = vld [vmem:[#allocation15 + $0x718] sm:$0xff]  ;;  %v2877_v27 = vadd.f32 %v2866_v23, %v7371_v41  ;;  %v2211_v23 = vld [vmem:[#allocation15 + $0x288] sm:$0xff] }
 0x3d2   :  { %2229 = vmatpush.msra.mxu3 %v2223_v50  ;;  %1901 = vmatpush.msrb.mxu1 %v1869_v40  ;;  %v2876_v47 = vadd.f32 %v2865_v53, %v7371_v41  ;;  %v2754_v50 = vld [vmem:[#allocation15 + $0x4f0] sm:$0xff]  ;;  %v3425_v53 = vld [vmem:[#allocation15 + $0x708] sm:$0xff]  ;;  %v2343_v19 = vmul.f32 %v7313_v63, %v7050_v10  ;;  %v3762_v63 = vld [vmem:[#allocation15 + $0x820] sm:$0xff] }
 0x3d3   :  { %3448 = vmatpush.msrb.mxu2 %v3432_v13  ;;  %3779 = vmatpush.msra.mxu0 %v3769_v4  ;;  %v2363_v21 = vmax.f32 %v2352_v57, 0.0  ;;  %v2217_v13 = vld [vmem:[#allocation15 + $0x2b8] sm:$0xff]  ;;  %v3426_v40 = vld [vmem:[#allocation15 + $0x710] sm:$0xff]  ;;  %v2215_v57 = vld [vmem:[#allocation15 + $0x2a8] sm:$0xff] }
 0x3d4   :  { %2230 = vmatpush.msra.mxu3 %v2222_v31  ;;  %2757 = vmatpush.msra.mxu1 %v2755_v39  ;;  %v2887_v3 = vmax.f32 %v2876_v47, 0.0  ;;  %v2353_v31 = vadd.f32 %v2342_v17, %v7315_v45  ;;  %v3765_v4 = vld [vmem:[#allocation15 + $0x838] sm:$0xff]  ;;  %v3424_v39 = vld [vmem:[#allocation15 + $0x700] sm:$0xff]  ;;  %v2888_v47 = vmax.f32 %v2877_v27, 0.0  ;;  %v2212_v10 = vld [vmem:[#allocation15 + $0x290] sm:$0xff] }
 0x3d5   :  { %3449 = vmatpush.msrb.mxu2 %v3431_v35  ;;  %3780 = vmatpush.msra.mxu0 %v3768_v0  ;;  %v2216_v35 = vld [vmem:[#allocation15 + $0x2b0] sm:$0xff] }
 0x3d6   :  { %2231 = vmatpush.msra.mxu3 %v2221_v9  ;;  %2758 = vmatpush.msra.mxu1 %v2754_v50  ;;  %v2364_v0 = vmax.f32 %v2353_v31, 0.0  ;;  %v2752_v50 = vld [vmem:[#allocation15 + $0x4e0] sm:$0xff] }
 0x3d7   :  { %3450 = vmatpush.msrb.mxu2 %v3430_v12  ;;  %3781 = vmatpush.msra.mxu0 %v3767_v61  ;;  %v7402_v12 = vpop.f32.mrf.mxu0 }
 0x3d8   :  { %2421 = vmatmul.f32.gmra.mxu2 %v2362_v1  ;;  %2232 = vmatpush.msra.mxu3 %v2220_v30  ;;  %v7398_v1 = vpop.f32.mrf.mxu2  ;;  %v2830_v9 = vpop.permute.xlu0 %2829  ;;  %v2214_v30 = vld [vmem:[#allocation15 + $0x2a0] sm:$0xff] }
 0x3d9   :  { %2933 = vmatmul.f32.gmra.mxu0 %v2886_v62  ;;  %3451 = vmatpush.msrb.mxu2 %v3429_v8  ;;  %v3766_v62 = vld [vmem:[#allocation15 + $0x840] sm:$0xff]  ;;  %v3764_v8 = vld [vmem:[#allocation15 + $0x830] sm:$0xff] }
 0x3da   :  { %2233 = vmatpush.msra.mxu3 %v2219_v22  ;;  %3782 = vmatpush.msra.mxu0 %v3766_v62  ;;  %v1572_v22 = vld [vmem:[#allocation16] sm:$0xf] }
 0x3db   :  { %3452 = vmatpush.msrb.mxu2 %v3428_v52  ;;  %2759 = vmatpush.msra.mxu1 %v2753_v33  ;;  %v2213_v52 = vld [vmem:[#allocation15 + $0x298] sm:$0xff]  ;;  %v7410_v17 = vperm.slane %v1572_v22, 2  ;;  %v1591_v33 = vperm.slane %v1572_v22, 0  ;;  %v3759_v22 = vld [vmem:[#allocation15 + $0x808] sm:$0xff] }
 0x3dc   :  { %2234 = vmatpush.msra.mxu3 %v2218_v44  ;;  %3783 = vmatpush.msra.mxu0 %v3765_v4  ;;  %v2354_v44 = vadd.f32 %v2343_v19, %v7315_v45  ;;  %v1503_v45 = vperm.slane %v7240_v16, 6  ;;  %v2210_v4 = vld [vmem:[#allocation15 + $0x280] sm:$0xff] }
 0x3dd   :  { %3453 = vmatpush.msrb.mxu2 %v3427_v54  ;;  %2760 = vmatpush.msra.mxu1 %v2752_v50  ;;  %v2750_v50 = vld [vmem:[#allocation15 + $0x4d0] sm:$0xff] }
 0x3de   :  { %2235 = vmatpush.msra.mxu3 %v2217_v13  ;;  %3784 = vmatpush.msra.mxu0 %v3764_v8  ;;  %v1311_v13 = vadd.f32 %v7383_v7, %v7263_v5  ;;  %v2365_v31 = vmax.f32 %v2354_v44, 0.0  ;;  %v2868_v5 = vmul.f32 %v7369_v11, %v7055_v24 }
 0x3df   :  { %3454 = vmatpush.msrb.mxu2 %v3426_v40 }
 0x3e0   :  { %2424 = vmatmul.f32.gmra.mxu2 %v2363_v21  ;;  %2236 = vmatpush.msra.mxu3 %v2216_v35  ;;  %v2867_v21 = vmul.f32 %v7369_v11, %v2830_v9  ;;  %v7408_v61 = vpop.f32.mrf.mxu2  ;;  %v7416_v40 = vpop.permute.xlu0 %2854  ;;  %v2751_v9 = vld [vmem:[#allocation15 + $0x4d8] sm:$0xff]  ;;  %v2879_v19 = vadd.f32 %v2868_v5, %v7371_v41 }
 0x3e1   :  { %2936 = vmatmul.f32.gmra.mxu0 %v2887_v3  ;;  %3455 = vmatpush.msrb.mxu2 %v3425_v53  ;;  %v3763_v3 = vld [vmem:[#allocation15 + $0x828] sm:$0xff]  ;;  %v3761_v53 = vld [vmem:[#allocation15 + $0x818] sm:$0xff] }
 0x3e2   :  { %2237 = vmatpush.msra.mxu3 %v2215_v57  ;;  %v2878_v54 = vadd.f32 %v2867_v21, %v7371_v41  ;;  %3785 = vmatpush.msra.mxu0 %v3763_v3  ;;  %v3760_v57 = vld [vmem:[#allocation15 + $0x810] sm:$0xff] }
 0x3e3   :  { %3456 = vmatpush.msrb.mxu2 %v3424_v39  ;;  %2761 = vmatpush.msra.mxu1 %v2751_v9  ;;  %v1331_v39 = vadd.f32 %v7323_v58, %v7265_v48  ;;  %v2461_v48 = vld [vmem:[#allocation15 + $0x3f8] sm:$0xff]  ;;  %v2458_v9 = vld [vmem:[#allocation15 + $0x3e0] sm:$0xff] }
 0x3e4   :  { %2238 = vmatpush.msra.mxu3 %v2214_v30  ;;  %3786 = vmatpush.msra.mxu0 %v3762_v63  ;;  %v2889_v35 = vmax.f32 %v2878_v54, 0.0  ;;  %v3224_v30 = vld [vmem:[#allocation18 + $0xc] sm:$0xf]  ;;  %v3758_v63 = vld [vmem:[#allocation15 + $0x800] sm:$0xff] }
 0x3e5   :  { %v7425_v24 = vperm.slane %v3224_v30, 0  ;;  %2762 = vmatpush.msra.mxu1 %v2750_v50  ;;  %v4303_v30 = vld [vmem:[#allocation15 + $0xa78] sm:$0xff] }
 0x3e6   :  { %2239 = vmatpush.msra.mxu3 %v2213_v52  ;;  %3787 = vmatpush.msra.mxu0 %v3761_v53  ;;  %v3968_v53 = vld [vmem:[#allocation15 + $0x970] sm:$0xff]  ;;  %v2453_v50 = vld [vmem:[#allocation15 + $0x3b8] sm:$0xff] }
 0x3e8   :  { %2427 = vmatmul.f32.gmra.mxu2 %v2364_v0  ;;  %2240 = vmatpush.msra.mxu3 %v2212_v10  ;;  %v1535_v0 = vadd.f32 %v1503_v45, %v1311_v13  ;;  %v2890_v10 = vmax.f32 %v2879_v19, 0.0  ;;  %v2460_v13 = vld [vmem:[#allocation15 + $0x3f0] sm:$0xff]  ;;  %v2869_v45 = vmul.f32 %v7369_v11, %v7013_v43  ;;  %v3967_v43 = vld [vmem:[#allocation15 + $0x968] sm:$0xff] }
 0x3e9   :  { %2939 = vmatmul.f32.gmra.mxu0 %v2888_v47  ;;  %v1504_v47 = vperm.slane %v7240_v16, 7  ;;  %v3337_v16 = vpop.permute.xlu0 %3336  ;;  %v2456_v19 = vld [vmem:[#allocation15 + $0x3d0] sm:$0xff] }
 0x3ea   :  { %2241 = vmatpush.msra.mxu3 %v2211_v23  ;;  %3788 = vmatpush.msra.mxu0 %v3760_v57  ;;  %v3220_v52 = vmax.f32 %v1535_v0, 0.0  ;;  %v3390_v23 = vmul.f32 %v7425_v24, %v3337_v16  ;;  %v2457_v57 = vld [vmem:[#allocation15 + $0x3d8] sm:$0xff] }
 0x3eb   :  { %v7427_v3 = vadd.f32 %v1504_v47, %v1331_v39  ;;  %v3966_v47 = vld [vmem:[#allocation15 + $0x960] sm:$0xff] }
 0x3ec   :  { %2242 = vmatpush.msra.mxu3 %v2210_v4  ;;  %3789 = vmatpush.msra.mxu0 %v3759_v22  ;;  %v2880_v4 = vadd.f32 %v2869_v45, %v7371_v41  ;;  %v2870_v22 = vmul.f32 %v7369_v11, %v7015_v46  ;;  %v3963_v46 = vld [vmem:[#allocation15 + $0x948] sm:$0xff] }
 0x3ee   :  { %v1824_v62 = vpop.f32.mrf.mxu0  ;;  %3790 = vmatpush.msra.mxu0 %v3758_v63  ;;  %v2891_v39 = vmax.f32 %v2880_v4, 0.0  ;;  %v2881_v16 = vadd.f32 %v2870_v22, %v7371_v41  ;;  %v2871_v4 = vmul.f32 %v7369_v11, %v7020_v51  ;;  %v4300_v51 = vld [vmem:[#allocation15 + $0xa60] sm:$0xff] }
 0x3ef   :  { %v1825_v27 = vadd.f32 %v1824_v62, %v7410_v17 }
 0x3f0   :  { %2430 = vmatmul.f32.gmra.mxu2 %v2365_v31  ;;  %v3969_v31 = vld [vmem:[#allocation15 + $0x978] sm:$0xff]  ;;  %v2892_v45 = vmax.f32 %v2881_v16, 0.0 }
 0x3f1   :  { %v1857_v7 = vmax.f32 %v1825_v27, 0.0  ;;  %2942 = vmatmul.f32.gmra.mxu0 %v2889_v35  ;;  %v3401_v27 = vadd.f32 %v3390_v23, %v7427_v3  ;;  %v2459_v35 = vld [vmem:[#allocation15 + $0x3e8] sm:$0xff]  ;;  %v2747_v23 = vld [vmem:[#allocation15 + $0x4b8] sm:$0xff]  ;;  %v3352_v22 = vpop.permute.xlu0 %3351 }
 0x3f2   :  { %v1609_v8 = vpop.f32.mrf.mxu2  ;;  %3971 = vmatpush.msrb.mxu0 %v3969_v31  ;;  %v4302_v31 = vld [vmem:[#allocation15 + $0xa70] sm:$0xff]  ;;  %v3393_v16 = vmul.f32 %v7425_v24, %v3352_v22  ;;  %v4295_v22 = vld [vmem:[#allocation15 + $0xa38] sm:$0xff] }
 0x3f3   :  { %1902 = vmatmul.f32.vlgmr.msrb.gmra.mxu1 %v1857_v7  ;;  %v1610_v21 = vadd.f32 %v1609_v8, %v1591_v33  ;;  %v2749_v33 = vld [vmem:[#allocation15 + $0x4c8] sm:$0xff]  ;;  %v3412_v7 = vmax.f32 %v3401_v27, 0.0  ;;  %v3391_v8 = vmul.f32 %v7425_v24, %v7060_v28  ;;  %v3964_v28 = vld [vmem:[#allocation15 + $0x950] sm:$0xff]  ;;  %v3392_v27 = vmul.f32 %v7425_v24, %v7068_v60 }
 0x3f4   :  { %2763 = vmatpush.msra.mxu1 %v2749_v33  ;;  %3972 = vmatpush.msrb.mxu0 %v3968_v53  ;;  %v3961_v33 = vld [vmem:[#allocation15 + $0x938] sm:$0xff]  ;;  %v2882_v60 = vadd.f32 %v2871_v4, %v7371_v41  ;;  %v3955_v4 = vld [vmem:[#allocation15 + $0x908] sm:$0xff] }
 0x3f5   :  { %v1612_v44 = vmax.f32 %v1610_v21, 0.0 }
 0x3f6   :  { %v1827_v54 = vpop.f32.mrf.mxu0  ;;  %3973 = vmatpush.msrb.mxu0 %v3967_v43  ;;  %v3403_v43 = vadd.f32 %v3392_v27, %v7427_v3  ;;  %v2446_v27 = vld [vmem:[#allocation15 + $0x380] sm:$0xff] }
 0x3f7   :  { %v1828_v58 = vadd.f32 %v1827_v54, %v7410_v17  ;;  %1647 = vmatmul.f32.vlgmr.msrb.gmra.mxu3 %v1612_v44  ;;  %v2748_v44 = vld [vmem:[#allocation15 + $0x4c0] sm:$0xff]  ;;  %v3402_v54 = vadd.f32 %v3391_v8, %v7427_v3 }
 0x3f8   :  { %3261 = vmatmul.f32.vlgmr.msra.gmra.mxu2 %v3220_v52  ;;  %2463 = vmatpush.msrb.mxu3 %v2461_v48  ;;  %v3965_v52 = vld [vmem:[#allocation15 + $0x958] sm:$0xff]  ;;  %v2455_v48 = vld [vmem:[#allocation15 + $0x3c8] sm:$0xff]  ;;  %v3414_v8 = vmax.f32 %v3403_v43, 0.0 }
 0x3f9   :  { %2945 = vmatmul.f32.gmra.mxu0 %v2890_v10  ;;  %v1858_v62 = vmax.f32 %v1828_v58, 0.0  ;;  %4305 = vmatpush.msra.mxu2 %v4303_v30  ;;  %v2454_v58 = vld [vmem:[#allocation15 + $0x3c0] sm:$0xff]  ;;  %v3413_v63 = vmax.f32 %v3402_v54, 0.0 }
 0x3fa   :  { %2464 = vmatpush.msrb.mxu3 %v2460_v13  ;;  %3974 = vmatpush.msrb.mxu0 %v3966_v47  ;;  %v3959_v47 = vld [vmem:[#allocation15 + $0x928] sm:$0xff]  ;;  %v2744_v54 = vld [vmem:[#allocation15 + $0x4a0] sm:$0xff] }
 0x3fb   :  { %1905 = vmatmul.f32.gmra.mxu1 %v1858_v62  ;;  %v3962_v62 = vld [vmem:[#allocation15 + $0x940] sm:$0xff]  ;;  %4306 = vmatpush.msra.mxu2 %v4302_v31  ;;  %v4298_v31 = vld [vmem:[#allocation15 + $0xa50] sm:$0xff] }
 0x3fc   :  { %2465 = vmatpush.msrb.mxu3 %v2459_v35  ;;  %3975 = vmatpush.msrb.mxu0 %v3965_v52  ;;  %v2452_v35 = vld [vmem:[#allocation15 + $0x3b0] sm:$0xff]  ;;  %v2893_v52 = vmax.f32 %v2882_v60, 0.0  ;;  %v2741_v60 = vld [vmem:[#allocation15 + $0x488] sm:$0xff] }
 0x3fd   :  { %2764 = vmatpush.msra.mxu1 %v2748_v44  ;;  %v3958_v44 = vld [vmem:[#allocation15 + $0x920] sm:$0xff] }
 0x3fe   :  { %v1830_v5 = vpop.f32.mrf.mxu0  ;;  %2466 = vmatpush.msrb.mxu3 %v2458_v9  ;;  %3976 = vmatpush.msrb.mxu0 %v3964_v28  ;;  %v2746_v9 = vld [vmem:[#allocation15 + $0x4b0] sm:$0xff] }
 0x3ff   :  { %v1831_v0 = vadd.f32 %v1830_v5, %v7410_v17  ;;  %2765 = vmatpush.msra.mxu1 %v2747_v23  ;;  %v2451_v5 = vld [vmem:[#allocation15 + $0x3a8] sm:$0xff]  ;;  %v2448_v28 = vld [vmem:[#allocation15 + $0x390] sm:$0xff] }
 0x400   :  { %3457 = vmatmul.f32.vlgmr.msrb.gmra.mxu2 %v3412_v7  ;;  %2467 = vmatpush.msrb.mxu3 %v2457_v57  ;;  %v4301_v7 = vld [vmem:[#allocation15 + $0xa68] sm:$0xff]  ;;  %v3960_v57 = vld [vmem:[#allocation15 + $0x930] sm:$0xff] }
 0x401   :  { %2948 = vmatmul.f32.gmra.mxu0 %v2891_v39  ;;  %v1859_v21 = vmax.f32 %v1831_v0, 0.0  ;;  %v2745_v0 = vld [vmem:[#allocation15 + $0x4a8] sm:$0xff]  ;;  %v2450_v39 = vld [vmem:[#allocation15 + $0x3a0] sm:$0xff]  ;;  %2766 = vmatpush.msra.mxu1 %v2746_v9 }
 0x402   :  { %2468 = vmatpush.msrb.mxu3 %v2456_v19  ;;  %3977 = vmatpush.msrb.mxu0 %v3963_v46  ;;  %v2449_v19 = vld [vmem:[#allocation15 + $0x398] sm:$0xff]  ;;  %v2447_v23 = vld [vmem:[#allocation15 + $0x388] sm:$0xff] }
 0x403   :  { %1908 = vmatmul.f32.gmra.mxu1 %v1859_v21  ;;  %4307 = vmatpush.msra.mxu2 %v4301_v7  ;;  %v4297_v9 = vld [vmem:[#allocation15 + $0xa48] sm:$0xff]  ;;  %v3954_v7 = vld [vmem:[#allocation15 + $0x900] sm:$0xff] }
 0x404   :  { %2469 = vmatpush.msrb.mxu3 %v2455_v48  ;;  %3978 = vmatpush.msrb.mxu0 %v3962_v62  ;;  %v7450_v48 = vpop.permute.xlu1 %3371  ;;  %v3956_v62 = vld [vmem:[#allocation15 + $0x910] sm:$0xff] }
 0x405   :  { %2767 = vmatpush.msra.mxu1 %v2745_v0  ;;  %4308 = vmatpush.msra.mxu2 %v4300_v51  ;;  %v2873_v51 = vmul.f32 %v7369_v11, %v7057_v25  ;;  %v4294_v25 = vld [vmem:[#allocation15 + $0xa30] sm:$0xff] }
 0x406   :  { %v1833_v10 = vpop.f32.mrf.mxu0  ;;  %2470 = vmatpush.msrb.mxu3 %v2454_v58  ;;  %3979 = vmatpush.msrb.mxu0 %v3961_v33  ;;  %v2872_v58 = vmul.f32 %v7369_v11, %v7416_v40  ;;  %v2742_v40 = vld [vmem:[#allocation15 + $0x490] sm:$0xff] }
 0x407   :  { %v1834_v13 = vadd.f32 %v1833_v10, %v7410_v17  ;;  %v3957_v10 = vld [vmem:[#allocation15 + $0x918] sm:$0xff]  ;;  %2768 = vmatpush.msra.mxu1 %v2744_v54  ;;  %v2990_v11 = vld [vmem:[#allocation15 + $0x5f0] sm:$0xff] }
 0x408   :  { %3460 = vmatmul.f32.gmra.mxu2 %v3413_v63  ;;  %2471 = vmatpush.msrb.mxu3 %v2453_v50  ;;  %v4299_v63 = vld [vmem:[#allocation15 + $0xa58] sm:$0xff]  ;;  %v3404_v50 = vadd.f32 %v3393_v16, %v7427_v3 }
 0x409   :  { %2951 = vmatmul.f32.gmra.mxu0 %v2892_v45  ;;  %v1860_v53 = vmax.f32 %v1834_v13, 0.0  ;;  %v2743_v13 = vld [vmem:[#allocation15 + $0x498] sm:$0xff]  ;;  %v2883_v45 = vadd.f32 %v2872_v58, %v7371_v41  ;;  %4309 = vmatpush.msra.mxu2 %v4299_v63 }
 0x40a   :  { %2472 = vmatpush.msrb.mxu3 %v2452_v35  ;;  %3980 = vmatpush.msrb.mxu0 %v3960_v57  ;;  %v2165_v35 = vld [vmem:[#allocation16 + $0x4] sm:$0xf]  ;;  %v3415_v33 = vmax.f32 %v3404_v50, 0.0  ;;  %v3394_v57 = vmul.f32 %v7425_v24, %v7062_v29  ;;  %v3282_v58 = vld [vmem:[#allocation15 + $0x6f8] sm:$0xff] }
 0x40b   :  { %1911 = vmatmul.f32.gmra.mxu1 %v1860_v53  ;;  %4310 = vmatpush.msra.mxu2 %v4298_v31  ;;  %v2187_v0 = vperm.slane %v2165_v35, 0 }
 0x40c   :  { %2473 = vmatpush.msrb.mxu3 %v2451_v5  ;;  %3981 = vmatpush.msrb.mxu0 %v3959_v47  ;;  %v2894_v5 = vmax.f32 %v2883_v45, 0.0  ;;  %v7472_v45 = vperm.slane %v2165_v35, 2  ;;  %v7476_v35 = vld [vmem:[#allocation13 + $0x8] sm:$0xff] }
 0x40d   :  { %2769 = vmatpush.msra.mxu1 %v2743_v13  ;;  %4311 = vmatpush.msra.mxu2 %v4297_v9  ;;  %v3395_v13 = vmul.f32 %v7425_v24, %v7074_v38 }
 0x40e   :  { %v1836_v30 = vpop.f32.mrf.mxu0  ;;  %2474 = vmatpush.msrb.mxu3 %v2450_v39  ;;  %3982 = vmatpush.msrb.mxu0 %v3958_v44  ;;  %v4296_v39 = vld [vmem:[#allocation15 + $0xa40] sm:$0xff] }
 0x40f   :  { %v1837_v21 = vadd.f32 %v1836_v30, %v7410_v17  ;;  %2770 = vmatpush.msra.mxu1 %v2742_v40  ;;  %v2740_v30 = vld [vmem:[#allocation15 + $0x480] sm:$0xff]  ;;  %4312 = vmatpush.msra.mxu2 %v4296_v39  ;;  %v3406_v40 = vadd.f32 %v3395_v13, %v7427_v3  ;;  %v3872_v13 = vpop.permute.xlu0 %3871 }
 0x410   :  { %3463 = vmatmul.f32.gmra.mxu2 %v3414_v8  ;;  %2475 = vmatpush.msrb.mxu3 %v2449_v19  ;;  %v7462_v8 = vpop.permute.xlu1 %3381  ;;  %v3405_v19 = vadd.f32 %v3394_v57, %v7427_v3  ;;  %v3279_v57 = vld [vmem:[#allocation15 + $0x6e0] sm:$0xff] }
 0x411   :  { %2954 = vmatmul.f32.gmra.mxu0 %v2893_v52  ;;  %v1861_v46 = vmax.f32 %v1837_v21, 0.0  ;;  %2771 = vmatpush.msra.mxu1 %v2741_v60  ;;  %v2991_v21 = vld [vmem:[#allocation15 + $0x5f8] sm:$0xff]  ;;  %v2884_v52 = vadd.f32 %v2873_v51, %v7371_v41  ;;  %v4293_v41 = vld [vmem:[#allocation15 + $0xa28] sm:$0xff]  ;;  %v3417_v51 = vmax.f32 %v3406_v40, 0.0 }
 0x412   :  { %2476 = vmatpush.msrb.mxu3 %v2448_v28  ;;  %3983 = vmatpush.msrb.mxu0 %v3957_v10  ;;  %v3416_v28 = vmax.f32 %v3405_v19, 0.0  ;;  %v1505_v10 = vperm.slane %v7339_v49, 0  ;;  %v2988_v49 = vld [vmem:[#allocation15 + $0x5e0] sm:$0xff] }
 0x413   :  { %1914 = vmatmul.f32.gmra.mxu1 %v1861_v46  ;;  %4313 = vmatpush.msra.mxu2 %v4295_v22  ;;  %v1351_v46 = vadd.f32 %v7398_v1, %v7276_v37  ;;  %v2895_v50 = vmax.f32 %v2884_v52, 0.0  ;;  %v4292_v37 = vld [vmem:[#allocation15 + $0xa20] sm:$0xff]  ;;  %v3396_v52 = vmul.f32 %v7425_v24, %v7065_v32 }
 0x414   :  { %2477 = vmatpush.msrb.mxu3 %v2447_v23  ;;  %3984 = vmatpush.msrb.mxu0 %v3956_v62  ;;  %v2989_v23 = vld [vmem:[#allocation15 + $0x5e8] sm:$0xff]  ;;  %v3281_v62 = vld [vmem:[#allocation15 + $0x6f0] sm:$0xff]  ;;  %v2984_v32 = vld [vmem:[#allocation15 + $0x5c0] sm:$0xff] }
 0x415   :  { %2772 = vmatpush.msra.mxu1 %v2740_v30  ;;  %4314 = vmatpush.msra.mxu2 %v4294_v25 }
 0x416   :  { %v1839_v53 = vpop.f32.mrf.mxu0  ;;  %2478 = vmatpush.msrb.mxu3 %v2446_v27  ;;  %3985 = vmatpush.msrb.mxu0 %v3955_v4  ;;  %v1370_v27 = vpop.f32.mrf.mxu3  ;;  %v3280_v4 = vld [vmem:[#allocation15 + $0x6e8] sm:$0xff] }
 0x417   :  { %v1840_v43 = vadd.f32 %v1839_v53, %v7410_v17  ;;  %2993 = vmatpush.msrb.mxu1 %v2991_v21  ;;  %4315 = vmatpush.msra.mxu2 %v4293_v41  ;;  %v1537_v53 = vadd.f32 %v1505_v10, %v1351_v46  ;;  %v1371_v38 = vadd.f32 %v1370_v27, %v7278_v20  ;;  %v4290_v20 = vld [vmem:[#allocation15 + $0xa10] sm:$0xff] }
 0x418   :  { %3466 = vmatmul.f32.gmra.mxu2 %v3415_v33  ;;  %3986 = vmatpush.msrb.mxu0 %v3954_v7  ;;  %v3867_v1 = vpop.permute.xlu1 %3866  ;;  %v1506_v33 = vperm.slane %v7476_v35, 1  ;;  %v3754_v7 = vld [vmem:[#allocation18 + $0x10] sm:$0xf] }
 0x419   :  { %2957 = vmatmul.f32.gmra.mxu0 %v2894_v5  ;;  %v1862_v47 = vmax.f32 %v1840_v43, 0.0  ;;  %2994 = vmatpush.msrb.mxu1 %v2990_v11  ;;  %v4291_v43 = vld [vmem:[#allocation15 + $0xa18] sm:$0xff]  ;;  %v3750_v30 = vmax.f32 %v1537_v53, 0.0  ;;  %v2986_v21 = vld [vmem:[#allocation15 + $0x5d0] sm:$0xff]  ;;  %v3397_v53 = vmul.f32 %v7425_v24, %v7450_v48 }
 0x41a   :  { %v2987_v5 = vld [vmem:[#allocation15 + $0x5d8] sm:$0xff]  ;;  %4316 = vmatpush.msra.mxu2 %v4292_v37  ;;  %v7482_v19 = vadd.f32 %v1506_v33, %v1371_v38  ;;  %v2982_v33 = vld [vmem:[#allocation15 + $0x5b0] sm:$0xff] }
 0x41b   :  { %1917 = vmatmul.f32.gmra.mxu1 %v1862_v47  ;;  %v2205_v29 = vpop.f32.mrf.mxu2  ;;  %v7480_v47 = vperm.slane %v3754_v7, 0 }
 0x41c   :  { %v2206_v44 = vadd.f32 %v2205_v29, %v2187_v0  ;;  %2995 = vmatpush.msrb.mxu1 %v2989_v23  ;;  %4317 = vmatpush.msra.mxu2 %v4291_v43  ;;  %v3278_v29 = vld [vmem:[#allocation15 + $0x6d8] sm:$0xff]  ;;  %v3276_v23 = vld [vmem:[#allocation15 + $0x6c8] sm:$0xff]  ;;  %v3408_v43 = vadd.f32 %v3397_v53, %v7427_v3  ;;  %v4492_v53 = vld [vmem:[#allocation15 + $0xb40] sm:$0xff] }
 0x41d   :  { %v3920_v25 = vmul.f32 %v7480_v47, %v3867_v1  ;;  %v3921_v1 = vmul.f32 %v7480_v47, %v3872_v13  ;;  %v4493_v13 = vld [vmem:[#allocation15 + $0xb48] sm:$0xff] }
 0x41e   :  { %v2208_v54 = vmax.f32 %v2206_v44, 0.0  ;;  %v1842_v16 = vpop.f32.mrf.mxu0  ;;  %2996 = vmatpush.msrb.mxu1 %v2988_v49  ;;  %v4289_v44 = vld [vmem:[#allocation15 + $0xa08] sm:$0xff]  ;;  %4318 = vmatpush.msra.mxu2 %v4290_v20  ;;  %v2983_v49 = vld [vmem:[#allocation15 + $0x5b8] sm:$0xff]  ;;  %v4832_v20 = vld [vmem:[#allocation15 + $0xc70] sm:$0xff] }
 0x41f   :  { %v1843_v63 = vadd.f32 %v1842_v16, %v7410_v17  ;;  %v3277_v16 = vld [vmem:[#allocation15 + $0x6d0] sm:$0xff]  ;;  %v3931_v10 = vadd.f32 %v3920_v25, %v7482_v19 }
 0x420   :  { %2243 = vmatmul.f32.vlgmr.msra.gmra.mxu3 %v2208_v54  ;;  %3469 = vmatmul.f32.gmra.mxu2 %v3416_v28  ;;  %v2985_v54 = vld [vmem:[#allocation15 + $0x5c8] sm:$0xff]  ;;  %v3407_v28 = vadd.f32 %v3396_v52, %v7427_v3  ;;  %v2980_v52 = vld [vmem:[#allocation15 + $0x5a0] sm:$0xff] }
 0x421   :  { %2960 = vmatmul.f32.gmra.mxu0 %v2895_v50  ;;  %v1863_v31 = vmax.f32 %v1843_v63, 0.0  ;;  %3284 = vmatpush.msra.mxu3 %v3282_v58  ;;  %v4288_v58 = vld [vmem:[#allocation15 + $0xa00] sm:$0xff]  ;;  %v4499_v63 = vld [vmem:[#allocation15 + $0xb78] sm:$0xff]  ;;  %v7490_v50 = vpop.permute.xlu1 %4401  ;;  %v3942_v40 = vmax.f32 %v3931_v10, 0.0  ;;  %v4831_v10 = vld [vmem:[#allocation15 + $0xc68] sm:$0xff] }
 0x422   :  { %2997 = vmatpush.msrb.mxu1 %v2987_v5  ;;  %4319 = vmatpush.msra.mxu2 %v4289_v44  ;;  %v3418_v37 = vmax.f32 %v3407_v28, 0.0  ;;  %v3275_v5 = vld [vmem:[#allocation15 + $0x6c0] sm:$0xff] }
 0x423   :  { %1920 = vmatmul.f32.gmra.mxu1 %v1863_v31  ;;  %v2401_v9 = vpop.f32.mrf.mxu2  ;;  %3285 = vmatpush.msra.mxu3 %v3281_v62 }
 0x424   :  { %v2402_v60 = vadd.f32 %v2401_v9, %v7472_v45  ;;  %2998 = vmatpush.msrb.mxu1 %v2986_v21  ;;  %4320 = vmatpush.msra.mxu2 %v4288_v58  ;;  %v4497_v9 = vld [vmem:[#allocation15 + $0xb68] sm:$0xff]  ;;  %v2979_v58 = vld [vmem:[#allocation15 + $0x598] sm:$0xff] }
 0x425   :  { %3286 = vmatpush.msra.mxu3 %v3280_v4  ;;  %v4498_v4 = vld [vmem:[#allocation15 + $0xb70] sm:$0xff] }
 0x426   :  { %v2434_v0 = vmax.f32 %v2402_v60, 0.0  ;;  %v1845_v39 = vpop.f32.mrf.mxu0  ;;  %2999 = vmatpush.msrb.mxu1 %v2985_v54  ;;  %4501 = vmatpush.msrb.mxu2 %v4499_v63  ;;  %v3932_v60 = vadd.f32 %v3921_v1, %v7482_v19  ;;  %v3398_v54 = vmul.f32 %v7425_v24, %v7172_v15  ;;  %v4830_v63 = vld [vmem:[#allocation15 + $0xc60] sm:$0xff] }
 0x427   :  { %v1846_v22 = vadd.f32 %v1845_v39, %v7410_v17  ;;  %3287 = vmatpush.msra.mxu3 %v3279_v57  ;;  %v2981_v57 = vld [vmem:[#allocation15 + $0x5a8] sm:$0xff]  ;;  %v4833_v39 = vld [vmem:[#allocation15 + $0xc78] sm:$0xff] }
 0x428   :  { %2479 = vmatmul.f32.vlgmr.msrb.gmra.mxu3 %v2434_v0  ;;  %3472 = vmatmul.f32.gmra.mxu2 %v3417_v51  ;;  %v4496_v0 = vld [vmem:[#allocation15 + $0xb60] sm:$0xff]  ;;  %v3274_v51 = vld [vmem:[#allocation15 + $0x6b8] sm:$0xff]  ;;  %v3943_v25 = vmax.f32 %v3932_v60, 0.0 }
 0x429   :  { %3791 = vmatmul.f32.vlgmr.msra.gmra.mxu0 %v3750_v30  ;;  %v1864_v11 = vmax.f32 %v1846_v22, 0.0  ;;  %3288 = vmatpush.msra.mxu3 %v3278_v29  ;;  %v7500_v30 = vpop.permute.xlu1 %4406  ;;  %v3419_v29 = vmax.f32 %v3408_v43, 0.0  ;;  %v2695_v43 = vld [vmem:[#allocation16 + $0x8] sm:$0xf] }
 0x42a   :  { %3000 = vmatpush.msrb.mxu1 %v2984_v32  ;;  %4502 = vmatpush.msrb.mxu2 %v4498_v4  ;;  %v3409_v32 = vadd.f32 %v3398_v54, %v7427_v3 }
 0x42b   :  { %1923 = vmatmul.f32.gmra.mxu1 %v1864_v11  ;;  %v2404_v46 = vpop.f32.mrf.mxu2  ;;  %3289 = vmatpush.msra.mxu3 %v3277_v16  ;;  %v4495_v11 = vld [vmem:[#allocation15 + $0xb58] sm:$0xff]  ;;  %v3922_v16 = vmul.f32 %v7480_v47, %v7190_v36 }
 0x42c   :  { %v2405_v41 = vadd.f32 %v2404_v46, %v7472_v45  ;;  %3001 = vmatpush.msrb.mxu1 %v2983_v49  ;;  %4503 = vmatpush.msrb.mxu2 %v4497_v9  ;;  %v4494_v46 = vld [vmem:[#allocation15 + $0xb50] sm:$0xff]  ;;  %v3420_v1 = vmax.f32 %v3409_v32, 0.0  ;;  %v4825_v32 = vld [vmem:[#allocation15 + $0xc38] sm:$0xff] }
 0x42d   :  { %3290 = vmatpush.msra.mxu3 %v3276_v23  ;;  %4835 = vmatpush.msra.mxu0 %v4833_v39  ;;  %v3933_v15 = vadd.f32 %v3922_v16, %v7482_v19  ;;  %v2978_v23 = vld [vmem:[#allocation15 + $0x590] sm:$0xff] }
 0x42e   :  { %v1848_v62 = vpop.f32.mrf.mxu0  ;;  %v2435_v31 = vmax.f32 %v2405_v41, 0.0  ;;  %3002 = vmatpush.msrb.mxu1 %v2982_v33  ;;  %4504 = vmatpush.msrb.mxu2 %v4496_v0  ;;  %v3399_v33 = vmul.f32 %v7425_v24, %v7462_v8  ;;  %v3272_v0 = vld [vmem:[#allocation15 + $0x6a8] sm:$0xff]  ;;  %v3271_v8 = vld [vmem:[#allocation15 + $0x6a0] sm:$0xff] }
 0x42f   :  { %v1849_v27 = vadd.f32 %v1848_v62, %v7410_v17  ;;  %3291 = vmatpush.msra.mxu3 %v3275_v5  ;;  %4836 = vmatpush.msra.mxu0 %v4832_v20  ;;  %v3273_v62 = vld [vmem:[#allocation15 + $0x6b0] sm:$0xff]  ;;  %v3944_v4 = vmax.f32 %v3933_v15, 0.0  ;;  %v9313_v5 = vld [vmem:[#allocation36_spill] sm:$0xff]  ;;  %v2717_v20 = vperm.slane %v2695_v43, 0 }
 0x430   :  { %2482 = vmatmul.f32.gmra.mxu3 %v2435_v31  ;;  %3475 = vmatmul.f32.gmra.mxu2 %v3418_v37  ;;  %v4829_v31 = vld [vmem:[#allocation15 + $0xc58] sm:$0xff]  ;;  %v3410_v39 = vadd.f32 %v3399_v33, %v7427_v3  ;;  %v4486_v33 = vld [vmem:[#allocation15 + $0xb10] sm:$0xff] }
 0x431   :  { %3987 = vmatmul.f32.vlgmr.msrb.gmra.mxu0 %v3942_v40  ;;  %v1865_v38 = vmax.f32 %v1849_v27, 0.0  ;;  %3292 = vmatpush.msra.mxu3 %v3274_v51  ;;  %v2977_v27 = vld [vmem:[#allocation15 + $0x588] sm:$0xff]  ;;  %v7513_v9 = vpop.permute.xlu1 %4411 }
 0x432   :  { %3003 = vmatpush.msrb.mxu1 %v2981_v57  ;;  %4505 = vmatpush.msrb.mxu2 %v4495_v11  ;;  %v2976_v57 = vld [vmem:[#allocation15 + $0x580] sm:$0xff]  ;;  %v3421_v16 = vmax.f32 %v3410_v39, 0.0 }
 0x433   :  { %1926 = vmatmul.f32.gmra.mxu1 %v1865_v38  ;;  %v2407_v7 = vpop.f32.mrf.mxu2  ;;  %4837 = vmatpush.msra.mxu0 %v4831_v10  ;;  %v4828_v38 = vld [vmem:[#allocation15 + $0xc50] sm:$0xff] }
 0x434   :  { %v2408_v48 = vadd.f32 %v2407_v7, %v7472_v45  ;;  %3004 = vmatpush.msrb.mxu1 %v2980_v52  ;;  %4506 = vmatpush.msrb.mxu2 %v4494_v46  ;;  %v3923_v7 = vmul.f32 %v7480_v47, %v9313_v5  ;;  %v3267_v5 = vld [vmem:[#allocation15 + $0x680] sm:$0xff] }
 0x435   :  { %4838 = vmatpush.msra.mxu0 %v4830_v63  ;;  %3293 = vmatpush.msra.mxu3 %v3273_v62  ;;  %v3269_v63 = vld [vmem:[#allocation15 + $0x690] sm:$0xff]  ;;  %v3812_v62 = vld [vmem:[#allocation15 + $0x8f8] sm:$0xff] }
 0x436   :  { %v1851_v22 = vpop.f32.mrf.mxu0  ;;  %v2436_v21 = vmax.f32 %v2408_v48, 0.0  ;;  %3005 = vmatpush.msrb.mxu1 %v2979_v58  ;;  %4507 = vmatpush.msrb.mxu2 %v4493_v13  ;;  %v4827_v48 = vld [vmem:[#allocation15 + $0xc48] sm:$0xff] }
 0x437   :  { %v1852_v44 = vadd.f32 %v1851_v22, %v7410_v17  ;;  %4839 = vmatpush.msra.mxu0 %v4829_v31  ;;  %v3934_v22 = vadd.f32 %v3923_v7, %v7482_v19  ;;  %3294 = vmatpush.msra.mxu3 %v3272_v0  ;;  %v1507_v7 = vperm.slane %v7476_v35, 2  ;;  %v4485_v0 = vld [vmem:[#allocation15 + $0xb08] sm:$0xff] }
 0x438   :  { %2485 = vmatmul.f32.gmra.mxu3 %v2436_v21  ;;  %3478 = vmatmul.f32.gmra.mxu2 %v3419_v29  ;;  %v4490_v21 = vld [vmem:[#allocation15 + $0xb30] sm:$0xff]  ;;  %v3887_v29 = vpop.permute.xlu0 %3886 }
 0x439   :  { %v1866_v28 = vmax.f32 %v1852_v44, 0.0  ;;  %3990 = vmatmul.f32.gmra.mxu0 %v3943_v25  ;;  %3006 = vmatpush.msrb.mxu1 %v2978_v23  ;;  %v4826_v44 = vld [vmem:[#allocation15 + $0xc40] sm:$0xff]  ;;  %v3270_v25 = vld [vmem:[#allocation15 + $0x698] sm:$0xff]  ;;  %v3924_v58 = vmul.f32 %v7480_v47, %v3887_v29  ;;  %v3945_v10 = vmax.f32 %v3934_v22, 0.0  ;;  %v3892_v31 = vpop.permute.xlu1 %3891  ;;  %v4284_v22 = vld [vmem:[#allocation18 + $0x14] sm:$0xf] }
 0x43a   :  { %4508 = vmatpush.msrb.mxu2 %v4492_v53  ;;  %4840 = vmatpush.msra.mxu0 %v4828_v38  ;;  %v4488_v23 = vld [vmem:[#allocation15 + $0xb20] sm:$0xff]  ;;  %v4823_v53 = vld [vmem:[#allocation15 + $0xc28] sm:$0xff]  ;;  %v4821_v29 = vld [vmem:[#allocation15 + $0xc18] sm:$0xff] }
 0x43b   :  { %1929 = vmatmul.f32.gmra.mxu1 %v1866_v28  ;;  %v2410_v41 = vpop.f32.mrf.mxu2  ;;  %3295 = vmatpush.msra.mxu3 %v3271_v8  ;;  %v4489_v28 = vld [vmem:[#allocation15 + $0xb28] sm:$0xff]  ;;  %v4822_v8 = vld [vmem:[#allocation15 + $0xc20] sm:$0xff] }
 0x43c   :  { %v2411_v36 = vadd.f32 %v2410_v41, %v7472_v45  ;;  %3007 = vmatpush.msrb.mxu1 %v2977_v27  ;;  %4841 = vmatpush.msra.mxu0 %v4827_v48  ;;  %v9314_v41 = vld [vmem:[#allocation34_spill] sm:$0xff]  ;;  %v7524_v27 = vperm.slane %v2695_v43, 2  ;;  %v1391_v43 = vadd.f32 %v7393_v2, %v7287_v59  ;;  %v3925_v59 = vmul.f32 %v7480_v47, %v3892_v31  ;;  %v3808_v31 = vld [vmem:[#allocation15 + $0x8d8] sm:$0xff] }
 0x43d   :  { %3296 = vmatpush.msra.mxu3 %v3270_v25  ;;  %v3400_v15 = vmul.f32 %v7425_v24, %v9314_v41  ;;  %v3935_v24 = vadd.f32 %v3924_v58, %v7482_v19  ;;  %v1508_v25 = vperm.slane %v7476_v35, 3  ;;  %v3809_v58 = vld [vmem:[#allocation15 + $0x8e0] sm:$0xff] }
 0x43e   :  { %v1854_v37 = vpop.f32.mrf.mxu0  ;;  %v2437_v49 = vmax.f32 %v2411_v36, 0.0  ;;  %3008 = vmatpush.msrb.mxu1 %v2976_v57  ;;  %4842 = vmatpush.msra.mxu0 %v4826_v44  ;;  %v4824_v36 = vld [vmem:[#allocation15 + $0xc30] sm:$0xff]  ;;  %v1411_v44 = vadd.f32 %v7331_v26, %v7289_v18  ;;  %v3516_v18 = vld [vmem:[#allocation15 + $0x7e8] sm:$0xff] }
 0x43f   :  { %v1855_v40 = vadd.f32 %v1854_v37, %v7410_v17  ;;  %v4491_v17 = vld [vmem:[#allocation15 + $0xb38] sm:$0xff]  ;;  %v3411_v37 = vadd.f32 %v3400_v15, %v7427_v3  ;;  %3297 = vmatpush.msra.mxu3 %v3269_v63  ;;  %v3946_v48 = vmax.f32 %v3935_v24, 0.0 }
 0x440   :  { %2488 = vmatmul.f32.gmra.mxu3 %v2437_v49  ;;  %3481 = vmatmul.f32.gmra.mxu2 %v3420_v1  ;;  %v4487_v49 = vld [vmem:[#allocation15 + $0xb18] sm:$0xff]  ;;  %v3268_v1 = vld [vmem:[#allocation15 + $0x688] sm:$0xff]  ;;  %v7528_v3 = vpop.permute.xlu0 %4421  ;;  %v7542_v63 = vadd.f32 %v1508_v25, %v1411_v44  ;;  %v5026_v25 = vld [vmem:[#allocation15 + $0xd60] sm:$0xff] }
 0x441   :  { %v1867_v60 = vmax.f32 %v1855_v40, 0.0  ;;  %3993 = vmatmul.f32.gmra.mxu0 %v3944_v4  ;;  %4509 = vmatpush.msrb.mxu2 %v4491_v17  ;;  %v3811_v4 = vld [vmem:[#allocation15 + $0x8f0] sm:$0xff]  ;;  %v3422_v17 = vmax.f32 %v3411_v37, 0.0 }
 0x442   :  { %4843 = vmatpush.msra.mxu0 %v4825_v32  ;;  %3298 = vmatpush.msra.mxu3 %v3268_v1  ;;  %v9315_v37 = vld [vmem:[#allocation35_spill] sm:$0xff] }
 0x443   :  { %1932 = vmatmul.f32.gmra.mxu1 %v1867_v60  ;;  %v2413_v51 = vpop.f32.mrf.mxu2  ;;  %4510 = vmatpush.msrb.mxu2 %v4490_v21  ;;  %v3810_v21 = vld [vmem:[#allocation15 + $0x8e8] sm:$0xff] }
 0x444   :  { %v2414_v52 = vadd.f32 %v2413_v51, %v7472_v45  ;;  %4844 = vmatpush.msra.mxu0 %v4824_v36  ;;  %3299 = vmatpush.msra.mxu3 %v3267_v5  ;;  %v3518_v51 = vld [vmem:[#allocation15 + $0x7f8] sm:$0xff]  ;;  %v4819_v36 = vld [vmem:[#allocation15 + $0xc08] sm:$0xff]  ;;  %v3513_v5 = vld [vmem:[#allocation15 + $0x7d0] sm:$0xff] }
 0x445   :  { %4511 = vmatpush.msrb.mxu2 %v4489_v28  ;;  %v4820_v28 = vld [vmem:[#allocation15 + $0xc10] sm:$0xff] }
 0x446   :  { %v2735_v11 = vpop.f32.mrf.mxu0  ;;  %v2438_v54 = vmax.f32 %v2414_v52, 0.0  ;;  %4845 = vmatpush.msra.mxu0 %v4823_v53  ;;  %v1539_v52 = vadd.f32 %v1507_v7, %v1391_v43  ;;  %3520 = vmatpush.msrb.mxu3 %v3518_v51  ;;  %v4818_v53 = vld [vmem:[#allocation15 + $0xc00] sm:$0xff] }
 0x447   :  { %v2736_v46 = vadd.f32 %v2735_v11, %v2717_v20  ;;  %4512 = vmatpush.msrb.mxu2 %v4488_v23  ;;  %v4484_v20 = vld [vmem:[#allocation15 + $0xb00] sm:$0xff]  ;;  %v3517_v11 = vld [vmem:[#allocation15 + $0x7f0] sm:$0xff] }
 0x448   :  { %2491 = vmatmul.f32.gmra.mxu3 %v2438_v54  ;;  %3484 = vmatmul.f32.gmra.mxu2 %v3421_v16  ;;  %v3936_v16 = vadd.f32 %v3925_v59, %v7482_v19  ;;  %v4280_v26 = vmax.f32 %v1539_v52, 0.0  ;;  %v3515_v23 = vld [vmem:[#allocation15 + $0x7e0] sm:$0xff]  ;;  %v7547_v1 = vpop.permute.xlu0 %4426  ;;  %v5027_v59 = vld [vmem:[#allocation15 + $0xd68] sm:$0xff] }
 0x449   :  { %v2738_v13 = vmax.f32 %v2736_v46, 0.0  ;;  %3996 = vmatmul.f32.gmra.mxu0 %v3945_v10  ;;  %4513 = vmatpush.msrb.mxu2 %v4487_v49  ;;  %v7539_v46 = vperm.slane %v4284_v22, 0  ;;  %v3897_v10 = vpop.permute.xlu1 %3896  ;;  %v3511_v51 = vld [vmem:[#allocation15 + $0x7c0] sm:$0xff] }
 0x44a   :  { %4846 = vmatpush.msra.mxu0 %v4822_v8  ;;  %3521 = vmatpush.msrb.mxu3 %v3517_v11  ;;  %v3926_v24 = vmul.f32 %v7480_v47, %v3897_v10  ;;  %v3806_v10 = vld [vmem:[#allocation15 + $0x8c8] sm:$0xff] }
 0x44b   :  { %2773 = vmatmul.f32.vlgmr.msra.gmra.mxu1 %v2738_v13  ;;  %v2416_v40 = vpop.f32.mrf.mxu2  ;;  %4514 = vmatpush.msrb.mxu2 %v4486_v33  ;;  %v4450_v49 = vmul.f32 %v7539_v46, %v9315_v37  ;;  %v5029_v33 = vld [vmem:[#allocation15 + $0xd78] sm:$0xff]  ;;  %v5024_v37 = vld [vmem:[#allocation15 + $0xd50] sm:$0xff] }
 0x44c   :  { %v2417_v38 = vadd.f32 %v2416_v40, %v7472_v45  ;;  %3814 = vmatpush.msra.mxu1 %v3812_v62  ;;  %4847 = vmatpush.msra.mxu0 %v4821_v29  ;;  %v3947_v62 = vmax.f32 %v3936_v16, 0.0  ;;  %v3514_v40 = vld [vmem:[#allocation15 + $0x7d8] sm:$0xff]  ;;  %v3937_v7 = vadd.f32 %v3926_v24, %v7482_v19  ;;  %v3509_v16 = vld [vmem:[#allocation15 + $0x7b0] sm:$0xff] }
 0x44d   :  { %4515 = vmatpush.msrb.mxu2 %v4485_v0  ;;  %3522 = vmatpush.msrb.mxu3 %v3516_v18  ;;  %v3510_v29 = vld [vmem:[#allocation15 + $0x7b8] sm:$0xff]  ;;  %v3508_v18 = vld [vmem:[#allocation15 + $0x7a8] sm:$0xff] }
 0x44e   :  { %v2931_v60 = vpop.f32.mrf.mxu0  ;;  %v2439_v57 = vmax.f32 %v2417_v38, 0.0  ;;  %3815 = vmatpush.msra.mxu1 %v3811_v4  ;;  %4848 = vmatpush.msra.mxu0 %v4820_v28  ;;  %v4461_v38 = vadd.f32 %v4450_v49, %v7542_v63  ;;  %v3948_v22 = vmax.f32 %v3937_v7, 0.0  ;;  %v3804_v49 = vld [vmem:[#allocation15 + $0x8b8] sm:$0xff]  ;;  %v3505_v7 = vld [vmem:[#allocation15 + $0x790] sm:$0xff] }
 0x44f   :  { %v2932_v39 = vadd.f32 %v2931_v60, %v7524_v27  ;;  %4516 = vmatpush.msrb.mxu2 %v4484_v20  ;;  %3523 = vmatpush.msrb.mxu3 %v3515_v23  ;;  %v3506_v24 = vld [vmem:[#allocation15 + $0x798] sm:$0xff] }
 0x450   :  { %2494 = vmatmul.f32.gmra.mxu3 %v2439_v57  ;;  %3487 = vmatmul.f32.gmra.mxu2 %v3422_v17  ;;  %v5028_v57 = vld [vmem:[#allocation15 + $0xd70] sm:$0xff]  ;;  %v3512_v17 = vld [vmem:[#allocation15 + $0x7c8] sm:$0xff]  ;;  %v4472_v8 = vmax.f32 %v4461_v38, 0.0  ;;  %v7557_v11 = vpop.permute.xlu0 %4431 }
 0x451   :  { %v2964_v2 = vmax.f32 %v2932_v39, 0.0  ;;  %3999 = vmatmul.f32.gmra.mxu0 %v3946_v48  ;;  %3816 = vmatpush.msra.mxu1 %v3810_v21  ;;  %v3902_v0 = vpop.permute.xlu1 %3901  ;;  %v4451_v21 = vmul.f32 %v7539_v46, %v7490_v50  ;;  %v5023_v38 = vld [vmem:[#allocation15 + $0xd48] sm:$0xff] }
 0x452   :  { %4849 = vmatpush.msra.mxu0 %v4819_v36  ;;  %3524 = vmatpush.msrb.mxu3 %v3514_v40  ;;  %v3927_v52 = vmul.f32 %v7480_v47, %v3902_v0  ;;  %v4452_v40 = vmul.f32 %v7539_v46, %v7500_v30 }
 0x453   :  { %3009 = vmatmul.f32.vlgmr.msrb.gmra.mxu1 %v2964_v2  ;;  %v2419_v54 = vpop.f32.mrf.mxu2  ;;  %v3807_v2 = vld [vmem:[#allocation15 + $0x8d0] sm:$0xff] }
 0x454   :  { %v2420_v32 = vadd.f32 %v2419_v54, %v7472_v45  ;;  %3817 = vmatpush.msra.mxu1 %v3809_v58  ;;  %4850 = vmatpush.msra.mxu0 %v4818_v53  ;;  %v4462_v54 = vadd.f32 %v4451_v21, %v7542_v63  ;;  %v3938_v50 = vadd.f32 %v3927_v52, %v7482_v19  ;;  %v5025_v58 = vld [vmem:[#allocation15 + $0xd58] sm:$0xff] }
 0x455   :  { %3525 = vmatpush.msrb.mxu3 %v3513_v5 }
 0x456   :  { %v2934_v41 = vpop.f32.mrf.mxu0  ;;  %v2440_v15 = vmax.f32 %v2420_v32, 0.0  ;;  %3818 = vmatpush.msra.mxu1 %v3808_v31  ;;  %5031 = vmatpush.msrb.mxu0 %v5029_v33  ;;  %v3949_v31 = vmax.f32 %v3938_v50, 0.0  ;;  %v3803_v33 = vld [vmem:[#allocation15 + $0x8b0] sm:$0xff] }
 0x457   :  { %v2935_v13 = vadd.f32 %v2934_v41, %v7524_v27  ;;  %3526 = vmatpush.msrb.mxu3 %v3512_v17  ;;  %v3907_v41 = vpop.permute.xlu2 %3906  ;;  %v3802_v17 = vld [vmem:[#allocation15 + $0x8a8] sm:$0xff] }
 0x458   :  { %2497 = vmatmul.f32.gmra.mxu3 %v2440_v15  ;;  %4321 = vmatmul.f32.vlgmr.msra.gmra.mxu2 %v4280_v26  ;;  %v3805_v26 = vld [vmem:[#allocation15 + $0x8c0] sm:$0xff]  ;;  %v3912_v0 = vpop.permute.xlu0 %3911 }
 0x459   :  { %v2965_v4 = vmax.f32 %v2935_v13, 0.0  ;;  %4002 = vmatmul.f32.gmra.mxu0 %v3947_v62  ;;  %3527 = vmatpush.msrb.mxu3 %v3511_v51  ;;  %v4473_v13 = vmax.f32 %v4462_v54, 0.0  ;;  %v3507_v62 = vld [vmem:[#allocation15 + $0x7a0] sm:$0xff]  ;;  %v7566_v5 = vpop.permute.xlu1 %4436  ;;  %v3929_v21 = vmul.f32 %v7480_v47, %v3912_v0  ;;  %v4453_v54 = vmul.f32 %v7539_v46, %v7513_v9 }
 0x45a   :  { %5032 = vmatpush.msrb.mxu0 %v5028_v57  ;;  %3819 = vmatpush.msra.mxu1 %v3807_v2  ;;  %v5022_v57 = vld [vmem:[#allocation15 + $0xd40] sm:$0xff] }
 0x45b   :  { %3012 = vmatmul.f32.gmra.mxu1 %v2965_v4  ;;  %v2422_v43 = vpop.f32.mrf.mxu2  ;;  %3528 = vmatpush.msrb.mxu3 %v3510_v29  ;;  %v3928_v4 = vmul.f32 %v7480_v47, %v3907_v41  ;;  %v3503_v2 = vld [vmem:[#allocation15 + $0x780] sm:$0xff]  ;;  %v3940_v9 = vadd.f32 %v3929_v21, %v7482_v19  ;;  %v7588_v41 = vpop.f32.mrf.mxu3 }
 0x45c   :  { %v2423_v60 = vadd.f32 %v2422_v43, %v7472_v45  ;;  %5033 = vmatpush.msrb.mxu0 %v5027_v59  ;;  %3820 = vmatpush.msra.mxu1 %v3806_v10  ;;  %v4463_v43 = vadd.f32 %v4452_v40, %v7542_v63 }
 0x45d   :  { %3529 = vmatpush.msrb.mxu3 %v3509_v16  ;;  %v3939_v30 = vadd.f32 %v3928_v4, %v7482_v19 }
 0x45e   :  { %v2937_v39 = vpop.f32.mrf.mxu0  ;;  %v2441_v48 = vmax.f32 %v2423_v60, 0.0  ;;  %5034 = vmatpush.msrb.mxu0 %v5026_v25  ;;  %3821 = vmatpush.msra.mxu1 %v3805_v26  ;;  %v4474_v59 = vmax.f32 %v4463_v43, 0.0  ;;  %v3801_v25 = vld [vmem:[#allocation15 + $0x8a0] sm:$0xff]  ;;  %v4464_v26 = vadd.f32 %v4453_v54, %v7542_v63  ;;  %v3951_v43 = vmax.f32 %v3940_v9, 0.0  ;;  %v4046_v9 = vld [vmem:[#allocation15 + $0x9e8] sm:$0xff] }
 0x45f   :  { %v2938_v20 = vadd.f32 %v2937_v39, %v7524_v27  ;;  %3530 = vmatpush.msrb.mxu3 %v3508_v18  ;;  %v3950_v52 = vmax.f32 %v3939_v30, 0.0  ;;  %v3800_v18 = vld [vmem:[#allocation15 + $0x898] sm:$0xff] }
 0x460   :  { %2500 = vmatmul.f32.gmra.mxu3 %v2441_v48  ;;  %4517 = vmatmul.f32.vlgmr.msrb.gmra.mxu2 %v4472_v8  ;;  %v3504_v48 = vld [vmem:[#allocation15 + $0x788] sm:$0xff]  ;;  %v7571_v8 = vld [vmem:[#allocation16] sm:$0xf]  ;;  %v4475_v4 = vmax.f32 %v4464_v26, 0.0 }
 0x461   :  { %v2966_v44 = vmax.f32 %v2938_v20, 0.0  ;;  %4005 = vmatmul.f32.gmra.mxu0 %v3948_v22  ;;  %3531 = vmatpush.msrb.mxu3 %v3507_v62  ;;  %v7574_v51 = vperm.slane %v7571_v8, 3  ;;  %v3799_v62 = vld [vmem:[#allocation15 + $0x890] sm:$0xff] }
 0x462   :  { %5035 = vmatpush.msrb.mxu0 %v5025_v58  ;;  %3822 = vmatpush.msra.mxu1 %v3804_v49  ;;  %v7581_v58 = vld [vmem:[#allocation18] sm:$0xf]  ;;  %v3222_v49 = vld [vmem:[#allocation16 + $0xc] sm:$0xf] }
 0x463   :  { %3015 = vmatmul.f32.gmra.mxu1 %v2966_v44  ;;  %v2425_v28 = vpop.f32.mrf.mxu2  ;;  %3532 = vmatpush.msrb.mxu3 %v3506_v24  ;;  %v5021_v44 = vld [vmem:[#allocation15 + $0xd38] sm:$0xff]  ;;  %v7584_v10 = vperm.slane %v7581_v58, 3 }
 0x464   :  { %v2426_v32 = vadd.f32 %v2425_v28, %v7472_v45  ;;  %5036 = vmatpush.msrb.mxu0 %v5024_v37  ;;  %3823 = vmatpush.msra.mxu1 %v3803_v33 }
 0x465   :  { %3533 = vmatpush.msrb.mxu3 %v3505_v7  ;;  %v5018_v7 = vld [vmem:[#allocation15 + $0xd20] sm:$0xff] }
 0x466   :  { %v2940_v15 = vpop.f32.mrf.mxu0  ;;  %v2442_v23 = vmax.f32 %v2426_v32, 0.0  ;;  %5037 = vmatpush.msrb.mxu0 %v5023_v38  ;;  %3824 = vmatpush.msra.mxu1 %v3802_v17  ;;  %v5020_v32 = vld [vmem:[#allocation15 + $0xd30] sm:$0xff]  ;;  %v3244_v17 = vperm.slane %v3222_v49, 0 }
 0x467   :  { %v2941_v36 = vadd.f32 %v2940_v15, %v7524_v27  ;;  %3534 = vmatpush.msrb.mxu3 %v3504_v48  ;;  %v5017_v48 = vld [vmem:[#allocation15 + $0xd18] sm:$0xff] }
 0x468   :  { %2503 = vmatmul.f32.gmra.mxu3 %v2442_v23  ;;  %4520 = vmatmul.f32.gmra.mxu2 %v4473_v13  ;;  %v5019_v13 = vld [vmem:[#allocation15 + $0xd28] sm:$0xff] }
 0x469   :  { %v2967_v53 = vmax.f32 %v2941_v36, 0.0  ;;  %4008 = vmatmul.f32.gmra.mxu0 %v3949_v31  ;;  %3535 = vmatpush.msrb.mxu3 %v3503_v2  ;;  %v3917_v36 = vpop.permute.xlu1 %3916 }
 0x46a   :  { %5038 = vmatpush.msrb.mxu0 %v5022_v57  ;;  %3825 = vmatpush.msra.mxu1 %v3801_v25  ;;  %v3930_v38 = vmul.f32 %v7480_v47, %v3917_v36  ;;  %v1630_v57 = vperm.slane %v7571_v8, 1  ;;  %v3797_v47 = vld [vmem:[#allocation15 + $0x880] sm:$0xff] }
 0x46b   :  { %3018 = vmatmul.f32.gmra.mxu1 %v2967_v53  ;;  %v2428_v60 = vpop.f32.mrf.mxu2  ;;  %v3798_v53 = vld [vmem:[#allocation15 + $0x888] sm:$0xff] }
 0x46c   :  { %v2429_v39 = vadd.f32 %v2428_v60, %v7472_v45  ;;  %5039 = vmatpush.msrb.mxu0 %v5021_v44  ;;  %3826 = vmatpush.msra.mxu1 %v3800_v18  ;;  %v9316_v60 = vld [vmem:[#allocation37_spill] sm:$0xff]  ;;  %v3941_v2 = vadd.f32 %v3930_v38, %v7482_v19  ;;  %v5559_v44 = vld [vmem:[#allocation15 + $0xf78] sm:$0xff] }
 0x46d   :  { %5561 = vmatpush.msra.mxu2 %v5559_v44 }
 0x46e   :  { %v2943_v20 = vpop.f32.mrf.mxu0  ;;  %v2443_v22 = vmax.f32 %v2429_v39, 0.0  ;;  %5040 = vmatpush.msrb.mxu0 %v5020_v32  ;;  %3827 = vmatpush.msra.mxu1 %v3799_v62  ;;  %v3952_v62 = vmax.f32 %v3941_v2, 0.0 }
 0x46f   :  { %v2944_v29 = vadd.f32 %v2943_v20, %v7524_v27  ;;  %v7598_v20 = vpop.permute.xlu2 %4441 }
 0x470   :  { %v1903_v16 = vpop.f32.mrf.mxu1  ;;  %2506 = vmatmul.f32.gmra.mxu3 %v2443_v22  ;;  %4523 = vmatmul.f32.gmra.mxu2 %v4474_v59  ;;  %v4048_v59 = vld [vmem:[#allocation15 + $0x9f8] sm:$0xff] }
 0x471   :  { %v2968_v28 = vmax.f32 %v2944_v29, 0.0  ;;  %v1904_v50 = vadd.f32 %v1903_v16, %v7574_v51  ;;  %4011 = vmatmul.f32.gmra.mxu0 %v3950_v52  ;;  %3828 = vmatpush.msra.mxu1 %v3798_v53  ;;  %v5016_v52 = vld [vmem:[#allocation15 + $0xd10] sm:$0xff]  ;;  %v1652_v16 = vperm.slane %v7581_v58, 1 }
 0x472   :  { %5041 = vmatpush.msrb.mxu0 %v5019_v13  ;;  %v1509_v13 = vperm.slane %v7476_v35, 4  ;;  %v5558_v53 = vld [vmem:[#allocation15 + $0xf70] sm:$0xff] }
 0x473   :  { %v1936_v15 = vmax.f32 %v1904_v50, 0.0  ;;  %3021 = vmatmul.f32.gmra.mxu1 %v2968_v28  ;;  %v2431_v23 = vpop.f32.mrf.mxu2  ;;  %v4047_v28 = vld [vmem:[#allocation15 + $0x9f0] sm:$0xff]  ;;  %5562 = vmatpush.msra.mxu2 %v5558_v53 }
 0x474   :  { %v2432_v31 = vadd.f32 %v2431_v23, %v7472_v45  ;;  %v4454_v45 = vmul.f32 %v7539_v46, %v9316_v60  ;;  %5042 = vmatpush.msrb.mxu0 %v5018_v7  ;;  %3829 = vmatpush.msra.mxu1 %v3797_v47  ;;  %v4814_v60 = vld [vmem:[#allocation18 + $0x18] sm:$0xf]  ;;  %v9318_v47 = vld [vmem:[#allocation39_spill] sm:$0xff] }
 0x475   :  { %v1948_v37 = vmul.f32 %v7584_v10, %v1936_v15  ;;  %v9317_v15 = vld [vmem:[#allocation38_spill] sm:$0xff]  ;;  %v7625_v2 = vperm.slane %v4814_v60, 0  ;;  %v4040_v60 = vld [vmem:[#allocation15 + $0x9b8] sm:$0xff] }
 0x476   :  { %v2946_v40 = vpop.f32.mrf.mxu0  ;;  %v2444_v24 = vmax.f32 %v2432_v31, 0.0  ;;  %v4465_v22 = vadd.f32 %v4454_v45, %v7542_v63  ;;  %5043 = vmatpush.msrb.mxu0 %v5017_v48  ;;  %4050 = vmatpush.msrb.mxu1 %v4048_v59  ;;  %v1431_v23 = vadd.f32 %v7408_v61, %v9317_v15  ;;  %v5015_v31 = vld [vmem:[#allocation15 + $0xd08] sm:$0xff]  ;;  %v5014_v61 = vld [vmem:[#allocation15 + $0xd00] sm:$0xff]  ;;  %v1510_v59 = vperm.slane %v7476_v35, 5  ;;  %v4342_v15 = vld [vmem:[#allocation15 + $0xaf8] sm:$0xff] }
 0x477   :  { %v2947_v33 = vadd.f32 %v2946_v40, %v7524_v27  ;;  %1959 = vadd.xlane.f32.xlu1 %v1948_v37  ;;  %v4455_v37 = vmul.f32 %v7539_v46, %v7528_v3  ;;  %v7613_v40 = vperm.slane %v3222_v49, 2  ;;  %v7617_v7 = vpop.permute.xlu2 %5456  ;;  %v5557_v49 = vld [vmem:[#allocation15 + $0xf68] sm:$0xff]  ;;  %v5556_v48 = vld [vmem:[#allocation15 + $0xf60] sm:$0xff] }
 0x478   :  { %v1906_v30 = vpop.f32.mrf.mxu1  ;;  %2509 = vmatmul.f32.gmra.mxu3 %v2444_v24  ;;  %4526 = vmatmul.f32.gmra.mxu2 %v4475_v4  ;;  %v4476_v26 = vmax.f32 %v4465_v22, 0.0  ;;  %v1541_v45 = vadd.f32 %v1509_v13, %v1431_v23  ;;  %v1451_v22 = vadd.f32 %v7588_v41, %v9318_v47  ;;  %v4456_v41 = vmul.f32 %v7539_v46, %v7547_v1 }
 0x479   :  { %v2969_v0 = vmax.f32 %v2947_v33, 0.0  ;;  %v1907_v39 = vadd.f32 %v1906_v30, %v7574_v51  ;;  %4014 = vmatmul.f32.gmra.mxu0 %v3951_v43  ;;  %4051 = vmatpush.msrb.mxu1 %v4047_v28  ;;  %v4045_v33 = vld [vmem:[#allocation15 + $0x9e0] sm:$0xff]  ;;  %v7615_v43 = vpop.permute.xlu0 %4446  ;;  %v4466_v3 = vadd.f32 %v4455_v37, %v7542_v63 }
 0x47a   :  { %v1648_v29 = vpop.f32.mrf.mxu3  ;;  %5044 = vmatpush.msrb.mxu0 %v5016_v52  ;;  %5563 = vmatpush.msra.mxu2 %v5557_v49  ;;  %v4043_v52 = vld [vmem:[#allocation15 + $0x9d0] sm:$0xff]  ;;  %v4810_v44 = vmax.f32 %v1541_v45, 0.0  ;;  %v4467_v1 = vadd.f32 %v4456_v41, %v7542_v63 }
 0x47b   :  { %v1937_v21 = vmax.f32 %v1907_v39, 0.0  ;;  %3024 = vmatmul.f32.gmra.mxu1 %v2969_v0  ;;  %v3262_v8 = vpop.f32.mrf.mxu2  ;;  %v7602_v25 = vadd.f32 %v1648_v29, %v1630_v57  ;;  %v4044_v57 = vld [vmem:[#allocation15 + $0x9d8] sm:$0xff]  ;;  %v1660_v39 = vperm.slane %v7581_v58, 2 }
 0x47c   :  { %v3263_v54 = vadd.f32 %v3262_v8, %v3244_v17  ;;  %4052 = vmatpush.msrb.mxu1 %v4046_v9  ;;  %5045 = vmatpush.msrb.mxu0 %v5015_v31  ;;  %v4927_v17 = vpop.permute.xlu1 %4926  ;;  %v4477_v8 = vmax.f32 %v4466_v3, 0.0  ;;  %v5554_v9 = vld [vmem:[#allocation15 + $0xf50] sm:$0xff]  ;;  %v5553_v31 = vld [vmem:[#allocation15 + $0xf48] sm:$0xff] }
 0x47d   :  { %v1949_v50 = vmul.f32 %v7584_v10, %v1937_v21  ;;  %v1651_v19 = vmax.f32 %v7602_v25, 0.0  ;;  %v4980_v25 = vmul.f32 %v7625_v2, %v4927_v17  ;;  %5564 = vmatpush.msra.mxu2 %v5556_v48  ;;  %v4341_v3 = vld [vmem:[#allocation15 + $0xaf0] sm:$0xff]  ;;  %v4457_v17 = vmul.f32 %v7539_v46, %v7557_v11 }
 0x47e   :  { %v3265_v32 = vmax.f32 %v3263_v54, 0.0  ;;  %v2949_v18 = vpop.f32.mrf.mxu0  ;;  %5046 = vmatpush.msrb.mxu0 %v5014_v61  ;;  %4053 = vmatpush.msrb.mxu1 %v4045_v33  ;;  %v5555_v54 = vld [vmem:[#allocation15 + $0xf58] sm:$0xff]  ;;  %v4478_v33 = vmax.f32 %v4467_v1, 0.0 }
 0x47f   :  { %v2950_v36 = vadd.f32 %v2949_v18, %v7524_v27  ;;  %1961 = vadd.xlane.f32.xlu2 %v1949_v50  ;;  %v1653_v4 = vmul.f32 %v1652_v16, %v1651_v19  ;;  %v1661_v28 = vmul.f32 %v1660_v39, %v1651_v19  ;;  %v7632_v50 = vadd.f32 %v1510_v59, %v1451_v22  ;;  %v4932_v37 = vpop.permute.xlu2 %4931  ;;  %v4039_v22 = vld [vmem:[#allocation15 + $0x9b0] sm:$0xff]  ;;  %v5551_v59 = vld [vmem:[#allocation15 + $0xf38] sm:$0xff] }
 0x480   :  { %v1909_v24 = vpop.f32.mrf.mxu1  ;;  %3300 = vmatmul.f32.vlgmr.msra.gmra.mxu3 %v3265_v32  ;;  %4529 = vmatmul.f32.gmra.mxu2 %v4476_v26  ;;  %v4042_v26 = vld [vmem:[#allocation15 + $0x9c8] sm:$0xff]  ;;  %v4981_v49 = vmul.f32 %v7625_v2, %v4932_v37 }
 0x481   :  { %v2970_v38 = vmax.f32 %v2950_v36, 0.0  ;;  %4017 = vmatmul.f32.gmra.mxu0 %v3952_v62  ;;  %1654 = vadd.xlane.f32.xlu0 %v1653_v4  ;;  %v1910_v35 = vadd.f32 %v1909_v24, %v7574_v51  ;;  %v7635_v23 = vpop.permute.xlu0 %5461  ;;  %v4991_v19 = vadd.f32 %v4980_v25, %v7632_v50  ;;  %v4041_v36 = vld [vmem:[#allocation15 + $0x9c0] sm:$0xff]  ;;  %v4038_v25 = vld [vmem:[#allocation15 + $0x9a8] sm:$0xff] }
 0x482   :  { %4054 = vmatpush.msrb.mxu1 %v4044_v57  ;;  %5565 = vmatpush.msra.mxu2 %v5555_v54  ;;  %v5552_v57 = vld [vmem:[#allocation15 + $0xf40] sm:$0xff]  ;;  %v4992_v11 = vadd.f32 %v4981_v49, %v7632_v50  ;;  %v4035_v49 = vld [vmem:[#allocation15 + $0x990] sm:$0xff] }
 0x483   :  { %3027 = vmatmul.f32.gmra.mxu1 %v2970_v38  ;;  %v3458_v30 = vpop.f32.mrf.mxu2  ;;  %4344 = vmatpush.msra.mxu3 %v4342_v15  ;;  %v1938_v24 = vmax.f32 %v1910_v35, 0.0  ;;  %v5002_v45 = vmax.f32 %v4991_v19, 0.0  ;;  %v4339_v54 = vld [vmem:[#allocation15 + $0xae0] sm:$0xff] }
 0x484   :  { %v3459_v0 = vadd.f32 %v3458_v30, %v7613_v40  ;;  %4055 = vmatpush.msrb.mxu1 %v4043_v52  ;;  %5566 = vmatpush.msra.mxu2 %v5554_v9  ;;  %v4037_v9 = vld [vmem:[#allocation15 + $0x9a0] sm:$0xff]  ;;  %v5003_v15 = vmax.f32 %v4992_v11, 0.0  ;;  %v5546_v11 = vld [vmem:[#allocation15 + $0xf10] sm:$0xff] }
 0x485   :  { %4345 = vmatpush.msra.mxu3 %v4341_v3  ;;  %v1950_v39 = vmul.f32 %v7584_v10, %v1938_v24 }
 0x486   :  { %v3491_v21 = vmax.f32 %v3459_v0, 0.0  ;;  %v2952_v29 = vpop.f32.mrf.mxu0  ;;  %4056 = vmatpush.msrb.mxu1 %v4042_v26  ;;  %5567 = vmatpush.msra.mxu2 %v5553_v31 }
 0x487   :  { %v2953_v58 = vadd.f32 %v2952_v29, %v7524_v27  ;;  %v7647_v29 = vpop.permute.xlu1 %5466 }
 0x488   :  { %v1912_v16 = vpop.f32.mrf.mxu1  ;;  %3536 = vmatmul.f32.vlgmr.msrb.gmra.mxu3 %v3491_v21  ;;  %4532 = vmatmul.f32.gmra.mxu2 %v4477_v8  ;;  %v4340_v21 = vld [vmem:[#allocation15 + $0xae8] sm:$0xff]  ;;  %v4468_v8 = vadd.f32 %v4457_v17, %v7542_v63  ;;  %v4335_v17 = vld [vmem:[#allocation15 + $0xac0] sm:$0xff] }
 0x489   :  { %v2971_v32 = vmax.f32 %v2953_v58, 0.0  ;;  %v1913_v18 = vadd.f32 %v1912_v16, %v7574_v51  ;;  %4851 = vmatmul.f32.vlgmr.msra.gmra.mxu0 %v4810_v44  ;;  %1662 = vadd.xlane.f32.xlu0 %v1661_v28  ;;  %v5550_v58 = vld [vmem:[#allocation15 + $0xf30] sm:$0xff]  ;;  %v4937_v41 = vpop.permute.xlu0 %4936  ;;  %v4338_v16 = vld [vmem:[#allocation15 + $0xad8] sm:$0xff] }
 0x48a   :  { %4057 = vmatpush.msrb.mxu1 %v4041_v36  ;;  %5568 = vmatpush.msra.mxu2 %v5552_v57  ;;  %v4479_v26 = vmax.f32 %v4468_v8, 0.0  ;;  %v4982_v1 = vmul.f32 %v7625_v2, %v4937_v41  ;;  %v4458_v36 = vmul.f32 %v7539_v46, %v7566_v5  ;;  %v3752_v41 = vld [vmem:[#allocation16 + $0x10] sm:$0xf] }
 0x48b   :  { %v1939_v13 = vmax.f32 %v1913_v18, 0.0  ;;  %3030 = vmatmul.f32.gmra.mxu1 %v2971_v32  ;;  %v3461_v62 = vpop.f32.mrf.mxu2  ;;  %4346 = vmatpush.msra.mxu3 %v4340_v21 }
 0x48c   :  { %v3462_v4 = vadd.f32 %v3461_v62, %v7613_v40  ;;  %4058 = vmatpush.msrb.mxu1 %v4040_v60  ;;  %5569 = vmatpush.msra.mxu2 %v5551_v59  ;;  %v4337_v62 = vld [vmem:[#allocation15 + $0xad0] sm:$0xff]  ;;  %v4993_v60 = vadd.f32 %v4982_v1, %v7632_v50 }
 0x48d   :  { %v1951_v53 = vmul.f32 %v7584_v10, %v1939_v13  ;;  %4347 = vmatpush.msra.mxu3 %v4339_v54  ;;  %v5549_v13 = vld [vmem:[#allocation15 + $0xf28] sm:$0xff] }
 0x48e   :  { %v3492_v38 = vmax.f32 %v3462_v4, 0.0  ;;  %v2955_v61 = vpop.f32.mrf.mxu0  ;;  %4059 = vmatpush.msrb.mxu1 %v4039_v22  ;;  %5570 = vmatpush.msra.mxu2 %v5550_v58  ;;  %v4036_v4 = vld [vmem:[#allocation15 + $0x998] sm:$0xff]  ;;  %v4034_v22 = vld [vmem:[#allocation15 + $0x988] sm:$0xff]  ;;  %v5004_v8 = vmax.f32 %v4993_v60, 0.0  ;;  %v6260_v58 = vld [vmem:[#allocation16 + $0x4] sm:$0xf] }
 0x48f   :  { %v2956_v30 = vadd.f32 %v2955_v61, %v7524_v27  ;;  %1965 = vadd.xlane.f32.xlu2 %v1951_v53  ;;  %4348 = vmatpush.msra.mxu3 %v4338_v16  ;;  %v5548_v53 = vld [vmem:[#allocation15 + $0xf20] sm:$0xff]  ;;  %v4469_v61 = vadd.f32 %v4458_v36, %v7542_v63  ;;  %v2226_v54 = vperm.slane %v6260_v58, 1 }
 0x490   :  { %v1915_v0 = vpop.f32.mrf.mxu1  ;;  %3539 = vmatmul.f32.gmra.mxu3 %v3492_v38  ;;  %4535 = vmatmul.f32.gmra.mxu2 %v4478_v33  ;;  %v7658_v38 = vpop.permute.xlu2 %5471  ;;  %v4336_v33 = vld [vmem:[#allocation15 + $0xac8] sm:$0xff] }
 0x491   :  { %v2972_v48 = vmax.f32 %v2956_v30, 0.0  ;;  %v1916_v47 = vadd.f32 %v1915_v0, %v7574_v51  ;;  %5047 = vmatmul.f32.vlgmr.msrb.gmra.mxu0 %v5002_v45  ;;  %1963 = vadd.xlane.f32.xlu0 %v1950_v39  ;;  %v5547_v45 = vld [vmem:[#allocation15 + $0xf18] sm:$0xff]  ;;  %v4942_v30 = vpop.permute.xlu1 %4941 }
 0x492   :  { %4060 = vmatpush.msrb.mxu1 %v4038_v25  ;;  %5571 = vmatpush.msra.mxu2 %v5549_v13  ;;  %v4983_v59 = vmul.f32 %v7625_v2, %v4942_v30  ;;  %v5544_v13 = vld [vmem:[#allocation15 + $0xf00] sm:$0xff] }
 0x493   :  { %v1940_v52 = vmax.f32 %v1916_v47, 0.0  ;;  %3033 = vmatmul.f32.gmra.mxu1 %v2972_v48  ;;  %v3464_v44 = vpop.f32.mrf.mxu2  ;;  %4349 = vmatpush.msra.mxu3 %v4337_v62  ;;  %v4480_v47 = vmax.f32 %v4469_v61, 0.0 }
 0x494   :  { %v3465_v35 = vadd.f32 %v3464_v44, %v7613_v40  ;;  %4061 = vmatpush.msrb.mxu1 %v4037_v9  ;;  %5572 = vmatpush.msra.mxu2 %v5548_v53  ;;  %v4459_v44 = vmul.f32 %v7539_v46, %v7598_v20  ;;  %v4333_v20 = vld [vmem:[#allocation15 + $0xab0] sm:$0xff]  ;;  %v4332_v53 = vld [vmem:[#allocation15 + $0xaa8] sm:$0xff] }
 0x495   :  { %v1952_v28 = vmul.f32 %v7584_v10, %v1940_v52  ;;  %4350 = vmatpush.msra.mxu3 %v4336_v33  ;;  %v4334_v52 = vld [vmem:[#allocation15 + $0xab8] sm:$0xff] }
 0x496   :  { %v3493_v32 = vmax.f32 %v3465_v35, 0.0  ;;  %v2958_v18 = vpop.f32.mrf.mxu0  ;;  %4062 = vmatpush.msrb.mxu1 %v4036_v4  ;;  %5573 = vmatpush.msra.mxu2 %v5547_v45 }
 0x497   :  { %v2959_v19 = vadd.f32 %v2958_v18, %v7524_v27  ;;  %1967 = vadd.xlane.f32.xlu1 %v1952_v28  ;;  %4351 = vmatpush.msra.mxu3 %v4335_v17  ;;  %v5545_v28 = vld [vmem:[#allocation15 + $0xf08] sm:$0xff]  ;;  %v4470_v18 = vadd.f32 %v4459_v44, %v7542_v63  ;;  %v4460_v17 = vmul.f32 %v7539_v46, %v7615_v43  ;;  %v4329_v43 = vld [vmem:[#allocation15 + $0xa90] sm:$0xff] }
 0x498   :  { %v1918_v31 = vpop.f32.mrf.mxu1  ;;  %3542 = vmatmul.f32.gmra.mxu3 %v3493_v32  ;;  %4538 = vmatmul.f32.gmra.mxu2 %v4479_v26  ;;  %v7669_v32 = vpop.permute.xlu0 %5476  ;;  %v4994_v26 = vadd.f32 %v4983_v59, %v7632_v50  ;;  %v4330_v59 = vld [vmem:[#allocation15 + $0xa98] sm:$0xff] }
 0x499   :  { %v2973_v37 = vmax.f32 %v2959_v19, 0.0  ;;  %v1919_v24 = vadd.f32 %v1918_v31, %v7574_v51  ;;  %5050 = vmatmul.f32.gmra.mxu0 %v5003_v15  ;;  %4063 = vmatpush.msrb.mxu1 %v4035_v49  ;;  %v3774_v19 = vperm.slane %v3752_v41, 0  ;;  %v4947_v62 = vpop.permute.xlu2 %4946  ;;  %v4331_v49 = vld [vmem:[#allocation15 + $0xaa0] sm:$0xff]  ;;  %v4471_v46 = vadd.f32 %v4460_v17, %v7542_v63  ;;  %v4328_v63 = vld [vmem:[#allocation15 + $0xa88] sm:$0xff] }
 0x49a   :  { %5574 = vmatpush.msra.mxu2 %v5546_v11  ;;  %4352 = vmatpush.msra.mxu3 %v4334_v52  ;;  %v4984_v45 = vmul.f32 %v7625_v2, %v4947_v62  ;;  %v5005_v30 = vmax.f32 %v4994_v26, 0.0  ;;  %v7681_v11 = vpop.permute.xlu1 %5481  ;;  %v5360_v17 = vld [vmem:[#allocation15 + $0xe60] sm:$0xff] }
 0x49b   :  { %v1941_v5 = vmax.f32 %v1919_v24, 0.0  ;;  %3036 = vmatmul.f32.gmra.mxu1 %v2973_v37  ;;  %v3467_v3 = vpop.f32.mrf.mxu2  ;;  %v6261_v37 = vld [vmem:[#allocation18 + $0x4] sm:$0xf] }
 0x49c   :  { %v3468_v57 = vadd.f32 %v3467_v3, %v7613_v40  ;;  %4064 = vmatpush.msrb.mxu1 %v4034_v22  ;;  %v2256_v24 = vperm.slane %v6261_v37, 2  ;;  %v2248_v4 = vperm.slane %v6261_v37, 1  ;;  %5575 = vmatpush.msra.mxu2 %v5545_v28  ;;  %v4481_v3 = vmax.f32 %v4470_v18, 0.0 }
 0x49d   :  { %v1953_v0 = vmul.f32 %v7584_v10, %v1941_v5  ;;  %4353 = vmatpush.msra.mxu3 %v4333_v20  ;;  %v4995_v44 = vadd.f32 %v4984_v45, %v7632_v50  ;;  %v7691_v20 = vperm.slane %v6261_v37, 3 }
 0x49e   :  { %v3494_v39 = vmax.f32 %v3468_v57, 0.0  ;;  %v2961_v48 = vpop.f32.mrf.mxu0  ;;  %5576 = vmatpush.msra.mxu2 %v5544_v13 }
 0x49f   :  { %v2962_v21 = vadd.f32 %v2961_v48, %v7524_v27  ;;  %1969 = vadd.xlane.f32.xlu2 %v1953_v0  ;;  %v4033_v27 = vld [vmem:[#allocation15 + $0x980] sm:$0xff]  ;;  %4354 = vmatpush.msra.mxu3 %v4332_v53  ;;  %v5344_v0 = vld [vmem:[#allocation18 + $0x1c] sm:$0xf]  ;;  %v5006_v13 = vmax.f32 %v4995_v44, 0.0 }
 0x4a0   :  { %v1921_v25 = vpop.f32.mrf.mxu1  ;;  %3545 = vmatmul.f32.gmra.mxu3 %v3494_v39  ;;  %4541 = vmatmul.f32.gmra.mxu2 %v4480_v47  ;;  %v7678_v39 = vperm.slane %v6260_v58, 3  ;;  %v7684_v52 = vperm.slane %v5344_v0, 0  ;;  %v4578_v53 = vld [vmem:[#allocation15 + $0xbf8] sm:$0xff]  ;;  %v4575_v44 = vld [vmem:[#allocation15 + $0xbe0] sm:$0xff] }
 0x4a1   :  { %v2974_v35 = vmax.f32 %v2962_v21, 0.0  ;;  %v1922_v16 = vadd.f32 %v1921_v25, %v7574_v51  ;;  %5053 = vmatmul.f32.gmra.mxu0 %v5004_v8  ;;  %4065 = vmatpush.msrb.mxu1 %v4033_v27  ;;  %v7687_v25 = vperm.slane %v3752_v41, 2 }
 0x4a2   :  { %4355 = vmatpush.msra.mxu3 %v4331_v49  ;;  %v4957_v0 = vpop.permute.xlu1 %4956 }
 0x4a3   :  { %v1942_v9 = vmax.f32 %v1922_v16, 0.0  ;;  %3039 = vmatmul.f32.gmra.mxu1 %v2974_v35  ;;  %v2244_v15 = vpop.f32.mrf.mxu3  ;;  %v3470_v1 = vpop.f32.mrf.mxu2  ;;  %v5363_v35 = vld [vmem:[#allocation15 + $0xe78] sm:$0xff] }
 0x4a4   :  { %v2245_v36 = vadd.f32 %v2244_v15, %v2226_v54  ;;  %v3471_v31 = vadd.f32 %v3470_v1, %v7613_v40  ;;  %4356 = vmatpush.msra.mxu3 %v4330_v59  ;;  %v4952_v16 = vpop.permute.xlu0 %4951  ;;  %5365 = vmatpush.msra.mxu0 %v5363_v35  ;;  %v4482_v15 = vmax.f32 %v4471_v46, 0.0  ;;  %v4327_v1 = vld [vmem:[#allocation15 + $0xa80] sm:$0xff] }
 0x4a5   :  { %v1954_v61 = vmul.f32 %v7584_v10, %v1942_v9  ;;  %v4985_v62 = vmul.f32 %v7625_v2, %v4952_v16  ;;  %v5359_v16 = vld [vmem:[#allocation15 + $0xe58] sm:$0xff] }
 0x4a6   :  { %v2247_v33 = vmax.f32 %v2245_v36, 0.0  ;;  %v3495_v60 = vmax.f32 %v3471_v31, 0.0  ;;  %v3792_v5 = vpop.f32.mrf.mxu0  ;;  %4357 = vmatpush.msra.mxu3 %v4329_v43  ;;  %v5510_v31 = vmul.f32 %v7684_v52, %v7617_v7 }
 0x4a7   :  { %v3793_v57 = vadd.f32 %v3792_v5, %v3774_v19  ;;  %1971 = vadd.xlane.f32.xlu1 %v1954_v61  ;;  %v5362_v19 = vld [vmem:[#allocation15 + $0xe70] sm:$0xff]  ;;  %v7700_v5 = vpop.permute.xlu2 %5486  ;;  %v4996_v49 = vadd.f32 %v4985_v62, %v7632_v50 }
 0x4a8   :  { %v1924_v48 = vpop.f32.mrf.mxu1  ;;  %3548 = vmatmul.f32.gmra.mxu3 %v3495_v60  ;;  %4544 = vmatmul.f32.gmra.mxu2 %v4481_v3  ;;  %v2257_v47 = vmul.f32 %v2256_v24, %v2247_v33  ;;  %v2249_v22 = vmul.f32 %v2248_v4, %v2247_v33  ;;  %v5361_v60 = vld [vmem:[#allocation15 + $0xe68] sm:$0xff]  ;;  %v5521_v7 = vadd.f32 %v5510_v31, %v7349_v56  ;;  %v4577_v3 = vld [vmem:[#allocation15 + $0xbf0] sm:$0xff] }
 0x4a9   :  { %v3795_v21 = vmax.f32 %v3793_v57, 0.0  ;;  %v1925_v8 = vadd.f32 %v1924_v48, %v7574_v51  ;;  %5056 = vmatmul.f32.gmra.mxu0 %v5005_v30  ;;  %4358 = vmatpush.msra.mxu3 %v4328_v63 }
 0x4aa   :  { %2258 = vadd.xlane.f32.xlu2 %v2257_v47  ;;  %2250 = vadd.xlane.f32.xlu0 %v2249_v22  ;;  %v4576_v47 = vld [vmem:[#allocation15 + $0xbe8] sm:$0xff]  ;;  %v5532_v43 = vmax.f32 %v5521_v7, 0.0  ;;  %v5512_v7 = vmul.f32 %v7684_v52, %v7647_v29 }
 0x4ab   :  { %3830 = vmatmul.f32.vlgmr.msra.gmra.mxu1 %v3795_v21  ;;  %v2480_v58 = vpop.f32.mrf.mxu3  ;;  %v3473_v54 = vpop.f32.mrf.mxu2  ;;  %v1943_v27 = vmax.f32 %v1925_v8, 0.0  ;;  %5366 = vmatpush.msra.mxu0 %v5362_v19  ;;  %v5511_v21 = vmul.f32 %v7684_v52, %v7635_v23  ;;  %v4573_v19 = vld [vmem:[#allocation15 + $0xbd0] sm:$0xff] }
 0x4ac   :  { %v2481_v28 = vadd.f32 %v2480_v58, %v7678_v39  ;;  %v3474_v18 = vadd.f32 %v3473_v54, %v7613_v40  ;;  %4359 = vmatpush.msra.mxu3 %v4327_v1  ;;  %v5007_v58 = vmax.f32 %v4996_v49, 0.0  ;;  %v4986_v54 = vmul.f32 %v7625_v2, %v4957_v0  ;;  %v7713_v1 = vpop.permute.xlu0 %5491 }
 0x4ad   :  { %v1955_v4 = vmul.f32 %v7584_v10, %v1943_v27  ;;  %5367 = vmatpush.msra.mxu0 %v5361_v60  ;;  %v4872_v27 = vld [vmem:[#allocation15 + $0xcf8] sm:$0xff] }
 0x4ae   :  { %v2513_v26 = vmax.f32 %v2481_v28, 0.0  ;;  %v3496_v9 = vmax.f32 %v3474_v18, 0.0  ;;  %v3988_v41 = vpop.f32.mrf.mxu0  ;;  %4580 = vmatpush.msrb.mxu3 %v4578_v53  ;;  %v4574_v18 = vld [vmem:[#allocation15 + $0xbd8] sm:$0xff]  ;;  %4874 = vmatpush.msra.mxu1 %v4872_v27 }
 0x4af   :  { %v3989_v36 = vadd.f32 %v3988_v41, %v7687_v25  ;;  %5368 = vmatpush.msra.mxu0 %v5360_v17  ;;  %v4871_v41 = vld [vmem:[#allocation15 + $0xcf0] sm:$0xff] }
 0x4b0   :  { %v1927_v37 = vpop.f32.mrf.mxu1  ;;  %3551 = vmatmul.f32.gmra.mxu3 %v3496_v9  ;;  %4547 = vmatmul.f32.gmra.mxu2 %v4482_v15  ;;  %v2525_v24 = vmul.f32 %v7691_v20, %v2513_v26  ;;  %v5358_v9 = vld [vmem:[#allocation15 + $0xe50] sm:$0xff]  ;;  %v5522_v15 = vadd.f32 %v5511_v21, %v7349_v56 }
 0x4b1   :  { %v4021_v61 = vmax.f32 %v3989_v36, 0.0  ;;  %v1928_v33 = vadd.f32 %v1927_v37, %v7574_v51  ;;  %5059 = vmatmul.f32.gmra.mxu0 %v5006_v13  ;;  %4581 = vmatpush.msrb.mxu3 %v4577_v3  ;;  %v4997_v13 = vadd.f32 %v4986_v54, %v7632_v50  ;;  %v5357_v37 = vld [vmem:[#allocation15 + $0xe48] sm:$0xff]  ;;  %v4570_v54 = vld [vmem:[#allocation15 + $0xbb8] sm:$0xff] }
 0x4b2   :  { %2536 = vadd.xlane.f32.xlu1 %v2525_v24  ;;  %1973 = vadd.xlane.f32.xlu2 %v1955_v4  ;;  %v4870_v24 = vld [vmem:[#allocation15 + $0xce8] sm:$0xff]  ;;  %v4962_v4 = vpop.permute.xlu2 %4961 }
 0x4b3   :  { %v1944_v45 = vmax.f32 %v1928_v33, 0.0  ;;  %4066 = vmatmul.f32.vlgmr.msrb.gmra.mxu1 %v4021_v61  ;;  %v2483_v30 = vpop.f32.mrf.mxu3  ;;  %v3476_v57 = vpop.f32.mrf.mxu2  ;;  %4582 = vmatpush.msrb.mxu3 %v4576_v47  ;;  %v4987_v17 = vmul.f32 %v7625_v2, %v4962_v4  ;;  %v5008_v0 = vmax.f32 %v4997_v13, 0.0  ;;  %v5356_v47 = vld [vmem:[#allocation15 + $0xe40] sm:$0xff] }
 0x4b4   :  { %v3477_v48 = vadd.f32 %v3476_v57, %v7613_v40  ;;  %v2484_v22 = vadd.f32 %v2483_v30, %v7678_v39  ;;  %5369 = vmatpush.msra.mxu0 %v5359_v16  ;;  %4875 = vmatpush.msra.mxu1 %v4871_v41  ;;  %v5533_v30 = vmax.f32 %v5522_v15, 0.0  ;;  %v4572_v57 = vld [vmem:[#allocation15 + $0xbc8] sm:$0xff] }
 0x4b5   :  { %v1956_v59 = vmul.f32 %v7584_v10, %v1944_v45  ;;  %4583 = vmatpush.msrb.mxu3 %v4575_v44  ;;  %v5523_v44 = vadd.f32 %v5512_v7, %v7349_v56  ;;  %v7732_v41 = vld [vmem:[#allocation16 + $0x8] sm:$0xf] }
 0x4b6   :  { %v3497_v8 = vmax.f32 %v3477_v48, 0.0  ;;  %v3991_v46 = vpop.f32.mrf.mxu0  ;;  %v2514_v63 = vmax.f32 %v2484_v22, 0.0  ;;  %5370 = vmatpush.msra.mxu0 %v5358_v9  ;;  %4876 = vmatpush.msra.mxu1 %v4870_v24  ;;  %v4569_v9 = vld [vmem:[#allocation15 + $0xbb0] sm:$0xff]  ;;  %v2756_v15 = vperm.slane %v7732_v41, 1 }
 0x4b7   :  { %v3992_v35 = vadd.f32 %v3991_v46, %v7687_v25  ;;  %1975 = vadd.xlane.f32.xlu0 %v1956_v59  ;;  %4584 = vmatpush.msrb.mxu3 %v4574_v18  ;;  %v4571_v59 = vld [vmem:[#allocation15 + $0xbc0] sm:$0xff]  ;;  %v5355_v46 = vld [vmem:[#allocation15 + $0xe38] sm:$0xff]  ;;  %v5534_v13 = vmax.f32 %v5523_v44, 0.0 }
 0x4b8   :  { %v1930_v28 = vpop.f32.mrf.mxu1  ;;  %3554 = vmatmul.f32.gmra.mxu3 %v3497_v8  ;;  %5577 = vmatmul.f32.vlgmr.msra.gmra.mxu2 %v5532_v43  ;;  %v2526_v60 = vmul.f32 %v7691_v20, %v2514_v63  ;;  %v4869_v43 = vld [vmem:[#allocation15 + $0xce0] sm:$0xff]  ;;  %v4868_v18 = vld [vmem:[#allocation15 + $0xcd8] sm:$0xff] }
 0x4b9   :  { %v4022_v23 = vmax.f32 %v3992_v35, 0.0  ;;  %v1931_v26 = vadd.f32 %v1930_v28, %v7574_v51  ;;  %5062 = vmatmul.f32.gmra.mxu0 %v5007_v58  ;;  %4585 = vmatpush.msrb.mxu3 %v4573_v19  ;;  %v7727_v58 = vpop.permute.xlu1 %5496  ;;  %v4998_v35 = vadd.f32 %v4987_v17, %v7632_v50  ;;  %v5354_v28 = vld [vmem:[#allocation15 + $0xe30] sm:$0xff]  ;;  %v5513_v19 = vmul.f32 %v7684_v52, %v7658_v38  ;;  %v5351_v44 = vld [vmem:[#allocation15 + $0xe18] sm:$0xff] }
 0x4ba   :  { %5371 = vmatpush.msra.mxu0 %v5357_v37  ;;  %4877 = vmatpush.msra.mxu1 %v4869_v43  ;;  %v4568_v37 = vld [vmem:[#allocation15 + $0xba8] sm:$0xff] }
 0x4bb   :  { %v1945_v62 = vmax.f32 %v1931_v26, 0.0  ;;  %4069 = vmatmul.f32.gmra.mxu1 %v4022_v23  ;;  %v2486_v36 = vpop.f32.mrf.mxu3  ;;  %v3479_v31 = vpop.f32.mrf.mxu2  ;;  %4586 = vmatpush.msrb.mxu3 %v4572_v57  ;;  %v5009_v24 = vmax.f32 %v4998_v35, 0.0  ;;  %v4567_v57 = vld [vmem:[#allocation15 + $0xba0] sm:$0xff]  ;;  %v5524_v17 = vadd.f32 %v5513_v19, %v7349_v56 }
 0x4bc   :  { %v2487_v53 = vadd.f32 %v2486_v36, %v7678_v39  ;;  %v3480_v61 = vadd.f32 %v3479_v31, %v7613_v40  ;;  %5372 = vmatpush.msra.mxu0 %v5356_v47  ;;  %4878 = vmatpush.msra.mxu1 %v4868_v18 }
 0x4bd   :  { %v1957_v33 = vmul.f32 %v7584_v10, %v1945_v62  ;;  %4587 = vmatpush.msrb.mxu3 %v4571_v59  ;;  %v4866_v59 = vld [vmem:[#allocation15 + $0xcc8] sm:$0xff] }
 0x4be   :  { %v2515_v3 = vmax.f32 %v2487_v53, 0.0  ;;  %v3498_v49 = vmax.f32 %v3480_v61, 0.0  ;;  %v3994_v45 = vpop.f32.mrf.mxu0  ;;  %5373 = vmatpush.msra.mxu0 %v5355_v46 }
 0x4bf   :  { %v3995_v48 = vadd.f32 %v3994_v45, %v7687_v25  ;;  %1977 = vadd.xlane.f32.xlu1 %v1957_v33  ;;  %2538 = vadd.xlane.f32.xlu0 %v2526_v60  ;;  %v5353_v60 = vld [vmem:[#allocation15 + $0xe28] sm:$0xff] }
 0x4c0   :  { %v1933_v22 = vpop.f32.mrf.mxu1  ;;  %3557 = vmatmul.f32.gmra.mxu3 %v3498_v49  ;;  %5580 = vmatmul.f32.gmra.mxu2 %v5533_v30  ;;  %v2527_v29 = vmul.f32 %v7691_v20, %v2515_v3  ;;  %v7741_v49 = vld [vmem:[#allocation18 + $0x8] sm:$0xf]  ;;  %v4867_v30 = vld [vmem:[#allocation15 + $0xcd0] sm:$0xff] }
 0x4c1   :  { %v4023_v21 = vmax.f32 %v3995_v48, 0.0  ;;  %v1934_v8 = vadd.f32 %v1933_v22, %v7574_v51  ;;  %5065 = vmatmul.f32.gmra.mxu0 %v5008_v0  ;;  %v4967_v51 = vpop.permute.xlu0 %4966  ;;  %4588 = vmatpush.msrb.mxu3 %v4570_v54  ;;  %v2778_v45 = vperm.slane %v7741_v49, 1  ;;  %v7745_v0 = vpop.permute.xlu2 %5501  ;;  %v5352_v48 = vld [vmem:[#allocation15 + $0xe20] sm:$0xff]  ;;  %v2786_v43 = vperm.slane %v7741_v49, 2 }
 0x4c2   :  { %2540 = vadd.xlane.f32.xlu2 %v2527_v29  ;;  %5374 = vmatpush.msra.mxu0 %v5354_v28  ;;  %v4988_v4 = vmul.f32 %v7625_v2, %v4967_v51  ;;  %v4865_v51 = vld [vmem:[#allocation15 + $0xcc0] sm:$0xff] }
 0x4c3   :  { %4072 = vmatmul.f32.gmra.mxu1 %v4023_v21  ;;  %v2489_v16 = vpop.f32.mrf.mxu3  ;;  %v3482_v27 = vpop.f32.mrf.mxu2  ;;  %v1946_v63 = vmax.f32 %v1934_v8, 0.0  ;;  %4589 = vmatpush.msrb.mxu3 %v4569_v9  ;;  %v4566_v21 = vld [vmem:[#allocation15 + $0xb98] sm:$0xff]  ;;  %v4565_v9 = vld [vmem:[#allocation15 + $0xb90] sm:$0xff] }
 0x4c4   :  { %v2490_v23 = vadd.f32 %v2489_v16, %v7678_v39  ;;  %v3483_v26 = vadd.f32 %v3482_v27, %v7613_v40  ;;  %5375 = vmatpush.msra.mxu0 %v5353_v60  ;;  %v4972_v8 = vpop.permute.xlu1 %4971  ;;  %4879 = vmatpush.msra.mxu1 %v4867_v30  ;;  %v5535_v16 = vmax.f32 %v5524_v17, 0.0  ;;  %v5514_v27 = vmul.f32 %v7684_v52, %v7669_v32  ;;  %v4282_v17 = vld [vmem:[#allocation16 + $0x14] sm:$0xf] }
 0x4c5   :  { %v1958_v38 = vmul.f32 %v7584_v10, %v1946_v63  ;;  %4590 = vmatpush.msrb.mxu3 %v4568_v37  ;;  %v4999_v10 = vadd.f32 %v4988_v4, %v7632_v50  ;;  %v7756_v32 = vperm.slane %v7732_v41, 3  ;;  %v4564_v37 = vld [vmem:[#allocation15 + $0xb88] sm:$0xff]  ;;  %v4563_v41 = vld [vmem:[#allocation15 + $0xb80] sm:$0xff] }
 0x4c6   :  { %v2516_v62 = vmax.f32 %v2490_v23, 0.0  ;;  %v3499_v36 = vmax.f32 %v3483_v26, 0.0  ;;  %v3997_v31 = vpop.f32.mrf.mxu0  ;;  %5376 = vmatpush.msra.mxu0 %v5352_v48  ;;  %4880 = vmatpush.msra.mxu1 %v4866_v59  ;;  %v4989_v23 = vmul.f32 %v7625_v2, %v4972_v8  ;;  %v5349_v4 = vld [vmem:[#allocation15 + $0xe08] sm:$0xff] }
 0x4c7   :  { %v3998_v53 = vadd.f32 %v3997_v31, %v7687_v25  ;;  %4591 = vmatpush.msrb.mxu3 %v4567_v57  ;;  %v5010_v63 = vmax.f32 %v4999_v10, 0.0  ;;  %v4864_v31 = vld [vmem:[#allocation15 + $0xcb8] sm:$0xff]  ;;  %v5515_v10 = vmul.f32 %v7684_v52, %v7681_v11  ;;  %v4862_v59 = vld [vmem:[#allocation15 + $0xca8] sm:$0xff] }
 0x4c8   :  { %v2774_v61 = vpop.f32.mrf.mxu1  ;;  %3560 = vmatmul.f32.gmra.mxu3 %v3499_v36  ;;  %5583 = vmatmul.f32.gmra.mxu2 %v5534_v13  ;;  %v2528_v33 = vmul.f32 %v7691_v20, %v2516_v62  ;;  %v5350_v13 = vld [vmem:[#allocation15 + $0xe10] sm:$0xff] }
 0x4c9   :  { %v4024_v7 = vmax.f32 %v3998_v53, 0.0  ;;  %v2775_v3 = vadd.f32 %v2774_v61, %v2756_v15  ;;  %5068 = vmatmul.f32.gmra.mxu0 %v5009_v24  ;;  %4592 = vmatpush.msrb.mxu3 %v4566_v21  ;;  %v5525_v24 = vadd.f32 %v5514_v27, %v7349_v56  ;;  %v5000_v53 = vadd.f32 %v4989_v23, %v7632_v50  ;;  %v4977_v60 = vpop.permute.xlu2 %4976 }
 0x4ca   :  { %2542 = vadd.xlane.f32.xlu1 %v2528_v33  ;;  %1979 = vadd.xlane.f32.xlu2 %v1958_v38  ;;  %v4863_v38 = vld [vmem:[#allocation15 + $0xcb0] sm:$0xff]  ;;  %v5526_v27 = vadd.f32 %v5515_v10, %v7349_v56  ;;  %v5108_v10 = vld [vmem:[#allocation15 + $0xdf8] sm:$0xff] }
 0x4cb   :  { %v2777_v47 = vmax.f32 %v2775_v3, 0.0  ;;  %4075 = vmatmul.f32.gmra.mxu1 %v4024_v7  ;;  %v2492_v22 = vpop.f32.mrf.mxu3  ;;  %v3485_v29 = vpop.f32.mrf.mxu2  ;;  %5377 = vmatpush.msra.mxu0 %v5351_v44  ;;  %v5536_v48 = vmax.f32 %v5525_v24, 0.0  ;;  %v5011_v21 = vmax.f32 %v5000_v53, 0.0  ;;  %v4304_v44 = vperm.slane %v4282_v17, 0 }
 0x4cc   :  { %v3486_v46 = vadd.f32 %v3485_v29, %v7613_v40  ;;  %v2493_v54 = vadd.f32 %v2492_v22, %v7678_v39  ;;  %4881 = vmatpush.msra.mxu1 %v4865_v51  ;;  %4593 = vmatpush.msrb.mxu3 %v4565_v9 }
 0x4cd   :  { %v2779_v35 = vmul.f32 %v2778_v45, %v2777_v47  ;;  %v2787_v19 = vmul.f32 %v2786_v43, %v2777_v47  ;;  %5378 = vmatpush.msra.mxu0 %v5350_v13  ;;  %v5348_v45 = vld [vmem:[#allocation15 + $0xe00] sm:$0xff] }
 0x4ce   :  { %v3500_v28 = vmax.f32 %v3486_v46, 0.0  ;;  %v4000_v18 = vpop.f32.mrf.mxu0  ;;  %v2517_v62 = vmax.f32 %v2493_v54, 0.0  ;;  %4882 = vmatpush.msra.mxu1 %v4864_v31  ;;  %4594 = vmatpush.msrb.mxu3 %v4564_v37  ;;  %v1471_v31 = vadd.f32 %v7402_v12, %v7299_v14  ;;  %v6264_v37 = vld [vmem:[#allocation13 + $0x8] sm:$0xff]  ;;  %v4858_v14 = vld [vmem:[#allocation15 + $0xc88] sm:$0xff] }
 0x4cf   :  { %v4001_v26 = vadd.f32 %v4000_v18, %v7687_v25  ;;  %2780 = vadd.xlane.f32.xlu0 %v2779_v35  ;;  %5379 = vmatpush.msra.mxu0 %v5349_v4  ;;  %v1511_v24 = vperm.slane %v6264_v37, 6 }
 0x4d0   :  { %v3010_v15 = vpop.f32.mrf.mxu1  ;;  %3563 = vmatmul.f32.gmra.mxu3 %v3500_v28  ;;  %5586 = vmatmul.f32.gmra.mxu2 %v5535_v16  ;;  %v2529_v57 = vmul.f32 %v7691_v20, %v2517_v62  ;;  %v7771_v16 = vperm.slane %v7741_v49, 3  ;;  %v5516_v49 = vmul.f32 %v7684_v52, %v7700_v5 }
 0x4d1   :  { %v4025_v36 = vmax.f32 %v4001_v26, 0.0  ;;  %5071 = vmatmul.f32.gmra.mxu0 %v5010_v63  ;;  %v3011_v30 = vadd.f32 %v3010_v15, %v7756_v32  ;;  %4883 = vmatpush.msra.mxu1 %v4863_v38  ;;  %v4860_v63 = vld [vmem:[#allocation15 + $0xc98] sm:$0xff] }
 0x4d2   :  { %2788 = vadd.xlane.f32.xlu2 %v2787_v19  ;;  %4595 = vmatpush.msrb.mxu3 %v4563_v41  ;;  %v5537_v19 = vmax.f32 %v5526_v27, 0.0  ;;  %v5527_v12 = vadd.f32 %v5516_v49, %v7349_v56 }
 0x4d3   :  { %4078 = vmatmul.f32.gmra.mxu1 %v4025_v36  ;;  %v2495_v61 = vpop.f32.mrf.mxu3  ;;  %v3488_v33 = vpop.f32.mrf.mxu2  ;;  %5380 = vmatpush.msra.mxu0 %v5348_v45  ;;  %v3043_v11 = vmax.f32 %v3011_v30, 0.0  ;;  %v4857_v30 = vld [vmem:[#allocation15 + $0xc80] sm:$0xff] }
 0x4d4   :  { %v2496_v7 = vadd.f32 %v2495_v61, %v7678_v39  ;;  %v3489_v3 = vadd.f32 %v3488_v33, %v7613_v40  ;;  %v4990_v40 = vmul.f32 %v7625_v2, %v4977_v60  ;;  %4884 = vmatpush.msra.mxu1 %v4862_v59  ;;  %v4861_v2 = vld [vmem:[#allocation15 + $0xca0] sm:$0xff]  ;;  %v7782_v61 = vperm.slane %v4282_v17, 2 }
 0x4d5   :  { %v3055_v15 = vmul.f32 %v7771_v16, %v3043_v11 }
 0x4d6   :  { %v2518_v47 = vmax.f32 %v2496_v7, 0.0  ;;  %v3501_v22 = vmax.f32 %v3489_v3, 0.0  ;;  %v4003_v29 = vpop.f32.mrf.mxu0  ;;  %v5001_v28 = vadd.f32 %v4990_v40, %v7632_v50  ;;  %4885 = vmatpush.msra.mxu1 %v4861_v2  ;;  %v4859_v50 = vld [vmem:[#allocation15 + $0xc90] sm:$0xff]  ;;  %v1543_v7 = vadd.f32 %v1511_v24, %v1471_v31 }
 0x4d7   :  { %v4004_v8 = vadd.f32 %v4003_v29, %v7687_v25  ;;  %2544 = vadd.xlane.f32.xlu0 %v2529_v57 }
 0x4d8   :  { %v3013_v46 = vpop.f32.mrf.mxu1  ;;  %3566 = vmatmul.f32.gmra.mxu3 %v3501_v22  ;;  %5589 = vmatmul.f32.gmra.mxu2 %v5536_v48  ;;  %v2530_v43 = vmul.f32 %v7691_v20, %v2518_v47  ;;  %v5012_v4 = vmax.f32 %v5001_v28, 0.0  ;;  %v5538_v47 = vmax.f32 %v5527_v12, 0.0  ;;  %v5517_v22 = vmul.f32 %v7684_v52, %v7713_v1  ;;  %v5106_v1 = vld [vmem:[#allocation15 + $0xde8] sm:$0xff] }
 0x4d9   :  { %v4026_v54 = vmax.f32 %v4004_v8, 0.0  ;;  %v3014_v35 = vadd.f32 %v3013_v46, %v7756_v32  ;;  %5074 = vmatmul.f32.gmra.mxu0 %v5011_v21  ;;  %4886 = vmatpush.msra.mxu1 %v4860_v63  ;;  %v5107_v21 = vld [vmem:[#allocation15 + $0xdf0] sm:$0xff]  ;;  %v5340_v8 = vmax.f32 %v1543_v7, 0.0 }
 0x4da   :  { %2546 = vadd.xlane.f32.xlu2 %v2530_v43  ;;  %v5528_v2 = vadd.f32 %v5517_v22, %v7349_v56 }
 0x4db   :  { %4081 = vmatmul.f32.gmra.mxu1 %v4026_v54  ;;  %v2498_v18 = vpop.f32.mrf.mxu3  ;;  %v4322_v51 = vpop.f32.mrf.mxu2  ;;  %v3044_v23 = vmax.f32 %v3014_v35, 0.0 }
 0x4dc   :  { %v2499_v26 = vadd.f32 %v2498_v18, %v7678_v39  ;;  %v4323_v9 = vadd.f32 %v4322_v51, %v4304_v44  ;;  %4887 = vmatpush.msra.mxu1 %v4859_v50  ;;  %v5105_v18 = vld [vmem:[#allocation15 + $0xde0] sm:$0xff] }
 0x4dd   :  { %v3056_v38 = vmul.f32 %v7771_v16, %v3044_v23 }
 0x4de   :  { %v2519_v13 = vmax.f32 %v2499_v26, 0.0  ;;  %v4325_v62 = vmax.f32 %v4323_v9, 0.0  ;;  %v4006_v36 = vpop.f32.mrf.mxu0  ;;  %4888 = vmatpush.msra.mxu1 %v4858_v14  ;;  %v5539_v26 = vmax.f32 %v5528_v2, 0.0  ;;  %v5518_v9 = vmul.f32 %v7684_v52, %v7727_v58  ;;  %v5103_v58 = vld [vmem:[#allocation15 + $0xdd0] sm:$0xff] }
 0x4df   :  { %v4007_v53 = vadd.f32 %v4006_v36, %v7687_v25  ;;  %3066 = vadd.xlane.f32.xlu0 %v3055_v15  ;;  %v5507_v15 = vpop.permute.xlu0 %5506  ;;  %v5519_v14 = vmul.f32 %v7684_v52, %v7745_v0 }
 0x4e0   :  { %v3016_v33 = vpop.f32.mrf.mxu1  ;;  %4360 = vmatmul.f32.vlgmr.msra.gmra.mxu3 %v4325_v62  ;;  %5592 = vmatmul.f32.gmra.mxu2 %v5537_v19  ;;  %v2531_v5 = vmul.f32 %v7691_v20, %v2519_v13  ;;  %v5104_v62 = vld [vmem:[#allocation15 + $0xdd8] sm:$0xff] }
 0x4e1   :  { %v4027_v41 = vmax.f32 %v4007_v53, 0.0  ;;  %v3017_v60 = vadd.f32 %v3016_v33, %v7756_v32  ;;  %5077 = vmatmul.f32.gmra.mxu0 %v5012_v4  ;;  %4889 = vmatpush.msra.mxu1 %v4857_v30  ;;  %v5529_v53 = vadd.f32 %v5518_v9, %v7349_v56  ;;  %v5101_v30 = vld [vmem:[#allocation15 + $0xdc0] sm:$0xff]  ;;  %v5530_v0 = vadd.f32 %v5519_v14, %v7349_v56 }
 0x4e2   :  { %2548 = vadd.xlane.f32.xlu1 %v2531_v5  ;;  %3068 = vadd.xlane.f32.xlu2 %v3056_v38  ;;  %v5102_v38 = vld [vmem:[#allocation15 + $0xdc8] sm:$0xff] }
 0x4e3   :  { %4084 = vmatmul.f32.gmra.mxu1 %v4027_v41  ;;  %v2501_v3 = vpop.f32.mrf.mxu3  ;;  %v4518_v45 = vpop.f32.mrf.mxu2  ;;  %v3045_v57 = vmax.f32 %v3017_v60, 0.0  ;;  %v5540_v12 = vmax.f32 %v5529_v53, 0.0 }
 0x4e4   :  { %v2502_v17 = vadd.f32 %v2501_v3, %v7678_v39  ;;  %v4519_v48 = vadd.f32 %v4518_v45, %v7782_v61  ;;  %5110 = vmatpush.msrb.mxu1 %v5108_v10 }
 0x4e5   :  { %v3057_v44 = vmul.f32 %v7771_v16, %v3045_v57 }
 0x4e6   :  { %v2520_v29 = vmax.f32 %v2502_v17, 0.0  ;;  %v4551_v59 = vmax.f32 %v4519_v48, 0.0  ;;  %v4009_v40 = vpop.f32.mrf.mxu0  ;;  %5111 = vmatpush.msrb.mxu1 %v5107_v21 }
 0x4e7   :  { %v4010_v46 = vadd.f32 %v4009_v40, %v7687_v25  ;;  %v7811_v7 = vpop.permute.xlu0 %3735 }
 0x4e8   :  { %v3019_v43 = vpop.f32.mrf.mxu1  ;;  %4596 = vmatmul.f32.vlgmr.msrb.gmra.mxu3 %v4551_v59  ;;  %5595 = vmatmul.f32.gmra.mxu2 %v5538_v47  ;;  %v2532_v11 = vmul.f32 %v7691_v20, %v2520_v29  ;;  %9319 = vst [vmem:[#allocation36_spill] sm:$0xff] %v7811_v7  ;;  %v5100_v47 = vld [vmem:[#allocation15 + $0xdb8] sm:$0xff]  ;;  %v5099_v59 = vld [vmem:[#allocation15 + $0xdb0] sm:$0xff] }
 0x4e9   :  { %v4028_v54 = vmax.f32 %v4010_v46, 0.0  ;;  %v3020_v35 = vadd.f32 %v3019_v43, %v7756_v32  ;;  %5381 = vmatmul.f32.vlgmr.msra.gmra.mxu0 %v5340_v8  ;;  %5112 = vmatpush.msrb.mxu1 %v5106_v1  ;;  %v5541_v8 = vmax.f32 %v5530_v0, 0.0  ;;  %v5520_v46 = vmul.f32 %v7684_v52, %v5507_v15  ;;  %v7824_v1 = vld [vmem:[%s9273_s12] ss:$0 sm:$0xff]  ;;  %v5097_v15 = vld [vmem:[#allocation15 + $0xda0] sm:$0xff] }
 0x4ea   :  { %3070 = vadd.xlane.f32.xlu1 %v3057_v44  ;;  %2550 = vadd.xlane.f32.xlu0 %v2532_v11 }
 0x4eb   :  { %4087 = vmatmul.f32.gmra.mxu1 %v4028_v54  ;;  %v2504_v27 = vpop.f32.mrf.mxu3  ;;  %v4521_v28 = vpop.f32.mrf.mxu2  ;;  %v3046_v51 = vmax.f32 %v3020_v35, 0.0  ;;  %v5098_v35 = vld [vmem:[#allocation15 + $0xda8] sm:$0xff] }
 0x4ec   :  { %v2505_v63 = vadd.f32 %v2504_v27, %v7678_v39  ;;  %v4522_v23 = vadd.f32 %v4521_v28, %v7782_v61  ;;  %5113 = vmatpush.msrb.mxu1 %v5105_v18  ;;  %v7827_v27 = vpop.permute.xlu2 %4265  ;;  %v7830_v18 = vld [vmem:[#allocation16 + $0xc] sm:$0xf] }
 0x4ed   :  { %v3058_v37 = vmul.f32 %v7771_v16, %v3046_v51  ;;  %9320 = vst [vmem:[#allocation34_spill] sm:$0xff] %v7827_v27  ;;  %v3283_v51 = vperm.slane %v7830_v18, 1 }
 0x4ee   :  { %v2521_v49 = vmax.f32 %v2505_v63, 0.0  ;;  %v4552_v19 = vmax.f32 %v4522_v23, 0.0  ;;  %v4012_v13 = vpop.f32.mrf.mxu0  ;;  %5114 = vmatpush.msrb.mxu1 %v5104_v62  ;;  %v4812_v63 = vld [vmem:[#allocation16 + $0x18] sm:$0xf] }
 0x4ef   :  { %v4013_v36 = vadd.f32 %v4012_v13, %v7687_v25  ;;  %v4834_v13 = vperm.slane %v4812_v63, 0  ;;  %v5096_v62 = vld [vmem:[#allocation15 + $0xd98] sm:$0xff] }
 0x4f0   :  { %v3022_v50 = vpop.f32.mrf.mxu1  ;;  %4599 = vmatmul.f32.gmra.mxu3 %v4552_v19  ;;  %5598 = vmatmul.f32.gmra.mxu2 %v5539_v26  ;;  %v2533_v31 = vmul.f32 %v7691_v20, %v2521_v49 }
 0x4f1   :  { %v4029_v24 = vmax.f32 %v4013_v36, 0.0  ;;  %v3023_v4 = vadd.f32 %v3022_v50, %v7756_v32  ;;  %5115 = vmatpush.msrb.mxu1 %v5103_v58 }
 0x4f2   :  { %2552 = vadd.xlane.f32.xlu2 %v2533_v31  ;;  %3072 = vadd.xlane.f32.xlu0 %v3058_v37  ;;  %v7838_v37 = vld [vmem:[#allocation18 + $0xc] sm:$0xf] }
 0x4f3   :  { %4090 = vmatmul.f32.gmra.mxu1 %v4029_v24  ;;  %v7806_v33 = vpop.f32.mrf.mxu3  ;;  %v4524_v5 = vpop.f32.mrf.mxu2  ;;  %v3047_v41 = vmax.f32 %v3023_v4, 0.0  ;;  %v3313_v24 = vperm.slane %v7838_v37, 2 }
 0x4f4   :  { %v4525_v60 = vadd.f32 %v4524_v5, %v7782_v61  ;;  %5116 = vmatpush.msrb.mxu1 %v5102_v38  ;;  %v1655_v43 = vpop.xlane.xlu0 %1654  ;;  %v5095_v5 = vld [vmem:[#allocation15 + $0xd90] sm:$0xff] }
 0x4f5   :  { %v3059_v48 = vmul.f32 %v7771_v16, %v3047_v41  ;;  %v1659_v23 = vadd.f32 %v7824_v1, %v1655_v43  ;;  %v5638_v41 = vld [vmem:[#allocation15 + $0xff8] sm:$0xff] }
 0x4f6   :  { %v4553_v3 = vmax.f32 %v4525_v60, 0.0  ;;  %v4015_v45 = vpop.f32.mrf.mxu0  ;;  %5117 = vmatpush.msrb.mxu1 %v5101_v30  ;;  %v5094_v30 = vld [vmem:[#allocation15 + $0xd88] sm:$0xff]  ;;  %5640 = vmatpush.msra.mxu3 %v5638_v41 }
 0x4f7   :  { %v4016_v57 = vadd.f32 %v4015_v45, %v7687_v25 }
 0x4f8   :  { %v7814_v17 = vpop.f32.mrf.mxu1  ;;  %4602 = vmatmul.f32.gmra.mxu3 %v4553_v3  ;;  %5601 = vmatmul.f32.gmra.mxu2 %v5540_v12 }
 0x4f9   :  { %v4030_v10 = vmax.f32 %v4016_v57, 0.0  ;;  %5118 = vmatpush.msrb.mxu1 %v5100_v47  ;;  %v5637_v57 = vld [vmem:[#allocation15 + $0xff0] sm:$0xff] }
 0x4fa   :  { %3074 = vadd.xlane.f32.xlu2 %v3059_v48  ;;  %v7843_v48 = vpop.xlane.xlu2 %1961  ;;  %5641 = vmatpush.msra.mxu3 %v5637_v57 }
 0x4fb   :  { %4093 = vmatmul.f32.gmra.mxu1 %v4030_v10  ;;  %v2510_v22 = vpop.f32.mrf.mxu3  ;;  %v4527_v29 = vpop.f32.mrf.mxu2  ;;  %v7845_v10 = vperm.slane %v4812_v63, 2  ;;  %v5633_v63 = vld [vmem:[#allocation15 + $0xfd0] sm:$0xff] }
 0x4fc   :  { %v2511_v40 = vadd.f32 %v2510_v22, %v7678_v39  ;;  %v4528_v21 = vadd.f32 %v4527_v29, %v7782_v61  ;;  %5119 = vmatpush.msrb.mxu1 %v5099_v59  ;;  %v5093_v22 = vld [vmem:[#allocation15 + $0xd80] sm:$0xff]  ;;  %v5636_v29 = vld [vmem:[#allocation15 + $0xfe8] sm:$0xff] }
 0x4fd   :  { %5642 = vmatpush.msra.mxu3 %v5636_v29 }
 0x4fe   :  { %v2523_v44 = vmax.f32 %v2511_v40, 0.0  ;;  %v4554_v11 = vmax.f32 %v4528_v21, 0.0  ;;  %v4018_v54 = vpop.f32.mrf.mxu0  ;;  %5120 = vmatpush.msrb.mxu1 %v5098_v35  ;;  %v3305_v21 = vperm.slane %v7838_v37, 1  ;;  %v7854_v35 = vpop.xlane.xlu0 %1662 }
 0x4ff   :  { %v4019_v2 = vadd.f32 %v4018_v54, %v7687_v25  ;;  %v5531_v25 = vadd.f32 %v5520_v46, %v7349_v56  ;;  %v5635_v46 = vld [vmem:[#allocation15 + $0xfe0] sm:$0xff]  ;;  %v5634_v54 = vld [vmem:[#allocation15 + $0xfd8] sm:$0xff]  ;;  %9321 = vst [vmem:[#allocation35_spill] sm:$0xff] %v7854_v35 }
 0x500   :  { %v3028_v28 = vpop.f32.mrf.mxu1  ;;  %4605 = vmatmul.f32.gmra.mxu3 %v4554_v11  ;;  %5604 = vmatmul.f32.gmra.mxu2 %v5541_v8  ;;  %v2535_v52 = vmul.f32 %v7691_v20, %v2523_v44  ;;  %v7851_v8 = vpop.xlane.xlu1 %1959 }
 0x501   :  { %v4031_v26 = vmax.f32 %v4019_v2, 0.0  ;;  %v3029_v9 = vadd.f32 %v3028_v28, %v7756_v32  ;;  %5121 = vmatpush.msrb.mxu1 %v5097_v15  ;;  %v5542_v4 = vmax.f32 %v5531_v25, 0.0  ;;  %5643 = vmatpush.msra.mxu3 %v5635_v46  ;;  %v5632_v15 = vld [vmem:[#allocation15 + $0xfc8] sm:$0xff] }
 0x502   :  { %2556 = vadd.xlane.f32.xlu0 %v2535_v52 }
 0x503   :  { %4096 = vmatmul.f32.gmra.mxu1 %v4031_v26  ;;  %v3301_v49 = vpop.f32.mrf.mxu3  ;;  %v4530_v19 = vpop.f32.mrf.mxu2  ;;  %2159 = vrot.lane.b32.xlu1 %v1659_v23, %s6578_s24  ;;  %v3049_v36 = vmax.f32 %v3029_v9, 0.0 }
 0x504   :  { %v3302_v50 = vadd.f32 %v3301_v49, %v3283_v51  ;;  %v4531_v31 = vadd.f32 %v4530_v19, %v7782_v61  ;;  %5122 = vmatpush.msrb.mxu1 %v5096_v62  ;;  %5644 = vmatpush.msra.mxu3 %v5634_v54  ;;  %v7859_v23 = vpop.xlane.xlu2 %1965  ;;  %v5631_v19 = vld [vmem:[#allocation15 + $0xfc0] sm:$0xff] }
 0x505   :  { %v3061_v12 = vmul.f32 %v7771_v16, %v3049_v36 }
 0x506   :  { %v3304_v58 = vmax.f32 %v3302_v50, 0.0  ;;  %v4555_v56 = vmax.f32 %v4531_v31, 0.0  ;;  %v4852_v53 = vpop.f32.mrf.mxu0  ;;  %5123 = vmatpush.msrb.mxu1 %v5095_v5  ;;  %5645 = vmatpush.msra.mxu3 %v5633_v63  ;;  %v5630_v50 = vld [vmem:[#allocation15 + $0xfb8] sm:$0xff] }
 0x507   :  { %v4853_v38 = vadd.f32 %v4852_v53, %v4834_v13 }
 0x508   :  { %v3031_v60 = vpop.f32.mrf.mxu1  ;;  %4608 = vmatmul.f32.gmra.mxu3 %v4555_v56  ;;  %5607 = vmatmul.f32.gmra.mxu2 %v5542_v4  ;;  %v3314_v14 = vmul.f32 %v3313_v24, %v3304_v58  ;;  %v3306_v52 = vmul.f32 %v3305_v21, %v3304_v58  ;;  %v5629_v58 = vld [vmem:[#allocation15 + $0xfb0] sm:$0xff]  ;;  %v7868_v56 = vpop.xlane.xlu0 %1963  ;;  %v7882_v21 = vperm.slane %v7830_v18, 3 }
 0x509   :  { %v4855_v3 = vmax.f32 %v4853_v38, 0.0  ;;  %v3032_v45 = vadd.f32 %v3031_v60, %v7756_v32  ;;  %5124 = vmatpush.msrb.mxu1 %v5094_v30  ;;  %5646 = vmatpush.msra.mxu3 %v5632_v15  ;;  %v5628_v60 = vld [vmem:[#allocation15 + $0xfa8] sm:$0xff] }
 0x50a   :  { %3315 = vadd.xlane.f32.xlu2 %v3314_v14  ;;  %3078 = vadd.xlane.f32.xlu0 %v3061_v12  ;;  %v7864_v49 = vpop.xlane.xlu1 %1967 }
 0x50b   :  { %4890 = vmatmul.f32.vlgmr.msra.gmra.mxu1 %v4855_v3  ;;  %v7847_v47 = vpop.f32.mrf.mxu3  ;;  %v4533_v0 = vpop.f32.mrf.mxu2  ;;  %v3050_v59 = vmax.f32 %v3032_v45, 0.0  ;;  %5647 = vmatpush.msra.mxu3 %v5631_v19  ;;  %v5627_v3 = vld [vmem:[#allocation15 + $0xfa0] sm:$0xff]  ;;  %v7898_v19 = vld [vmem:[#allocation16 + $0x10] sm:$0xf] }
 0x50c   :  { %v4534_v40 = vadd.f32 %v4533_v0, %v7782_v61  ;;  %5125 = vmatpush.msrb.mxu1 %v5093_v22  ;;  %v5626_v22 = vld [vmem:[#allocation15 + $0xf98] sm:$0xff] }
 0x50d   :  { %v3062_v28 = vmul.f32 %v7771_v16, %v3050_v59  ;;  %5648 = vmatpush.msra.mxu3 %v5630_v50 }
 0x50e   :  { %v4556_v43 = vmax.f32 %v4534_v40, 0.0  ;;  %v5048_v44 = vpop.f32.mrf.mxu0  ;;  %v5625_v40 = vld [vmem:[#allocation15 + $0xf90] sm:$0xff] }
 0x50f   :  { %v5049_v11 = vadd.f32 %v5048_v44, %v7845_v10  ;;  %5649 = vmatpush.msra.mxu3 %v5629_v58  ;;  %v2508_v44 = vadd.f32 %v7806_v33, %v7678_v39 }
 0x510   :  { %v7856_v2 = vpop.f32.mrf.mxu1  ;;  %4611 = vmatmul.f32.gmra.mxu3 %v4556_v43 }
 0x511   :  { %v5081_v51 = vmax.f32 %v5049_v11, 0.0  ;;  %5650 = vmatpush.msra.mxu3 %v5628_v60  ;;  %v3026_v60 = vadd.f32 %v7814_v17, %v7756_v32 }
 0x512   :  { %3080 = vadd.xlane.f32.xlu2 %v3062_v28  ;;  %3307 = vadd.xlane.f32.xlu0 %v3306_v52  ;;  %v7870_v53 = vpop.xlane.xlu2 %1969  ;;  %v5624_v28 = vld [vmem:[#allocation15 + $0xf88] sm:$0xff] }
 0x513   :  { %5126 = vmatmul.f32.vlgmr.msrb.gmra.mxu1 %v5081_v51  ;;  %v7861_v26 = vpop.f32.mrf.mxu3  ;;  %v4536_v9 = vpop.f32.mrf.mxu2  ;;  %5651 = vmatpush.msra.mxu3 %v5627_v3  ;;  %v7891_v52 = vld [vmem:[%s9273_s12 + $0x1] ss:$0 sm:$0xff] }
 0x514   :  { %v4537_v25 = vadd.f32 %v4536_v9, %v7782_v61  ;;  %v5623_v9 = vld [vmem:[#allocation15 + $0xf80] sm:$0xff] }
 0x515   :  { %5652 = vmatpush.msra.mxu3 %v5626_v22 }
 0x516   :  { %v4557_v13 = vmax.f32 %v4537_v25, 0.0  ;;  %v5051_v62 = vpop.f32.mrf.mxu0 }
 0x517   :  { %v5052_v36 = vadd.f32 %v5051_v62, %v7845_v10  ;;  %5653 = vmatpush.msra.mxu3 %v5625_v40  ;;  %v2522_v62 = vmax.f32 %v2508_v44, 0.0  ;;  %v7920_v40 = vld [vmem:[#allocation18 + $0x10] sm:$0xf]  ;;  %v3048_v44 = vmax.f32 %v3026_v60, 0.0 }
 0x518   :  { %v3037_v31 = vpop.f32.mrf.mxu1  ;;  %4614 = vmatmul.f32.gmra.mxu3 %v4557_v13  ;;  %v3813_v13 = vperm.slane %v7898_v19, 1  ;;  %v3843_v17 = vperm.slane %v7920_v40, 2 }
 0x519   :  { %v5082_v24 = vmax.f32 %v5052_v36, 0.0  ;;  %v3038_v4 = vadd.f32 %v3037_v31, %v7756_v32  ;;  %5654 = vmatpush.msra.mxu3 %v5624_v28  ;;  %v5402_v28 = vld [vmem:[#allocation15 + $0xef8] sm:$0xff] }
 0x51a   :  { %v7875_v12 = vpop.xlane.xlu1 %1971  ;;  %5404 = vmatpush.msra.mxu1 %v5402_v28  ;;  %v3035_v28 = vadd.f32 %v7856_v2, %v7756_v32 }
 0x51b   :  { %v3052_v5 = vmax.f32 %v3038_v4, 0.0  ;;  %5129 = vmatmul.f32.gmra.mxu1 %v5082_v24  ;;  %v7872_v38 = vpop.f32.mrf.mxu3  ;;  %v4539_v41 = vpop.f32.mrf.mxu2  ;;  %5655 = vmatpush.msra.mxu3 %v5623_v9  ;;  %v7904_v24 = vperm.slane %v7838_v37, 3 }
 0x51c   :  { %v4540_v14 = vadd.f32 %v4539_v41, %v7782_v61 }
 0x51d   :  { %v3064_v0 = vmul.f32 %v7771_v16, %v3052_v5  ;;  %v7884_v46 = vpop.xlane.xlu2 %2258  ;;  %v2251_v43 = vpop.xlane.xlu0 %2250 }
 0x51e   :  { %v4558_v45 = vmax.f32 %v4540_v14, 0.0  ;;  %v5054_v30 = vpop.f32.mrf.mxu0  ;;  %9322 = vst [vmem:[#allocation37_spill] sm:$0xff] %v7884_v46  ;;  %v2255_v9 = vadd.f32 %v7891_v52, %v2251_v43  ;;  %v7941_v43 = vld [vmem:[#allocation16 + $0x1c] sm:$0xf] }
 0x51f   :  { %v5055_v57 = vadd.f32 %v5054_v30, %v7845_v10  ;;  %3084 = vadd.xlane.f32.xlu0 %v3064_v0 }
 0x520   :  { %v7879_v29 = vpop.f32.mrf.mxu1  ;;  %4617 = vmatmul.f32.gmra.mxu3 %v4558_v45  ;;  %v2534_v45 = vmul.f32 %v7691_v20, %v2522_v62  ;;  %v5401_v62 = vld [vmem:[#allocation15 + $0xef0] sm:$0xff] }
 0x521   :  { %v5083_v59 = vmax.f32 %v5055_v57, 0.0  ;;  %5405 = vmatpush.msra.mxu1 %v5401_v62 }
 0x523   :  { %5132 = vmatmul.f32.gmra.mxu1 %v5083_v59  ;;  %v3546_v11 = vpop.f32.mrf.mxu3  ;;  %v4542_v54 = vpop.f32.mrf.mxu2 }
 0x524   :  { %v3547_v51 = vadd.f32 %v3546_v11, %v7882_v21  ;;  %v4543_v18 = vadd.f32 %v4542_v54, %v7782_v61 }
 0x525   :  { %v2537_v63 = vpop.xlane.xlu1 %2536  ;;  %v7917_v57 = vpop.xlane.xlu2 %1973 }
 0x526   :  { %v3573_v15 = vmax.f32 %v3547_v51, 0.0  ;;  %v4559_v25 = vmax.f32 %v4543_v18, 0.0  ;;  %v5057_v39 = vpop.f32.mrf.mxu0  ;;  %v7896_v33 = vadd.f32 %v7891_v52, %v2537_v63  ;;  %v3538_v63 = vadd.f32 %v7847_v47, %v7882_v21 }
 0x527   :  { %v5058_v36 = vadd.f32 %v5057_v39, %v7845_v10 }
 0x528   :  { %v2580_v50 = vmin.f32 %v7896_v33, 0.0  ;;  %v3831_v31 = vpop.f32.mrf.mxu1  ;;  %4620 = vmatmul.f32.gmra.mxu3 %v4559_v25  ;;  %v3585_v41 = vmul.f32 %v7904_v24, %v3573_v15  ;;  %vm2569_vm2 = vcmp.gt.f32.partialorder %v7896_v33, 0.0 }
 0x529   :  { %v5084_v4 = vmax.f32 %v5058_v36, 0.0  ;;  %v7906_v58 = vadd.f32 %v3831_v31, %v3813_v13  ;;  %v3060_v13 = vmul.f32 %v7771_v16, %v3048_v44  ;;  %v5400_v31 = vld [vmem:[#allocation15 + $0xee8] sm:$0xff] }
 0x52a   :  { %v7908_v5 = vpop.xlane.xlu0 %1975  ;;  %v2591_v30 = vmul.f32 1.442695, %v2580_v50  ;;  %3599 = vadd.xlane.f32.xlu2 %v3585_v41  ;;  %5406 = vmatpush.msra.mxu1 %v5400_v31 }
 0x52b   :  { %5135 = vmatmul.f32.gmra.mxu1 %v5084_v4  ;;  %v7913_v14 = vpop.f32.mrf.mxu3  ;;  %v4545_v3 = vpop.f32.mrf.mxu2  ;;  %v9287_v0 = vmax.f32 %v7906_v58, 0.0 }
 0x52c   :  { %v4546_v37 = vadd.f32 %v4545_v3, %v7782_v61  ;;  %6060 = vpow2.f32 %v2591_v30  ;;  %v3570_v3 = vmax.f32 %v3538_v63, 0.0  ;;  %v5399_v30 = vld [vmem:[#allocation15 + $0xee0] sm:$0xff] }
 0x52d   :  { %2554 = vadd.xlane.f32.xlu1 %v2534_v45  ;;  %v3844_v18 = vmul.f32 %v3843_v17, %v9287_v0  ;;  %5407 = vmatpush.msra.mxu1 %v5399_v30  ;;  %v3051_v30 = vmax.f32 %v3035_v28, 0.0 }
 0x52e   :  { %v4560_v22 = vmax.f32 %v4546_v37, 0.0  ;;  %v5060_v59 = vpop.f32.mrf.mxu0 }
 0x52f   :  { %v5061_v11 = vadd.f32 %v5060_v59, %v7845_v10  ;;  %v7948_v59 = vperm.slane %v7941_v43, 2 }
 0x530   :  { %v7924_v20 = vpop.f32.mrf.mxu1  ;;  %4623 = vmatmul.f32.gmra.mxu3 %v4560_v22 }
 0x531   :  { %v5085_v54 = vmax.f32 %v5061_v11, 0.0  ;;  %v5398_v11 = vld [vmem:[#allocation15 + $0xed8] sm:$0xff] }
 0x532   :  { %v2539_v51 = vpop.xlane.xlu0 %2538  ;;  %3845 = vadd.xlane.f32.xlu2 %v3844_v18  ;;  %v7938_v50 = vpop.xlane.xlu1 %1977  ;;  %5408 = vmatpush.msra.mxu1 %v5398_v11 }
 0x533   :  { %v7932_v15 = vadd.f32 %v7891_v52, %v2539_v51  ;;  %5138 = vmatmul.f32.gmra.mxu1 %v5085_v54  ;;  %v7934_v25 = vpop.f32.mrf.mxu3  ;;  %v4548_v39 = vpop.f32.mrf.mxu2  ;;  %2689 = vrot.lane.b32.xlu0 %v2255_v9, %s6578_s24  ;;  %v3582_v9 = vmul.f32 %v7904_v24, %v3570_v3 }
 0x534   :  { %v4549_v36 = vadd.f32 %v4548_v39, %v7782_v61  ;;  %v6061_v4 = vpop.eup %6060  ;;  %v5397_v39 = vld [vmem:[#allocation15 + $0xed0] sm:$0xff] }
 0x535   :  { %3076 = vadd.xlane.f32.xlu1 %v3060_v13  ;;  %v2541_v47 = vpop.xlane.xlu2 %2540  ;;  %v2581_v41 = vmin.f32 %v7932_v15, 0.0  ;;  %v5937_v17 = vadd.f32 -1.0, %v6061_v4  ;;  %5409 = vmatpush.msra.mxu1 %v5397_v39  ;;  %v5396_v4 = vld [vmem:[#allocation15 + $0xec8] sm:$0xff]  ;;  %vm2570_vm3 = vcmp.gt.f32.partialorder %v7932_v15, 0.0 }
 0x536   :  { %v5063_v60 = vpop.f32.mrf.mxu0  ;;  %v4561_v45 = vmax.f32 %v4549_v36, 0.0  ;;  %v7951_v44 = vadd.f32 %v7891_v52, %v2541_v47 }
 0x537   :  { %v2593_v37 = vmul.f32 1.442695, %v2581_v41  ;;  %v5064_v61 = vadd.f32 %v5063_v60, %v7845_v10  ;;  %v2624_v36 = vsel %vm2569_vm2, %v7896_v33, %v5937_v17  ;;  %5410 = vmatpush.msra.mxu1 %v5396_v4  ;;  %v5393_v4 = vld [vmem:[#allocation15 + $0xeb0] sm:$0xff] }
 0x538   :  { %v7945_v22 = vpop.f32.mrf.mxu1  ;;  %4626 = vmatmul.f32.gmra.mxu3 %v4561_v45  ;;  %v2582_v51 = vmin.f32 %v7951_v44, 0.0  ;;  %v2635_v17 = vadd.f32 1.0, %v2624_v36  ;;  %vm2571_vm5 = vcmp.gt.f32.partialorder %v7951_v44, 0.0 }
 0x539   :  { %6062 = vpow2.f32 %v2593_v37  ;;  %v5086_v54 = vmax.f32 %v5064_v61, 0.0  ;;  %v5395_v61 = vld [vmem:[#allocation15 + $0xec0] sm:$0xff] }
 0x53a   :  { %v2595_v47 = vmul.f32 1.442695, %v2582_v51  ;;  %5411 = vmatpush.msra.mxu1 %v5395_v61 }
 0x53b   :  { %v3555_v18 = vpop.f32.mrf.mxu3  ;;  %v5578_v63 = vpop.f32.mrf.mxu2  ;;  %5141 = vmatmul.f32.gmra.mxu1 %v5086_v54 }
 0x53c   :  { %v3556_v13 = vadd.f32 %v3555_v18, %v7882_v21  ;;  %v5579_v62 = vadd.f32 %v5578_v63, %v7948_v59  ;;  %6064 = vpow2.f32 %v2595_v47  ;;  %v5394_v63 = vld [vmem:[#allocation15 + $0xeb8] sm:$0xff] }
 0x53d   :  { %3593 = vadd.xlane.f32.xlu1 %v3582_v9  ;;  %v2543_v31 = vpop.xlane.xlu1 %2542  ;;  %v7961_v2 = vpop.xlane.xlu2 %1979  ;;  %v3541_v9 = vadd.f32 %v7861_v26, %v7882_v21  ;;  %5412 = vmatpush.msra.mxu1 %v5394_v63  ;;  %v5391_v63 = vld [vmem:[#allocation15 + $0xea0] sm:$0xff] }
 0x53e   :  { %v3576_v41 = vmax.f32 %v3556_v13, 0.0  ;;  %v5611_v60 = vmax.f32 %v5579_v62, 0.0  ;;  %v5066_v3 = vpop.f32.mrf.mxu0  ;;  %v7964_v45 = vadd.f32 %v7891_v52, %v2543_v31  ;;  %v3063_v31 = vmul.f32 %v7771_v16, %v3051_v30 }
 0x53f   :  { %v5067_v37 = vadd.f32 %v5066_v3, %v7845_v10  ;;  %v6063_v33 = vpop.eup %6062  ;;  %5413 = vmatpush.msra.mxu1 %v5393_v4  ;;  %v3571_v61 = vmax.f32 %v3541_v9, 0.0 }
 0x540   :  { %v2583_v11 = vmin.f32 %v7964_v45, 0.0  ;;  %v7968_v54 = vpop.f32.mrf.mxu1  ;;  %v5938_v51 = vadd.f32 -1.0, %v6063_v33  ;;  %5656 = vmatmul.f32.vlgmr.msra.gmra.mxu3 %v5611_v60  ;;  %v3588_v13 = vmul.f32 %v7904_v24, %v3576_v41  ;;  %v2646_v60 = vmul.f32 %v2635_v17, %v7294_v6  ;;  %v9324_v33 = vld [vmem:[#allocation25_spill] sm:$0xff] }
 0x541   :  { %v5087_v18 = vmax.f32 %v5067_v37, 0.0  ;;  %vm2572_vm6 = vcmp.gt.f32.partialorder %v7964_v45, 0.0 }
 0x542   :  { %v2597_v28 = vmul.f32 1.442695, %v2583_v11  ;;  %v7973_v39 = vpop.xlane.xlu0 %2780  ;;  %v2625_v62 = vsel %vm2570_vm3, %v7932_v15, %v5938_v51  ;;  %3605 = vadd.xlane.f32.xlu2 %v3588_v13  ;;  %v6065_v26 = vpop.eup %6064  ;;  %v5392_v15 = vld [vmem:[#allocation15 + $0xea8] sm:$0xff] }
 0x543   :  { %v7977_v36 = vpop.f32.mrf.mxu3  ;;  %v5581_v47 = vpop.f32.mrf.mxu2  ;;  %v2636_v3 = vadd.f32 1.0, %v2625_v62  ;;  %5144 = vmatmul.f32.gmra.mxu1 %v5087_v18  ;;  %v5939_v30 = vadd.f32 -1.0, %v6065_v26 }
 0x544   :  { %6066 = vpow2.f32 %v2597_v28  ;;  %v5582_v37 = vadd.f32 %v5581_v47, %v7948_v59  ;;  %5414 = vmatpush.msra.mxu1 %v5392_v15  ;;  %v2657_v28 = vsel %vm2124_vm4, %v2646_v60, 0.0  ;;  %v3583_v60 = vmul.f32 %v7904_v24, %v3571_v61 }
 0x545   :  { %3082 = vadd.xlane.f32.xlu1 %v3063_v31  ;;  %v7982_v41 = vpop.xlane.xlu2 %2788  ;;  %v2647_v11 = vmul.f32 %v2636_v3, %v9324_v33  ;;  %v2626_v62 = vsel %vm2571_vm5, %v7951_v44, %v5939_v30  ;;  %v5390_v3 = vld [vmem:[#allocation15 + $0xe98] sm:$0xff]  ;;  %v9325_v44 = vld [vmem:[#allocation30_spill] sm:$0xff] }
 0x546   :  { %9323 = vst [vmem:[#allocation38_spill] sm:$0xff] %v7982_v41  ;;  %v5069_v51 = vpop.f32.mrf.mxu0  ;;  %v5612_v17 = vmax.f32 %v5582_v37, 0.0  ;;  %v2637_v31 = vadd.f32 1.0, %v2626_v62  ;;  %5415 = vmatpush.msra.mxu1 %v5391_v63  ;;  %v7994_v37 = vadd.f32 %v7824_v1, %v7851_v8  ;;  %v5389_v63 = vld [vmem:[#allocation15 + $0xe90] sm:$0xff]  ;;  %v8007_v8 = vadd.f32 %v7824_v1, %v7843_v48 }
 0x547   :  { %v5070_v18 = vadd.f32 %v5069_v51, %v7845_v10  ;;  %v2658_v13 = vsel %vm2124_vm4, %v2647_v11, 0.0  ;;  %v3041_v11 = vadd.f32 %v7879_v29, %v7756_v32 }
 0x548   :  { %v7990_v47 = vpop.f32.mrf.mxu1  ;;  %v2659_v9 = vadd.f32 %v2658_v13, %v2657_v28  ;;  %5659 = vmatmul.f32.gmra.mxu3 %v5612_v17  ;;  %v2648_v30 = vmul.f32 %v2637_v31, %v9325_v44  ;;  %5416 = vmatpush.msra.mxu1 %v5390_v3  ;;  %v5388_v31 = vld [vmem:[#allocation15 + $0xe88] sm:$0xff]  ;;  %v2003_v3 = vmin.f32 %v7994_v37, 0.0  ;;  %vm1992_vm8 = vcmp.gt.f32.partialorder %v7994_v37, 0.0 }
 0x549   :  { %v5088_v4 = vmax.f32 %v5070_v18, 0.0  ;;  %v3053_v0 = vmax.f32 %v3041_v11, 0.0  ;;  %vm1993_vm11 = vcmp.gt.f32.partialorder %v8007_v8, 0.0 }
 0x54a   :  { %v6067_v26 = vpop.eup %6066  ;;  %v2545_v15 = vpop.xlane.xlu0 %2544  ;;  %v2660_v29 = vsel %vm2124_vm4, %v2648_v30, 0.0  ;;  %5417 = vmatpush.msra.mxu1 %v5389_v63  ;;  %v5387_v30 = vld [vmem:[#allocation15 + $0xe80] sm:$0xff] }
 0x54b   :  { %v5940_v51 = vadd.f32 -1.0, %v6067_v26  ;;  %v8001_v28 = vadd.f32 %v7891_v52, %v2545_v15  ;;  %v8003_v17 = vpop.f32.mrf.mxu3  ;;  %v5584_v18 = vpop.f32.mrf.mxu2  ;;  %5147 = vmatmul.f32.gmra.mxu1 %v5088_v4  ;;  %v2661_v26 = vadd.f32 %v2660_v29, %v2659_v9  ;;  %v2014_v29 = vmul.f32 1.442695, %v2003_v3 }
 0x54c   :  { %v5585_v32 = vadd.f32 %v5584_v18, %v7948_v59  ;;  %5418 = vmatpush.msra.mxu1 %v5388_v31  ;;  %v3544_v3 = vadd.f32 %v7872_v38, %v7882_v21 }
 0x54d   :  { %v2627_v61 = vsel %vm2572_vm6, %v7964_v45, %v5940_v51  ;;  %v2584_v13 = vmin.f32 %v8001_v28, 0.0  ;;  %3595 = vadd.xlane.f32.xlu1 %v3583_v60  ;;  %v2547_v62 = vpop.xlane.xlu2 %2546  ;;  %v2004_v45 = vmin.f32 %v8007_v8, 0.0  ;;  %v9326_v51 = vld [vmem:[#allocation40_spill] sm:$0xff]  ;;  %vm2573_vm7 = vcmp.gt.f32.partialorder %v8001_v28, 0.0 }
 0x54e   :  { %v2638_v48 = vadd.f32 1.0, %v2627_v61  ;;  %v5072_v15 = vpop.f32.mrf.mxu0  ;;  %v5613_v4 = vmax.f32 %v5585_v32, 0.0  ;;  %v8019_v60 = vadd.f32 %v7891_v52, %v2547_v62  ;;  %5419 = vmatpush.msra.mxu1 %v5387_v30  ;;  %v3550_v61 = vadd.f32 %v7913_v14, %v7882_v21 }
 0x54f   :  { %v2599_v27 = vmul.f32 1.442695, %v2584_v13  ;;  %v5073_v18 = vadd.f32 %v5072_v15, %v7845_v10  ;;  %v2016_v15 = vmul.f32 1.442695, %v2004_v45 }
 0x550   :  { %v2649_v7 = vmul.f32 %v2638_v48, %v9326_v51  ;;  %v8021_v63 = vpop.f32.mrf.mxu1  ;;  %5662 = vmatmul.f32.gmra.mxu3 %v5613_v4  ;;  %v2585_v32 = vmin.f32 %v8019_v60, 0.0  ;;  %v3065_v48 = vmul.f32 %v7771_v16, %v3053_v0  ;;  %v8047_v16 = vld [vmem:[%s9273_s12 + $0x2] ss:$0 sm:$0xff]  ;;  %v3574_v38 = vmax.f32 %v3550_v61, 0.0 }
 0x551   :  { %6068 = vpow2.f32 %v2599_v27  ;;  %v5089_v9 = vmax.f32 %v5073_v18, 0.0  ;;  %v8042_v18 = vperm.slane %v7898_v19, 3  ;;  %vm2574_vm9 = vcmp.gt.f32.partialorder %v8019_v60, 0.0 }
 0x552   :  { %v2662_v11 = vsel %vm2124_vm4, %v2649_v7, 0.0  ;;  %v2601_v27 = vmul.f32 1.442695, %v2585_v32  ;;  %v8035_v7 = vadd.f32 %v7824_v1, %v7868_v56  ;;  %v8039_v14 = vpop.xlane.xlu0 %3066 }
 0x553   :  { %v8027_v13 = vadd.f32 %v2662_v11, %v2661_v26  ;;  %v8029_v31 = vpop.f32.mrf.mxu3  ;;  %v5587_v62 = vpop.f32.mrf.mxu2  ;;  %5150 = vmatmul.f32.gmra.mxu1 %v5089_v9 }
 0x554   :  { %v5588_v4 = vadd.f32 %v5587_v62, %v7948_v59  ;;  %6070 = vpow2.f32 %v2601_v27  ;;  %v2005_v32 = vmin.f32 %v8035_v7, 0.0  ;;  %v3572_v62 = vmax.f32 %v3544_v3, 0.0 }
 0x555   :  { %3086 = vadd.xlane.f32.xlu1 %v3065_v48  ;;  %v2549_v26 = vpop.xlane.xlu1 %2548  ;;  %6072 = vpow2.f32 %v2014_v29  ;;  %v4068_v27 = vadd.f32 %v7924_v20, %v8042_v18  ;;  %v2785_v29 = vadd.f32 %v8047_v16, %v7973_v39  ;;  %v8070_v39 = vadd.f32 %v7824_v1, %v7859_v23 }
 0x556   :  { %v5614_v0 = vmax.f32 %v5588_v4, 0.0  ;;  %v5075_v30 = vpop.f32.mrf.mxu0  ;;  %v8050_v56 = vadd.f32 %v7891_v52, %v2549_v26  ;;  %6074 = vpow2.f32 %v2016_v15  ;;  %vm1994_vm13 = vcmp.gt.f32.partialorder %v8035_v7, 0.0 }
 0x557   :  { %v6069_v45 = vpop.eup %6068  ;;  %v5076_v9 = vadd.f32 %v5075_v30, %v7845_v10  ;;  %v2006_v35 = vmin.f32 %v8070_v39, 0.0  ;;  %vm1995_vm14 = vcmp.gt.f32.partialorder %v8070_v39, 0.0 }
 0x558   :  { %v5941_v11 = vadd.f32 -1.0, %v6069_v45  ;;  %v2586_v19 = vmin.f32 %v8050_v56, 0.0  ;;  %5665 = vmatmul.f32.gmra.mxu3 %v5614_v0  ;;  %v8061_v15 = vpop.f32.mrf.mxu1  ;;  %v3586_v45 = vmul.f32 %v7904_v24, %v3574_v38  ;;  %vm2575_vm10 = vcmp.gt.f32.partialorder %v8050_v56, 0.0 }
 0x559   :  { %v5090_v48 = vmax.f32 %v5076_v9, 0.0 }
 0x55a   :  { %v2628_v61 = vsel %vm2573_vm7, %v8001_v28, %v5941_v11  ;;  %v2603_v4 = vmul.f32 1.442695, %v2586_v19  ;;  %v6071_v3 = vpop.eup %6070  ;;  %3216 = vrot.lane.b32.xlu2 %v2785_v29, %s6578_s24  ;;  %v2018_v28 = vmul.f32 1.442695, %v2005_v32  ;;  %v9327_v11 = vld [vmem:[#allocation26_spill] sm:$0xff]  ;;  %v4100_v29 = vmax.f32 %v4068_v27, 0.0 }
 0x55b   :  { %v2639_v26 = vadd.f32 1.0, %v2628_v61  ;;  %v5590_v30 = vpop.f32.mrf.mxu2  ;;  %5153 = vmatmul.f32.gmra.mxu1 %v5090_v48  ;;  %v8065_v0 = vpop.f32.mrf.mxu3  ;;  %v3584_v61 = vmul.f32 %v7904_v24, %v3572_v62  ;;  %v8076_v48 = vadd.f32 %v7824_v1, %v7864_v49  ;;  %v5942_v32 = vadd.f32 -1.0, %v6071_v3 }
 0x55c   :  { %6076 = vpow2.f32 %v2603_v4  ;;  %v5591_v20 = vadd.f32 %v5590_v30, %v7948_v59  ;;  %v6073_v9 = vpop.eup %6072  ;;  %v8079_v30 = vperm.slane %v7920_v40, 3 }
 0x55d   :  { %v2650_v19 = vmul.f32 %v2639_v26, %v9327_v11  ;;  %3601 = vadd.xlane.f32.xlu1 %v3586_v45  ;;  %v2551_v38 = vpop.xlane.xlu0 %2550  ;;  %v6075_v4 = vpop.eup %6074  ;;  %3597 = vadd.xlane.f32.xlu0 %v3584_v61  ;;  %v5925_v45 = vadd.f32 -1.0, %v6073_v9  ;;  %6078 = vpow2.f32 %v2018_v28  ;;  %v2629_v9 = vsel %vm2574_vm9, %v8019_v60, %v5942_v32 }
 0x55e   :  { %v5615_v41 = vmax.f32 %v5591_v20, 0.0  ;;  %v5078_v46 = vpop.f32.mrf.mxu0  ;;  %v8084_v62 = vadd.f32 %v7891_v52, %v2551_v38  ;;  %v5926_v27 = vadd.f32 -1.0, %v6075_v4  ;;  %v4112_v52 = vmul.f32 %v8079_v30, %v4100_v29 }
 0x55f   :  { %v2664_v23 = vsel %vm2124_vm4, %v2650_v19, 0.0  ;;  %v5079_v26 = vadd.f32 %v5078_v46, %v7845_v10  ;;  %v3835_v19 = vperm.slane %v7920_v40, 1  ;;  %v2007_v10 = vmin.f32 %v8076_v48, 0.0 }
 0x560   :  { %v8088_v49 = vadd.f32 %v2664_v23, %v8027_v13  ;;  %5668 = vmatmul.f32.gmra.mxu3 %v5615_v41  ;;  %v2587_v46 = vmin.f32 %v8084_v62, 0.0  ;;  %v3559_v13 = vadd.f32 %v7977_v36, %v7882_v21  ;;  %v8101_v40 = vadd.f32 %v7824_v1, %v7870_v53  ;;  %v8104_v28 = vpop.f32.mrf.mxu1 }
 0x561   :  { %v5091_v20 = vmax.f32 %v5079_v26, 0.0  ;;  %v5364_v4 = vperm.slane %v7941_v43, 0  ;;  %v3553_v36 = vadd.f32 %v7934_v25, %v7882_v21  ;;  %v9328_v29 = vmax.f32 %v7906_v58, 0.0 }
 0x562   :  { %v6077_v3 = vpop.eup %6076  ;;  %v2605_v41 = vmul.f32 1.442695, %v2587_v46  ;;  %v2047_v53 = vsel %vm1992_vm8, %v7994_v37, %v5925_v45  ;;  %v2020_v32 = vmul.f32 1.442695, %v2006_v35  ;;  %v2640_v26 = vadd.f32 1.0, %v2629_v9 }
 0x563   :  { %v5943_v61 = vadd.f32 -1.0, %v6077_v3  ;;  %v5593_v38 = vpop.f32.mrf.mxu2  ;;  %5156 = vmatmul.f32.gmra.mxu1 %v5091_v20  ;;  %v3836_v23 = vmul.f32 %v3835_v19, %v9328_v29  ;;  %v8116_v20 = vpop.f32.mrf.mxu3  ;;  %v2048_v3 = vsel %vm1993_vm11, %v8007_v8, %v5926_v27  ;;  %v8121_v25 = vadd.f32 %v7824_v1, %v7875_v12 }
 0x564   :  { %6080 = vpow2.f32 %v2605_v41  ;;  %v5594_v58 = vadd.f32 %v5593_v38, %v7948_v59  ;;  %v6079_v19 = vpop.eup %6078  ;;  %v2022_v46 = vmul.f32 1.442695, %v2007_v10  ;;  %v2008_v37 = vmin.f32 %v8101_v40, 0.0 }
 0x565   :  { %v2630_v60 = vsel %vm2575_vm10, %v8050_v56, %v5943_v61  ;;  %4123 = vadd.xlane.f32.xlu1 %v4112_v52  ;;  %v3577_v56 = vmax.f32 %v3559_v13, 0.0  ;;  %3837 = vadd.xlane.f32.xlu0 %v3836_v23  ;;  %v8125_v52 = vadd.f32 1.0, %v2047_v53  ;;  %v8129_v9 = vadd.f32 %v7824_v1, %v7917_v57  ;;  %v9329_v23 = vld [vmem:[#allocation31_spill] sm:$0xff] }
 0x566   :  { %v5382_v43 = vpop.f32.mrf.mxu0  ;;  %v2641_v35 = vadd.f32 1.0, %v2630_v60  ;;  %v3575_v8 = vmax.f32 %v3553_v36, 0.0  ;;  %v5616_v27 = vmax.f32 %v5594_v58, 0.0  ;;  %v8131_v12 = vadd.f32 1.0, %v2048_v3 }
 0x567   :  { %v5383_v45 = vadd.f32 %v5382_v43, %v5364_v4  ;;  %6082 = vpow2.f32 %v2020_v32  ;;  %v2651_v13 = vmul.f32 %v2640_v26, %v7321_v55  ;;  %v2009_v10 = vmin.f32 %v8121_v25, 0.0 }
 0x568   :  { %v8137_v38 = vadd.f32 %v7824_v1, %v7908_v5  ;;  %v4080_v41 = vadd.f32 %v8021_v63, %v8042_v18  ;;  %5671 = vmatmul.f32.gmra.mxu3 %v5616_v27  ;;  %v3589_v4 = vmul.f32 %v7904_v24, %v3577_v56  ;;  %v5927_v60 = vadd.f32 -1.0, %v6079_v19  ;;  %v8153_v56 = vpop.f32.mrf.mxu1 }
 0x569   :  { %v5385_v61 = vmax.f32 %v5383_v45, 0.0  ;;  %6084 = vpow2.f32 %v2022_v46  ;;  %v2024_v29 = vmul.f32 1.442695, %v2008_v37  ;;  %v2652_v53 = vmul.f32 %v2641_v35, %v9329_v23 }
 0x56a   :  { %v6081_v36 = vpop.eup %6080  ;;  %v2010_v32 = vmin.f32 %v8129_v9, 0.0  ;;  %v4071_v5 = vadd.f32 %v7945_v22, %v8042_v18  ;;  %v3587_v43 = vmul.f32 %v7904_v24, %v3575_v8  ;;  %v8149_v63 = vadd.f32 %v7824_v1, %v7938_v50 }
 0x56b   :  { %v5596_v57 = vpop.f32.mrf.mxu2  ;;  %5420 = vmatmul.f32.vlgmr.msra.gmra.mxu1 %v5385_v61  ;;  %v5944_v26 = vadd.f32 -1.0, %v6081_v36  ;;  %v2666_v3 = vsel %vm2124_vm4, %v2651_v13, 0.0  ;;  %vm2576_vm12 = vcmp.gt.f32.partialorder %v8084_v62, 0.0  ;;  %v2026_v19 = vmul.f32 1.442695, %v2009_v10  ;;  %v8163_v27 = vpop.f32.mrf.mxu3 }
 0x56c   :  { %v5597_v58 = vadd.f32 %v5596_v57, %v7948_v59  ;;  %v2011_v46 = vmin.f32 %v8137_v38, 0.0  ;;  %v4104_v22 = vmax.f32 %v4080_v41, 0.0  ;;  %v8160_v50 = vadd.f32 %v7824_v1, %v7961_v2  ;;  %v9330_v1 = vld [vmem:[#allocation27_spill] sm:$0xff] }
 0x56d   :  { %3607 = vadd.xlane.f32.xlu1 %v3589_v4  ;;  %v2631_v37 = vsel %vm2576_vm12, %v8084_v62, %v5944_v26  ;;  %3603 = vadd.xlane.f32.xlu0 %v3587_v43  ;;  %v6083_v35 = vpop.eup %6082  ;;  %v2668_v45 = vsel %vm2124_vm4, %v2652_v53, 0.0  ;;  %v2028_v61 = vmul.f32 1.442695, %v2010_v32  ;;  %v4101_v10 = vmax.f32 %v4071_v5, 0.0 }
 0x56e   :  { %v2642_v8 = vadd.f32 1.0, %v2631_v37  ;;  %v5617_v13 = vmax.f32 %v5597_v58, 0.0  ;;  %v2667_v41 = vadd.f32 %v2666_v3, %v8088_v49  ;;  %v2049_v62 = vsel %vm1994_vm13, %v8035_v7, %v5927_v60 }
 0x56f   :  { %v6085_v57 = vpop.eup %6084  ;;  %6086 = vpow2.f32 %v2024_v29  ;;  %v2012_v4 = vmin.f32 %v8149_v63, 0.0  ;;  %v4116_v36 = vmul.f32 %v8079_v30, %v4104_v22  ;;  %v3568_v26 = vadd.f32 %v8065_v0, %v7882_v21 }
 0x570   :  { %v2653_v2 = vmul.f32 %v2642_v8, %v9330_v1  ;;  %6088 = vpow2.f32 %v2026_v19  ;;  %v2669_v53 = vadd.f32 %v2668_v45, %v2667_v41  ;;  %5674 = vmatmul.f32.gmra.mxu3 %v5617_v13  ;;  %v2030_v5 = vmul.f32 1.442695, %v2011_v46  ;;  %v8185_v13 = vpop.f32.mrf.mxu1 }
 0x571   :  { %v2013_v49 = vmin.f32 %v8160_v50, 0.0  ;;  %6090 = vpow2.f32 %v2028_v61  ;;  %v4077_v60 = vadd.f32 %v7990_v47, %v8042_v18  ;;  %v4113_v3 = vmul.f32 %v8079_v30, %v4101_v10  ;;  %v8187_v10 = vld [vmem:[#allocation16 + $0x14] sm:$0xf] }
 0x572   :  { %v2670_v43 = vsel %vm2124_vm4, %v2653_v2, 0.0  ;;  %v2113_v0 = vmul.f32 %v7294_v6, %v8125_v52  ;;  %v5928_v58 = vadd.f32 -1.0, %v6083_v35  ;;  %v2060_v19 = vadd.f32 1.0, %v2049_v62 }
 0x573   :  { %v5599_v32 = vpop.f32.mrf.mxu2  ;;  %v8178_v29 = vadd.f32 %v2670_v43, %v2669_v53  ;;  %v2032_v46 = vmul.f32 1.442695, %v2012_v4  ;;  %v3580_v22 = vmax.f32 %v3568_v26, 0.0  ;;  %v2114_v8 = vmul.f32 %v9324_v33, %v8131_v12  ;;  %v8196_v2 = vpop.f32.mrf.mxu3 }
 0x574   :  { %v5600_v7 = vadd.f32 %v5599_v32, %v7948_v59  ;;  %6092 = vpow2.f32 %v2030_v5  ;;  %v2034_v47 = vmul.f32 1.442695, %v2013_v49  ;;  %v8190_v41 = vperm.slane %v8187_v10, 3 }
 0x575   :  { %4131 = vadd.xlane.f32.xlu1 %v4116_v36  ;;  %4125 = vadd.xlane.f32.xlu0 %v4113_v3  ;;  %v6087_v45 = vpop.eup %6086  ;;  %v5929_v52 = vadd.f32 -1.0, %v6085_v57  ;;  %v4103_v35 = vmax.f32 %v4077_v60, 0.0  ;;  %v2125_v62 = vsel %vm2124_vm4, %v2113_v0, 0.0  ;;  %v2050_v4 = vsel %vm1995_vm14, %v8070_v39, %v5928_v58 }
 0x576   :  { %v5618_v37 = vmax.f32 %v5600_v7, 0.0  ;;  %v6089_v61 = vpop.eup %6088  ;;  %v2115_v12 = vmul.f32 %v9325_v44, %v2060_v19  ;;  %6094 = vpow2.f32 %v2032_v46  ;;  %v5930_v53 = vadd.f32 -1.0, %v6087_v45 }
 0x577   :  { %v6091_v36 = vpop.eup %6090  ;;  %v4074_v26 = vadd.f32 %v7968_v54, %v8042_v18  ;;  %v3592_v32 = vmul.f32 %v7904_v24, %v3580_v22  ;;  %v4089_v57 = vadd.f32 %v8153_v56, %v8042_v18  ;;  %v2126_v49 = vsel %vm2124_vm4, %v2114_v8, 0.0 }
 0x578   :  { %5677 = vmatmul.f32.gmra.mxu3 %v5618_v37  ;;  %vm1996_vm15 = vcmp.gt.f32.partialorder %v8076_v48, 0.0  ;;  %6096 = vpow2.f32 %v2034_v47  ;;  %v5931_v7 = vadd.f32 -1.0, %v6089_v61  ;;  %v3562_v54 = vadd.f32 %v8003_v17, %v7882_v21 }
 0x579   :  { %v2051_v43 = vsel %vm1996_vm15, %v8076_v48, %v5929_v52  ;;  %v4115_v60 = vmul.f32 %v8079_v30, %v4103_v35  ;;  %v2061_v56 = vadd.f32 1.0, %v2050_v4  ;;  %v2128_v0 = vsel %vm2124_vm4, %v2115_v12, 0.0 }
 0x57a   :  { %v6093_v3 = vpop.eup %6092  ;;  %vm1997_vm0 = vcmp.gt.f32.partialorder %v8101_v40, 0.0  ;;  %v5932_v58 = vadd.f32 -1.0, %v6091_v36  ;;  %v4102_v46 = vmax.f32 %v4074_v26, 0.0  ;;  %v4107_v22 = vmax.f32 %v4089_v57, 0.0  ;;  %v8218_v36 = vpop.f32.mrf.mxu1 }
 0x57b   :  { %v5602_v5 = vpop.f32.mrf.mxu2  ;;  %v2052_v19 = vsel %vm1997_vm0, %v8101_v40, %v5930_v53  ;;  %v2127_v45 = vadd.f32 %v2126_v49, %v2125_v62  ;;  %v2062_v8 = vadd.f32 1.0, %v2051_v43  ;;  %vm1998_vm1 = vcmp.gt.f32.partialorder %v8121_v25, 0.0  ;;  %v8226_v49 = vpop.f32.mrf.mxu3 }
 0x57c   :  { %v5603_v39 = vadd.f32 %v5602_v5, %v7948_v59  ;;  %v6095_v48 = vpop.eup %6094  ;;  %v2053_v17 = vsel %vm1998_vm1, %v8121_v25, %v5931_v7  ;;  %vm1999_vm2 = vcmp.gt.f32.partialorder %v8129_v9, 0.0  ;;  %v5933_v47 = vadd.f32 -1.0, %v6093_v3 }
 0x57d   :  { %3613 = vadd.xlane.f32.xlu1 %v3592_v32  ;;  %4129 = vadd.xlane.f32.xlu0 %v4115_v60  ;;  %v3578_v61 = vmax.f32 %v3562_v54, 0.0  ;;  %v2116_v35 = vmul.f32 %v9326_v51, %v2061_v56  ;;  %v2129_v4 = vadd.f32 %v2128_v0, %v2127_v45  ;;  %v2063_v40 = vadd.f32 1.0, %v2052_v19  ;;  %v8232_v54 = vpop.xlane.xlu0 %3072 }
 0x57e   :  { %v5619_v37 = vmax.f32 %v5603_v39, 0.0  ;;  %v6097_v52 = vpop.eup %6096  ;;  %v2054_v12 = vsel %vm1999_vm2, %v8129_v9, %v5932_v58  ;;  %v5934_v53 = vadd.f32 -1.0, %v6095_v48  ;;  %v4114_v62 = vmul.f32 %v8079_v30, %v4102_v46  ;;  %v8239_v58 = vld [vmem:[#allocation18 + $0x14] sm:$0xf] }
 0x57f   :  { %v4119_v26 = vmul.f32 %v8079_v30, %v4107_v22  ;;  %v4598_v25 = vadd.f32 %v8163_v27, %v8190_v41  ;;  %v2117_v57 = vmul.f32 %v9327_v11, %v2062_v8  ;;  %v2064_v5 = vadd.f32 1.0, %v2053_v17  ;;  %v3069_v8 = vpop.xlane.xlu2 %3068 }
 0x580   :  { %5680 = vmatmul.f32.gmra.mxu3 %v5619_v37  ;;  %vm2000_vm3 = vcmp.gt.f32.partialorder %v8137_v38, 0.0  ;;  %v5935_v43 = vadd.f32 -1.0, %v6097_v52  ;;  %v4086_v7 = vadd.f32 %v8104_v28, %v8042_v18  ;;  %v3590_v27 = vmul.f32 %v7904_v24, %v3578_v61 }
 0x581   :  { %v2055_v39 = vsel %vm2000_vm3, %v8137_v38, %v5933_v47  ;;  %v2130_v60 = vsel %vm2124_vm4, %v2116_v35, 0.0  ;;  %v2118_v3 = vmul.f32 %v7321_v55, %v2063_v40  ;;  %v2065_v56 = vadd.f32 1.0, %v2054_v12 }
 0x582   :  { %vm2001_vm5 = vcmp.gt.f32.partialorder %v8149_v63, 0.0  ;;  %v4630_v38 = vmax.f32 %v4598_v25, 0.0  ;;  %v8242_v28 = vperm.slane %v8239_v58, 3  ;;  %v2132_v46 = vsel %vm2124_vm4, %v2117_v57, 0.0 }
 0x583   :  { %v5605_v32 = vpop.f32.mrf.mxu2  ;;  %4127 = vadd.xlane.f32.xlu2 %v4114_v62  ;;  %v2056_v0 = vsel %vm2001_vm5, %v8149_v63, %v5934_v53  ;;  %v2119_v22 = vmul.f32 %v9329_v23, %v2064_v5  ;;  %v2066_v37 = vadd.f32 1.0, %v2055_v39  ;;  %vm2002_vm6 = vcmp.gt.f32.partialorder %v8160_v50, 0.0 }
 0x584   :  { %v5606_v9 = vadd.f32 %v5605_v32, %v7948_v59  ;;  %v2131_v48 = vadd.f32 %v2130_v60, %v2129_v4  ;;  %v2057_v45 = vsel %vm2002_vm6, %v8160_v50, %v5935_v43  ;;  %v4106_v63 = vmax.f32 %v4086_v7, 0.0  ;;  %v8254_v50 = vpop.f32.mrf.mxu1  ;;  %v8265_v43 = vpop.f32.mrf.mxu3  ;;  %v9332_v60 = vld [vmem:[#allocation28_spill] sm:$0xff] }
 0x585   :  { %4137 = vadd.xlane.f32.xlu1 %v4119_v26  ;;  %3609 = vadd.xlane.f32.xlu0 %v3590_v27  ;;  %v4343_v17 = vperm.slane %v8187_v10, 1  ;;  %v2134_v47 = vsel %vm2124_vm4, %v2118_v3, 0.0  ;;  %v2120_v61 = vmul.f32 %v9330_v1, %v2065_v56  ;;  %v2067_v52 = vadd.f32 1.0, %v2056_v0  ;;  %v8261_v57 = vpop.xlane.xlu0 %2556  ;;  %v3071_v56 = vpop.xlane.xlu1 %3070 }
 0x586   :  { %v5620_v19 = vmax.f32 %v5606_v9, 0.0  ;;  %v2133_v35 = vadd.f32 %v2132_v46, %v2131_v48  ;;  %v4642_v40 = vmul.f32 %v8242_v28, %v4630_v38  ;;  %v2136_v53 = vsel %vm2124_vm4, %v2119_v22, 0.0  ;;  %v9331_v9 = vld [vmem:[#allocation32_spill] sm:$0xff] }
 0x587   :  { %v2121_v4 = vmul.f32 %v7334_v42, %v2066_v37  ;;  %v2068_v62 = vadd.f32 1.0, %v2057_v45  ;;  %v4118_v25 = vmul.f32 %v8079_v30, %v4106_v63  ;;  %v8259_v32 = vadd.f32 %v8116_v20, %v4343_v17 }
 0x588   :  { %5683 = vmatmul.f32.gmra.mxu3 %v5620_v19  ;;  %v2135_v10 = vadd.f32 %v2134_v47, %v2133_v35  ;;  %v2138_v5 = vsel %vm2124_vm4, %v2120_v61, 0.0  ;;  %v2122_v39 = vmul.f32 %v9331_v9, %v2067_v52  ;;  %v4373_v38 = vperm.slane %v8239_v58, 2  ;;  %v8271_v19 = vpop.xlane.xlu2 %2552 }
 0x589   :  { %v2123_v3 = vmul.f32 %v9332_v60, %v2068_v62  ;;  %v9288_v20 = vmax.f32 %v8259_v32, 0.0  ;;  %v4095_v63 = vadd.f32 %v8218_v36, %v8042_v18  ;;  %v8291_v62 = vadd.f32 %v8047_v16, %v8039_v14 }
 0x58a   :  { %v2137_v7 = vadd.f32 %v2136_v53, %v2135_v10  ;;  %v2142_v46 = vsel %vm2124_vm4, %v2122_v39, 0.0  ;;  %v4604_v10 = vadd.f32 %v8226_v49, %v8190_v41  ;;  %v8309_v49 = vadd.f32 %v8047_v16, %v8232_v54 }
 0x58b   :  { %v5608_v12 = vpop.f32.mrf.mxu2  ;;  %v2144_v37 = vsel %vm2124_vm4, %v2123_v3, 0.0  ;;  %v4374_v45 = vmul.f32 %v4373_v38, %v9288_v20  ;;  %v3110_v14 = vmin.f32 %v8291_v62, 0.0  ;;  %vm3099_vm8 = vcmp.gt.f32.partialorder %v8291_v62, 0.0 }
 0x58c   :  { %v5609_v26 = vadd.f32 %v5608_v12, %v7948_v59  ;;  %v2140_v59 = vsel %vm2124_vm4, %v2121_v4, 0.0  ;;  %v2139_v0 = vadd.f32 %v2138_v5, %v2137_v7  ;;  %v8279_v17 = vpop.f32.mrf.mxu1  ;;  %v8283_v35 = vpop.f32.mrf.mxu3  ;;  %v4109_v12 = vmax.f32 %v4095_v63, 0.0 }
 0x58d   :  { %4653 = vadd.xlane.f32.xlu1 %v4642_v40  ;;  %4135 = vadd.xlane.f32.xlu0 %v4118_v25  ;;  %9333 = vst [vmem:[#allocation39_spill] sm:$0xff] %v8279_v17  ;;  %v3079_v47 = vpop.xlane.xlu0 %3078  ;;  %v8281_v52 = vpop.permute.xlu1 %2159  ;;  %v8286_v40 = vadd.f32 %v8047_v16, %v3069_v8  ;;  %v8299_v8 = vadd.f32 %v8047_v16, %v3071_v56  ;;  %v4632_v39 = vmax.f32 %v4604_v10, 0.0  ;;  %vm3102_vm10 = vcmp.gt.f32.partialorder %v8309_v49, 0.0 }
 0x58e   :  { %v5621_v27 = vmax.f32 %v5609_v26, 0.0  ;;  %v2141_v22 = vadd.f32 %v2140_v59, %v2139_v0  ;;  %9334 = vst [vmem:[#allocation25_spill] sm:$0xff] %v8281_v52  ;;  %v4121_v26 = vmul.f32 %v8079_v30, %v4109_v12  ;;  %v8314_v59 = vld [vmem:[%s9273_s12 + $0x3] ss:$0 sm:$0xff] }
 0x58f   :  { %v3111_v36 = vmin.f32 %v8286_v40, 0.0  ;;  %vm3100_vm7 = vcmp.gt.f32.partialorder %v8286_v40, 0.0  ;;  %vm3101_vm9 = vcmp.gt.f32.partialorder %v8299_v8, 0.0 }
 0x590   :  { %5686 = vmatmul.f32.gmra.mxu3 %v5621_v27  ;;  %v2143_v48 = vadd.f32 %v2142_v46, %v2141_v22  ;;  %v3075_v53 = vpop.xlane.xlu2 %3074  ;;  %v3112_v27 = vmin.f32 %v8299_v8, 0.0  ;;  %v3121_v46 = vmul.f32 1.442695, %v3110_v14  ;;  %v4644_v22 = vmul.f32 %v8242_v28, %v4632_v39 }
 0x591   :  { %v3123_v5 = vmul.f32 1.442695, %v3111_v36  ;;  %v8319_v0 = vadd.f32 %v8047_v16, %v3075_v53  ;;  %v8336_v14 = vadd.f32 %v8047_v16, %v3079_v47 }
 0x592   :  { %v2145_v61 = vadd.f32 %v2144_v37, %v2143_v48  ;;  %v3125_v37 = vmul.f32 1.442695, %v3112_v27  ;;  %v3113_v48 = vmin.f32 %v8309_v49, 0.0 }
 0x593   :  { %6098 = vpow2.f32 %v3123_v5  ;;  %vm3103_vm11 = vcmp.gt.f32.partialorder %v8319_v0, 0.0  ;;  %vm3105_vm13 = vcmp.gt.f32.partialorder %v8336_v14, 0.0 }
 0x594   :  { %v2151_v4 = vmul.f32 %v7347_v34, %v2145_v61  ;;  %v8301_v25 = vpop.f32.mrf.mxu1  ;;  %v4612_v3 = vpop.f32.mrf.mxu3  ;;  %6100 = vpow2.f32 %v3121_v46  ;;  %v3127_v53 = vmul.f32 1.442695, %v3113_v48 }
 0x595   :  { %4375 = vadd.xlane.f32.xlu0 %v4374_v45  ;;  %v3308_v7 = vpop.xlane.xlu0 %3307  ;;  %v4613_v54 = vadd.f32 %v4612_v3, %v8190_v41  ;;  %v3114_v45 = vmin.f32 %v8319_v0, 0.0  ;;  %6102 = vpow2.f32 %v3125_v37 }
 0x596   :  { %v3312_v38 = vadd.f32 %v8314_v59, %v3308_v7  ;;  %6104 = vpow2.f32 %v3127_v53 }
 0x597   :  { %v4635_v61 = vmax.f32 %v4613_v54, 0.0  ;;  %v3129_v39 = vmul.f32 1.442695, %v3114_v45 }
 0x598   :  { %v8316_v56 = vpop.xlane.xlu2 %3315 }
 0x599   :  { %9335 = vst [vmem:[#allocation30_spill] sm:$0xff] %v8316_v56  ;;  %v6099_v36 = vpop.eup %6098  ;;  %v4647_v27 = vmul.f32 %v8242_v28, %v4635_v61  ;;  %6106 = vpow2.f32 %v3129_v39 }
 0x59a   :  { %v6101_v46 = vpop.eup %6100 }
 0x59b   :  { %2153 = vrot.lane.b32.xlu2 %v2151_v4, %s6576_s14  ;;  %v6103_v37 = vpop.eup %6102  ;;  %v5949_v61 = vadd.f32 -1.0, %v6101_v46 }
 0x59c   :  { %v5130_v4 = vpop.f32.mrf.mxu1 }
 0x59d   :  { %4141 = vadd.xlane.f32.xlu0 %v4121_v26  ;;  %v8330_v26 = vld [vmem:[#allocation16 + $0x18] sm:$0xf]  ;;  %v3085_v46 = vpop.xlane.xlu0 %3084 }
 0x59e   :  { %9336 = vst [vmem:[#allocation26_spill] sm:$0xff] %v8330_v26  ;;  %v8333_v10 = vperm.slane %v8330_v26, 3  ;;  %v8377_v56 = vadd.f32 %v8047_v16, %v3085_v46 }
 0x5a0   :  { %v8303_v34 = vpop.xlane.xlu1 %2554  ;;  %v3081_v7 = vpop.xlane.xlu2 %3080  ;;  %v5131_v3 = vadd.f32 %v5130_v4, %v8333_v10  ;;  %v8353_v4 = vld [vmem:[%s9273_s12 + $0x1] ss:$0 sm:$0xff]  ;;  %vm3108_vm2 = vcmp.gt.f32.partialorder %v8377_v56, 0.0 }
 0x5a1   :  { %v8343_v47 = vadd.f32 %v8047_v16, %v3081_v7  ;;  %9337 = vst [vmem:[#allocation31_spill] sm:$0xff] %v8353_v4  ;;  %v8359_v7 = vld [vmem:[#allocation18 + $0x18] sm:$0xf] }
 0x5a2   :  { %v5161_v45 = vmax.f32 %v5131_v3, 0.0  ;;  %9338 = vst [vmem:[#allocation27_spill] sm:$0xff] %v8359_v7  ;;  %v6105_v3 = vpop.eup %6104 }
 0x5a3   :  { %vm3106_vm14 = vcmp.gt.f32.partialorder %v8343_v47, 0.0 }
 0x5a5   :  { %4657 = vadd.xlane.f32.xlu0 %v4644_v22  ;;  %v3116_v22 = vmin.f32 %v8336_v14, 0.0 }
 0x5a6   :  { %3746 = vrot.lane.b32.xlu1 %v3312_v38, %s6578_s24  ;;  %v5950_v38 = vadd.f32 -1.0, %v6099_v36  ;;  %v8357_v36 = vadd.f32 %v8353_v4, %v8271_v19 }
 0x5a7   :  { %v3133_v39 = vmul.f32 1.442695, %v3116_v22 }
 0x5a8   :  { %v3077_v63 = vpop.xlane.xlu1 %3076  ;;  %v3155_v53 = vsel %vm3100_vm7, %v8286_v40, %v5950_v38  ;;  %v8366_v40 = vadd.f32 %v8029_v31, %v7882_v21  ;;  %v3117_v38 = vmin.f32 %v8343_v47, 0.0  ;;  %v5952_v31 = vadd.f32 -1.0, %v6105_v3 }
 0x5a9   :  { %v8328_v12 = vadd.f32 %v8047_v16, %v3077_v63  ;;  %v3166_v20 = vadd.f32 1.0, %v3155_v53  ;;  %vm2577_vm1 = vcmp.gt.f32.partialorder %v8357_v36, 0.0 }
 0x5aa   :  { %v3135_v52 = vmul.f32 1.442695, %v3117_v38  ;;  %v3119_v38 = vmin.f32 %v8377_v56, 0.0 }
 0x5ab   :  { %v3115_v5 = vmin.f32 %v8328_v12, 0.0  ;;  %vm3104_vm12 = vcmp.gt.f32.partialorder %v8328_v12, 0.0 }
 0x5ad   :  { %v3131_v54 = vmul.f32 1.442695, %v3115_v5  ;;  %4663 = vadd.xlane.f32.xlu0 %v4647_v27  ;;  %v5951_v5 = vadd.f32 -1.0, %v6103_v37  ;;  %v8362_v27 = vperm.slane %v8359_v7, 3  ;;  %v6107_v37 = vpop.eup %6106  ;;  %v8382_v7 = vadd.f32 %v8353_v4, %v8303_v34 }
 0x5ae   :  { %v5953_v17 = vadd.f32 -1.0, %v6107_v37  ;;  %v8392_v34 = vadd.f32 %v8353_v4, %v8261_v57 }
 0x5af   :  { %6108 = vpow2.f32 %v3131_v54  ;;  %v5173_v19 = vmul.f32 %v8362_v27, %v5161_v45  ;;  %v2588_v54 = vmin.f32 %v8357_v36, 0.0  ;;  %v3156_v21 = vsel %vm3101_vm9, %v8299_v8, %v5951_v5 }
 0x5b0   :  { %v3594_v48 = vpop.xlane.xlu1 %3593  ;;  %6110 = vpow2.f32 %v3133_v39  ;;  %v3579_v45 = vmax.f32 %v8366_v40, 0.0  ;;  %v3177_v5 = vmul.f32 %v3166_v20, %v9324_v33  ;;  %v3167_v39 = vadd.f32 1.0, %v3156_v21 }
 0x5b1   :  { %v8347_v63 = vadd.f32 %v8314_v59, %v3594_v48  ;;  %v3154_v48 = vsel %vm3099_vm8, %v8291_v62, %v5949_v61  ;;  %v2607_v3 = vmul.f32 1.442695, %v2588_v54  ;;  %v3157_v40 = vsel %vm3102_vm10, %v8309_v49, %v5952_v31 }
 0x5b2   :  { %v3165_v53 = vadd.f32 1.0, %v3154_v48  ;;  %6112 = vpow2.f32 %v3135_v52  ;;  %v3158_v48 = vsel %vm3103_vm11, %v8319_v0, %v5953_v17  ;;  %v3188_v57 = vsel %vm2124_vm4, %v3177_v5, 0.0  ;;  %v8403_v52 = vpop.f32.mrf.mxu3 }
 0x5b3   :  { %v3637_v22 = vmin.f32 %v8347_v63, 0.0  ;;  %v3178_v54 = vmul.f32 %v3167_v39, %v9325_v44  ;;  %v3168_v21 = vadd.f32 1.0, %v3157_v40  ;;  %v2590_v31 = vmin.f32 %v8392_v34, 0.0 }
 0x5b4   :  { %v3176_v37 = vmul.f32 %v3165_v53, %v7294_v6  ;;  %v4083_v5 = vadd.f32 %v8061_v15, %v8042_v18  ;;  %vm3626_vm15 = vcmp.gt.f32.partialorder %v8347_v63, 0.0  ;;  %vm2578_vm5 = vcmp.gt.f32.partialorder %v8382_v7, 0.0 }
 0x5b5   :  { %5185 = vadd.xlane.f32.xlu0 %v5173_v19  ;;  %v6109_v61 = vpop.eup %6108  ;;  %v3648_v26 = vmul.f32 1.442695, %v3637_v22  ;;  %v2589_v19 = vmin.f32 %v8382_v7, 0.0  ;;  %vm2579_vm6 = vcmp.gt.f32.partialorder %v8392_v34, 0.0 }
 0x5b6   :  { %v5954_v20 = vadd.f32 -1.0, %v6109_v61  ;;  %v6111_v22 = vpop.eup %6110  ;;  %v3169_v61 = vadd.f32 1.0, %v3158_v48  ;;  %v2611_v48 = vmul.f32 1.442695, %v2590_v31  ;;  %v8424_v31 = vpop.f32.mrf.mxu1 }
 0x5b7   :  { %6114 = vpow2.f32 %v3648_v26  ;;  %v5955_v53 = vadd.f32 -1.0, %v6111_v22  ;;  %v2609_v4 = vmul.f32 1.442695, %v2589_v19  ;;  %v3187_v26 = vsel %vm2124_vm4, %v3176_v37, 0.0 }
 0x5b8   :  { %v3083_v62 = vpop.xlane.xlu1 %3082  ;;  %6116 = vpow2.f32 %v2607_v3  ;;  %v3159_v17 = vsel %vm3104_vm12, %v8328_v12, %v5954_v20  ;;  %v6113_v3 = vpop.eup %6112  ;;  %v3189_v40 = vadd.f32 %v3188_v57, %v3187_v26  ;;  %v3591_v22 = vmul.f32 %v7904_v24, %v3579_v45 }
 0x5b9   :  { %v8385_v8 = vadd.f32 %v8047_v16, %v3083_v62  ;;  %v3139_v62 = vmul.f32 1.442695, %v3119_v38  ;;  %v3190_v38 = vsel %vm2124_vm4, %v3178_v54, 0.0  ;;  %v3170_v12 = vadd.f32 1.0, %v3159_v17 }
 0x5ba   :  { %v3180_v15 = vmul.f32 %v3169_v61, %v9327_v11  ;;  %v4105_v54 = vmax.f32 %v4083_v5, 0.0  ;;  %v3191_v45 = vadd.f32 %v3190_v38, %v3189_v40  ;;  %v8430_v40 = vpop.f32.mrf.mxu3 }
 0x5bb   :  { %v3118_v46 = vmin.f32 %v8385_v8, 0.0  ;;  %vm3107_vm0 = vcmp.gt.f32.partialorder %v8385_v8, 0.0 }
 0x5bd   :  { %v3137_v49 = vmul.f32 1.442695, %v3118_v46  ;;  %v3179_v46 = vmul.f32 %v3168_v21, %v9326_v51  ;;  %v6115_v19 = vpop.eup %6114  ;;  %v4365_v21 = vperm.slane %v8239_v58, 1 }
 0x5be   :  { %v6117_v37 = vpop.eup %6116  ;;  %v5961_v17 = vadd.f32 -1.0, %v6115_v19 }
 0x5bf   :  { %6118 = vpow2.f32 %v3137_v49  ;;  %v3160_v49 = vsel %vm3105_vm13, %v8336_v14, %v5955_v53  ;;  %v3192_v51 = vsel %vm2124_vm4, %v3179_v46, 0.0  ;;  %v3181_v14 = vmul.f32 %v3170_v12, %v7321_v55 }
 0x5c0   :  { %v3596_v0 = vpop.xlane.xlu1 %3595  ;;  %6120 = vpow2.f32 %v3139_v62  ;;  %v4098_v62 = vadd.f32 %v8254_v50, %v8042_v18  ;;  %v3171_v61 = vadd.f32 1.0, %v3160_v49  ;;  %v3194_v53 = vsel %vm2124_vm4, %v3180_v15, 0.0 }
 0x5c1   :  { %v8411_v39 = vadd.f32 %v8314_v59, %v3596_v0  ;;  %6122 = vpow2.f32 %v2609_v4  ;;  %v5956_v0 = vadd.f32 -1.0, %v6113_v3  ;;  %v5945_v4 = vadd.f32 -1.0, %v6117_v37 }
 0x5c2   :  { %v4110_v19 = vmax.f32 %v4098_v62, 0.0  ;;  %v3681_v12 = vsel %vm3626_vm15, %v8347_v63, %v5961_v17  ;;  %v4117_v37 = vmul.f32 %v8079_v30, %v4105_v54  ;;  %v3196_v15 = vsel %vm2124_vm4, %v3181_v14, 0.0 }
 0x5c3   :  { %v3638_v20 = vmin.f32 %v8411_v39, 0.0  ;;  %v3161_v50 = vsel %vm3106_vm14, %v8343_v47, %v5956_v0  ;;  %v3182_v47 = vmul.f32 %v3171_v61, %v9329_v23  ;;  %vm3627_vm3 = vcmp.gt.f32.partialorder %v8411_v39, 0.0 }
 0x5c4   :  { %3611 = vadd.xlane.f32.xlu2 %v3591_v22  ;;  %v3193_v22 = vadd.f32 %v3192_v51, %v3191_v45  ;;  %v4122_v54 = vmul.f32 %v8079_v30, %v4110_v19 }
 0x5c5   :  { %v6119_v57 = vpop.eup %6118  ;;  %v3650_v24 = vmul.f32 1.442695, %v3638_v20  ;;  %v3198_v61 = vsel %vm2124_vm4, %v3182_v47, 0.0  ;;  %v4092_v47 = vadd.f32 %v8185_v13, %v8042_v18 }
 0x5c6   :  { %v5957_v26 = vadd.f32 -1.0, %v6119_v57  ;;  %v6121_v3 = vpop.eup %6120  ;;  %v3195_v49 = vadd.f32 %v3194_v53, %v3193_v22 }
 0x5c7   :  { %6124 = vpow2.f32 %v3650_v24  ;;  %v6123_v46 = vpop.eup %6122  ;;  %v5958_v57 = vadd.f32 -1.0, %v6121_v3  ;;  %v3692_v24 = vadd.f32 1.0, %v3681_v12 }
 0x5c8   :  { %6126 = vpow2.f32 %v2611_v48  ;;  %v3087_v5 = vpop.xlane.xlu1 %3086  ;;  %v3162_v20 = vsel %vm3107_vm0, %v8385_v8, %v5957_v26  ;;  %v5946_v51 = vadd.f32 -1.0, %v6123_v46  ;;  %v2632_v8 = vsel %vm2577_vm1, %v8357_v36, %v5945_v4 }
 0x5c9   :  { %v8435_v38 = vadd.f32 %v8047_v16, %v3087_v5  ;;  %v3172_v16 = vadd.f32 1.0, %v3161_v50  ;;  %v3173_v45 = vadd.f32 1.0, %v3162_v20  ;;  %v3197_v17 = vadd.f32 %v3196_v15, %v3195_v49  ;;  %v8454_v5 = vpop.f32.mrf.mxu1  ;;  %v8468_v15 = vpop.xlane.xlu2 %3599 }
 0x5ca   :  { %v3163_v53 = vsel %vm3108_vm2, %v8377_v56, %v5958_v57  ;;  %v2633_v4 = vsel %vm2578_vm5, %v8382_v7, %v5946_v51  ;;  %v3703_v3 = vmul.f32 %v3692_v24, %v7294_v6  ;;  %v2643_v22 = vadd.f32 1.0, %v2632_v8 }
 0x5cb   :  { %v3120_v48 = vmin.f32 %v8435_v38, 0.0  ;;  %v3183_v14 = vmul.f32 %v3172_v16, %v9330_v1  ;;  %v3184_v50 = vmul.f32 %v3173_v45, %v7334_v42  ;;  %v3199_v19 = vadd.f32 %v3198_v61, %v3197_v17 }
 0x5cc   :  { %4133 = vadd.xlane.f32.xlu2 %v4117_v37  ;;  %v3174_v20 = vadd.f32 1.0, %v3163_v53  ;;  %v8458_v37 = vpop.f32.mrf.mxu3  ;;  %v3714_v57 = vsel %vm2124_vm4, %v3703_v3, 0.0  ;;  %v2654_v58 = vmul.f32 %v2643_v22, %v7334_v42  ;;  %vm3109_vm7 = vcmp.gt.f32.partialorder %v8435_v38, 0.0 }
 0x5cd   :  { %v6125_v0 = vpop.eup %6124  ;;  %v3141_v63 = vmul.f32 1.442695, %v3120_v48  ;;  %v2644_v48 = vadd.f32 1.0, %v2633_v4  ;;  %v3200_v16 = vsel %vm2124_vm4, %v3183_v14, 0.0  ;;  %v4601_v4 = vadd.f32 %v8196_v2, %v8190_v41  ;;  %v9341_v2 = vld [vmem:[#allocation29_spill] sm:$0xff] }
 0x5ce   :  { %v6127_v62 = vpop.eup %6126  ;;  %v5962_v26 = vadd.f32 -1.0, %v6125_v0  ;;  %v3202_v0 = vsel %vm2124_vm4, %v3184_v50, 0.0  ;;  %v3201_v51 = vadd.f32 %v3200_v16, %v3199_v19  ;;  %v3185_v45 = vmul.f32 %v3174_v20, %v9331_v9 }
 0x5cf   :  { %6128 = vpow2.f32 %v3141_v63  ;;  %v5947_v12 = vadd.f32 -1.0, %v6127_v62  ;;  %v4108_v63 = vmax.f32 %v4092_v47, 0.0  ;;  %v2655_v62 = vmul.f32 %v2644_v48, %v9331_v9 }
 0x5d0   :  { %v3682_v36 = vsel %vm3627_vm3, %v8411_v39, %v5962_v26  ;;  %4143 = vadd.xlane.f32.xlu1 %v4122_v54  ;;  %v9339_v39 = vmax.f32 %v8259_v32, 0.0  ;;  %v3203_v8 = vadd.f32 %v3202_v0, %v3201_v51  ;;  %v2672_v26 = vsel %vm2124_vm4, %v2654_v58, 0.0 }
 0x5d1   :  { %v3693_v46 = vadd.f32 1.0, %v3682_v36  ;;  %v2634_v24 = vsel %vm2579_vm6, %v8392_v34, %v5947_v12  ;;  %v3204_v14 = vsel %vm2124_vm4, %v3185_v45, 0.0  ;;  %v8486_v53 = vpop.f32.mrf.mxu1  ;;  %v4120_v36 = vmul.f32 %v8079_v30, %v4108_v63  ;;  %v8498_v12 = vpop.xlane.xlu2 %3845 }
 0x5d2   :  { %v4366_v7 = vmul.f32 %v4365_v21, %v9339_v39  ;;  %v8475_v21 = vpop.permute.xlu0 %2689  ;;  %v2645_v61 = vadd.f32 1.0, %v2634_v24  ;;  %v2674_v3 = vsel %vm2124_vm4, %v2655_v62, 0.0  ;;  %v3205_v50 = vadd.f32 %v3204_v14, %v3203_v8  ;;  %9340 = vst [vmem:[#allocation32_spill] sm:$0xff] %v8498_v12 }
 0x5d3   :  { %v3704_v56 = vmul.f32 %v3693_v46, %v9324_v33  ;;  %v4631_v39 = vmax.f32 %v4601_v4, 0.0  ;;  %v4616_v45 = vadd.f32 %v8403_v52, %v8190_v41  ;;  %v5134_v52 = vadd.f32 %v8424_v31, %v8333_v10 }
 0x5d4   :  { %4367 = vadd.xlane.f32.xlu2 %v4366_v7  ;;  %v8494_v46 = vpop.f32.mrf.mxu3  ;;  %v2656_v19 = vmul.f32 %v2645_v61, %v9332_v60 }
 0x5d5   :  { %v6129_v49 = vpop.eup %6128  ;;  %v3715_v32 = vsel %vm2124_vm4, %v3704_v56, 0.0  ;;  %v4643_v48 = vmul.f32 %v8242_v28, %v4631_v39  ;;  %v4636_v63 = vmax.f32 %v4616_v45, 0.0  ;;  %v5162_v4 = vmax.f32 %v5134_v52, 0.0  ;;  %v8560_v45 = vld [vmem:[#allocation18 + $0x1c] sm:$0xf] }
 0x5d6   :  { %v8477_v18 = vadd.f32 %v3715_v32, %v3714_v57  ;;  %v5959_v13 = vadd.f32 -1.0, %v6129_v49  ;;  %v2676_v47 = vsel %vm2124_vm4, %v2656_v19, 0.0  ;;  %v4607_v49 = vadd.f32 %v8265_v43, %v8190_v41  ;;  %v9342_v32 = vld [vmem:[#allocation33_spill] sm:$0xff]  ;;  %9347 = vst [vmem:[#allocation41_spill] sm:$0xff] %v8560_v45 }
 0x5d7   :  { %v4648_v14 = vmul.f32 %v8242_v28, %v4636_v63  ;;  %v4619_v19 = vadd.f32 %v8430_v40, %v8190_v41  ;;  %v8563_v63 = vperm.slane %v8560_v45, 3  ;;  %v9349_v45 = vld [vmem:[#allocation26_spill] sm:$0xff] }
 0x5d8   :  { %v3164_v54 = vsel %vm3109_vm7, %v8435_v38, %v5959_v13  ;;  %v2673_v38 = vadd.f32 %v2672_v26, %v8178_v29  ;;  %v4633_v51 = vmax.f32 %v4607_v49, 0.0 }
 0x5d9   :  { %v3175_v17 = vadd.f32 1.0, %v3164_v54  ;;  %v8508_v16 = vpop.f32.mrf.mxu1  ;;  %v8510_v57 = vpop.xlane.xlu2 %3605  ;;  %v6274_v54 = vld [vmem:[%s9273_s12] ss:$0 sm:$0xff] }
 0x5da   :  { %v8500_v20 = vpop.xlane.xlu0 %3597  ;;  %v2675_v56 = vadd.f32 %v2674_v3, %v2673_v38  ;;  %v4645_v24 = vmul.f32 %v8242_v28, %v4633_v51 }
 0x5db   :  { %v3186_v34 = vmul.f32 %v3175_v17, %v9332_v60  ;;  %v9344_v17 = vld [vmem:[#allocation35_spill] sm:$0xff] }
 0x5dc   :  { %4139 = vadd.xlane.f32.xlu2 %v4120_v36  ;;  %v2677_v29 = vadd.f32 %v2676_v47, %v2675_v56  ;;  %v8512_v0 = vpop.f32.mrf.mxu3  ;;  %v1664_v26 = vadd.f32 %v6274_v54, %v9344_v17  ;;  %v3602_v36 = vpop.xlane.xlu1 %3601  ;;  %v8545_v56 = vld [vmem:[#allocation16 + $0x1c] sm:$0xf] }
 0x5dd   :  { %v3206_v22 = vsel %vm2124_vm4, %v3186_v34, 0.0  ;;  %9345 = vst [vmem:[#allocation33_spill] sm:$0xff] %v8545_v56  ;;  %v8548_v31 = vperm.slane %v8545_v56, 3  ;;  %v9351_v56 = vld [vmem:[#allocation31_spill] sm:$0xff] }
 0x5de   :  { %v3207_v30 = vadd.f32 %v3206_v22, %v3205_v50  ;;  %v2681_v58 = vmul.f32 %v9342_v32, %v2677_v29  ;;  %v1665_v34 = vmul.f32 1.442695, %v1664_v26  ;;  %v5174_v22 = vmul.f32 %v8362_v27, %v5162_v4 }
 0x5e0   :  { %v3208_v7 = vmul.f32 %v3207_v30, %v9341_v2  ;;  %6130 = vpow2.f32 %v1665_v34  ;;  %v4625_v34 = vadd.f32 %v8494_v46, %v8190_v41  ;;  %v8583_v46 = vadd.f32 %v8314_v59, %v8468_v15 }
 0x5e1   :  { %v8521_v43 = vpop.f32.mrf.mxu1  ;;  %v8523_v62 = vpop.permute.xlu2 %3216 }
 0x5e2   :  { %3210 = vrot.lane.b32.xlu0 %v3208_v7, %s6576_s14  ;;  %v8515_v13 = vpop.xlane.xlu0 %3837  ;;  %9343 = vst [vmem:[#allocation28_spill] sm:$0xff] %v8523_v62  ;;  %v4637_v7 = vmax.f32 %v4619_v19, 0.0  ;;  %vm3629_vm9 = vcmp.gt.f32.partialorder %v8583_v46, 0.0  ;;  %v9355_v62 = vld [vmem:[#allocation38_spill] sm:$0xff] }
 0x5e4   :  { %4655 = vadd.xlane.f32.xlu2 %v4643_v48  ;;  %v5657_v8 = vpop.f32.mrf.mxu3  ;;  %v8550_v29 = vpop.xlane.xlu1 %4123  ;;  %v4649_v40 = vmul.f32 %v8242_v28, %v4637_v7  ;;  %v4639_v7 = vmax.f32 %v4625_v34, 0.0 }
 0x5e5   :  { %v5658_v49 = vadd.f32 %v5657_v8, %v8548_v31  ;;  %v4610_v8 = vadd.f32 %v8283_v35, %v8190_v41 }
 0x5e6   :  { %v6131_v39 = vpop.eup %6130 }
 0x5e7   :  { %v4634_v4 = vmax.f32 %v4610_v8, 0.0 }
 0x5e9   :  { %2683 = vrot.lane.b32.xlu1 %v2681_v58, %s6576_s14  ;;  %v8536_v50 = vpop.f32.mrf.mxu1  ;;  %v4622_v58 = vadd.f32 %v8458_v37, %v8190_v41 }
 0x5ea   :  { %v8529_v61 = vpop.xlane.xlu0 %3603 }
 0x5eb   :  { %v4638_v17 = vmax.f32 %v4622_v58, 0.0 }
 0x5ec   :  { %4659 = vadd.xlane.f32.xlu2 %v4645_v24  ;;  %v8538_v38 = vpop.f32.mrf.mxu3  ;;  %v5690_v24 = vmax.f32 %v5658_v49, 0.0  ;;  %v3608_v52 = vpop.xlane.xlu1 %3607  ;;  %v4646_v49 = vmul.f32 %v8242_v28, %v4634_v4 }
 0x5ed   :  { %v4650_v37 = vmul.f32 %v8242_v28, %v4638_v17  ;;  %v4628_v17 = vadd.f32 %v8512_v0, %v8190_v41 }
 0x5ee   :  { %v5702_v26 = vmul.f32 %v8563_v63, %v5690_v24 }
 0x5ef   :  { %v4640_v4 = vmax.f32 %v4628_v17, 0.0 }
 0x5f1   :  { %v8555_v32 = vpop.f32.mrf.mxu1 }
 0x5f2   :  { %v8543_v30 = vpop.xlane.xlu0 %4125  ;;  %9346 = vst [vmem:[#allocation35_spill] sm:$0xff] %v8555_v32 }
 0x5f4   :  { %4665 = vadd.xlane.f32.xlu2 %v4648_v14  ;;  %v5663_v51 = vpop.f32.mrf.mxu3 }
 0x5f5   :  { %v5664_v14 = vadd.f32 %v5663_v51, %v8548_v31 }
 0x5f6   :  { %v8534_v3 = vpop.xlane.xlu2 %4127 }
 0x5f7   :  { %v5692_v19 = vmax.f32 %v5664_v14, 0.0 }
 0x5f9   :  { %v5704_v58 = vmul.f32 %v8563_v63, %v5692_v19  ;;  %v8599_v19 = vadd.f32 %v8314_v59, %v8529_v61  ;;  %v4652_v61 = vmul.f32 %v8242_v28, %v4640_v4 }
 0x5fa   :  { %v8565_v54 = vpop.xlane.xlu0 %4129 }
 0x5fb   :  { %vm3631_vm11 = vcmp.gt.f32.partialorder %v8599_v19, 0.0 }
 0x5fc   :  { %5187 = vadd.xlane.f32.xlu2 %v5174_v22  ;;  %v5154_v22 = vpop.f32.mrf.mxu1  ;;  %v5666_v35 = vpop.f32.mrf.mxu3 }
 0x5fd   :  { %v5667_v51 = vadd.f32 %v5666_v35, %v8548_v31 }
 0x5fe   :  { %v2154_v47 = vpop.permute.xlu2 %2153 }
 0x5ff   :  { %v8552_v48 = vmul.f32 %v6131_v39, %v2154_v47  ;;  %v8576_v39 = vadd.f32 %v8314_v59, %v8500_v20  ;;  %v4651_v20 = vmul.f32 %v8242_v28, %v4639_v7  ;;  %v5693_v15 = vmax.f32 %v5667_v51, 0.0 }
 0x600   :  { %v5661_v51 = vadd.f32 %v8538_v38, %v8548_v31 }
 0x601   :  { %v3639_v24 = vmin.f32 %v8576_v39, 0.0  ;;  %v5705_v35 = vmul.f32 %v8563_v63, %v5693_v15  ;;  %vm3628_vm8 = vcmp.gt.f32.partialorder %v8576_v39, 0.0 }
 0x602   :  { %v3610_v47 = vpop.xlane.xlu0 %3609  ;;  %v5691_v15 = vmax.f32 %v5661_v51, 0.0 }
 0x603   :  { %v3652_v14 = vmul.f32 1.442695, %v3639_v24  ;;  %v3642_v24 = vmin.f32 %v8599_v19, 0.0 }
 0x604   :  { %4667 = vadd.xlane.f32.xlu2 %v4649_v40  ;;  %v5128_v40 = vadd.f32 %v8301_v25, %v8333_v10  ;;  %v3640_v25 = vmin.f32 %v8583_v46, 0.0  ;;  %v5157_v34 = vpop.f32.mrf.mxu1 }
 0x605   :  { %v5158_v7 = vadd.f32 %v5157_v34, %v8333_v10  ;;  %6132 = vpow2.f32 %v3652_v14  ;;  %v3658_v28 = vmul.f32 1.442695, %v3642_v24 }
 0x606   :  { %v5160_v8 = vmax.f32 %v5128_v40, 0.0  ;;  %v3654_v0 = vmul.f32 1.442695, %v3640_v25  ;;  %v8608_v40 = vadd.f32 %v8314_v59, %v8510_v57  ;;  %v8618_v57 = vld [vmem:[%s9273_s12 + $0x4] ss:$0 sm:$0xff] }
 0x607   :  { %v8623_v38 = vadd.f32 %v8618_v57, %v8550_v29 }
 0x608   :  { %v5172_v41 = vmul.f32 %v8362_v27, %v5160_v8  ;;  %6134 = vpow2.f32 %v3654_v0  ;;  %v3643_v17 = vmin.f32 %v8608_v40, 0.0  ;;  %v8628_v0 = vadd.f32 %v8314_v59, %v3608_v52 }
 0x609   :  { %v4167_v29 = vmin.f32 %v8623_v38, 0.0  ;;  %vm3632_vm12 = vcmp.gt.f32.partialorder %v8608_v40, 0.0  ;;  %vm4156_vm13 = vcmp.gt.f32.partialorder %v8623_v38, 0.0 }
 0x60a   :  { %vm3633_vm14 = vcmp.gt.f32.partialorder %v8628_v0, 0.0 }
 0x60b   :  { %v6133_v14 = vpop.eup %6132 }
 0x60c   :  { %5713 = vadd.xlane.f32.xlu0 %v5702_v26  ;;  %4669 = vadd.xlane.f32.xlu2 %v4650_v37  ;;  %v8591_v26 = vpop.xlane.xlu1 %4131  ;;  %v8595_v37 = vadd.f32 %v8314_v59, %v3602_v36 }
 0x60e   :  { %v3641_v36 = vmin.f32 %v8595_v37, 0.0  ;;  %vm3630_vm10 = vcmp.gt.f32.partialorder %v8595_v37, 0.0 }
 0x610   :  { %v3656_v8 = vmul.f32 1.442695, %v3641_v36  ;;  %v5963_v36 = vadd.f32 -1.0, %v6133_v14  ;;  %v4178_v14 = vmul.f32 1.442695, %v4167_v29 }
 0x612   :  { %6136 = vpow2.f32 %v3656_v8 }
 0x613   :  { %4661 = vadd.xlane.f32.xlu1 %v4646_v49  ;;  %v8604_v49 = vpop.xlane.xlu0 %4135  ;;  %6138 = vpow2.f32 %v3658_v28 }
 0x614   :  { %5717 = vadd.xlane.f32.xlu0 %v5704_v58  ;;  %4671 = vadd.xlane.f32.xlu2 %v4651_v20  ;;  %v5669_v58 = vpop.f32.mrf.mxu3  ;;  %v5170_v20 = vmax.f32 %v5158_v7, 0.0  ;;  %v3614_v25 = vpop.xlane.xlu1 %3613  ;;  %v5703_v7 = vmul.f32 %v8563_v63, %v5691_v15  ;;  %v8643_v15 = vadd.f32 %v8618_v57, %v8543_v30 }
 0x615   :  { %v5670_v4 = vadd.f32 %v5669_v58, %v8548_v31  ;;  %v8636_v58 = vadd.f32 %v8314_v59, %v3610_v47  ;;  %v8653_v30 = vadd.f32 %v8314_v59, %v3614_v25 }
 0x616   :  { %v5182_v34 = vmul.f32 %v8362_v27, %v5170_v20  ;;  %v4168_v29 = vmin.f32 %v8643_v15, 0.0  ;;  %vm4157_vm0 = vcmp.gt.f32.partialorder %v8643_v15, 0.0 }
 0x617   :  { %v5694_v20 = vmax.f32 %v5670_v4, 0.0  ;;  %vm3634_vm15 = vcmp.gt.f32.partialorder %v8636_v58, 0.0  ;;  %vm3636_vm1 = vcmp.gt.f32.partialorder %v8653_v30, 0.0 }
 0x619   :  { %v5706_v4 = vmul.f32 %v8563_v63, %v5694_v20 }
 0x61b   :  { %5183 = vadd.xlane.f32.xlu1 %v5172_v41  ;;  %v3660_v41 = vmul.f32 1.442695, %v3643_v17  ;;  %v8632_v51 = vpop.xlane.xlu0 %4375  ;;  %v3644_v17 = vmin.f32 %v8628_v0, 0.0 }
 0x61c   :  { %5719 = vadd.xlane.f32.xlu0 %v5705_v35  ;;  %4673 = vadd.xlane.f32.xlu2 %v4652_v61  ;;  %v6135_v35 = vpop.eup %6134  ;;  %v5155_v61 = vadd.f32 %v5154_v22, %v8333_v10  ;;  %9348 = vst [vmem:[#allocation42_spill] sm:$0xff] %v8632_v51  ;;  %v5672_v24 = vpop.f32.mrf.mxu3  ;;  %v3683_v22 = vsel %vm3628_vm8, %v8576_v39, %v5963_v36 }
 0x61d   :  { %v5964_v52 = vadd.f32 -1.0, %v6135_v35  ;;  %6140 = vpow2.f32 %v3660_v41  ;;  %v6137_v28 = vpop.eup %6136  ;;  %v5673_v35 = vadd.f32 %v5672_v24, %v8548_v31  ;;  %v3645_v41 = vmin.f32 %v8636_v58, 0.0 }
 0x61e   :  { %v5169_v8 = vmax.f32 %v5155_v61, 0.0  ;;  %v6139_v47 = vpop.eup %6138  ;;  %v3662_v36 = vmul.f32 1.442695, %v3644_v17  ;;  %v8659_v51 = vadd.f32 %v8618_v57, %v8534_v3  ;;  %v5965_v20 = vadd.f32 -1.0, %v6137_v28 }
 0x61f   :  { %v3684_v39 = vsel %vm3629_vm9, %v8583_v46, %v5964_v52  ;;  %6142 = vpow2.f32 %v4178_v14  ;;  %v5966_v24 = vadd.f32 -1.0, %v6139_v47  ;;  %v4873_v46 = vperm.slane %v9349_v45, 1 }
 0x620   :  { %v5181_v61 = vmul.f32 %v8362_v27, %v5169_v8  ;;  %v3695_v52 = vadd.f32 1.0, %v3684_v39  ;;  %v5695_v17 = vmax.f32 %v5673_v35, 0.0  ;;  %6144 = vpow2.f32 %v3662_v36 }
 0x621   :  { %v3647_v3 = vmin.f32 %v8653_v30, 0.0  ;;  %v4180_v28 = vmul.f32 1.442695, %v4168_v29  ;;  %v8670_v45 = vadd.f32 %v8618_v57, %v8591_v26  ;;  %v4169_v14 = vmin.f32 %v8659_v51, 0.0  ;;  %v9350_v29 = vld [vmem:[#allocation37_spill] sm:$0xff] }
 0x622   :  { %v3685_v35 = vsel %vm3630_vm10, %v8595_v37, %v5965_v20  ;;  %v3686_v39 = vsel %vm3631_vm11, %v8599_v19, %v5966_v24  ;;  %v8680_v36 = vadd.f32 %v8618_v57, %v8565_v54  ;;  %v9352_v37 = vld [vmem:[#allocation39_spill] sm:$0xff]  ;;  %vm4158_vm2 = vcmp.gt.f32.partialorder %v8659_v51, 0.0 }
 0x623   :  { %v6141_v12 = vpop.eup %6140  ;;  %v8662_v25 = vpop.xlane.xlu0 %4141  ;;  %v8688_v20 = vadd.f32 %v9352_v37, %v4873_v46  ;;  %v4171_v54 = vmin.f32 %v8670_v45, 0.0  ;;  %v3697_v37 = vadd.f32 1.0, %v3686_v39  ;;  %vm4160_vm5 = vcmp.gt.f32.partialorder %v8670_v45, 0.0 }
 0x624   :  { %5203 = vadd.xlane.f32.xlu0 %v5182_v34  ;;  %5715 = vadd.xlane.f32.xlu2 %v5703_v7  ;;  %v8645_v34 = vpop.xlane.xlu1 %4137  ;;  %v3694_v7 = vadd.f32 1.0, %v3683_v22  ;;  %v3664_v22 = vmul.f32 1.442695, %v3645_v41  ;;  %v5967_v47 = vadd.f32 -1.0, %v6141_v12  ;;  %v3842_v41 = vadd.f32 %v8618_v57, %v8515_v13 }
 0x625   :  { %v6143_v26 = vpop.eup %6142  ;;  %v8685_v12 = vadd.f32 %v9351_v56, %v9350_v29  ;;  %v3668_v13 = vmul.f32 1.442695, %v3647_v3  ;;  %v9354_v56 = vld [vmem:[#allocation40_spill] sm:$0xff]  ;;  %v3696_v29 = vadd.f32 1.0, %v3685_v35  ;;  %v6277_v3 = vld [vmem:[%s9273_s12 + $0x2] ss:$0 sm:$0xff] }
 0x626   :  { %v3705_v8 = vmul.f32 %v3694_v7, %v9325_v44  ;;  %v5707_v7 = vmul.f32 %v8563_v63, %v5695_v17  ;;  %6146 = vpow2.f32 %v3664_v22  ;;  %v4182_v17 = vmul.f32 1.442695, %v4169_v14  ;;  %v6145_v22 = vpop.eup %6144 }
 0x627   :  { %6148 = vpow2.f32 %v4180_v28  ;;  %v3687_v46 = vsel %vm3632_vm12, %v8608_v40, %v5967_v47  ;;  %v5973_v28 = vadd.f32 -1.0, %v6143_v26  ;;  %v5968_v35 = vadd.f32 -1.0, %v6145_v22 }
 0x628   :  { %v3717_v24 = vsel %vm2124_vm4, %v3705_v8, 0.0  ;;  %v2790_v8 = vadd.f32 %v6277_v3, %v9355_v62  ;;  %6150 = vpow2.f32 %v3668_v13  ;;  %v3698_v47 = vadd.f32 1.0, %v3687_v46 }
 0x629   :  { %v4186_v39 = vmul.f32 1.442695, %v4171_v54  ;;  %6152 = vpow2.f32 %v4182_v17  ;;  %v3707_v26 = vmul.f32 %v3696_v29, %v9327_v11  ;;  %vm4159_vm6 = vcmp.gt.f32.partialorder %v8680_v36, 0.0 }
 0x62a   :  { %v3709_v29 = vmul.f32 %v3698_v47, %v9329_v23 }
 0x62b   :  { %v8706_v32 = vpop.xlane.xlu0 %4657  ;;  %6154 = vpow2.f32 %v4186_v39 }
 0x62c   :  { %5721 = vadd.xlane.f32.xlu0 %v5706_v4  ;;  %5201 = vadd.xlane.f32.xlu2 %v5181_v61  ;;  %v5675_v4 = vpop.f32.mrf.mxu3  ;;  %v8691_v19 = vpop.xlane.xlu1 %4653 }
 0x62d   :  { %v5676_v61 = vadd.f32 %v5675_v4, %v8548_v31  ;;  %9353 = vst [vmem:[#allocation26_spill] sm:$0xff] %v8691_v19  ;;  %v3706_v4 = vmul.f32 %v3695_v52, %v9354_v56  ;;  %v4170_v19 = vmin.f32 %v8680_v36, 0.0  ;;  %v3718_v52 = vadd.f32 %v3717_v24, %v8477_v18  ;;  %v6147_v40 = vpop.eup %6146 }
 0x62e   :  { %v4211_v18 = vsel %vm4156_vm13, %v8623_v38, %v5973_v28  ;;  %v5969_v22 = vadd.f32 -1.0, %v6147_v40  ;;  %v3688_v38 = vsel %vm3633_vm14, %v8628_v0, %v5968_v35 }
 0x62f   :  { %v5696_v14 = vmax.f32 %v5676_v61, 0.0  ;;  %v3719_v62 = vsel %vm2124_vm4, %v3706_v4, 0.0  ;;  %v3708_v61 = vmul.f32 %v3697_v37, %v7321_v55  ;;  %v4184_v13 = vmul.f32 1.442695, %v4170_v19 }
 0x630   :  { %v3720_v17 = vadd.f32 %v3719_v62, %v3718_v52  ;;  %v8720_v4 = vadd.f32 %v8618_v57, %v8604_v49  ;;  %v3721_v37 = vsel %vm2124_vm4, %v3707_v26, 0.0  ;;  %v4222_v28 = vadd.f32 1.0, %v4211_v18 }
 0x631   :  { %v5708_v24 = vmul.f32 %v8563_v63, %v5696_v14  ;;  %v3723_v14 = vsel %vm2124_vm4, %v3708_v61, 0.0  ;;  %6156 = vpow2.f32 %v4184_v13  ;;  %v8732_v49 = vadd.f32 %v8618_v57, %v8645_v34 }
 0x632   :  { %v3722_v47 = vadd.f32 %v3721_v37, %v3720_v17  ;;  %v3699_v35 = vadd.f32 1.0, %v3688_v38  ;;  %v3689_v39 = vsel %vm3634_vm15, %v8636_v58, %v5969_v22  ;;  %v4173_v62 = vmin.f32 %v8720_v4, 0.0 }
 0x633   :  { %v2791_v26 = vmul.f32 1.442695, %v2790_v8  ;;  %v3700_v38 = vadd.f32 1.0, %v3689_v39  ;;  %v4174_v58 = vmin.f32 %v8732_v49, 0.0  ;;  %v8742_v22 = vpop.xlane.xlu0 %4663  ;;  %vm4162_vm8 = vcmp.gt.f32.partialorder %v8720_v4, 0.0 }
 0x634   :  { %5723 = vadd.xlane.f32.xlu0 %v5707_v7  ;;  %4276 = vrot.lane.b32.xlu1 %v3842_v41, %s6578_s24  ;;  %v9296_v7 = vmax.f32 %v8688_v20, 0.0  ;;  %v9356_v41 = vld [vmem:[#allocation27_spill] sm:$0xff]  ;;  %v8722_v46 = vpop.permute.xlu1 %3746  ;;  %v3724_v18 = vadd.f32 %v3723_v14, %v3722_v47  ;;  %vm4163_vm9 = vcmp.gt.f32.partialorder %v8732_v49, 0.0 }
 0x635   :  { %v4895_v2 = vperm.slane %v9356_v41, 1  ;;  %v6149_v41 = vpop.eup %6148  ;;  %9357 = vst [vmem:[#allocation37_spill] sm:$0xff] %v8722_v46  ;;  %v3711_v39 = vmul.f32 %v3700_v38, %v7334_v42 }
 0x636   :  { %v5974_v52 = vadd.f32 -1.0, %v6149_v41  ;;  %v3725_v41 = vsel %vm2124_vm4, %v3709_v29, 0.0  ;;  %v3710_v29 = vmul.f32 %v3699_v35, %v9330_v1 }
 0x637   :  { %v3612_v3 = vpop.xlane.xlu2 %3611  ;;  %v4896_v61 = vmul.f32 %v4895_v2, %v9296_v7  ;;  %v4233_v2 = vmul.f32 %v4222_v28, %v7294_v6 }
 0x638   :  { %v8715_v54 = vadd.f32 %v8314_v59, %v3612_v3  ;;  %v6151_v59 = vpop.eup %6150  ;;  %v4212_v17 = vsel %vm4157_vm0, %v8643_v15, %v5974_v52  ;;  %v8754_v15 = vadd.f32 %v8618_v57, %v8662_v25 }
 0x639   :  { %v6153_v40 = vpop.eup %6152  ;;  %v5971_v3 = vadd.f32 -1.0, %v6151_v59  ;;  %v4223_v28 = vadd.f32 1.0, %v4212_v17 }
 0x63a   :  { %v3646_v19 = vmin.f32 %v8715_v54, 0.0  ;;  %v5975_v34 = vadd.f32 -1.0, %v6153_v40  ;;  %v3726_v40 = vadd.f32 %v3725_v41, %v3724_v18  ;;  %vm3635_vm3 = vcmp.gt.f32.partialorder %v8715_v54, 0.0 }
 0x63b   :  { %v3691_v14 = vsel %vm3636_vm1, %v8653_v30, %v5971_v3  ;;  %vm4165_vm10 = vcmp.gt.f32.partialorder %v8754_v15, 0.0 }
 0x63c   :  { %5725 = vadd.xlane.f32.xlu0 %v5708_v24  ;;  %v3666_v0 = vmul.f32 1.442695, %v3646_v19  ;;  %v6155_v24 = vpop.eup %6154  ;;  %v4190_v19 = vmul.f32 1.442695, %v4173_v62  ;;  %v4213_v47 = vsel %vm4158_vm2, %v8659_v51, %v5975_v34  ;;  %v4192_v62 = vmul.f32 1.442695, %v4174_v58 }
 0x63d   :  { %v6157_v37 = vpop.eup %6156  ;;  %v3702_v7 = vadd.f32 1.0, %v3691_v14  ;;  %v4224_v46 = vadd.f32 1.0, %v4213_v47  ;;  %v3727_v51 = vsel %vm2124_vm4, %v3710_v29, 0.0  ;;  %v4234_v34 = vmul.f32 %v4223_v28, %v9324_v33  ;;  %v8777_v14 = vpop.xlane.xlu0 %5185 }
 0x63e   :  { %6158 = vpow2.f32 %v3666_v0  ;;  %v5977_v0 = vadd.f32 -1.0, %v6155_v24  ;;  %v5976_v3 = vadd.f32 -1.0, %v6157_v37  ;;  %v3729_v24 = vsel %vm2124_vm4, %v3711_v39, 0.0 }
 0x63f   :  { %v4134_v13 = vpop.xlane.xlu2 %4133  ;;  %6160 = vpow2.f32 %v4190_v19  ;;  %v3728_v58 = vadd.f32 %v3727_v51, %v3726_v40  ;;  %v4235_v37 = vmul.f32 %v4224_v46, %v9325_v44  ;;  %v2261_v47 = vmul.f32 1.442695, %v8685_v12 }
 0x640   :  { %v8745_v8 = vadd.f32 %v8618_v57, %v4134_v13  ;;  %v4215_v19 = vsel %vm4160_vm5, %v8670_v45, %v5977_v0  ;;  %v4214_v29 = vsel %vm4159_vm6, %v8680_v36, %v5976_v3  ;;  %v5137_v40 = vadd.f32 %v8454_v5, %v8333_v10 }
 0x641   :  { %v3730_v45 = vadd.f32 %v3729_v24, %v3728_v58  ;;  %v4245_v36 = vsel %vm2124_vm4, %v4234_v34, 0.0  ;;  %v4244_v39 = vsel %vm2124_vm4, %v4233_v2, 0.0  ;;  %v4247_v12 = vsel %vm2124_vm4, %v4235_v37, 0.0 }
 0x642   :  { %v4172_v52 = vmin.f32 %v8745_v8, 0.0  ;;  %vm4161_vm7 = vcmp.gt.f32.partialorder %v8745_v8, 0.0 }
 0x643   :  { %v4144_v59 = vpop.xlane.xlu1 %4143 }
 0x644   :  { %4897 = vadd.xlane.f32.xlu0 %v4896_v61  ;;  %v6159_v35 = vpop.eup %6158  ;;  %v4188_v13 = vmul.f32 1.442695, %v4172_v52  ;;  %v8760_v30 = vadd.f32 %v8618_v57, %v4144_v59  ;;  %v4176_v61 = vmin.f32 %v8754_v15, 0.0  ;;  %v3713_v59 = vmul.f32 %v3702_v7, %v9332_v60 }
 0x645   :  { %v5970_v25 = vadd.f32 -1.0, %v6159_v35  ;;  %v6161_v28 = vpop.eup %6160  ;;  %v4225_v35 = vadd.f32 1.0, %v4214_v29 }
 0x646   :  { %6162 = vpow2.f32 %v4188_v13  ;;  %v4177_v38 = vmin.f32 %v8760_v30, 0.0  ;;  %vm4166_vm11 = vcmp.gt.f32.partialorder %v8760_v30, 0.0 }
 0x647   :  { %v3690_v41 = vsel %vm3635_vm3, %v8715_v54, %v5970_v25  ;;  %v8768_v18 = vpop.xlane.xlu2 %4367  ;;  %6164 = vpow2.f32 %v4192_v62  ;;  %v4196_v54 = vmul.f32 1.442695, %v4176_v61  ;;  %v4226_v62 = vadd.f32 1.0, %v4215_v19  ;;  %v9358_v19 = vld [vmem:[#allocation36_spill] sm:$0xff] }
 0x648   :  { %v3701_v17 = vadd.f32 1.0, %v3690_v41  ;;  %6166 = vpow2.f32 %v2791_v26  ;;  %v4198_v46 = vmul.f32 1.442695, %v4177_v38  ;;  %v3733_v25 = vsel %vm2124_vm4, %v3713_v59, 0.0 }
 0x649   :  { %6168 = vpow2.f32 %v4196_v54  ;;  %v4246_v26 = vadd.f32 %v4245_v36, %v4244_v39  ;;  %v5979_v61 = vadd.f32 -1.0, %v6161_v28  ;;  %v4236_v24 = vmul.f32 %v4225_v35, %v9354_v56 }
 0x64a   :  { %v3712_v52 = vmul.f32 %v3701_v17, %v9331_v9  ;;  %6170 = vpow2.f32 %v4198_v46 }
 0x64b   :  { %v4248_v58 = vadd.f32 %v4247_v12, %v4246_v26  ;;  %6172 = vpow2.f32 %v2261_v47  ;;  %v4249_v36 = vsel %vm2124_vm4, %v4236_v24, 0.0 }
 0x64c   :  { %v6163_v0 = vpop.eup %6162  ;;  %v3731_v7 = vsel %vm2124_vm4, %v3712_v52, 0.0  ;;  %v5163_v52 = vmax.f32 %v5137_v40, 0.0 }
 0x64d   :  { %v3732_v13 = vadd.f32 %v3731_v7, %v3730_v45  ;;  %v5978_v3 = vadd.f32 -1.0, %v6163_v0  ;;  %v6165_v5 = vpop.eup %6164  ;;  %v4237_v0 = vmul.f32 %v4226_v62, %v9327_v11  ;;  %v4250_v46 = vadd.f32 %v4249_v36, %v4248_v58 }
 0x64e   :  { %v6167_v38 = vpop.eup %6166  ;;  %v5980_v59 = vadd.f32 -1.0, %v6165_v5  ;;  %v5140_v5 = vadd.f32 %v8486_v53, %v8333_v10 }
 0x64f   :  { %v4216_v51 = vsel %vm4161_vm7, %v8745_v8, %v5978_v3  ;;  %v4140_v41 = vpop.xlane.xlu2 %4139  ;;  %v3734_v34 = vadd.f32 %v3733_v25, %v3732_v13  ;;  %v4217_v8 = vsel %vm4162_vm8, %v8720_v4, %v5979_v61  ;;  %v6169_v45 = vpop.eup %6168  ;;  %v5175_v3 = vmul.f32 %v8362_v27, %v5163_v52 }
 0x650   :  { %v4227_v2 = vadd.f32 1.0, %v4216_v51  ;;  %v4153_v17 = vadd.f32 %v8618_v57, %v4140_v41  ;;  %v6171_v39 = vpop.eup %6170  ;;  %v4218_v47 = vsel %vm4163_vm9, %v8732_v49, %v5980_v59  ;;  %v4228_v40 = vadd.f32 1.0, %v4217_v8  ;;  %v9359_v49 = vld [vmem:[#allocation25_spill] sm:$0xff] }
 0x651   :  { %v3738_v29 = vmul.f32 %v9358_v19, %v3734_v34  ;;  %v5982_v4 = vadd.f32 -1.0, %v6169_v45  ;;  %v4251_v62 = vsel %vm2124_vm4, %v4237_v0, 0.0  ;;  %v6173_v12 = vpop.eup %6172  ;;  %v4229_v26 = vadd.f32 1.0, %v4218_v47 }
 0x652   :  { %v4175_v37 = vmin.f32 %v4153_v17, 0.0  ;;  %v4238_v35 = vmul.f32 %v4227_v2, %v7321_v55  ;;  %v4252_v61 = vadd.f32 %v4251_v62, %v4250_v46  ;;  %v5983_v51 = vadd.f32 -1.0, %v6171_v39 }
 0x653   :  { %3740 = vrot.lane.b32.xlu2 %v3738_v29, %s6576_s14  ;;  %v2162_v34 = vadd.f32 %v9359_v49, %v8552_v48  ;;  %v4239_v24 = vmul.f32 %v4228_v40, %v9329_v23  ;;  %v5164_v53 = vmax.f32 %v5140_v5, 0.0  ;;  %v4240_v59 = vmul.f32 %v4229_v26, %v9330_v1 }
 0x654   :  { %v3211_v54 = vpop.permute.xlu0 %3210  ;;  %v4194_v7 = vmul.f32 1.442695, %v4175_v37  ;;  %v4253_v25 = vsel %vm2124_vm4, %v4238_v35, 0.0  ;;  %v4221_v37 = vsel %vm4166_vm11, %v8760_v30, %v5983_v51  ;;  %vm4164_vm12 = vcmp.gt.f32.partialorder %v4153_v17, 0.0 }
 0x655   :  { %v3213_v28 = vmul.f32 %v6167_v38, %v3211_v54  ;;  %v4220_v38 = vsel %vm4165_vm10, %v8754_v15, %v5982_v4  ;;  %v4254_v58 = vadd.f32 %v4253_v25, %v4252_v61  ;;  %v4255_v48 = vsel %vm2124_vm4, %v4239_v24, 0.0 }
 0x656   :  { %6174 = vpow2.f32 %v4194_v7  ;;  %v4231_v52 = vadd.f32 1.0, %v4220_v38  ;;  %v4232_v36 = vadd.f32 1.0, %v4221_v37  ;;  %v5176_v46 = vmul.f32 %v8362_v27, %v5164_v53  ;;  %v9361_v37 = vld [vmem:[#allocation35_spill] sm:$0xff] }
 0x657   :  { %v8801_v13 = vpop.xlane.xlu2 %4655  ;;  %v4256_v45 = vadd.f32 %v4255_v48, %v4254_v58  ;;  %v5143_v30 = vadd.f32 %v8508_v16, %v8333_v10  ;;  %v4257_v39 = vsel %vm2124_vm4, %v4240_v59, 0.0  ;;  %v5146_v51 = vadd.f32 %v8521_v43, %v8333_v10 }
 0x658   :  { %v4242_v47 = vmul.f32 %v4231_v52, %v9331_v9  ;;  %v5149_v58 = vadd.f32 %v8536_v50, %v8333_v10 }
 0x659   :  { %v5165_v62 = vmax.f32 %v5143_v30, 0.0 }
 0x65a   :  { %v4261_v25 = vsel %vm2124_vm4, %v4242_v47, 0.0 }
 0x65b   :  { %v2684_v41 = vpop.permute.xlu1 %2683  ;;  %v5177_v61 = vmul.f32 %v8362_v27, %v5165_v62 }
 0x65c   :  { %v2686_v2 = vmul.f32 %v6173_v12, %v2684_v41  ;;  %v6175_v19 = vpop.eup %6174  ;;  %v9360_v41 = vld [vmem:[#allocation34_spill] sm:$0xff] }
 0x65d   :  { %v5981_v54 = vadd.f32 -1.0, %v6175_v19 }
 0x65e   :  { %v2687_v29 = vadd.f32 %v2686_v2, %v2162_v34  ;;  %5189 = vadd.xlane.f32.xlu1 %v5175_v3  ;;  %v5678_v3 = vpop.f32.mrf.mxu3  ;;  %v5166_v34 = vmax.f32 %v5146_v51, 0.0  ;;  %v9364_v51 = vld [vmem:[#allocation26_spill] sm:$0xff] }
 0x65f   :  { %v4219_v15 = vsel %vm4164_vm12, %v4153_v17, %v5981_v54  ;;  %v8818_v0 = vpop.xlane.xlu2 %4659  ;;  %v4243_v17 = vmul.f32 %v4232_v36, %v9332_v60  ;;  %v5152_v54 = vadd.f32 %v9361_v37, %v8333_v10 }
 0x660   :  { %v2692_v8 = vadd.f32 %v8475_v21, %v2687_v29  ;;  %v4230_v35 = vadd.f32 1.0, %v4219_v15  ;;  %v4258_v21 = vadd.f32 %v4257_v39, %v4256_v45  ;;  %v5178_v38 = vmul.f32 %v8362_v27, %v5166_v34 }
 0x661   :  { %v4263_v5 = vsel %vm2124_vm4, %v4243_v17, 0.0  ;;  %v5167_v29 = vmax.f32 %v5149_v58, 0.0  ;;  %v5168_v52 = vmax.f32 %v5152_v54, 0.0  ;;  %v5679_v15 = vadd.f32 %v5678_v3, %v8548_v31  ;;  %v5421_v54 = vpop.f32.mrf.mxu1 }
 0x662   :  { %v8820_v7 = vadd.f32 %v3213_v28, %v2692_v8  ;;  %v4241_v40 = vmul.f32 %v4230_v35, %v7334_v42 }
 0x663   :  { %v5179_v59 = vmul.f32 %v8362_v27, %v5167_v29  ;;  %v5180_v45 = vmul.f32 %v8362_v27, %v5168_v52  ;;  %v5697_v36 = vmax.f32 %v5679_v15, 0.0 }
 0x664   :  { %v4259_v4 = vsel %vm2124_vm4, %v4241_v40, 0.0 }
 0x665   :  { %v4260_v28 = vadd.f32 %v4259_v4, %v4258_v21  ;;  %v9362_v4 = vld [vmem:[#allocation29_spill] sm:$0xff] }
 0x666   :  { %5191 = vadd.xlane.f32.xlu1 %v5176_v46  ;;  %v5681_v24 = vpop.f32.mrf.mxu3  ;;  %v5709_v46 = vmul.f32 %v8563_v63, %v5697_v36 }
 0x667   :  { %v8831_v12 = vpop.xlane.xlu2 %4665  ;;  %v4262_v16 = vadd.f32 %v4261_v25, %v4260_v28  ;;  %v5682_v19 = vadd.f32 %v5681_v24, %v8548_v31  ;;  %v9363_v25 = vld [vmem:[#allocation30_spill] sm:$0xff]  ;;  %v9365_v24 = vld [vmem:[#allocation28_spill] sm:$0xff] }
 0x669   :  { %v4264_v26 = vadd.f32 %v4263_v5, %v4262_v16  ;;  %v5698_v53 = vmax.f32 %v5682_v19, 0.0  ;;  %v9366_v19 = vld [vmem:[#allocation33_spill] sm:$0xff] }
 0x66a   :  { %v5403_v29 = vperm.slane %v9366_v19, 1 }
 0x66b   :  { %v4268_v49 = vmul.f32 %v9360_v41, %v4264_v26  ;;  %v5710_v48 = vmul.f32 %v8563_v63, %v5698_v53 }
 0x66c   :  { %v8900_v52 = vadd.f32 %v5421_v54, %v5403_v29 }
 0x66d   :  { %4270 = vrot.lane.b32.xlu0 %v4268_v49, %s6576_s14 }
 0x66e   :  { %5193 = vadd.xlane.f32.xlu1 %v5177_v61  ;;  %v5684_v50 = vpop.f32.mrf.mxu3 }
 0x66f   :  { %v8839_v2 = vpop.xlane.xlu2 %5187  ;;  %v5685_v10 = vadd.f32 %v5684_v50, %v8548_v31 }
 0x671   :  { %v5699_v47 = vmax.f32 %v5685_v10, 0.0  ;;  %v5424_v10 = vmax.f32 %v8900_v52, 0.0 }
 0x673   :  { %v5711_v27 = vmul.f32 %v8563_v63, %v5699_v47 }
 0x676   :  { %5195 = vadd.xlane.f32.xlu1 %v5178_v38  ;;  %v5687_v30 = vpop.f32.mrf.mxu3  ;;  %v3219_v38 = vadd.f32 %v9365_v24, %v8820_v7 }
 0x677   :  { %v8845_v43 = vpop.xlane.xlu2 %4667  ;;  %v5688_v39 = vadd.f32 %v5687_v30, %v8548_v31  ;;  %v6278_v31 = vld [vmem:[%s9273_s12 + $0x3] ss:$0 sm:$0xff] }
 0x678   :  { %v3317_v16 = vadd.f32 %v6278_v31, %v9363_v25 }
 0x679   :  { %v5700_v40 = vmax.f32 %v5688_v39, 0.0 }
 0x67a   :  { %v3318_v5 = vmul.f32 1.442695, %v3317_v16 }
 0x67b   :  { %v5712_v3 = vmul.f32 %v8563_v63, %v5700_v40  ;;  %v8883_v63 = vld [vmem:[%s9273_s12 + $0x5] ss:$0 sm:$0xff] }
 0x67c   :  { %5729 = vadd.xlane.f32.xlu2 %v5710_v48  ;;  %6176 = vpow2.f32 %v3318_v5  ;;  %v4675_v41 = vadd.f32 %v8883_v63, %v9364_v51  ;;  %v8904_v15 = vadd.f32 %v8883_v63, %v8706_v32  ;;  %v8908_v36 = vadd.f32 %v8883_v63, %v8818_v0  ;;  %v8919_v32 = vld [vmem:[%s9273_s12 + $0x6] ss:$0 sm:$0xff] }
 0x67d   :  { %v8933_v25 = vadd.f32 %v8919_v32, %v8777_v14  ;;  %v8937_v51 = vadd.f32 %v8883_v63, %v8831_v12  ;;  %v8945_v14 = vadd.f32 %v8883_v63, %v8845_v43 }
 0x67e   :  { %5197 = vadd.xlane.f32.xlu1 %v5179_v59  ;;  %v4697_v53 = vmin.f32 %v4675_v41, 0.0  ;;  %v4676_v59 = vadd.f32 %v8883_v63, %v8801_v13  ;;  %v4699_v47 = vmin.f32 %v8904_v15, 0.0  ;;  %v4700_v40 = vmin.f32 %v8908_v36, 0.0 }
 0x67f   :  { %v8851_v8 = vpop.xlane.xlu2 %4669  ;;  %v8860_v21 = vpop.xlane.xlu0 %5713  ;;  %v4703_v19 = vmin.f32 %v8937_v51, 0.0  ;;  %vm4686_vm13 = vcmp.gt.f32.partialorder %v4675_v41, 0.0  ;;  %vm4688_vm15 = vcmp.gt.f32.partialorder %v8904_v15, 0.0  ;;  %vm4689_vm0 = vcmp.gt.f32.partialorder %v8908_v36, 0.0 }
 0x680   :  { %v4708_v50 = vmul.f32 1.442695, %v4697_v53  ;;  %v4712_v31 = vmul.f32 1.442695, %v4699_v47  ;;  %v4714_v5 = vmul.f32 1.442695, %v4700_v40  ;;  %v8957_v43 = vadd.f32 %v8883_v63, %v8851_v8 }
 0x681   :  { %v8962_v47 = vld [vmem:[%s9273_s12 + $0x7] ss:$0 sm:$0xff]  ;;  %vm4687_vm14 = vcmp.gt.f32.partialorder %v4676_v59, 0.0  ;;  %vm5217_vm3 = vcmp.gt.f32.partialorder %v8933_v25, 0.0  ;;  %vm4692_vm5 = vcmp.gt.f32.partialorder %v8937_v51, 0.0  ;;  %vm4693_vm6 = vcmp.gt.f32.partialorder %v8945_v14, 0.0 }
 0x682   :  { %v6177_v49 = vpop.eup %6176  ;;  %6178 = vpow2.f32 %v4708_v50  ;;  %vm4694_vm8 = vcmp.gt.f32.partialorder %v8957_v43, 0.0 }
 0x686   :  { %5199 = vadd.xlane.f32.xlu1 %v5180_v45  ;;  %v4698_v45 = vmin.f32 %v4676_v59, 0.0  ;;  %v4662_v7 = vpop.xlane.xlu1 %4661 }
 0x687   :  { %v8855_v35 = vpop.xlane.xlu2 %4671  ;;  %v8868_v28 = vpop.xlane.xlu0 %5717  ;;  %v8913_v39 = vadd.f32 %v8883_v63, %v4662_v7  ;;  %v4704_v7 = vmin.f32 %v8945_v14, 0.0 }
 0x688   :  { %v4710_v30 = vmul.f32 1.442695, %v4698_v45  ;;  %v6179_v16 = vpop.eup %6178  ;;  %v8952_v45 = vadd.f32 %v8919_v32, %v8839_v2  ;;  %v6279_v2 = vld [vmem:[#allocation18 + $0x18] sm:$0xf] }
 0x689   :  { %v5985_v24 = vadd.f32 -1.0, %v6179_v16  ;;  %vm4690_vm1 = vcmp.gt.f32.partialorder %v8913_v39, 0.0 }
 0x68a   :  { %6180 = vpow2.f32 %v4710_v30  ;;  %v4720_v30 = vmul.f32 1.442695, %v4703_v19  ;;  %v4705_v19 = vmin.f32 %v8957_v43, 0.0  ;;  %vm5218_vm7 = vcmp.gt.f32.partialorder %v8952_v45, 0.0 }
 0x68b   :  { %6182 = vpow2.f32 %v4712_v31  ;;  %v4741_v53 = vsel %vm4686_vm13, %v4675_v41, %v5985_v24  ;;  %v9368_v31 = vld [vmem:[#allocation32_spill] sm:$0xff]  ;;  %v5229_v24 = vmin.f32 %v8952_v45, 0.0 }
 0x68c   :  { %6184 = vpow2.f32 %v4714_v5  ;;  %v4752_v40 = vadd.f32 1.0, %v4741_v53  ;;  %v3847_v16 = vadd.f32 %v8618_v57, %v9368_v31 }
 0x68e   :  { %5727 = vadd.xlane.f32.xlu1 %v5709_v46  ;;  %v9367_v46 = vld [vmem:[#allocation41_spill] sm:$0xff]  ;;  %v4763_v53 = vmul.f32 %v4752_v40, %v7294_v6 }
 0x68f   :  { %v8862_v17 = vpop.xlane.xlu2 %4673  ;;  %v8876_v26 = vpop.xlane.xlu0 %5719  ;;  %v5425_v13 = vperm.slane %v9367_v46, 1 }
 0x690   :  { %v4774_v31 = vsel %vm2124_vm4, %v4763_v53, 0.0 }
 0x694   :  { %4795 = vrot.lane.b32.xlu2 %v9362_v4, %s6579_s2 }
 0x696   :  { %5731 = vadd.xlane.f32.xlu1 %v5711_v27  ;;  %v5426_v27 = vmul.f32 %v5425_v13, %v5424_v10 }
 0x697   :  { %5733 = vadd.xlane.f32.xlu0 %v5712_v3  ;;  %v8870_v62 = vpop.xlane.xlu2 %5715  ;;  %v8896_v37 = vpop.xlane.xlu0 %5203  ;;  %v4701_v3 = vmin.f32 %v8913_v39, 0.0 }
 0x69f   :  { %v8878_v61 = vpop.xlane.xlu2 %5201  ;;  %v8922_v0 = vpop.xlane.xlu0 %5721 }
 0x6a7   :  { %v8948_v29 = vpop.xlane.xlu0 %5723 }
 0x6ab   :  { %5855 = vrot.lane.b32.xlu0 %v9362_v4, %s6581_s11 }
 0x6ad   :  { %v3741_v34 = vpop.permute.xlu2 %3740 }
 0x6ae   :  { %v3743_v58 = vmul.f32 %v6177_v49, %v3741_v34  ;;  %v4716_v34 = vmul.f32 1.442695, %v4701_v3  ;;  %v4903_v3 = vperm.slane %v6279_v2, 2  ;;  %v4724_v2 = vmul.f32 1.442695, %v4705_v19 }
 0x6af   :  { %5325 = vrot.lane.b32.xlu1 %v9362_v4, %s6580_s4  ;;  %v8928_v4 = vadd.f32 %v8883_v63, %v8742_v22  ;;  %v8940_v22 = vpop.xlane.xlu1 %5183 }
 0x6b0   :  { %v8898_v48 = vadd.f32 %v3743_v58, %v3219_v38  ;;  %v5228_v38 = vmin.f32 %v8933_v25, 0.0  ;;  %v6181_v58 = vpop.eup %6180  ;;  %6186 = vpow2.f32 %v4716_v34  ;;  %v9009_v19 = vadd.f32 %v8919_v32, %v8940_v22 }
 0x6b1   :  { %v4702_v49 = vmin.f32 %v8928_v4, 0.0  ;;  %v5986_v50 = vadd.f32 -1.0, %v6181_v58  ;;  %v6183_v13 = vpop.eup %6182  ;;  %vm4691_vm2 = vcmp.gt.f32.partialorder %v8928_v4, 0.0 }
 0x6b2   :  { %v5240_v54 = vmul.f32 1.442695, %v5228_v38  ;;  %v6185_v41 = vpop.eup %6184  ;;  %v5987_v34 = vadd.f32 -1.0, %v6183_v13  ;;  %v4722_v38 = vmul.f32 1.442695, %v4704_v7  ;;  %vm5216_vm12 = vcmp.gt.f32.partialorder %v9009_v19, 0.0 }
 0x6b3   :  { %v4718_v12 = vmul.f32 1.442695, %v4702_v49  ;;  %v4742_v5 = vsel %vm4687_vm14, %v4676_v59, %v5986_v50  ;;  %v5433_v49 = vperm.slane %v9367_v46, 2  ;;  %v5988_v58 = vadd.f32 -1.0, %v6185_v41  ;;  %v8985_v41 = vpop.xlane.xlu0 %5725 }
 0x6b4   :  { %v4753_v57 = vadd.f32 1.0, %v4742_v5  ;;  %v8978_v59 = vadd.f32 %v8883_v63, %v8855_v35  ;;  %v9369_v46 = vmax.f32 %v8688_v20, 0.0  ;;  %v3848_v50 = vmul.f32 1.442695, %v3847_v16 }
 0x6b5   :  { %6188 = vpow2.f32 %v4718_v12  ;;  %v8973_v12 = vadd.f32 %v8962_v47, %v8860_v21  ;;  %v5242_v21 = vmul.f32 1.442695, %v5229_v24  ;;  %v5434_v35 = vmul.f32 %v5433_v49, %v5424_v10 }
 0x6b6   :  { %6190 = vpow2.f32 %v5240_v54  ;;  %v6187_v8 = vpop.eup %6186  ;;  %v4904_v54 = vmul.f32 %v4903_v3, %v9369_v46  ;;  %v4744_v20 = vsel %vm4689_vm0, %v8908_v36, %v5988_v58  ;;  %v4764_v16 = vmul.f32 %v4753_v57, %v9324_v33 }
 0x6b7   :  { %6192 = vpow2.f32 %v4720_v30  ;;  %v5989_v7 = vadd.f32 -1.0, %v6187_v8  ;;  %v4743_v30 = vsel %vm4688_vm15, %v8904_v15, %v5987_v34  ;;  %v5757_v3 = vmin.f32 %v8973_v12, 0.0 }
 0x6b8   :  { %6194 = vpow2.f32 %v4722_v38  ;;  %v4706_v15 = vmin.f32 %v8978_v59, 0.0  ;;  %v4754_v34 = vadd.f32 1.0, %v4743_v30  ;;  %v9000_v36 = vadd.f32 %v8962_v47, %v8868_v28 }
 0x6b9   :  { %v4745_v52 = vsel %vm4690_vm1, %v8913_v39, %v5989_v7  ;;  %v4755_v49 = vadd.f32 1.0, %v4744_v20  ;;  %6196 = vpow2.f32 %v5242_v21  ;;  %v9004_v38 = vadd.f32 %v8883_v63, %v8862_v17 }
 0x6ba   :  { %6198 = vpow2.f32 %v4724_v2  ;;  %v5768_v58 = vmul.f32 1.442695, %v5757_v3  ;;  %v4775_v53 = vsel %vm2124_vm4, %v4764_v16, 0.0  ;;  %v4756_v57 = vadd.f32 1.0, %v4745_v52 }
 0x6bb   :  { %v6189_v13 = vpop.eup %6188  ;;  %v4726_v46 = vmul.f32 1.442695, %v4706_v15  ;;  %v4765_v7 = vmul.f32 %v4754_v34, %v9325_v44  ;;  %v5759_v17 = vmin.f32 %v9000_v36, 0.0  ;;  %v4766_v21 = vmul.f32 %v4755_v49, %v9354_v56 }
 0x6bc   :  { %v6191_v40 = vpop.eup %6190  ;;  %v5990_v24 = vadd.f32 -1.0, %v6189_v13  ;;  %v4707_v22 = vmin.f32 %v9004_v38, 0.0  ;;  %6200 = vpow2.f32 %v5768_v58  ;;  %v5227_v2 = vmin.f32 %v9009_v19, 0.0 }
 0x6bd   :  { %5427 = vadd.xlane.f32.xlu2 %v5426_v27  ;;  %v8964_v27 = vpop.permute.xlu1 %4276  ;;  %v6193_v8 = vpop.eup %6192  ;;  %v5998_v10 = vadd.f32 -1.0, %v6191_v40  ;;  %v4776_v40 = vadd.f32 %v4775_v53, %v4774_v31  ;;  %v4767_v15 = vmul.f32 %v4756_v57, %v9327_v11  ;;  %6202 = vpow2.f32 %v4726_v46 }
 0x6be   :  { %v6195_v39 = vpop.eup %6194  ;;  %v5991_v28 = vadd.f32 -1.0, %v6193_v8  ;;  %v4746_v13 = vsel %vm4691_vm2, %v8928_v4, %v5990_v24  ;;  %6204 = vpow2.f32 %v3848_v50  ;;  %v5772_v31 = vmul.f32 1.442695, %v5759_v17 }
 0x6bf   :  { %v5272_v30 = vsel %vm5217_vm3, %v8933_v25, %v5998_v10  ;;  %v5992_v20 = vadd.f32 -1.0, %v6195_v39  ;;  %v6197_v3 = vpop.eup %6196  ;;  %v4757_v4 = vadd.f32 1.0, %v4746_v13  ;;  %v9023_v25 = vpop.xlane.xlu0 %4897  ;;  %v9029_v24 = vadd.f32 %v8962_v47, %v8876_v26 }
 0x6c0   :  { %v4747_v16 = vsel %vm4692_vm5, %v8937_v51, %v5991_v28  ;;  %v6199_v34 = vpop.eup %6198  ;;  %v4777_v52 = vsel %vm2124_vm4, %v4765_v7, 0.0  ;;  %v4779_v51 = vsel %vm2124_vm4, %v4766_v21, 0.0  ;;  %v4728_v10 = vmul.f32 1.442695, %v4707_v22 }
 0x6c1   :  { %v4778_v49 = vadd.f32 %v4777_v52, %v4776_v40  ;;  %v4758_v58 = vadd.f32 1.0, %v4747_v16  ;;  %v5238_v39 = vmul.f32 1.442695, %v5227_v2  ;;  %v4768_v50 = vmul.f32 %v4757_v4, %v7321_v55 }
 0x6c2   :  { %v5999_v53 = vadd.f32 -1.0, %v6197_v3  ;;  %v5993_v28 = vadd.f32 -1.0, %v6199_v34  ;;  %v4781_v57 = vsel %vm2124_vm4, %v4767_v15, 0.0  ;;  %v6201_v26 = vpop.eup %6200  ;;  %6206 = vpow2.f32 %v5772_v31 }
 0x6c3   :  { %v4780_v7 = vadd.f32 %v4779_v51, %v4778_v49  ;;  %v5760_v13 = vmin.f32 %v9029_v24, 0.0  ;;  %v6203_v17 = vpop.eup %6202  ;;  %6208 = vpow2.f32 %v4728_v10  ;;  %v4769_v22 = vmul.f32 %v4758_v58, %v9329_v23 }
 0x6c4   :  { %v6205_v21 = vpop.eup %6204  ;;  %6210 = vpow2.f32 %v5238_v39  ;;  %v5273_v2 = vsel %vm5218_vm7, %v8952_v45, %v5999_v53  ;;  %v4749_v3 = vsel %vm4694_vm8, %v8957_v43, %v5993_v28  ;;  %v6009_v4 = vadd.f32 -1.0, %v6201_v26 }
 0x6c5   :  { %v4782_v40 = vadd.f32 %v4781_v57, %v4780_v7  ;;  %v5994_v34 = vadd.f32 -1.0, %v6203_v17  ;;  %v9056_v10 = vadd.f32 %v8883_v63, %v8768_v18  ;;  %v4785_v58 = vsel %vm2124_vm4, %v4769_v22, 0.0 }
 0x6c6   :  { %vm5746_vm9 = vcmp.gt.f32.partialorder %v8973_v12, 0.0  ;;  %v4760_v53 = vadd.f32 1.0, %v4749_v3  ;;  %vm4695_vm10 = vcmp.gt.f32.partialorder %v8978_v59, 0.0  ;;  %vm5748_vm11 = vcmp.gt.f32.partialorder %v9000_v36, 0.0 }
 0x6c7   :  { %v5801_v28 = vsel %vm5746_vm9, %v8973_v12, %v6009_v4  ;;  %v4750_v57 = vsel %vm4695_vm10, %v8978_v59, %v5994_v34  ;;  %v9078_v12 = vadd.f32 %v8919_v32, %v8896_v37  ;;  %vm5749_vm13 = vcmp.gt.f32.partialorder %v9029_v24, 0.0 }
 0x6c8   :  { %v6207_v49 = vpop.eup %6206  ;;  %v9080_v17 = vadd.f32 1.0, %v5801_v28  ;;  %v4761_v22 = vadd.f32 1.0, %v4750_v57  ;;  %v9091_v37 = vadd.f32 %v8962_v47, %v8922_v0  ;;  %vm4696_vm14 = vcmp.gt.f32.partialorder %v9004_v38, 0.0 }
 0x6c9   :  { %v6011_v59 = vadd.f32 -1.0, %v6207_v49  ;;  %v5237_v3 = vmin.f32 %v9078_v12, 0.0  ;;  %v9105_v0 = vadd.f32 %v8962_v47, %v8948_v29  ;;  %vm5226_vm2 = vcmp.gt.f32.partialorder %v9078_v12, 0.0 }
 0x6ca   :  { %vm5750_vm0 = vcmp.gt.f32.partialorder %v9091_v37, 0.0 }
 0x6d1   :  { %v8995_v5 = vpop.xlane.xlu1 %5189 }
 0x6d2   :  { %v9069_v26 = vadd.f32 %v8919_v32, %v8995_v5 }
 0x6d4   :  { %vm5219_vm1 = vcmp.gt.f32.partialorder %v9069_v26, 0.0 }
 0x6d5   :  { %5435 = vadd.xlane.f32.xlu0 %v5434_v35  ;;  %v5283_v35 = vadd.f32 1.0, %v5272_v30 }
 0x6d7   :  { %v5294_v46 = vmul.f32 %v5283_v35, %v9324_v33  ;;  %v5774_v35 = vmul.f32 1.442695, %v5760_v13 }
 0x6d9   :  { %4905 = vadd.xlane.f32.xlu1 %v4904_v54  ;;  %v9025_v8 = vpop.xlane.xlu1 %5191  ;;  %v4748_v54 = vsel %vm4693_vm6, %v8945_v14, %v5992_v20  ;;  %v9042_v14 = vadd.f32 %v8962_v47, %v8870_v62  ;;  %v4783_v20 = vsel %vm2124_vm4, %v4768_v50, 0.0  ;;  %v9370_v62 = vld [vmem:[#allocation37_spill] sm:$0xff]  ;;  %v9052_v51 = vsel %vm2124_vm4, %v5294_v46, 0.0 }
 0x6da   :  { %v4759_v30 = vadd.f32 1.0, %v4748_v54  ;;  %v3749_v31 = vadd.f32 %v9370_v62, %v8898_v48  ;;  %v4784_v54 = vadd.f32 %v4783_v20, %v4782_v40  ;;  %v6209_v48 = vpop.eup %6208  ;;  %v9062_v50 = vadd.f32 1.0, %v5273_v2 }
 0x6db   :  { %v5758_v43 = vmin.f32 %v9042_v14, 0.0  ;;  %v6211_v18 = vpop.eup %6210  ;;  %6212 = vpow2.f32 %v5774_v35  ;;  %v4771_v20 = vmul.f32 %v4760_v53, %v7334_v42  ;;  %v5230_v2 = vmin.f32 %v9069_v26, 0.0 }
 0x6dc   :  { %v4770_v45 = vmul.f32 %v4759_v30, %v9330_v1  ;;  %v5995_v30 = vadd.f32 -1.0, %v6209_v48  ;;  %v5997_v5 = vadd.f32 -1.0, %v6211_v18  ;;  %v4772_v62 = vmul.f32 %v4761_v22, %v9331_v9 }
 0x6dd   :  { %v5770_v13 = vmul.f32 1.442695, %v5758_v43  ;;  %v5244_v29 = vmul.f32 1.442695, %v5230_v2  ;;  %v5762_v48 = vmin.f32 %v9105_v0, 0.0  ;;  %vm5747_vm15 = vcmp.gt.f32.partialorder %v9042_v14, 0.0 }
 0x6de   :  { %v4787_v7 = vsel %vm2124_vm4, %v4770_v45, 0.0  ;;  %v4751_v34 = vsel %vm4696_vm14, %v9004_v38, %v5995_v30  ;;  %v5761_v38 = vmin.f32 %v9091_v37, 0.0  ;;  %v4789_v45 = vsel %vm2124_vm4, %v4771_v20, 0.0 }
 0x6df   :  { %v4271_v16 = vpop.permute.xlu0 %4270  ;;  %6214 = vpow2.f32 %v5770_v13  ;;  %v4762_v43 = vadd.f32 1.0, %v4751_v34  ;;  %vm5751_vm6 = vcmp.gt.f32.partialorder %v9105_v0, 0.0 }
 0x6e0   :  { %v4273_v52 = vmul.f32 %v6205_v21, %v4271_v16  ;;  %v4786_v21 = vadd.f32 %v4785_v58, %v4784_v54  ;;  %v5803_v16 = vsel %vm5748_vm11, %v9000_v36, %v6011_v59  ;;  %v9117_v36 = vadd.f32 %v8919_v32, %v8878_v61 }
 0x6e1   :  { %v5194_v15 = vpop.xlane.xlu1 %5193  ;;  %v5258_v58 = vmul.f32 1.442695, %v5237_v3  ;;  %v9125_v61 = vadd.f32 %v8962_v47, %v8985_v41  ;;  %v4791_v59 = vsel %vm2124_vm4, %v4772_v62, 0.0  ;;  %6216 = vpow2.f32 %v5244_v29 }
 0x6e2   :  { %v4274_v39 = vadd.f32 %v4273_v52, %v3749_v31  ;;  %v9097_v4 = vadd.f32 %v8919_v32, %v5194_v15  ;;  %v4788_v35 = vadd.f32 %v4787_v7, %v4786_v21  ;;  %v5271_v31 = vsel %vm5216_vm12, %v9009_v19, %v5997_v5 }
 0x6e3   :  { %v5814_v19 = vadd.f32 1.0, %v5803_v16  ;;  %v5236_v30 = vmin.f32 %v9117_v36, 0.0  ;;  %v5776_v21 = vmul.f32 1.442695, %v5761_v38  ;;  %6218 = vpow2.f32 %v5258_v58 }
 0x6e4   :  { %v9072_v46 = vadd.f32 %v8964_v27, %v4274_v39  ;;  %v9085_v27 = vadd.f32 %v8919_v32, %v9025_v8  ;;  %v6213_v8 = vpop.eup %6212  ;;  %v5232_v54 = vmin.f32 %v9097_v4, 0.0  ;;  %v5282_v39 = vadd.f32 1.0, %v5271_v31 }
 0x6e5   :  { %v6012_v49 = vadd.f32 -1.0, %v6213_v8  ;;  %v4790_v53 = vadd.f32 %v4789_v45, %v4788_v35  ;;  %v6215_v28 = vpop.eup %6214  ;;  %v5778_v3 = vmul.f32 1.442695, %v5762_v48  ;;  %v5763_v16 = vmin.f32 %v9125_v61, 0.0 }
 0x6e6   :  { %v5231_v15 = vmin.f32 %v9085_v27, 0.0  ;;  %v5248_v5 = vmul.f32 1.442695, %v5232_v54  ;;  %v5293_v20 = vmul.f32 %v5282_v39, %v7294_v6  ;;  %v6010_v2 = vadd.f32 -1.0, %v6215_v28 }
 0x6e7   :  { %v5804_v41 = vsel %vm5749_vm13, %v9029_v24, %v6012_v49  ;;  %v4792_v8 = vadd.f32 %v4791_v59, %v4790_v53  ;;  %v5256_v24 = vmul.f32 1.442695, %v5236_v30  ;;  %v6217_v38 = vpop.eup %6216  ;;  %v5823_v29 = vmul.f32 %v9080_v17, %v7294_v6 }
 0x6e8   :  { %v5246_v18 = vmul.f32 1.442695, %v5231_v15  ;;  %v5815_v62 = vadd.f32 1.0, %v5804_v41  ;;  %v5802_v45 = vsel %vm5747_vm15, %v9042_v14, %v6010_v2  ;;  %v5304_v58 = vsel %vm2124_vm4, %v5293_v20, 0.0 }
 0x6e9   :  { %v5196_v40 = vpop.xlane.xlu1 %5195  ;;  %v6219_v49 = vpop.eup %6218  ;;  %v5780_v54 = vmul.f32 1.442695, %v5763_v16  ;;  %v5813_v14 = vadd.f32 1.0, %v5802_v45  ;;  %v6000_v17 = vadd.f32 -1.0, %v6217_v38  ;;  %vm5220_vm3 = vcmp.gt.f32.partialorder %v9085_v27, 0.0 }
 0x6ea   :  { %v9113_v52 = vadd.f32 %v8919_v32, %v5196_v40  ;;  %v4773_v40 = vmul.f32 %v4762_v43, %v9332_v60  ;;  %6220 = vpow2.f32 %v5246_v18  ;;  %v5826_v53 = vmul.f32 %v5815_v62, %v9354_v56 }
 0x6eb   :  { %6222 = vpow2.f32 %v5776_v21  ;;  %v5834_v21 = vsel %vm2124_vm4, %v5823_v29, 0.0  ;;  %v5824_v2 = vmul.f32 %v5813_v14, %v9324_v33  ;;  %vm5225_vm5 = vcmp.gt.f32.partialorder %v9117_v36, 0.0 }
 0x6ec   :  { %v5233_v57 = vmin.f32 %v9113_v52, 0.0  ;;  %6224 = vpow2.f32 %v5248_v5  ;;  %v4793_v15 = vsel %vm2124_vm4, %v4773_v40, 0.0  ;;  %v9169_v20 = vsel %vm2124_vm4, %v5826_v53, 0.0 }
 0x6ed   :  { %6226 = vpow2.f32 %v5778_v3  ;;  %v4794_v43 = vadd.f32 %v4793_v15, %v4792_v8  ;;  %v5274_v3 = vsel %vm5219_vm1, %v9069_v26, %v6000_v17  ;;  %v4902_v15 = vadd.f32 %v8919_v32, %v9023_v25 }
 0x6ee   :  { %v5250_v34 = vmul.f32 1.442695, %v5233_v57  ;;  %v5285_v26 = vadd.f32 1.0, %v5274_v3  ;;  %vm5221_vm7 = vcmp.gt.f32.partialorder %v9097_v4, 0.0  ;;  %vm5222_vm8 = vcmp.gt.f32.partialorder %v9113_v52, 0.0 }
 0x6ef   :  { %v5730_v7 = vpop.xlane.xlu2 %5729  ;;  %vm5752_vm11 = vcmp.gt.f32.partialorder %v9125_v61, 0.0 }
 0x6f0   :  { %6228 = vpow2.f32 %v5250_v34  ;;  %v6221_v6 = vpop.eup %6220  ;;  %v9156_v57 = vadd.f32 %v8962_v47, %v5730_v7  ;;  %v6007_v34 = vadd.f32 -1.0, %v6219_v49  ;;  %v5835_v49 = vsel %vm2124_vm4, %v5824_v2, 0.0 }
 0x6f1   :  { %v5198_v13 = vpop.xlane.xlu1 %5197  ;;  %6230 = vpow2.f32 %v5256_v24  ;;  %v6001_v7 = vadd.f32 -1.0, %v6221_v6  ;;  %v5296_v14 = vmul.f32 %v5285_v26, %v9354_v56 }
 0x6f2   :  { %v9131_v22 = vadd.f32 %v8919_v32, %v5198_v13  ;;  %4806 = vrot.lane.b32.xlu1 %v9056_v10, %s6578_s24  ;;  %v5295_v10 = vmul.f32 %v9062_v50, %v9325_v44  ;;  %v5825_v50 = vmul.f32 %v5814_v19, %v9325_v44  ;;  %v6223_v44 = vpop.eup %6222  ;;  %v5306_v19 = vadd.f32 %v9052_v51, %v5304_v58 }
 0x6f3   :  { %v6225_v59 = vpop.eup %6224  ;;  %v5765_v8 = vmin.f32 %v9156_v57, 0.0  ;;  %v6013_v24 = vadd.f32 -1.0, %v6223_v44  ;;  %v5275_v38 = vsel %vm5220_vm3, %v9085_v27, %v6001_v7  ;;  %vm5754_vm13 = vcmp.gt.f32.partialorder %v9156_v57, 0.0 }
 0x6f4   :  { %v5234_v35 = vmin.f32 %v9131_v22, 0.0  ;;  %v5307_v30 = vsel %vm2124_vm4, %v5295_v10, 0.0  ;;  %v9164_v41 = vsel %vm2124_vm4, %v5825_v50, 0.0  ;;  %v6227_v5 = vpop.eup %6226  ;;  %v6002_v10 = vadd.f32 -1.0, %v6225_v59 }
 0x6f5   :  { %v5784_v25 = vmul.f32 1.442695, %v5765_v8  ;;  %v5286_v53 = vadd.f32 1.0, %v5275_v38  ;;  %vm5223_vm9 = vcmp.gt.f32.partialorder %v9131_v22, 0.0 }
 0x6f6   :  { %v5252_v31 = vmul.f32 1.442695, %v5234_v35  ;;  %v6229_v40 = vpop.eup %6228  ;;  %v9175_v35 = vadd.f32 %v5307_v30, %v5306_v19  ;;  %v5276_v58 = vsel %vm5221_vm7, %v9097_v4, %v6002_v10 }
 0x6f7   :  { %v4796_v39 = vpop.permute.xlu2 %4795  ;;  %v6231_v16 = vpop.eup %6230  ;;  %v6003_v29 = vadd.f32 -1.0, %v6229_v40  ;;  %v5287_v44 = vadd.f32 1.0, %v5276_v58  ;;  %v5297_v30 = vmul.f32 %v5286_v53, %v9327_v11 }
 0x6f8   :  { %v4798_v28 = vmul.f32 %v4796_v39, %v4794_v43  ;;  %6232 = vpow2.f32 %v5252_v31  ;;  %v6014_v31 = vadd.f32 -1.0, %v6227_v5  ;;  %v6006_v50 = vadd.f32 -1.0, %v6231_v16 }
 0x6f9   :  { %v5200_v48 = vpop.xlane.xlu1 %5199  ;;  %6234 = vpow2.f32 %v5780_v54  ;;  %v5805_v39 = vsel %vm5750_vm0, %v9091_v37, %v6013_v24  ;;  %v5277_v4 = vsel %vm5222_vm8, %v9113_v52, %v6003_v29  ;;  %v5298_v40 = vmul.f32 %v5287_v44, %v7321_v55 }
 0x6fa   :  { %v9153_v18 = vadd.f32 %v8919_v32, %v5200_v48  ;;  %4800 = vrot.lane.b32.xlu2 %v4798_v28, %s6576_s14  ;;  %v5806_v48 = vsel %vm5751_vm6, %v9105_v0, %v6014_v31  ;;  %v5816_v59 = vadd.f32 1.0, %v5805_v39  ;;  %v5281_v0 = vsel %vm5226_vm2, %v9078_v12, %v6007_v34 }
 0x6fb   :  { %v5288_v56 = vadd.f32 1.0, %v5277_v4  ;;  %v5817_v5 = vadd.f32 1.0, %v5806_v48  ;;  %v5280_v3 = vsel %vm5225_vm5, %v9117_v36, %v6006_v50  ;;  %v5311_v10 = vsel %vm2124_vm4, %v5297_v30, 0.0 }
 0x6fc   :  { %v5235_v13 = vmin.f32 %v9153_v18, 0.0  ;;  %vm5224_vm10 = vcmp.gt.f32.partialorder %v9153_v18, 0.0  ;;  %v5827_v8 = vmul.f32 %v5816_v59, %v9327_v11  ;;  %v5313_v36 = vsel %vm2124_vm4, %v5298_v40, 0.0 }
 0x6fe   :  { %v5254_v51 = vmul.f32 1.442695, %v5235_v13  ;;  %v6233_v62 = vpop.eup %6232  ;;  %v5836_v13 = vadd.f32 %v5835_v49, %v5834_v21 }
 0x6ff   :  { %v6235_v43 = vpop.eup %6234  ;;  %v6004_v54 = vadd.f32 -1.0, %v6233_v62 }
 0x700   :  { %6236 = vpow2.f32 %v5254_v51  ;;  %v6015_v6 = vadd.f32 -1.0, %v6235_v43  ;;  %v5309_v51 = vsel %vm2124_vm4, %v5296_v14, 0.0  ;;  %v5838_v2 = vadd.f32 %v9164_v41, %v5836_v13 }
 0x701   :  { %v5728_v33 = vpop.xlane.xlu1 %5727  ;;  %6238 = vpow2.f32 %v5784_v25  ;;  %v5278_v37 = vsel %vm5223_vm9, %v9131_v22, %v6004_v54  ;;  %v5841_v54 = vsel %vm2124_vm4, %v5827_v8, 0.0 }
 0x702   :  { %v9182_v45 = vadd.f32 %v8962_v47, %v5728_v33  ;;  %5336 = vrot.lane.b32.xlu2 %v4902_v15, %s6578_s24  ;;  %v5807_v22 = vsel %vm5752_vm11, %v9125_v61, %v6015_v6  ;;  %v5289_v12 = vadd.f32 1.0, %v5278_v37  ;;  %v5299_v61 = vmul.f32 %v5288_v56, %v9329_v23 }
 0x703   :  { %v5828_v15 = vmul.f32 %v5817_v5, %v7321_v55  ;;  %v5818_v41 = vadd.f32 1.0, %v5807_v22  ;;  %v5310_v33 = vadd.f32 %v5309_v51, %v9175_v35  ;;  %v5291_v35 = vadd.f32 1.0, %v5280_v3 }
 0x704   :  { %v5764_v27 = vmin.f32 %v9182_v45, 0.0  ;;  %v5300_v11 = vmul.f32 %v5289_v12, %v9330_v1  ;;  %vm5753_vm12 = vcmp.gt.f32.partialorder %v9182_v45, 0.0  ;;  %v5315_v25 = vsel %vm2124_vm4, %v5299_v61, 0.0 }
 0x705   :  { %v5312_v43 = vadd.f32 %v5311_v10, %v5310_v33  ;;  %v5829_v48 = vmul.f32 %v5818_v41, %v9329_v23  ;;  %v5302_v59 = vmul.f32 %v5291_v35, %v9331_v9 }
 0x706   :  { %v6237_v28 = vpop.eup %6236  ;;  %v5782_v17 = vmul.f32 1.442695, %v5764_v27  ;;  %v5317_v53 = vsel %vm2124_vm4, %v5300_v11, 0.0  ;;  %v9371_v11 = vld [vmem:[#allocation42_spill] sm:$0xff] }
 0x707   :  { %v6005_v19 = vadd.f32 -1.0, %v6237_v28  ;;  %v5314_v27 = vadd.f32 %v5313_v36, %v5312_v43  ;;  %v5840_v28 = vadd.f32 %v9169_v20, %v5838_v2  ;;  %v5845_v37 = vsel %vm2124_vm4, %v5829_v48, 0.0 }
 0x708   :  { %6240 = vpow2.f32 %v5782_v17  ;;  %v5321_v40 = vsel %vm2124_vm4, %v5302_v59, 0.0 }
 0x709   :  { %v5732_v52 = vpop.xlane.xlu1 %5731  ;;  %v5279_v7 = vsel %vm5224_vm10, %v9153_v18, %v6005_v19  ;;  %v6239_v18 = vpop.eup %6238  ;;  %v5316_v6 = vadd.f32 %v5315_v25, %v5314_v27  ;;  %v5292_v19 = vadd.f32 1.0, %v5281_v0  ;;  %v5842_v13 = vadd.f32 %v5841_v54, %v5840_v28 }
 0x70a   :  { %v5744_v21 = vadd.f32 %v8962_v47, %v5732_v52  ;;  %v5734_v34 = vpop.xlane.xlu0 %5733  ;;  %v5290_v62 = vadd.f32 1.0, %v5279_v7  ;;  %v6017_v49 = vadd.f32 -1.0, %v6239_v18 }
 0x70b   :  { %v5745_v24 = vadd.f32 %v8962_v47, %v5734_v34  ;;  %v5318_v23 = vadd.f32 %v5317_v53, %v5316_v6  ;;  %v5303_v12 = vmul.f32 %v5292_v19, %v9332_v60 }
 0x70c   :  { %v5766_v16 = vmin.f32 %v5744_v21, 0.0  ;;  %v5301_v50 = vmul.f32 %v5290_v62, %v7334_v42  ;;  %v5809_v14 = vsel %vm5754_vm13, %v9156_v57, %v6017_v49  ;;  %vm5755_vm14 = vcmp.gt.f32.partialorder %v5744_v21, 0.0 }
 0x70d   :  { %v5767_v29 = vmin.f32 %v5745_v24, 0.0  ;;  %v5820_v30 = vadd.f32 1.0, %v5809_v14  ;;  %vm5756_vm15 = vcmp.gt.f32.partialorder %v5745_v24, 0.0  ;;  %v5323_v18 = vsel %vm2124_vm4, %v5303_v12, 0.0 }
 0x70e   :  { %v6241_v31 = vpop.eup %6240  ;;  %v5786_v26 = vmul.f32 1.442695, %v5766_v16  ;;  %v5319_v17 = vsel %vm2124_vm4, %v5301_v50, 0.0 }
 0x70f   :  { %v6016_v38 = vadd.f32 -1.0, %v6241_v31  ;;  %v5788_v58 = vmul.f32 1.442695, %v5767_v29  ;;  %v5320_v52 = vadd.f32 %v5319_v17, %v5318_v23  ;;  %v5831_v0 = vmul.f32 %v5820_v30, %v7334_v42 }
 0x710   :  { %6242 = vpow2.f32 %v5786_v26 }
 0x711   :  { %v5808_v55 = vsel %vm5753_vm12, %v9182_v45, %v6016_v38  ;;  %6244 = vpow2.f32 %v5788_v58  ;;  %v5843_v45 = vsel %vm2124_vm4, %v5828_v15, 0.0  ;;  %v5322_v8 = vadd.f32 %v5321_v40, %v5320_v52 }
 0x712   :  { %v5819_v39 = vadd.f32 1.0, %v5808_v55  ;;  %v5844_v20 = vadd.f32 %v5843_v45, %v5842_v13  ;;  %v5849_v10 = vsel %vm2124_vm4, %v5831_v0, 0.0  ;;  %v4377_v38 = vadd.f32 %v8883_v63, %v9371_v11 }
 0x713   :  { %v5324_v42 = vadd.f32 %v5323_v18, %v5322_v8 }
 0x714   :  { %v5830_v4 = vmul.f32 %v5819_v39, %v9330_v1  ;;  %v5846_v1 = vadd.f32 %v5845_v37, %v5844_v20  ;;  %v4378_v29 = vmul.f32 1.442695, %v4377_v38 }
 0x716   :  { %v6243_v44 = vpop.eup %6242  ;;  %v5847_v5 = vsel %vm2124_vm4, %v5830_v4, 0.0  ;;  %6246 = vpow2.f32 %v4378_v29 }
 0x717   :  { %v6018_v56 = vadd.f32 -1.0, %v6243_v44  ;;  %v6245_v57 = vpop.eup %6244  ;;  %v5848_v16 = vadd.f32 %v5847_v5, %v5846_v1 }
 0x718   :  { %v6019_v51 = vadd.f32 -1.0, %v6245_v57 }
 0x719   :  { %v5810_v7 = vsel %vm5755_vm14, %v5744_v21, %v6018_v56  ;;  %v5850_v62 = vadd.f32 %v5849_v10, %v5848_v16 }
 0x71a   :  { %v5821_v22 = vadd.f32 1.0, %v5810_v7  ;;  %v5811_v3 = vsel %vm5756_vm15, %v5745_v24, %v6019_v51 }
 0x71b   :  { %v5822_v34 = vadd.f32 1.0, %v5811_v3 }
 0x71c   :  { %v5832_v2 = vmul.f32 %v5821_v22, %v9331_v9  ;;  %v6247_v43 = vpop.eup %6246 }
 0x71d   :  { %v5833_v21 = vmul.f32 %v5822_v34, %v9332_v60  ;;  %v5856_v24 = vpop.permute.xlu0 %5855 }
 0x71e   :  { %v5851_v61 = vsel %vm2124_vm4, %v5832_v2, 0.0 }
 0x71f   :  { %v5852_v41 = vadd.f32 %v5851_v61, %v5850_v62  ;;  %v5853_v33 = vsel %vm2124_vm4, %v5833_v21, 0.0  ;;  %vm5879_vm4 = vcmask 7168  }
 0x721   :  { %v5326_v31 = vpop.permute.xlu1 %5325  ;;  %v5854_v9 = vadd.f32 %v5853_v33, %v5852_v41 }
 0x722   :  { %v5328_v15 = vmul.f32 %v5326_v31, %v5324_v42 }
 0x723   :  { %v5858_v26 = vmul.f32 %v5856_v24, %v5854_v9 }
 0x724   :  { %5330 = vrot.lane.b32.xlu0 %v5328_v15, %s6576_s14 }
 0x72c   :  { %5860 = vrot.lane.b32.xlu0 %v5858_v26, %s6576_s14 }
 0x730   :  { %v5428_v36 = vpop.xlane.xlu2 %5427 }
 0x731   :  { %v5432_v60 = vadd.f32 %v8962_v47, %v5428_v36 }
 0x733   :  { %5866 = vrot.lane.b32.xlu1 %v5432_v60, %s6578_s24 }
 0x748   :  { %v5436_v35 = vpop.xlane.xlu0 %5435 }
 0x749   :  { %v5437_v27 = vadd.f32 %v8962_v47, %v5436_v35 }
 0x74b   :  { %v5438_v48 = vmul.f32 1.442695, %v5437_v27 }
 0x74c   :  { %v4906_v55 = vpop.xlane.xlu1 %4905 }
 0x74d   :  { %v4907_v58 = vadd.f32 %v8919_v32, %v4906_v55 }
 0x74f   :  { %v4908_v54 = vmul.f32 1.442695, %v4907_v58 }
 0x751   :  { %6248 = vpow2.f32 %v4908_v54 }
 0x752   :  { %6250 = vpow2.f32 %v5438_v48 }
 0x754   :  { %v4801_v49 = vpop.permute.xlu2 %4800 }
 0x755   :  { %v4803_v25 = vmul.f32 %v6247_v43, %v4801_v49 }
 0x757   :  { %v4804_v50 = vadd.f32 %v4803_v25, %v9072_v46  ;;  %v6249_v53 = vpop.eup %6248 }
 0x758   :  { %v6251_v4 = vpop.eup %6250 }
 0x75c   :  { %v5337_v46 = vpop.permute.xlu2 %5336 }
 0x764   :  { %v4807_v63 = vpop.permute.xlu1 %4806 }
 0x765   :  { %v4809_v6 = vadd.f32 %v4807_v63, %v4804_v50 }
 0x796   :  { %v5331_v39 = vpop.permute.xlu0 %5330 }
 0x797   :  { %v5333_v28 = vmul.f32 %v6249_v53, %v5331_v39 }
 0x799   :  { %v5334_v45 = vadd.f32 %v5333_v28, %v4809_v6 }
 0x79b   :  { %v5339_v44 = vadd.f32 %v5337_v46, %v5334_v45 }
 0x79e   :  { %v5861_v14 = vpop.permute.xlu0 %5860 }
 0x79f   :  { %v5863_v17 = vmul.f32 %v6251_v4, %v5861_v14 }
 0x7a1   :  { %v5864_v19 = vadd.f32 %v5863_v17, %v5339_v44 }
 0x7a5   :  { %v5867_v32 = vpop.permute.xlu1 %5866 }
 0x7a6   :  { %v5869_v13 = vadd.f32 %v5867_v32, %v5864_v19 }
 0x7a8   :  { %v5870_v23 = vsub.f32 0.0, %v5869_v13 }
 0x7aa   :  { %v5871_v59 = vmul.f32 1.442695, %v5870_v23 }
 0x7ac   :  { %6252 = vpow2.f32 %v5871_v59 }
 0x7b2   :  { %v6253_v47 = vpop.eup %6252 }
 0x7b3   :  { %v5873_v37 = vadd.f32 1.0, %v6253_v47 }
 0x7b5   :  { %6254 = vrcp.f32 %v5873_v37 }
 0x7bb   :  { %v6255_v30 = vpop.eup %6254 }
 0x7bc   :  { %5876 = vrot.lane.b32.xlu2 %v6255_v30, %s6576_s14 }
 0x816   :  { %v5877_v56 = vpop.permute.xlu2 %5876 }
 0x817   :  { %5880 = vst.msk [vmem:[%s9276_s15] sm:$0xff] %vm5879_vm4, %v5877_v56 }
 0x818   :  { %5885 = vsyncpa [#allocation3], 1 }
 0x819   :  { %5886 = vsyncpa [#allocation5], 1 }
 0x81a   :  { %5887 = vsyncpa [#allocation8], 1 }
 0x81b   :  { %5888 = vsyncpa [#allocation11], 1 }
 0x81c   :  { %5889 = vsyncpa [#allocation14], 1 }
 0x81d   :  { %5890 = vsyncpa [#allocation17], 1 }

</bundles_post_ra>
